<compile_context>
chip_gen: v7x
topology: tpu7x:2x2x1
jax: 0.10.0
libtpu: 0.0.40
codegen_flags: <defaults>
</compile_context>

<pallas_src>
import functools

import jax
import jax.numpy as jnp
from jax.experimental import pallas as pl
from jax.experimental.pallas import tpu as pltpu


def _round_up(x, m):
    return ((x + m - 1) // m) * m


# ----------------------------------------------------------------------------
# Fused Pallas kernel: one grid step == B_blk batch samples, whole HMU forward.
# ----------------------------------------------------------------------------
def _hmu_fused_kernel(*refs, num_groups, hidden_dim, in_c, H, W, b_blk,
                      mxu_dtype):
    G, hd = num_groups, hidden_dim
    E = G * hd
    B = b_blk
    HW = H * W
    M = B * HW
    f32 = jnp.float32

    # ---- unpack refs (inputs..., output, scratch) ---------------------------
    x_ref, ew_ref, eb_ref = refs[0], refs[1], refs[2]
    iw_refs = refs[3:3 + 2 * G]                         # alternating (w, b)
    gw1_ref, gb1_ref, gw2_ref, gb2_ref = refs[3 + 2 * G:7 + 2 * G]
    fw_ref, fb_ref = refs[7 + 2 * G], refs[8 + 2 * G]
    o_ref = refs[9 + 2 * G]
    pad_ref, out_buf, gate_buf = refs[10 + 2 * G:13 + 2 * G]

    Wp = pad_ref.shape[2]                               # (W+2) rounded up to 8

    # ---- zero ONLY the 1-pixel halo border (not the whole scratch) ---------
    # Interior channels a conv reads are always written right before the read.
    # Done every grid step so v7x megacore "parallel" sharding stays correct.
    pad_ref[:, 0:1, :, :] = jnp.zeros((B, 1, Wp, E), pad_ref.dtype)
    pad_ref[:, H + 1:H + 2, :, :] = jnp.zeros((B, 1, Wp, E), pad_ref.dtype)
    pad_ref[:, :, 0:1, :] = jnp.zeros((B, H + 2, 1, E), pad_ref.dtype)
    pad_ref[:, :, W + 1:W + 2, :] = jnp.zeros((B, H + 2, 1, E), pad_ref.dtype)

    def conv3x3(parts, w_ref, b_ref, relu):
        """3x3 'same' conv.  `parts` are (M, c_i) activations stored
        side-by-side into the halo scratch (no register concat); the conv is
        9 shifted-window MXU dots accumulated in f32 — no im2col lane concat,
        no materialized (M, 9*cin) patch matrix."""
        off = 0
        for p in parts:
            c = p.shape[-1]
            pad_ref[:, 1:H + 1, 1:W + 1, off:off + c] = (
                p.reshape(B, H, W, c).astype(pad_ref.dtype))
            off += c
        cin = off
        acc = None
        for t in range(9):                              # weight layout (9, cin, cout)
            dy, dx = t // 3, t % 3
            win = pad_ref[:, dy:dy + H, dx:dx + W, 0:cin].reshape(M, cin)
            d = jnp.dot(win, w_ref[t], preferred_element_type=f32)
            acc = d if acc is None else acc + d
        acc = acc + b_ref[...].astype(f32)
        return jnp.maximum(acc, 0.0) if relu else acc

    # ---- expand 1x1 conv (+ folded BN) + ReLU -------------------------------
    x2d = x_ref[...].reshape(M, in_c).astype(f32)        # also the residual
    xe = jnp.maximum(
        jnp.dot(x2d.astype(mxu_dtype), ew_ref[...],
                preferred_element_type=f32) + eb_ref[...], 0.0)       # (M, E)

    # ---- interact chain; per-group outputs stream into VMEM scratch --------
    prev_mid = None
    for g in range(G):
        xg = xe[:, g * hd:(g + 1) * hd]
        parts = [xg] if g == 0 else [xg, prev_mid]
        bo = conv3x3(parts, iw_refs[2 * g], iw_refs[2 * g + 1], relu=True)
        out_buf[:, g * hd:(g + 1) * hd] = bo[:, 0:hd]
        if g < G - 1:                       # torch .chunk(3): (out, mid, gate)
            prev_mid = bo[:, hd:2 * hd]
            gate_buf[:, g * hd:(g + 1) * hd] = bo[:, 2 * hd:3 * hd]
        else:                               # torch .chunk(2): (out, gate)
            gate_buf[:, g * hd:(g + 1) * hd] = bo[:, hd:2 * hd]

    # ---- gate: per-sample GAP -> 1x1 -> ReLU -> 1x1 -> softmax(channels) ---
    pooled = jnp.mean(gate_buf[...].reshape(B, HW, E), axis=1)        # (B, E)
    h = jnp.maximum(
        jnp.dot(pooled.astype(mxu_dtype), gw1_ref[...],
                preferred_element_type=f32) + gb1_ref[...], 0.0)      # (B, hd)
    logits = jnp.dot(h.astype(mxu_dtype), gw2_ref[...],
                     preferred_element_type=f32) + gb2_ref[...]       # (B, E)
    mx = jnp.max(logits, axis=-1, keepdims=True)
    ex = jnp.exp(logits - mx)
    gate = ex * pl.reciprocal(jnp.sum(ex, axis=-1, keepdims=True), approx=True)

    # ---- fuse: gate * out -> 3x3 conv (+ folded BN) -> residual -> ReLU ----
    out_g = (out_buf[...].reshape(B, HW, E) * gate[:, None, :]).reshape(M, E)
    y = conv3x3([out_g], fw_ref, fb_ref, relu=False)                  # (M, in_c)
    y = jnp.maximum(y + x2d, 0.0)
    o_ref[...] = y.reshape(B, H, W, in_c).astype(o_ref.dtype)


# ----------------------------------------------------------------------------
# Parameter construction (deterministic, BN folded into conv scale/bias).
# 3x3 conv weights are reshaped to per-tap form (9, Cin, Cout).
# ----------------------------------------------------------------------------
def _folded_conv_bn(key, kh, kw, cin, cout, conv_bias=False, eps=1e-5):
    ks = jax.random.split(key, 6)
    w = 0.1 * jax.random.normal(ks[0], (kh, kw, cin, cout), jnp.float32)
    cb = (0.05 * jax.random.normal(ks[1], (cout,), jnp.float32)
          if conv_bias else jnp.zeros((cout,), jnp.float32))
    gamma = 1.0 + 0.1 * jax.random.normal(ks[2], (cout,), jnp.float32)
    beta = 0.1 * jax.random.normal(ks[3], (cout,), jnp.float32)
    mean = 0.1 * jax.random.normal(ks[4], (cout,), jnp.float32)
    var = 1.0 + 0.1 * jax.random.uniform(ks[5], (cout,), jnp.float32)
    scale = gamma / jnp.sqrt(var + eps)
    return w * scale, (cb - mean) * scale + beta


def _plain_conv1x1(key, cin, cout):
    k1, k2 = jax.random.split(key)
    w = 0.1 * jax.random.normal(k1, (cin, cout), jnp.float32)
    b = 0.05 * jax.random.normal(k2, (cout,), jnp.float32)
    return w, b


def init_hmu_params(key, in_c, num_groups=4, hidden_dim=None):
    hidden_dim = hidden_dim or in_c // 2
    expand_dim = hidden_dim * num_groups
    keys = jax.random.split(key, num_groups + 4)
    params = {}

    w, b = _folded_conv_bn(keys[0], 1, 1, in_c, expand_dim)
    params["expand_w"] = w.reshape(in_c, expand_dim)
    params["expand_b"] = b

    interact = []
    w, b = _folded_conv_bn(keys[1], 3, 3, hidden_dim, 3 * hidden_dim)
    interact.append((w.reshape(9, hidden_dim, 3 * hidden_dim), b))
    for g in range(1, num_groups - 1):
        w, b = _folded_conv_bn(keys[1 + g], 3, 3, 2 * hidden_dim, 3 * hidden_dim)
        interact.append((w.reshape(9, 2 * hidden_dim, 3 * hidden_dim), b))
    w, b = _folded_conv_bn(keys[num_groups], 3, 3, 2 * hidden_dim, 2 * hidden_dim)
    interact.append((w.reshape(9, 2 * hidden_dim, 2 * hidden_dim), b))
    params["interact"] = interact

    params["gate_w1"], params["gate_b1"] = _plain_conv1x1(
        keys[num_groups + 1], expand_dim, hidden_dim)
    params["gate_w2"], params["gate_b2"] = _plain_conv1x1(
        keys[num_groups + 2], hidden_dim, expand_dim)

    w, b = _folded_conv_bn(keys[num_groups + 3], 3, 3, expand_dim, in_c,
                           conv_bias=True)
    params["fuse_w"], params["fuse_b"] = w.reshape(9, expand_dim, in_c), b
    return params


# ----------------------------------------------------------------------------
# HMU forward (NCHW in / NCHW out, NHWC internally, single fused pallas_call).
# ----------------------------------------------------------------------------
def hmu_forward(x_nchw, params, num_groups=4, mxu_dtype=jnp.float32,
                batch_block=None):
    # mxu_dtype=jnp.bfloat16 recommended on v6e/v7x (weights pre-cast once,
    # halo scratch kept bf16-resident); keep float32 on v5e.  Accumulation and
    # elementwise epilogues stay f32 regardless.
    N, C, H, W = x_nchw.shape
    hd = params["gate_w1"].shape[1]
    E = hd * num_groups
    assert params["expand_w"].shape == (C, E)

    if batch_block is None:
        # Largest divisor of N that keeps grid length >= 2 (feeds both v7x
        # TensorCores); degenerates to 1 for N <= 2.
        target = max(1, N // 2)
        batch_block = 1
        for d in range(1, target + 1):
            if N % d == 0:
                batch_block = d
    assert N % batch_block == 0
    Bb = batch_block
    grid = (N // Bb,)

    x = jnp.transpose(x_nchw, (0, 2, 3, 1))                      # NHWC

    # Pre-cast all MXU weight operands ONCE in the wrapper (no in-kernel casts).
    cast = lambda a: a.astype(mxu_dtype)
    operands = [x, cast(params["expand_w"]), params["expand_b"].reshape(1, E)]
    for (w, b) in params["interact"]:
        operands += [cast(w), b.reshape(1, b.shape[0])]
    operands += [cast(params["gate_w1"]), params["gate_b1"].reshape(1, hd),
                 cast(params["gate_w2"]), params["gate_b2"].reshape(1, E),
                 cast(params["fuse_w"]), params["fuse_b"].reshape(1, C)]

    in_specs = [pl.BlockSpec((Bb, H, W, C), lambda n: (n, 0, 0, 0))]
    in_specs += [pl.BlockSpec(op.shape, lambda n, nd=op.ndim: (0,) * nd)
                 for op in operands[1:]]

    Wp = _round_up(W + 2, 8)                 # sublane-aligned halo scratch
    HW = H * W
    mxu_bytes = jnp.dtype(mxu_dtype).itemsize

    # Rough VMEM budget (lane dim padded to 128, double-buffered I/O blocks,
    # scratch, generous allowance for live intermediates) + explicit limit.
    lane = lambda c: _round_up(max(c, 1), 128)
    est = (2 * 2 * Bb * H * W * lane(C) * 4                 # in + out blocks
           + Bb * (H + 2) * Wp * lane(E) * mxu_bytes        # halo scratch
           + 2 * Bb * HW * lane(E) * 4                      # out / gate bufs
           + 6 * Bb * HW * lane(max(3 * hd, E, C)) * 4)     # live values
    assert est <= 56 * 1024 * 1024, (
        "per-step working set likely exceeds v7x VMEM; reduce batch_block or "
        "implement row-strip tiling (see TODO)")
    vmem_limit = int(min(64 * 1024 * 1024, max(32 * 1024 * 1024, 2 * est)))

    kernel = functools.partial(
        _hmu_fused_kernel, num_groups=num_groups, hidden_dim=hd, in_c=C,
        H=H, W=W, b_blk=Bb, mxu_dtype=mxu_dtype)

    scratch_shapes = [
        pltpu.VMEM((Bb, H + 2, Wp, E), mxu_dtype),   # zero-border halo image
        pltpu.VMEM((Bb * HW, E), jnp.float32),       # "firsts" (pre-gate out)
        pltpu.VMEM((Bb * HW, E), jnp.float32),       # gate-generator input
    ]

    y = pl.pallas_call(
        kernel,
        out_shape=jax.ShapeDtypeStruct((N, H, W, C), x.dtype),
        grid=grid,
        in_specs=in_specs,
        out_specs=pl.BlockSpec((Bb, H, W, C), lambda n: (n, 0, 0, 0)),
        scratch_shapes=scratch_shapes,
        compiler_params=pltpu.CompilerParams(
            dimension_semantics=("parallel",),
            vmem_limit_bytes=vmem_limit),
    )(*operands)
    return jnp.transpose(y, (0, 3, 1, 2))                        # back to NCHW


# ----------------------------------------------------------------------------
if __name__ == "__main__":
    in_c, num_groups = 8, 4
    x = jax.random.normal(jax.random.PRNGKey(0), (2, in_c, 16, 16), jnp.float32)
    params = init_hmu_params(jax.random.PRNGKey(42), in_c, num_groups)
    y = hmu_forward(x, params, num_groups=num_groups)
    jax.block_until_ready(y)
    assert y.shape == x.shape and y.dtype == x.dtype
    print("KERNEL_OK")
</pallas_src>

<mosaic_0001>
module attributes {stable_mosaic.version = 11 : i64} {
  func.func @_hmu_fused_kernel(%arg0: i32, %arg1: memref<1x16x16x8xf32, #tpu.memory_space<vmem>>, %arg2: memref<8x16xf32, #tpu.memory_space<vmem>>, %arg3: memref<1x16xf32, #tpu.memory_space<vmem>>, %arg4: memref<9x4x12xf32, #tpu.memory_space<vmem>>, %arg5: memref<1x12xf32, #tpu.memory_space<vmem>>, %arg6: memref<9x8x12xf32, #tpu.memory_space<vmem>>, %arg7: memref<1x12xf32, #tpu.memory_space<vmem>>, %arg8: memref<9x8x12xf32, #tpu.memory_space<vmem>>, %arg9: memref<1x12xf32, #tpu.memory_space<vmem>>, %arg10: memref<9x8x8xf32, #tpu.memory_space<vmem>>, %arg11: memref<1x8xf32, #tpu.memory_space<vmem>>, %arg12: memref<16x4xf32, #tpu.memory_space<vmem>>, %arg13: memref<1x4xf32, #tpu.memory_space<vmem>>, %arg14: memref<4x16xf32, #tpu.memory_space<vmem>>, %arg15: memref<1x16xf32, #tpu.memory_space<vmem>>, %arg16: memref<9x16x8xf32, #tpu.memory_space<vmem>>, %arg17: memref<1x8xf32, #tpu.memory_space<vmem>>, %arg18: memref<1x16x16x8xf32, #tpu.memory_space<vmem>>, %arg19: memref<1x18x24x16xf32, #tpu.memory_space<vmem>>, %arg20: memref<256x16xf32, #tpu.memory_space<vmem>>, %arg21: memref<256x16xf32, #tpu.memory_space<vmem>>) attributes {dimension_semantics = [#tpu.dimension_semantics<parallel>], iteration_bounds = array<i64: 2>, scalar_prefetch = 0 : i64, scratch_operands = 3 : i64, tpu.core_type = #tpu.core_type<tc>, window_params = [{transform_indices = @transform_0, window_bounds = array<i64: 1, 16, 16, 8>}, {pipeline_mode = #tpu.pipeline_mode<synchronous>, transform_indices = @transform_1, window_bounds = array<i64: 8, 16>}, {pipeline_mode = #tpu.pipeline_mode<synchronous>, transform_indices = @transform_2, window_bounds = array<i64: 1, 16>}, {pipeline_mode = #tpu.pipeline_mode<synchronous>, transform_indices = @transform_3, window_bounds = array<i64: 9, 4, 12>}, {pipeline_mode = #tpu.pipeline_mode<synchronous>, transform_indices = @transform_4, window_bounds = array<i64: 1, 12>}, {pipeline_mode = #tpu.pipeline_mode<synchronous>, transform_indices = @transform_5, window_bounds = array<i64: 9, 8, 12>}, {pipeline_mode = #tpu.pipeline_mode<synchronous>, transform_indices = @transform_6, window_bounds = array<i64: 1, 12>}, {pipeline_mode = #tpu.pipeline_mode<synchronous>, transform_indices = @transform_7, window_bounds = array<i64: 9, 8, 12>}, {pipeline_mode = #tpu.pipeline_mode<synchronous>, transform_indices = @transform_8, window_bounds = array<i64: 1, 12>}, {pipeline_mode = #tpu.pipeline_mode<synchronous>, transform_indices = @transform_9, window_bounds = array<i64: 9, 8, 8>}, {pipeline_mode = #tpu.pipeline_mode<synchronous>, transform_indices = @transform_10, window_bounds = array<i64: 1, 8>}, {pipeline_mode = #tpu.pipeline_mode<synchronous>, transform_indices = @transform_11, window_bounds = array<i64: 16, 4>}, {pipeline_mode = #tpu.pipeline_mode<synchronous>, transform_indices = @transform_12, window_bounds = array<i64: 1, 4>}, {pipeline_mode = #tpu.pipeline_mode<synchronous>, transform_indices = @transform_13, window_bounds = array<i64: 4, 16>}, {pipeline_mode = #tpu.pipeline_mode<synchronous>, transform_indices = @transform_14, window_bounds = array<i64: 1, 16>}, {pipeline_mode = #tpu.pipeline_mode<synchronous>, transform_indices = @transform_15, window_bounds = array<i64: 9, 16, 8>}, {pipeline_mode = #tpu.pipeline_mode<synchronous>, transform_indices = @transform_16, window_bounds = array<i64: 1, 8>}, {transform_indices = @transform_17, window_bounds = array<i64: 1, 16, 16, 8>}]} {
    %cst = arith.constant 0.000000e+00 : f32
    %0 = vector.broadcast %cst : f32 to vector<1x1x24x16xf32>
    %c0 = arith.constant 0 : index
    %c0_0 = arith.constant 0 : index
    %c0_1 = arith.constant 0 : index
    %c0_2 = arith.constant 0 : index
    %1 = vector.load %arg19[%c0, %c0_0, %c0_1, %c0_2] : memref<1x18x24x16xf32, #tpu.memory_space<vmem>>, vector<1x1x24x16xf32>
    tpu.vector_store %arg19[%c0, %c0_0, %c0_1, %c0_2], %0 {strides = array<i32>} : memref<1x18x24x16xf32, #tpu.memory_space<vmem>>, vector<1x1x24x16xf32>,
    %cst_3 = arith.constant 0.000000e+00 : f32
    %2 = vector.broadcast %cst_3 : f32 to vector<1x1x24x16xf32>
    %c0_4 = arith.constant 0 : index
    %c17 = arith.constant 17 : index
    %c0_5 = arith.constant 0 : index
    %c0_6 = arith.constant 0 : index
    %3 = vector.load %arg19[%c0_4, %c17, %c0_5, %c0_6] : memref<1x18x24x16xf32, #tpu.memory_space<vmem>>, vector<1x1x24x16xf32>
    tpu.vector_store %arg19[%c0_4, %c17, %c0_5, %c0_6], %2 {strides = array<i32>} : memref<1x18x24x16xf32, #tpu.memory_space<vmem>>, vector<1x1x24x16xf32>,
    %cst_7 = arith.constant 0.000000e+00 : f32
    %4 = vector.broadcast %cst_7 : f32 to vector<1x18x1x16xf32>
    %c0_8 = arith.constant 0 : index
    %c0_9 = arith.constant 0 : index
    %c0_10 = arith.constant 0 : index
    %c0_11 = arith.constant 0 : index
    %5 = vector.load %arg19[%c0_8, %c0_9, %c0_10, %c0_11] : memref<1x18x24x16xf32, #tpu.memory_space<vmem>>, vector<1x18x1x16xf32>
    tpu.vector_store %arg19[%c0_8, %c0_9, %c0_10, %c0_11], %4 {strides = array<i32>} : memref<1x18x24x16xf32, #tpu.memory_space<vmem>>, vector<1x18x1x16xf32>,
    %cst_12 = arith.constant 0.000000e+00 : f32
    %6 = vector.broadcast %cst_12 : f32 to vector<1x18x1x16xf32>
    %c0_13 = arith.constant 0 : index
    %c0_14 = arith.constant 0 : index
    %c17_15 = arith.constant 17 : index
    %c0_16 = arith.constant 0 : index
    %7 = vector.load %arg19[%c0_13, %c0_14, %c17_15, %c0_16] : memref<1x18x24x16xf32, #tpu.memory_space<vmem>>, vector<1x18x1x16xf32>
    tpu.vector_store %arg19[%c0_13, %c0_14, %c17_15, %c0_16], %6 {strides = array<i32>} : memref<1x18x24x16xf32, #tpu.memory_space<vmem>>, vector<1x18x1x16xf32>,
    %c0_17 = arith.constant 0 : index
    %c0_18 = arith.constant 0 : index
    %c0_19 = arith.constant 0 : index
    %c0_20 = arith.constant 0 : index
    %8 = vector.load %arg1[%c0_17, %c0_18, %c0_19, %c0_20] : memref<1x16x16x8xf32, #tpu.memory_space<vmem>>, vector<1x16x16x8xf32>
    %9 = vector.shape_cast %8 : vector<1x16x16x8xf32> to vector<256x8xf32>
    %c0_21 = arith.constant 0 : index
    %c0_22 = arith.constant 0 : index
    %10 = vector.load %arg2[%c0_21, %c0_22] : memref<8x16xf32, #tpu.memory_space<vmem>>, vector<8x16xf32>
    %cst_23 = arith.constant dense<0.000000e+00> : vector<256x16xf32>
    %11 = tpu.matmul %9, %10, %cst_23 {dimension_numbers = #tpu.dot_dimension_numbers<[1], [0], [0], [1], [0, 0, 1, 1], [], []>} : vector<256x8xf32>, vector<8x16xf32>, vector<256x16xf32> -> vector<256x16xf32>
    %c0_24 = arith.constant 0 : index
    %c0_25 = arith.constant 0 : index
    %12 = vector.load %arg3[%c0_24, %c0_25] : memref<1x16xf32, #tpu.memory_space<vmem>>, vector<1x16xf32>
    %13 = vector.broadcast %12 : vector<1x16xf32> to vector<256x16xf32>
    %14 = arith.addf %11, %13 : vector<256x16xf32>
    %cst_26 = arith.constant 0.000000e+00 : f32
    %15 = vector.broadcast %cst_26 : f32 to vector<256x16xf32>
    %16 = arith.maximumf %14, %15 : vector<256x16xf32>
    %17 = vector.extract_strided_slice %16 {offsets = [0, 0], sizes = [256, 4], strides = [1, 1]} : vector<256x16xf32> to vector<256x4xf32>
    %18 = vector.shape_cast %17 : vector<256x4xf32> to vector<1x16x16x4xf32>
    %c0_27 = arith.constant 0 : index
    %c1 = arith.constant 1 : index
    %c1_28 = arith.constant 1 : index
    %c0_29 = arith.constant 0 : index
    %19 = vector.load %arg19[%c0_27, %c1, %c1_28, %c0_29] : memref<1x18x24x16xf32, #tpu.memory_space<vmem>>, vector<1x16x16x4xf32>
    tpu.vector_store %arg19[%c0_27, %c1, %c1_28, %c0_29], %18 {strides = array<i32>} : memref<1x18x24x16xf32, #tpu.memory_space<vmem>>, vector<1x16x16x4xf32>,
    %c0_30 = arith.constant 0 : index
    %c0_31 = arith.constant 0 : index
    %c0_32 = arith.constant 0 : index
    %c0_33 = arith.constant 0 : index
    %20 = vector.load %arg19[%c0_30, %c0_31, %c0_32, %c0_33] : memref<1x18x24x16xf32, #tpu.memory_space<vmem>>, vector<1x16x16x4xf32>
    %21 = vector.shape_cast %20 : vector<1x16x16x4xf32> to vector<256x4xf32>
    %c0_34 = arith.constant 0 : index
    %c0_35 = arith.constant 0 : index
    %c0_36 = arith.constant 0 : index
    %22 = vector.load %arg4[%c0_34, %c0_35, %c0_36] : memref<9x4x12xf32, #tpu.memory_space<vmem>>, vector<1x4x12xf32>
    %23 = vector.shape_cast %22 : vector<1x4x12xf32> to vector<4x12xf32>
    %cst_37 = arith.constant dense<0.000000e+00> : vector<256x12xf32>
    %24 = tpu.matmul %21, %23, %cst_37 {dimension_numbers = #tpu.dot_dimension_numbers<[1], [0], [0], [1], [0, 0, 1, 1], [], []>} : vector<256x4xf32>, vector<4x12xf32>, vector<256x12xf32> -> vector<256x12xf32>
    %c0_38 = arith.constant 0 : index
    %c0_39 = arith.constant 0 : index
    %c1_40 = arith.constant 1 : index
    %c0_41 = arith.constant 0 : index
    %25 = vector.load %arg19[%c0_38, %c0_39, %c1_40, %c0_41] : memref<1x18x24x16xf32, #tpu.memory_space<vmem>>, vector<1x16x16x4xf32>
    %26 = vector.shape_cast %25 : vector<1x16x16x4xf32> to vector<256x4xf32>
    %c1_42 = arith.constant 1 : index
    %c0_43 = arith.constant 0 : index
    %c0_44 = arith.constant 0 : index
    %27 = vector.load %arg4[%c1_42, %c0_43, %c0_44] : memref<9x4x12xf32, #tpu.memory_space<vmem>>, vector<1x4x12xf32>
    %28 = vector.shape_cast %27 : vector<1x4x12xf32> to vector<4x12xf32>
    %cst_45 = arith.constant dense<0.000000e+00> : vector<256x12xf32>
    %29 = tpu.matmul %26, %28, %cst_45 {dimension_numbers = #tpu.dot_dimension_numbers<[1], [0], [0], [1], [0, 0, 1, 1], [], []>} : vector<256x4xf32>, vector<4x12xf32>, vector<256x12xf32> -> vector<256x12xf32>
    %30 = arith.addf %24, %29 : vector<256x12xf32>
    %c0_46 = arith.constant 0 : index
    %c0_47 = arith.constant 0 : index
    %c2 = arith.constant 2 : index
    %c0_48 = arith.constant 0 : index
    %31 = vector.load %arg19[%c0_46, %c0_47, %c2, %c0_48] : memref<1x18x24x16xf32, #tpu.memory_space<vmem>>, vector<1x16x16x4xf32>
    %32 = vector.shape_cast %31 : vector<1x16x16x4xf32> to vector<256x4xf32>
    %c2_49 = arith.constant 2 : index
    %c0_50 = arith.constant 0 : index
    %c0_51 = arith.constant 0 : index
    %33 = vector.load %arg4[%c2_49, %c0_50, %c0_51] : memref<9x4x12xf32, #tpu.memory_space<vmem>>, vector<1x4x12xf32>
    %34 = vector.shape_cast %33 : vector<1x4x12xf32> to vector<4x12xf32>
    %cst_52 = arith.constant dense<0.000000e+00> : vector<256x12xf32>
    %35 = tpu.matmul %32, %34, %cst_52 {dimension_numbers = #tpu.dot_dimension_numbers<[1], [0], [0], [1], [0, 0, 1, 1], [], []>} : vector<256x4xf32>, vector<4x12xf32>, vector<256x12xf32> -> vector<256x12xf32>
    %36 = arith.addf %30, %35 : vector<256x12xf32>
    %c0_53 = arith.constant 0 : index
    %c1_54 = arith.constant 1 : index
    %c0_55 = arith.constant 0 : index
    %c0_56 = arith.constant 0 : index
    %37 = vector.load %arg19[%c0_53, %c1_54, %c0_55, %c0_56] : memref<1x18x24x16xf32, #tpu.memory_space<vmem>>, vector<1x16x16x4xf32>
    %38 = vector.shape_cast %37 : vector<1x16x16x4xf32> to vector<256x4xf32>
    %c3 = arith.constant 3 : index
    %c0_57 = arith.constant 0 : index
    %c0_58 = arith.constant 0 : index
    %39 = vector.load %arg4[%c3, %c0_57, %c0_58] : memref<9x4x12xf32, #tpu.memory_space<vmem>>, vector<1x4x12xf32>
    %40 = vector.shape_cast %39 : vector<1x4x12xf32> to vector<4x12xf32>
    %cst_59 = arith.constant dense<0.000000e+00> : vector<256x12xf32>
    %41 = tpu.matmul %38, %40, %cst_59 {dimension_numbers = #tpu.dot_dimension_numbers<[1], [0], [0], [1], [0, 0, 1, 1], [], []>} : vector<256x4xf32>, vector<4x12xf32>, vector<256x12xf32> -> vector<256x12xf32>
    %42 = arith.addf %36, %41 : vector<256x12xf32>
    %c0_60 = arith.constant 0 : index
    %c1_61 = arith.constant 1 : index
    %c1_62 = arith.constant 1 : index
    %c0_63 = arith.constant 0 : index
    %43 = vector.load %arg19[%c0_60, %c1_61, %c1_62, %c0_63] : memref<1x18x24x16xf32, #tpu.memory_space<vmem>>, vector<1x16x16x4xf32>
    %44 = vector.shape_cast %43 : vector<1x16x16x4xf32> to vector<256x4xf32>
    %c4 = arith.constant 4 : index
    %c0_64 = arith.constant 0 : index
    %c0_65 = arith.constant 0 : index
    %45 = vector.load %arg4[%c4, %c0_64, %c0_65] : memref<9x4x12xf32, #tpu.memory_space<vmem>>, vector<1x4x12xf32>
    %46 = vector.shape_cast %45 : vector<1x4x12xf32> to vector<4x12xf32>
    %cst_66 = arith.constant dense<0.000000e+00> : vector<256x12xf32>
    %47 = tpu.matmul %44, %46, %cst_66 {dimension_numbers = #tpu.dot_dimension_numbers<[1], [0], [0], [1], [0, 0, 1, 1], [], []>} : vector<256x4xf32>, vector<4x12xf32>, vector<256x12xf32> -> vector<256x12xf32>
    %48 = arith.addf %42, %47 : vector<256x12xf32>
    %c0_67 = arith.constant 0 : index
    %c1_68 = arith.constant 1 : index
    %c2_69 = arith.constant 2 : index
    %c0_70 = arith.constant 0 : index
    %49 = vector.load %arg19[%c0_67, %c1_68, %c2_69, %c0_70] : memref<1x18x24x16xf32, #tpu.memory_space<vmem>>, vector<1x16x16x4xf32>
    %50 = vector.shape_cast %49 : vector<1x16x16x4xf32> to vector<256x4xf32>
    %c5 = arith.constant 5 : index
    %c0_71 = arith.constant 0 : index
    %c0_72 = arith.constant 0 : index
    %51 = vector.load %arg4[%c5, %c0_71, %c0_72] : memref<9x4x12xf32, #tpu.memory_space<vmem>>, vector<1x4x12xf32>
    %52 = vector.shape_cast %51 : vector<1x4x12xf32> to vector<4x12xf32>
    %cst_73 = arith.constant dense<0.000000e+00> : vector<256x12xf32>
    %53 = tpu.matmul %50, %52, %cst_73 {dimension_numbers = #tpu.dot_dimension_numbers<[1], [0], [0], [1], [0, 0, 1, 1], [], []>} : vector<256x4xf32>, vector<4x12xf32>, vector<256x12xf32> -> vector<256x12xf32>
    %54 = arith.addf %48, %53 : vector<256x12xf32>
    %c0_74 = arith.constant 0 : index
    %c2_75 = arith.constant 2 : index
    %c0_76 = arith.constant 0 : index
    %c0_77 = arith.constant 0 : index
    %55 = vector.load %arg19[%c0_74, %c2_75, %c0_76, %c0_77] : memref<1x18x24x16xf32, #tpu.memory_space<vmem>>, vector<1x16x16x4xf32>
    %56 = vector.shape_cast %55 : vector<1x16x16x4xf32> to vector<256x4xf32>
    %c6 = arith.constant 6 : index
    %c0_78 = arith.constant 0 : index
    %c0_79 = arith.constant 0 : index
    %57 = vector.load %arg4[%c6, %c0_78, %c0_79] : memref<9x4x12xf32, #tpu.memory_space<vmem>>, vector<1x4x12xf32>
    %58 = vector.shape_cast %57 : vector<1x4x12xf32> to vector<4x12xf32>
    %cst_80 = arith.constant dense<0.000000e+00> : vector<256x12xf32>
    %59 = tpu.matmul %56, %58, %cst_80 {dimension_numbers = #tpu.dot_dimension_numbers<[1], [0], [0], [1], [0, 0, 1, 1], [], []>} : vector<256x4xf32>, vector<4x12xf32>, vector<256x12xf32> -> vector<256x12xf32>
    %60 = arith.addf %54, %59 : vector<256x12xf32>
    %c0_81 = arith.constant 0 : index
    %c2_82 = arith.constant 2 : index
    %c1_83 = arith.constant 1 : index
    %c0_84 = arith.constant 0 : index
    %61 = vector.load %arg19[%c0_81, %c2_82, %c1_83, %c0_84] : memref<1x18x24x16xf32, #tpu.memory_space<vmem>>, vector<1x16x16x4xf32>
    %62 = vector.shape_cast %61 : vector<1x16x16x4xf32> to vector<256x4xf32>
    %c7 = arith.constant 7 : index
    %c0_85 = arith.constant 0 : index
    %c0_86 = arith.constant 0 : index
    %63 = vector.load %arg4[%c7, %c0_85, %c0_86] : memref<9x4x12xf32, #tpu.memory_space<vmem>>, vector<1x4x12xf32>
    %64 = vector.shape_cast %63 : vector<1x4x12xf32> to vector<4x12xf32>
    %cst_87 = arith.constant dense<0.000000e+00> : vector<256x12xf32>
    %65 = tpu.matmul %62, %64, %cst_87 {dimension_numbers = #tpu.dot_dimension_numbers<[1], [0], [0], [1], [0, 0, 1, 1], [], []>} : vector<256x4xf32>, vector<4x12xf32>, vector<256x12xf32> -> vector<256x12xf32>
    %66 = arith.addf %60, %65 : vector<256x12xf32>
    %c0_88 = arith.constant 0 : index
    %c2_89 = arith.constant 2 : index
    %c2_90 = arith.constant 2 : index
    %c0_91 = arith.constant 0 : index
    %67 = vector.load %arg19[%c0_88, %c2_89, %c2_90, %c0_91] : memref<1x18x24x16xf32, #tpu.memory_space<vmem>>, vector<1x16x16x4xf32>
    %68 = vector.shape_cast %67 : vector<1x16x16x4xf32> to vector<256x4xf32>
    %c8 = arith.constant 8 : index
    %c0_92 = arith.constant 0 : index
    %c0_93 = arith.constant 0 : index
    %69 = vector.load %arg4[%c8, %c0_92, %c0_93] : memref<9x4x12xf32, #tpu.memory_space<vmem>>, vector<1x4x12xf32>
    %70 = vector.shape_cast %69 : vector<1x4x12xf32> to vector<4x12xf32>
    %cst_94 = arith.constant dense<0.000000e+00> : vector<256x12xf32>
    %71 = tpu.matmul %68, %70, %cst_94 {dimension_numbers = #tpu.dot_dimension_numbers<[1], [0], [0], [1], [0, 0, 1, 1], [], []>} : vector<256x4xf32>, vector<4x12xf32>, vector<256x12xf32> -> vector<256x12xf32>
    %72 = arith.addf %66, %71 : vector<256x12xf32>
    %c0_95 = arith.constant 0 : index
    %c0_96 = arith.constant 0 : index
    %73 = vector.load %arg5[%c0_95, %c0_96] : memref<1x12xf32, #tpu.memory_space<vmem>>, vector<1x12xf32>
    %74 = vector.broadcast %73 : vector<1x12xf32> to vector<256x12xf32>
    %75 = arith.addf %72, %74 : vector<256x12xf32>
    %cst_97 = arith.constant 0.000000e+00 : f32
    %76 = vector.broadcast %cst_97 : f32 to vector<256x12xf32>
    %77 = arith.maximumf %75, %76 : vector<256x12xf32>
    %78 = vector.extract_strided_slice %77 {offsets = [0, 0], sizes = [256, 4], strides = [1, 1]} : vector<256x12xf32> to vector<256x4xf32>
    %c0_98 = arith.constant 0 : index
    %c0_99 = arith.constant 0 : index
    %79 = vector.load %arg20[%c0_98, %c0_99] : memref<256x16xf32, #tpu.memory_space<vmem>>, vector<256x4xf32>
    tpu.vector_store %arg20[%c0_98, %c0_99], %78 {strides = array<i32>} : memref<256x16xf32, #tpu.memory_space<vmem>>, vector<256x4xf32>,
    %80 = vector.extract_strided_slice %77 {offsets = [0, 4], sizes = [256, 4], strides = [1, 1]} : vector<256x12xf32> to vector<256x4xf32>
    %81 = vector.extract_strided_slice %77 {offsets = [0, 8], sizes = [256, 4], strides = [1, 1]} : vector<256x12xf32> to vector<256x4xf32>
    %c0_100 = arith.constant 0 : index
    %c0_101 = arith.constant 0 : index
    %82 = vector.load %arg21[%c0_100, %c0_101] : memref<256x16xf32, #tpu.memory_space<vmem>>, vector<256x4xf32>
    tpu.vector_store %arg21[%c0_100, %c0_101], %81 {strides = array<i32>} : memref<256x16xf32, #tpu.memory_space<vmem>>, vector<256x4xf32>,
    %83 = vector.extract_strided_slice %16 {offsets = [0, 4], sizes = [256, 4], strides = [1, 1]} : vector<256x16xf32> to vector<256x4xf32>
    %84 = vector.shape_cast %83 : vector<256x4xf32> to vector<1x16x16x4xf32>
    %c0_102 = arith.constant 0 : index
    %c1_103 = arith.constant 1 : index
    %c1_104 = arith.constant 1 : index
    %c0_105 = arith.constant 0 : index
    %85 = vector.load %arg19[%c0_102, %c1_103, %c1_104, %c0_105] : memref<1x18x24x16xf32, #tpu.memory_space<vmem>>, vector<1x16x16x4xf32>
    tpu.vector_store %arg19[%c0_102, %c1_103, %c1_104, %c0_105], %84 {strides = array<i32>} : memref<1x18x24x16xf32, #tpu.memory_space<vmem>>, vector<1x16x16x4xf32>,
    %86 = vector.shape_cast %80 : vector<256x4xf32> to vector<1x16x16x4xf32>
    %c0_106 = arith.constant 0 : index
    %c1_107 = arith.constant 1 : index
    %c1_108 = arith.constant 1 : index
    %c4_109 = arith.constant 4 : index
    %87 = vector.load %arg19[%c0_106, %c1_107, %c1_108, %c4_109] : memref<1x18x24x16xf32, #tpu.memory_space<vmem>>, vector<1x16x16x4xf32>
    tpu.vector_store %arg19[%c0_106, %c1_107, %c1_108, %c4_109], %86 {strides = array<i32>} : memref<1x18x24x16xf32, #tpu.memory_space<vmem>>, vector<1x16x16x4xf32>,
    %c0_110 = arith.constant 0 : index
    %c0_111 = arith.constant 0 : index
    %c0_112 = arith.constant 0 : index
    %c0_113 = arith.constant 0 : index
    %88 = vector.load %arg19[%c0_110, %c0_111, %c0_112, %c0_113] : memref<1x18x24x16xf32, #tpu.memory_space<vmem>>, vector<1x16x16x8xf32>
    %89 = vector.shape_cast %88 : vector<1x16x16x8xf32> to vector<256x8xf32>
    %c0_114 = arith.constant 0 : index
    %c0_115 = arith.constant 0 : index
    %c0_116 = arith.constant 0 : index
    %90 = vector.load %arg6[%c0_114, %c0_115, %c0_116] : memref<9x8x12xf32, #tpu.memory_space<vmem>>, vector<1x8x12xf32>
    %91 = vector.shape_cast %90 : vector<1x8x12xf32> to vector<8x12xf32>
    %cst_117 = arith.constant dense<0.000000e+00> : vector<256x12xf32>
    %92 = tpu.matmul %89, %91, %cst_117 {dimension_numbers = #tpu.dot_dimension_numbers<[1], [0], [0], [1], [0, 0, 1, 1], [], []>} : vector<256x8xf32>, vector<8x12xf32>, vector<256x12xf32> -> vector<256x12xf32>
    %c0_118 = arith.constant 0 : index
    %c0_119 = arith.constant 0 : index
    %c1_120 = arith.constant 1 : index
    %c0_121 = arith.constant 0 : index
    %93 = vector.load %arg19[%c0_118, %c0_119, %c1_120, %c0_121] : memref<1x18x24x16xf32, #tpu.memory_space<vmem>>, vector<1x16x16x8xf32>
    %94 = vector.shape_cast %93 : vector<1x16x16x8xf32> to vector<256x8xf32>
    %c1_122 = arith.constant 1 : index
    %c0_123 = arith.constant 0 : index
    %c0_124 = arith.constant 0 : index
    %95 = vector.load %arg6[%c1_122, %c0_123, %c0_124] : memref<9x8x12xf32, #tpu.memory_space<vmem>>, vector<1x8x12xf32>
    %96 = vector.shape_cast %95 : vector<1x8x12xf32> to vector<8x12xf32>
    %cst_125 = arith.constant dense<0.000000e+00> : vector<256x12xf32>
    %97 = tpu.matmul %94, %96, %cst_125 {dimension_numbers = #tpu.dot_dimension_numbers<[1], [0], [0], [1], [0, 0, 1, 1], [], []>} : vector<256x8xf32>, vector<8x12xf32>, vector<256x12xf32> -> vector<256x12xf32>
    %98 = arith.addf %92, %97 : vector<256x12xf32>
    %c0_126 = arith.constant 0 : index
    %c0_127 = arith.constant 0 : index
    %c2_128 = arith.constant 2 : index
    %c0_129 = arith.constant 0 : index
    %99 = vector.load %arg19[%c0_126, %c0_127, %c2_128, %c0_129] : memref<1x18x24x16xf32, #tpu.memory_space<vmem>>, vector<1x16x16x8xf32>
    %100 = vector.shape_cast %99 : vector<1x16x16x8xf32> to vector<256x8xf32>
    %c2_130 = arith.constant 2 : index
    %c0_131 = arith.constant 0 : index
    %c0_132 = arith.constant 0 : index
    %101 = vector.load %arg6[%c2_130, %c0_131, %c0_132] : memref<9x8x12xf32, #tpu.memory_space<vmem>>, vector<1x8x12xf32>
    %102 = vector.shape_cast %101 : vector<1x8x12xf32> to vector<8x12xf32>
    %cst_133 = arith.constant dense<0.000000e+00> : vector<256x12xf32>
    %103 = tpu.matmul %100, %102, %cst_133 {dimension_numbers = #tpu.dot_dimension_numbers<[1], [0], [0], [1], [0, 0, 1, 1], [], []>} : vector<256x8xf32>, vector<8x12xf32>, vector<256x12xf32> -> vector<256x12xf32>
    %104 = arith.addf %98, %103 : vector<256x12xf32>
    %c0_134 = arith.constant 0 : index
    %c1_135 = arith.constant 1 : index
    %c0_136 = arith.constant 0 : index
    %c0_137 = arith.constant 0 : index
    %105 = vector.load %arg19[%c0_134, %c1_135, %c0_136, %c0_137] : memref<1x18x24x16xf32, #tpu.memory_space<vmem>>, vector<1x16x16x8xf32>
    %106 = vector.shape_cast %105 : vector<1x16x16x8xf32> to vector<256x8xf32>
    %c3_138 = arith.constant 3 : index
    %c0_139 = arith.constant 0 : index
    %c0_140 = arith.constant 0 : index
    %107 = vector.load %arg6[%c3_138, %c0_139, %c0_140] : memref<9x8x12xf32, #tpu.memory_space<vmem>>, vector<1x8x12xf32>
    %108 = vector.shape_cast %107 : vector<1x8x12xf32> to vector<8x12xf32>
    %cst_141 = arith.constant dense<0.000000e+00> : vector<256x12xf32>
    %109 = tpu.matmul %106, %108, %cst_141 {dimension_numbers = #tpu.dot_dimension_numbers<[1], [0], [0], [1], [0, 0, 1, 1], [], []>} : vector<256x8xf32>, vector<8x12xf32>, vector<256x12xf32> -> vector<256x12xf32>
    %110 = arith.addf %104, %109 : vector<256x12xf32>
    %c0_142 = arith.constant 0 : index
    %c1_143 = arith.constant 1 : index
    %c1_144 = arith.constant 1 : index
    %c0_145 = arith.constant 0 : index
    %111 = vector.load %arg19[%c0_142, %c1_143, %c1_144, %c0_145] : memref<1x18x24x16xf32, #tpu.memory_space<vmem>>, vector<1x16x16x8xf32>
    %112 = vector.shape_cast %111 : vector<1x16x16x8xf32> to vector<256x8xf32>
    %c4_146 = arith.constant 4 : index
    %c0_147 = arith.constant 0 : index
    %c0_148 = arith.constant 0 : index
    %113 = vector.load %arg6[%c4_146, %c0_147, %c0_148] : memref<9x8x12xf32, #tpu.memory_space<vmem>>, vector<1x8x12xf32>
    %114 = vector.shape_cast %113 : vector<1x8x12xf32> to vector<8x12xf32>
    %cst_149 = arith.constant dense<0.000000e+00> : vector<256x12xf32>
    %115 = tpu.matmul %112, %114, %cst_149 {dimension_numbers = #tpu.dot_dimension_numbers<[1], [0], [0], [1], [0, 0, 1, 1], [], []>} : vector<256x8xf32>, vector<8x12xf32>, vector<256x12xf32> -> vector<256x12xf32>
    %116 = arith.addf %110, %115 : vector<256x12xf32>
    %c0_150 = arith.constant 0 : index
    %c1_151 = arith.constant 1 : index
    %c2_152 = arith.constant 2 : index
    %c0_153 = arith.constant 0 : index
    %117 = vector.load %arg19[%c0_150, %c1_151, %c2_152, %c0_153] : memref<1x18x24x16xf32, #tpu.memory_space<vmem>>, vector<1x16x16x8xf32>
    %118 = vector.shape_cast %117 : vector<1x16x16x8xf32> to vector<256x8xf32>
    %c5_154 = arith.constant 5 : index
    %c0_155 = arith.constant 0 : index
    %c0_156 = arith.constant 0 : index
    %119 = vector.load %arg6[%c5_154, %c0_155, %c0_156] : memref<9x8x12xf32, #tpu.memory_space<vmem>>, vector<1x8x12xf32>
    %120 = vector.shape_cast %119 : vector<1x8x12xf32> to vector<8x12xf32>
    %cst_157 = arith.constant dense<0.000000e+00> : vector<256x12xf32>
    %121 = tpu.matmul %118, %120, %cst_157 {dimension_numbers = #tpu.dot_dimension_numbers<[1], [0], [0], [1], [0, 0, 1, 1], [], []>} : vector<256x8xf32>, vector<8x12xf32>, vector<256x12xf32> -> vector<256x12xf32>
    %122 = arith.addf %116, %121 : vector<256x12xf32>
    %c0_158 = arith.constant 0 : index
    %c2_159 = arith.constant 2 : index
    %c0_160 = arith.constant 0 : index
    %c0_161 = arith.constant 0 : index
    %123 = vector.load %arg19[%c0_158, %c2_159, %c0_160, %c0_161] : memref<1x18x24x16xf32, #tpu.memory_space<vmem>>, vector<1x16x16x8xf32>
    %124 = vector.shape_cast %123 : vector<1x16x16x8xf32> to vector<256x8xf32>
    %c6_162 = arith.constant 6 : index
    %c0_163 = arith.constant 0 : index
    %c0_164 = arith.constant 0 : index
    %125 = vector.load %arg6[%c6_162, %c0_163, %c0_164] : memref<9x8x12xf32, #tpu.memory_space<vmem>>, vector<1x8x12xf32>
    %126 = vector.shape_cast %125 : vector<1x8x12xf32> to vector<8x12xf32>
    %cst_165 = arith.constant dense<0.000000e+00> : vector<256x12xf32>
    %127 = tpu.matmul %124, %126, %cst_165 {dimension_numbers = #tpu.dot_dimension_numbers<[1], [0], [0], [1], [0, 0, 1, 1], [], []>} : vector<256x8xf32>, vector<8x12xf32>, vector<256x12xf32> -> vector<256x12xf32>
    %128 = arith.addf %122, %127 : vector<256x12xf32>
    %c0_166 = arith.constant 0 : index
    %c2_167 = arith.constant 2 : index
    %c1_168 = arith.constant 1 : index
    %c0_169 = arith.constant 0 : index
    %129 = vector.load %arg19[%c0_166, %c2_167, %c1_168, %c0_169] : memref<1x18x24x16xf32, #tpu.memory_space<vmem>>, vector<1x16x16x8xf32>
    %130 = vector.shape_cast %129 : vector<1x16x16x8xf32> to vector<256x8xf32>
    %c7_170 = arith.constant 7 : index
    %c0_171 = arith.constant 0 : index
    %c0_172 = arith.constant 0 : index
    %131 = vector.load %arg6[%c7_170, %c0_171, %c0_172] : memref<9x8x12xf32, #tpu.memory_space<vmem>>, vector<1x8x12xf32>
    %132 = vector.shape_cast %131 : vector<1x8x12xf32> to vector<8x12xf32>
    %cst_173 = arith.constant dense<0.000000e+00> : vector<256x12xf32>
    %133 = tpu.matmul %130, %132, %cst_173 {dimension_numbers = #tpu.dot_dimension_numbers<[1], [0], [0], [1], [0, 0, 1, 1], [], []>} : vector<256x8xf32>, vector<8x12xf32>, vector<256x12xf32> -> vector<256x12xf32>
    %134 = arith.addf %128, %133 : vector<256x12xf32>
    %c0_174 = arith.constant 0 : index
    %c2_175 = arith.constant 2 : index
    %c2_176 = arith.constant 2 : index
    %c0_177 = arith.constant 0 : index
    %135 = vector.load %arg19[%c0_174, %c2_175, %c2_176, %c0_177] : memref<1x18x24x16xf32, #tpu.memory_space<vmem>>, vector<1x16x16x8xf32>
    %136 = vector.shape_cast %135 : vector<1x16x16x8xf32> to vector<256x8xf32>
    %c8_178 = arith.constant 8 : index
    %c0_179 = arith.constant 0 : index
    %c0_180 = arith.constant 0 : index
    %137 = vector.load %arg6[%c8_178, %c0_179, %c0_180] : memref<9x8x12xf32, #tpu.memory_space<vmem>>, vector<1x8x12xf32>
    %138 = vector.shape_cast %137 : vector<1x8x12xf32> to vector<8x12xf32>
    %cst_181 = arith.constant dense<0.000000e+00> : vector<256x12xf32>
    %139 = tpu.matmul %136, %138, %cst_181 {dimension_numbers = #tpu.dot_dimension_numbers<[1], [0], [0], [1], [0, 0, 1, 1], [], []>} : vector<256x8xf32>, vector<8x12xf32>, vector<256x12xf32> -> vector<256x12xf32>
    %140 = arith.addf %134, %139 : vector<256x12xf32>
    %c0_182 = arith.constant 0 : index
    %c0_183 = arith.constant 0 : index
    %141 = vector.load %arg7[%c0_182, %c0_183] : memref<1x12xf32, #tpu.memory_space<vmem>>, vector<1x12xf32>
    %142 = vector.broadcast %141 : vector<1x12xf32> to vector<256x12xf32>
    %143 = arith.addf %140, %142 : vector<256x12xf32>
    %cst_184 = arith.constant 0.000000e+00 : f32
    %144 = vector.broadcast %cst_184 : f32 to vector<256x12xf32>
    %145 = arith.maximumf %143, %144 : vector<256x12xf32>
    %146 = vector.extract_strided_slice %145 {offsets = [0, 0], sizes = [256, 4], strides = [1, 1]} : vector<256x12xf32> to vector<256x4xf32>
    %c0_185 = arith.constant 0 : index
    %c4_186 = arith.constant 4 : index
    %147 = vector.load %arg20[%c0_185, %c4_186] : memref<256x16xf32, #tpu.memory_space<vmem>>, vector<256x4xf32>
    tpu.vector_store %arg20[%c0_185, %c4_186], %146 {strides = array<i32>} : memref<256x16xf32, #tpu.memory_space<vmem>>, vector<256x4xf32>,
    %148 = vector.extract_strided_slice %145 {offsets = [0, 4], sizes = [256, 4], strides = [1, 1]} : vector<256x12xf32> to vector<256x4xf32>
    %149 = vector.extract_strided_slice %145 {offsets = [0, 8], sizes = [256, 4], strides = [1, 1]} : vector<256x12xf32> to vector<256x4xf32>
    %c0_187 = arith.constant 0 : index
    %c4_188 = arith.constant 4 : index
    %150 = vector.load %arg21[%c0_187, %c4_188] : memref<256x16xf32, #tpu.memory_space<vmem>>, vector<256x4xf32>
    tpu.vector_store %arg21[%c0_187, %c4_188], %149 {strides = array<i32>} : memref<256x16xf32, #tpu.memory_space<vmem>>, vector<256x4xf32>,
    %151 = vector.extract_strided_slice %16 {offsets = [0, 8], sizes = [256, 4], strides = [1, 1]} : vector<256x16xf32> to vector<256x4xf32>
    %152 = vector.shape_cast %151 : vector<256x4xf32> to vector<1x16x16x4xf32>
    %c0_189 = arith.constant 0 : index
    %c1_190 = arith.constant 1 : index
    %c1_191 = arith.constant 1 : index
    %c0_192 = arith.constant 0 : index
    %153 = vector.load %arg19[%c0_189, %c1_190, %c1_191, %c0_192] : memref<1x18x24x16xf32, #tpu.memory_space<vmem>>, vector<1x16x16x4xf32>
    tpu.vector_store %arg19[%c0_189, %c1_190, %c1_191, %c0_192], %152 {strides = array<i32>} : memref<1x18x24x16xf32, #tpu.memory_space<vmem>>, vector<1x16x16x4xf32>,
    %154 = vector.shape_cast %148 : vector<256x4xf32> to vector<1x16x16x4xf32>
    %c0_193 = arith.constant 0 : index
    %c1_194 = arith.constant 1 : index
    %c1_195 = arith.constant 1 : index
    %c4_196 = arith.constant 4 : index
    %155 = vector.load %arg19[%c0_193, %c1_194, %c1_195, %c4_196] : memref<1x18x24x16xf32, #tpu.memory_space<vmem>>, vector<1x16x16x4xf32>
    tpu.vector_store %arg19[%c0_193, %c1_194, %c1_195, %c4_196], %154 {strides = array<i32>} : memref<1x18x24x16xf32, #tpu.memory_space<vmem>>, vector<1x16x16x4xf32>,
    %c0_197 = arith.constant 0 : index
    %c0_198 = arith.constant 0 : index
    %c0_199 = arith.constant 0 : index
    %c0_200 = arith.constant 0 : index
    %156 = vector.load %arg19[%c0_197, %c0_198, %c0_199, %c0_200] : memref<1x18x24x16xf32, #tpu.memory_space<vmem>>, vector<1x16x16x8xf32>
    %157 = vector.shape_cast %156 : vector<1x16x16x8xf32> to vector<256x8xf32>
    %c0_201 = arith.constant 0 : index
    %c0_202 = arith.constant 0 : index
    %c0_203 = arith.constant 0 : index
    %158 = vector.load %arg8[%c0_201, %c0_202, %c0_203] : memref<9x8x12xf32, #tpu.memory_space<vmem>>, vector<1x8x12xf32>
    %159 = vector.shape_cast %158 : vector<1x8x12xf32> to vector<8x12xf32>
    %cst_204 = arith.constant dense<0.000000e+00> : vector<256x12xf32>
    %160 = tpu.matmul %157, %159, %cst_204 {dimension_numbers = #tpu.dot_dimension_numbers<[1], [0], [0], [1], [0, 0, 1, 1], [], []>} : vector<256x8xf32>, vector<8x12xf32>, vector<256x12xf32> -> vector<256x12xf32>
    %c0_205 = arith.constant 0 : index
    %c0_206 = arith.constant 0 : index
    %c1_207 = arith.constant 1 : index
    %c0_208 = arith.constant 0 : index
    %161 = vector.load %arg19[%c0_205, %c0_206, %c1_207, %c0_208] : memref<1x18x24x16xf32, #tpu.memory_space<vmem>>, vector<1x16x16x8xf32>
    %162 = vector.shape_cast %161 : vector<1x16x16x8xf32> to vector<256x8xf32>
    %c1_209 = arith.constant 1 : index
    %c0_210 = arith.constant 0 : index
    %c0_211 = arith.constant 0 : index
    %163 = vector.load %arg8[%c1_209, %c0_210, %c0_211] : memref<9x8x12xf32, #tpu.memory_space<vmem>>, vector<1x8x12xf32>
    %164 = vector.shape_cast %163 : vector<1x8x12xf32> to vector<8x12xf32>
    %cst_212 = arith.constant dense<0.000000e+00> : vector<256x12xf32>
    %165 = tpu.matmul %162, %164, %cst_212 {dimension_numbers = #tpu.dot_dimension_numbers<[1], [0], [0], [1], [0, 0, 1, 1], [], []>} : vector<256x8xf32>, vector<8x12xf32>, vector<256x12xf32> -> vector<256x12xf32>
    %166 = arith.addf %160, %165 : vector<256x12xf32>
    %c0_213 = arith.constant 0 : index
    %c0_214 = arith.constant 0 : index
    %c2_215 = arith.constant 2 : index
    %c0_216 = arith.constant 0 : index
    %167 = vector.load %arg19[%c0_213, %c0_214, %c2_215, %c0_216] : memref<1x18x24x16xf32, #tpu.memory_space<vmem>>, vector<1x16x16x8xf32>
    %168 = vector.shape_cast %167 : vector<1x16x16x8xf32> to vector<256x8xf32>
    %c2_217 = arith.constant 2 : index
    %c0_218 = arith.constant 0 : index
    %c0_219 = arith.constant 0 : index
    %169 = vector.load %arg8[%c2_217, %c0_218, %c0_219] : memref<9x8x12xf32, #tpu.memory_space<vmem>>, vector<1x8x12xf32>
    %170 = vector.shape_cast %169 : vector<1x8x12xf32> to vector<8x12xf32>
    %cst_220 = arith.constant dense<0.000000e+00> : vector<256x12xf32>
    %171 = tpu.matmul %168, %170, %cst_220 {dimension_numbers = #tpu.dot_dimension_numbers<[1], [0], [0], [1], [0, 0, 1, 1], [], []>} : vector<256x8xf32>, vector<8x12xf32>, vector<256x12xf32> -> vector<256x12xf32>
    %172 = arith.addf %166, %171 : vector<256x12xf32>
    %c0_221 = arith.constant 0 : index
    %c1_222 = arith.constant 1 : index
    %c0_223 = arith.constant 0 : index
    %c0_224 = arith.constant 0 : index
    %173 = vector.load %arg19[%c0_221, %c1_222, %c0_223, %c0_224] : memref<1x18x24x16xf32, #tpu.memory_space<vmem>>, vector<1x16x16x8xf32>
    %174 = vector.shape_cast %173 : vector<1x16x16x8xf32> to vector<256x8xf32>
    %c3_225 = arith.constant 3 : index
    %c0_226 = arith.constant 0 : index
    %c0_227 = arith.constant 0 : index
    %175 = vector.load %arg8[%c3_225, %c0_226, %c0_227] : memref<9x8x12xf32, #tpu.memory_space<vmem>>, vector<1x8x12xf32>
    %176 = vector.shape_cast %175 : vector<1x8x12xf32> to vector<8x12xf32>
    %cst_228 = arith.constant dense<0.000000e+00> : vector<256x12xf32>
    %177 = tpu.matmul %174, %176, %cst_228 {dimension_numbers = #tpu.dot_dimension_numbers<[1], [0], [0], [1], [0, 0, 1, 1], [], []>} : vector<256x8xf32>, vector<8x12xf32>, vector<256x12xf32> -> vector<256x12xf32>
    %178 = arith.addf %172, %177 : vector<256x12xf32>
    %c0_229 = arith.constant 0 : index
    %c1_230 = arith.constant 1 : index
    %c1_231 = arith.constant 1 : index
    %c0_232 = arith.constant 0 : index
    %179 = vector.load %arg19[%c0_229, %c1_230, %c1_231, %c0_232] : memref<1x18x24x16xf32, #tpu.memory_space<vmem>>, vector<1x16x16x8xf32>
    %180 = vector.shape_cast %179 : vector<1x16x16x8xf32> to vector<256x8xf32>
    %c4_233 = arith.constant 4 : index
    %c0_234 = arith.constant 0 : index
    %c0_235 = arith.constant 0 : index
    %181 = vector.load %arg8[%c4_233, %c0_234, %c0_235] : memref<9x8x12xf32, #tpu.memory_space<vmem>>, vector<1x8x12xf32>
    %182 = vector.shape_cast %181 : vector<1x8x12xf32> to vector<8x12xf32>
    %cst_236 = arith.constant dense<0.000000e+00> : vector<256x12xf32>
    %183 = tpu.matmul %180, %182, %cst_236 {dimension_numbers = #tpu.dot_dimension_numbers<[1], [0], [0], [1], [0, 0, 1, 1], [], []>} : vector<256x8xf32>, vector<8x12xf32>, vector<256x12xf32> -> vector<256x12xf32>
    %184 = arith.addf %178, %183 : vector<256x12xf32>
    %c0_237 = arith.constant 0 : index
    %c1_238 = arith.constant 1 : index
    %c2_239 = arith.constant 2 : index
    %c0_240 = arith.constant 0 : index
    %185 = vector.load %arg19[%c0_237, %c1_238, %c2_239, %c0_240] : memref<1x18x24x16xf32, #tpu.memory_space<vmem>>, vector<1x16x16x8xf32>
    %186 = vector.shape_cast %185 : vector<1x16x16x8xf32> to vector<256x8xf32>
    %c5_241 = arith.constant 5 : index
    %c0_242 = arith.constant 0 : index
    %c0_243 = arith.constant 0 : index
    %187 = vector.load %arg8[%c5_241, %c0_242, %c0_243] : memref<9x8x12xf32, #tpu.memory_space<vmem>>, vector<1x8x12xf32>
    %188 = vector.shape_cast %187 : vector<1x8x12xf32> to vector<8x12xf32>
    %cst_244 = arith.constant dense<0.000000e+00> : vector<256x12xf32>
    %189 = tpu.matmul %186, %188, %cst_244 {dimension_numbers = #tpu.dot_dimension_numbers<[1], [0], [0], [1], [0, 0, 1, 1], [], []>} : vector<256x8xf32>, vector<8x12xf32>, vector<256x12xf32> -> vector<256x12xf32>
    %190 = arith.addf %184, %189 : vector<256x12xf32>
    %c0_245 = arith.constant 0 : index
    %c2_246 = arith.constant 2 : index
    %c0_247 = arith.constant 0 : index
    %c0_248 = arith.constant 0 : index
    %191 = vector.load %arg19[%c0_245, %c2_246, %c0_247, %c0_248] : memref<1x18x24x16xf32, #tpu.memory_space<vmem>>, vector<1x16x16x8xf32>
    %192 = vector.shape_cast %191 : vector<1x16x16x8xf32> to vector<256x8xf32>
    %c6_249 = arith.constant 6 : index
    %c0_250 = arith.constant 0 : index
    %c0_251 = arith.constant 0 : index
    %193 = vector.load %arg8[%c6_249, %c0_250, %c0_251] : memref<9x8x12xf32, #tpu.memory_space<vmem>>, vector<1x8x12xf32>
    %194 = vector.shape_cast %193 : vector<1x8x12xf32> to vector<8x12xf32>
    %cst_252 = arith.constant dense<0.000000e+00> : vector<256x12xf32>
    %195 = tpu.matmul %192, %194, %cst_252 {dimension_numbers = #tpu.dot_dimension_numbers<[1], [0], [0], [1], [0, 0, 1, 1], [], []>} : vector<256x8xf32>, vector<8x12xf32>, vector<256x12xf32> -> vector<256x12xf32>
    %196 = arith.addf %190, %195 : vector<256x12xf32>
    %c0_253 = arith.constant 0 : index
    %c2_254 = arith.constant 2 : index
    %c1_255 = arith.constant 1 : index
    %c0_256 = arith.constant 0 : index
    %197 = vector.load %arg19[%c0_253, %c2_254, %c1_255, %c0_256] : memref<1x18x24x16xf32, #tpu.memory_space<vmem>>, vector<1x16x16x8xf32>
    %198 = vector.shape_cast %197 : vector<1x16x16x8xf32> to vector<256x8xf32>
    %c7_257 = arith.constant 7 : index
    %c0_258 = arith.constant 0 : index
    %c0_259 = arith.constant 0 : index
    %199 = vector.load %arg8[%c7_257, %c0_258, %c0_259] : memref<9x8x12xf32, #tpu.memory_space<vmem>>, vector<1x8x12xf32>
    %200 = vector.shape_cast %199 : vector<1x8x12xf32> to vector<8x12xf32>
    %cst_260 = arith.constant dense<0.000000e+00> : vector<256x12xf32>
    %201 = tpu.matmul %198, %200, %cst_260 {dimension_numbers = #tpu.dot_dimension_numbers<[1], [0], [0], [1], [0, 0, 1, 1], [], []>} : vector<256x8xf32>, vector<8x12xf32>, vector<256x12xf32> -> vector<256x12xf32>
    %202 = arith.addf %196, %201 : vector<256x12xf32>
    %c0_261 = arith.constant 0 : index
    %c2_262 = arith.constant 2 : index
    %c2_263 = arith.constant 2 : index
    %c0_264 = arith.constant 0 : index
    %203 = vector.load %arg19[%c0_261, %c2_262, %c2_263, %c0_264] : memref<1x18x24x16xf32, #tpu.memory_space<vmem>>, vector<1x16x16x8xf32>
    %204 = vector.shape_cast %203 : vector<1x16x16x8xf32> to vector<256x8xf32>
    %c8_265 = arith.constant 8 : index
    %c0_266 = arith.constant 0 : index
    %c0_267 = arith.constant 0 : index
    %205 = vector.load %arg8[%c8_265, %c0_266, %c0_267] : memref<9x8x12xf32, #tpu.memory_space<vmem>>, vector<1x8x12xf32>
    %206 = vector.shape_cast %205 : vector<1x8x12xf32> to vector<8x12xf32>
    %cst_268 = arith.constant dense<0.000000e+00> : vector<256x12xf32>
    %207 = tpu.matmul %204, %206, %cst_268 {dimension_numbers = #tpu.dot_dimension_numbers<[1], [0], [0], [1], [0, 0, 1, 1], [], []>} : vector<256x8xf32>, vector<8x12xf32>, vector<256x12xf32> -> vector<256x12xf32>
    %208 = arith.addf %202, %207 : vector<256x12xf32>
    %c0_269 = arith.constant 0 : index
    %c0_270 = arith.constant 0 : index
    %209 = vector.load %arg9[%c0_269, %c0_270] : memref<1x12xf32, #tpu.memory_space<vmem>>, vector<1x12xf32>
    %210 = vector.broadcast %209 : vector<1x12xf32> to vector<256x12xf32>
    %211 = arith.addf %208, %210 : vector<256x12xf32>
    %cst_271 = arith.constant 0.000000e+00 : f32
    %212 = vector.broadcast %cst_271 : f32 to vector<256x12xf32>
    %213 = arith.maximumf %211, %212 : vector<256x12xf32>
    %214 = vector.extract_strided_slice %213 {offsets = [0, 0], sizes = [256, 4], strides = [1, 1]} : vector<256x12xf32> to vector<256x4xf32>
    %c0_272 = arith.constant 0 : index
    %c8_273 = arith.constant 8 : index
    %215 = vector.load %arg20[%c0_272, %c8_273] : memref<256x16xf32, #tpu.memory_space<vmem>>, vector<256x4xf32>
    tpu.vector_store %arg20[%c0_272, %c8_273], %214 {strides = array<i32>} : memref<256x16xf32, #tpu.memory_space<vmem>>, vector<256x4xf32>,
    %216 = vector.extract_strided_slice %213 {offsets = [0, 4], sizes = [256, 4], strides = [1, 1]} : vector<256x12xf32> to vector<256x4xf32>
    %217 = vector.extract_strided_slice %213 {offsets = [0, 8], sizes = [256, 4], strides = [1, 1]} : vector<256x12xf32> to vector<256x4xf32>
    %c0_274 = arith.constant 0 : index
    %c8_275 = arith.constant 8 : index
    %218 = vector.load %arg21[%c0_274, %c8_275] : memref<256x16xf32, #tpu.memory_space<vmem>>, vector<256x4xf32>
    tpu.vector_store %arg21[%c0_274, %c8_275], %217 {strides = array<i32>} : memref<256x16xf32, #tpu.memory_space<vmem>>, vector<256x4xf32>,
    %219 = vector.extract_strided_slice %16 {offsets = [0, 12], sizes = [256, 4], strides = [1, 1]} : vector<256x16xf32> to vector<256x4xf32>
    %220 = vector.shape_cast %219 : vector<256x4xf32> to vector<1x16x16x4xf32>
    %c0_276 = arith.constant 0 : index
    %c1_277 = arith.constant 1 : index
    %c1_278 = arith.constant 1 : index
    %c0_279 = arith.constant 0 : index
    %221 = vector.load %arg19[%c0_276, %c1_277, %c1_278, %c0_279] : memref<1x18x24x16xf32, #tpu.memory_space<vmem>>, vector<1x16x16x4xf32>
    tpu.vector_store %arg19[%c0_276, %c1_277, %c1_278, %c0_279], %220 {strides = array<i32>} : memref<1x18x24x16xf32, #tpu.memory_space<vmem>>, vector<1x16x16x4xf32>,
    %222 = vector.shape_cast %216 : vector<256x4xf32> to vector<1x16x16x4xf32>
    %c0_280 = arith.constant 0 : index
    %c1_281 = arith.constant 1 : index
    %c1_282 = arith.constant 1 : index
    %c4_283 = arith.constant 4 : index
    %223 = vector.load %arg19[%c0_280, %c1_281, %c1_282, %c4_283] : memref<1x18x24x16xf32, #tpu.memory_space<vmem>>, vector<1x16x16x4xf32>
    tpu.vector_store %arg19[%c0_280, %c1_281, %c1_282, %c4_283], %222 {strides = array<i32>} : memref<1x18x24x16xf32, #tpu.memory_space<vmem>>, vector<1x16x16x4xf32>,
    %c0_284 = arith.constant 0 : index
    %c0_285 = arith.constant 0 : index
    %c0_286 = arith.constant 0 : index
    %c0_287 = arith.constant 0 : index
    %224 = vector.load %arg19[%c0_284, %c0_285, %c0_286, %c0_287] : memref<1x18x24x16xf32, #tpu.memory_space<vmem>>, vector<1x16x16x8xf32>
    %225 = vector.shape_cast %224 : vector<1x16x16x8xf32> to vector<256x8xf32>
    %c0_288 = arith.constant 0 : index
    %c0_289 = arith.constant 0 : index
    %c0_290 = arith.constant 0 : index
    %226 = vector.load %arg10[%c0_288, %c0_289, %c0_290] : memref<9x8x8xf32, #tpu.memory_space<vmem>>, vector<1x8x8xf32>
    %227 = vector.shape_cast %226 : vector<1x8x8xf32> to vector<8x8xf32>
    %cst_291 = arith.constant dense<0.000000e+00> : vector<256x8xf32>
    %228 = tpu.matmul %225, %227, %cst_291 {dimension_numbers = #tpu.dot_dimension_numbers<[1], [0], [0], [1], [0, 0, 1, 1], [], []>} : vector<256x8xf32>, vector<8x8xf32>, vector<256x8xf32> -> vector<256x8xf32>
    %c0_292 = arith.constant 0 : index
    %c0_293 = arith.constant 0 : index
    %c1_294 = arith.constant 1 : index
    %c0_295 = arith.constant 0 : index
    %229 = vector.load %arg19[%c0_292, %c0_293, %c1_294, %c0_295] : memref<1x18x24x16xf32, #tpu.memory_space<vmem>>, vector<1x16x16x8xf32>
    %230 = vector.shape_cast %229 : vector<1x16x16x8xf32> to vector<256x8xf32>
    %c1_296 = arith.constant 1 : index
    %c0_297 = arith.constant 0 : index
    %c0_298 = arith.constant 0 : index
    %231 = vector.load %arg10[%c1_296, %c0_297, %c0_298] : memref<9x8x8xf32, #tpu.memory_space<vmem>>, vector<1x8x8xf32>
    %232 = vector.shape_cast %231 : vector<1x8x8xf32> to vector<8x8xf32>
    %cst_299 = arith.constant dense<0.000000e+00> : vector<256x8xf32>
    %233 = tpu.matmul %230, %232, %cst_299 {dimension_numbers = #tpu.dot_dimension_numbers<[1], [0], [0], [1], [0, 0, 1, 1], [], []>} : vector<256x8xf32>, vector<8x8xf32>, vector<256x8xf32> -> vector<256x8xf32>
    %234 = arith.addf %228, %233 : vector<256x8xf32>
    %c0_300 = arith.constant 0 : index
    %c0_301 = arith.constant 0 : index
    %c2_302 = arith.constant 2 : index
    %c0_303 = arith.constant 0 : index
    %235 = vector.load %arg19[%c0_300, %c0_301, %c2_302, %c0_303] : memref<1x18x24x16xf32, #tpu.memory_space<vmem>>, vector<1x16x16x8xf32>
    %236 = vector.shape_cast %235 : vector<1x16x16x8xf32> to vector<256x8xf32>
    %c2_304 = arith.constant 2 : index
    %c0_305 = arith.constant 0 : index
    %c0_306 = arith.constant 0 : index
    %237 = vector.load %arg10[%c2_304, %c0_305, %c0_306] : memref<9x8x8xf32, #tpu.memory_space<vmem>>, vector<1x8x8xf32>
    %238 = vector.shape_cast %237 : vector<1x8x8xf32> to vector<8x8xf32>
    %cst_307 = arith.constant dense<0.000000e+00> : vector<256x8xf32>
    %239 = tpu.matmul %236, %238, %cst_307 {dimension_numbers = #tpu.dot_dimension_numbers<[1], [0], [0], [1], [0, 0, 1, 1], [], []>} : vector<256x8xf32>, vector<8x8xf32>, vector<256x8xf32> -> vector<256x8xf32>
    %240 = arith.addf %234, %239 : vector<256x8xf32>
    %c0_308 = arith.constant 0 : index
    %c1_309 = arith.constant 1 : index
    %c0_310 = arith.constant 0 : index
    %c0_311 = arith.constant 0 : index
    %241 = vector.load %arg19[%c0_308, %c1_309, %c0_310, %c0_311] : memref<1x18x24x16xf32, #tpu.memory_space<vmem>>, vector<1x16x16x8xf32>
    %242 = vector.shape_cast %241 : vector<1x16x16x8xf32> to vector<256x8xf32>
    %c3_312 = arith.constant 3 : index
    %c0_313 = arith.constant 0 : index
    %c0_314 = arith.constant 0 : index
    %243 = vector.load %arg10[%c3_312, %c0_313, %c0_314] : memref<9x8x8xf32, #tpu.memory_space<vmem>>, vector<1x8x8xf32>
    %244 = vector.shape_cast %243 : vector<1x8x8xf32> to vector<8x8xf32>
    %cst_315 = arith.constant dense<0.000000e+00> : vector<256x8xf32>
    %245 = tpu.matmul %242, %244, %cst_315 {dimension_numbers = #tpu.dot_dimension_numbers<[1], [0], [0], [1], [0, 0, 1, 1], [], []>} : vector<256x8xf32>, vector<8x8xf32>, vector<256x8xf32> -> vector<256x8xf32>
    %246 = arith.addf %240, %245 : vector<256x8xf32>
    %c0_316 = arith.constant 0 : index
    %c1_317 = arith.constant 1 : index
    %c1_318 = arith.constant 1 : index
    %c0_319 = arith.constant 0 : index
    %247 = vector.load %arg19[%c0_316, %c1_317, %c1_318, %c0_319] : memref<1x18x24x16xf32, #tpu.memory_space<vmem>>, vector<1x16x16x8xf32>
    %248 = vector.shape_cast %247 : vector<1x16x16x8xf32> to vector<256x8xf32>
    %c4_320 = arith.constant 4 : index
    %c0_321 = arith.constant 0 : index
    %c0_322 = arith.constant 0 : index
    %249 = vector.load %arg10[%c4_320, %c0_321, %c0_322] : memref<9x8x8xf32, #tpu.memory_space<vmem>>, vector<1x8x8xf32>
    %250 = vector.shape_cast %249 : vector<1x8x8xf32> to vector<8x8xf32>
    %cst_323 = arith.constant dense<0.000000e+00> : vector<256x8xf32>
    %251 = tpu.matmul %248, %250, %cst_323 {dimension_numbers = #tpu.dot_dimension_numbers<[1], [0], [0], [1], [0, 0, 1, 1], [], []>} : vector<256x8xf32>, vector<8x8xf32>, vector<256x8xf32> -> vector<256x8xf32>
    %252 = arith.addf %246, %251 : vector<256x8xf32>
    %c0_324 = arith.constant 0 : index
    %c1_325 = arith.constant 1 : index
    %c2_326 = arith.constant 2 : index
    %c0_327 = arith.constant 0 : index
    %253 = vector.load %arg19[%c0_324, %c1_325, %c2_326, %c0_327] : memref<1x18x24x16xf32, #tpu.memory_space<vmem>>, vector<1x16x16x8xf32>
    %254 = vector.shape_cast %253 : vector<1x16x16x8xf32> to vector<256x8xf32>
    %c5_328 = arith.constant 5 : index
    %c0_329 = arith.constant 0 : index
    %c0_330 = arith.constant 0 : index
    %255 = vector.load %arg10[%c5_328, %c0_329, %c0_330] : memref<9x8x8xf32, #tpu.memory_space<vmem>>, vector<1x8x8xf32>
    %256 = vector.shape_cast %255 : vector<1x8x8xf32> to vector<8x8xf32>
    %cst_331 = arith.constant dense<0.000000e+00> : vector<256x8xf32>
    %257 = tpu.matmul %254, %256, %cst_331 {dimension_numbers = #tpu.dot_dimension_numbers<[1], [0], [0], [1], [0, 0, 1, 1], [], []>} : vector<256x8xf32>, vector<8x8xf32>, vector<256x8xf32> -> vector<256x8xf32>
    %258 = arith.addf %252, %257 : vector<256x8xf32>
    %c0_332 = arith.constant 0 : index
    %c2_333 = arith.constant 2 : index
    %c0_334 = arith.constant 0 : index
    %c0_335 = arith.constant 0 : index
    %259 = vector.load %arg19[%c0_332, %c2_333, %c0_334, %c0_335] : memref<1x18x24x16xf32, #tpu.memory_space<vmem>>, vector<1x16x16x8xf32>
    %260 = vector.shape_cast %259 : vector<1x16x16x8xf32> to vector<256x8xf32>
    %c6_336 = arith.constant 6 : index
    %c0_337 = arith.constant 0 : index
    %c0_338 = arith.constant 0 : index
    %261 = vector.load %arg10[%c6_336, %c0_337, %c0_338] : memref<9x8x8xf32, #tpu.memory_space<vmem>>, vector<1x8x8xf32>
    %262 = vector.shape_cast %261 : vector<1x8x8xf32> to vector<8x8xf32>
    %cst_339 = arith.constant dense<0.000000e+00> : vector<256x8xf32>
    %263 = tpu.matmul %260, %262, %cst_339 {dimension_numbers = #tpu.dot_dimension_numbers<[1], [0], [0], [1], [0, 0, 1, 1], [], []>} : vector<256x8xf32>, vector<8x8xf32>, vector<256x8xf32> -> vector<256x8xf32>
    %264 = arith.addf %258, %263 : vector<256x8xf32>
    %c0_340 = arith.constant 0 : index
    %c2_341 = arith.constant 2 : index
    %c1_342 = arith.constant 1 : index
    %c0_343 = arith.constant 0 : index
    %265 = vector.load %arg19[%c0_340, %c2_341, %c1_342, %c0_343] : memref<1x18x24x16xf32, #tpu.memory_space<vmem>>, vector<1x16x16x8xf32>
    %266 = vector.shape_cast %265 : vector<1x16x16x8xf32> to vector<256x8xf32>
    %c7_344 = arith.constant 7 : index
    %c0_345 = arith.constant 0 : index
    %c0_346 = arith.constant 0 : index
    %267 = vector.load %arg10[%c7_344, %c0_345, %c0_346] : memref<9x8x8xf32, #tpu.memory_space<vmem>>, vector<1x8x8xf32>
    %268 = vector.shape_cast %267 : vector<1x8x8xf32> to vector<8x8xf32>
    %cst_347 = arith.constant dense<0.000000e+00> : vector<256x8xf32>
    %269 = tpu.matmul %266, %268, %cst_347 {dimension_numbers = #tpu.dot_dimension_numbers<[1], [0], [0], [1], [0, 0, 1, 1], [], []>} : vector<256x8xf32>, vector<8x8xf32>, vector<256x8xf32> -> vector<256x8xf32>
    %270 = arith.addf %264, %269 : vector<256x8xf32>
    %c0_348 = arith.constant 0 : index
    %c2_349 = arith.constant 2 : index
    %c2_350 = arith.constant 2 : index
    %c0_351 = arith.constant 0 : index
    %271 = vector.load %arg19[%c0_348, %c2_349, %c2_350, %c0_351] : memref<1x18x24x16xf32, #tpu.memory_space<vmem>>, vector<1x16x16x8xf32>
    %272 = vector.shape_cast %271 : vector<1x16x16x8xf32> to vector<256x8xf32>
    %c8_352 = arith.constant 8 : index
    %c0_353 = arith.constant 0 : index
    %c0_354 = arith.constant 0 : index
    %273 = vector.load %arg10[%c8_352, %c0_353, %c0_354] : memref<9x8x8xf32, #tpu.memory_space<vmem>>, vector<1x8x8xf32>
    %274 = vector.shape_cast %273 : vector<1x8x8xf32> to vector<8x8xf32>
    %cst_355 = arith.constant dense<0.000000e+00> : vector<256x8xf32>
    %275 = tpu.matmul %272, %274, %cst_355 {dimension_numbers = #tpu.dot_dimension_numbers<[1], [0], [0], [1], [0, 0, 1, 1], [], []>} : vector<256x8xf32>, vector<8x8xf32>, vector<256x8xf32> -> vector<256x8xf32>
    %276 = arith.addf %270, %275 : vector<256x8xf32>
    %c0_356 = arith.constant 0 : index
    %c0_357 = arith.constant 0 : index
    %277 = vector.load %arg11[%c0_356, %c0_357] : memref<1x8xf32, #tpu.memory_space<vmem>>, vector<1x8xf32>
    %278 = vector.broadcast %277 : vector<1x8xf32> to vector<256x8xf32>
    %279 = arith.addf %276, %278 : vector<256x8xf32>
    %cst_358 = arith.constant 0.000000e+00 : f32
    %280 = vector.broadcast %cst_358 : f32 to vector<256x8xf32>
    %281 = arith.maximumf %279, %280 : vector<256x8xf32>
    %282 = vector.extract_strided_slice %281 {offsets = [0, 0], sizes = [256, 4], strides = [1, 1]} : vector<256x8xf32> to vector<256x4xf32>
    %c0_359 = arith.constant 0 : index
    %c12 = arith.constant 12 : index
    %283 = vector.load %arg20[%c0_359, %c12] : memref<256x16xf32, #tpu.memory_space<vmem>>, vector<256x4xf32>
    tpu.vector_store %arg20[%c0_359, %c12], %282 {strides = array<i32>} : memref<256x16xf32, #tpu.memory_space<vmem>>, vector<256x4xf32>,
    %284 = vector.extract_strided_slice %281 {offsets = [0, 4], sizes = [256, 4], strides = [1, 1]} : vector<256x8xf32> to vector<256x4xf32>
    %c0_360 = arith.constant 0 : index
    %c12_361 = arith.constant 12 : index
    %285 = vector.load %arg21[%c0_360, %c12_361] : memref<256x16xf32, #tpu.memory_space<vmem>>, vector<256x4xf32>
    tpu.vector_store %arg21[%c0_360, %c12_361], %284 {strides = array<i32>} : memref<256x16xf32, #tpu.memory_space<vmem>>, vector<256x4xf32>,
    %c0_362 = arith.constant 0 : index
    %c0_363 = arith.constant 0 : index
    %286 = vector.load %arg21[%c0_362, %c0_363] : memref<256x16xf32, #tpu.memory_space<vmem>>, vector<256x16xf32>
    %287 = vector.shape_cast %286 : vector<256x16xf32> to vector<1x256x16xf32>
    %cst_364 = arith.constant dense<0.000000e+00> : vector<1x16xf32>
    %288 = vector.multi_reduction <add>, %287, %cst_364 [1] : vector<1x256x16xf32> to vector<1x16xf32>
    %cst_365 = arith.constant 2.560000e+02 : f32
    %289 = vector.broadcast %cst_365 : f32 to vector<1x16xf32>
    %290 = arith.divf %288, %289 : vector<1x16xf32>
    %c0_366 = arith.constant 0 : index
    %c0_367 = arith.constant 0 : index
    %291 = vector.load %arg12[%c0_366, %c0_367] : memref<16x4xf32, #tpu.memory_space<vmem>>, vector<16x4xf32>
    %cst_368 = arith.constant dense<0.000000e+00> : vector<1x4xf32>
    %292 = tpu.matmul %290, %291, %cst_368 {dimension_numbers = #tpu.dot_dimension_numbers<[1], [0], [0], [1], [0, 0, 1, 1], [], []>} : vector<1x16xf32>, vector<16x4xf32>, vector<1x4xf32> -> vector<1x4xf32>
    %c0_369 = arith.constant 0 : index
    %c0_370 = arith.constant 0 : index
    %293 = vector.load %arg13[%c0_369, %c0_370] : memref<1x4xf32, #tpu.memory_space<vmem>>, vector<1x4xf32>
    %294 = arith.addf %292, %293 : vector<1x4xf32>
    %cst_371 = arith.constant 0.000000e+00 : f32
    %295 = vector.broadcast %cst_371 : f32 to vector<1x4xf32>
    %296 = arith.maximumf %294, %295 : vector<1x4xf32>
    %c0_372 = arith.constant 0 : index
    %c0_373 = arith.constant 0 : index
    %297 = vector.load %arg14[%c0_372, %c0_373] : memref<4x16xf32, #tpu.memory_space<vmem>>, vector<4x16xf32>
    %cst_374 = arith.constant dense<0.000000e+00> : vector<1x16xf32>
    %298 = tpu.matmul %296, %297, %cst_374 {dimension_numbers = #tpu.dot_dimension_numbers<[1], [0], [0], [1], [0, 0, 1, 1], [], []>} : vector<1x4xf32>, vector<4x16xf32>, vector<1x16xf32> -> vector<1x16xf32>
    %c0_375 = arith.constant 0 : index
    %c0_376 = arith.constant 0 : index
    %299 = vector.load %arg15[%c0_375, %c0_376] : memref<1x16xf32, #tpu.memory_space<vmem>>, vector<1x16xf32>
    %300 = arith.addf %298, %299 : vector<1x16xf32>
    %cst_377 = arith.constant dense<0xFF800000> : vector<1xf32>
    %301 = vector.multi_reduction <maximumf>, %300, %cst_377 [1] : vector<1x16xf32> to vector<1xf32>
    %302 = vector.shape_cast %301 : vector<1xf32> to vector<1x1xf32>
    %303 = vector.broadcast %302 : vector<1x1xf32> to vector<1x16xf32>
    %304 = arith.subf %300, %303 : vector<1x16xf32>
    %305 = math.exp %304 : vector<1x16xf32>
    %cst_378 = arith.constant dense<0.000000e+00> : vector<1xf32>
    %306 = vector.multi_reduction <add>, %305, %cst_378 [1] : vector<1x16xf32> to vector<1xf32>
    %307 = vector.shape_cast %306 : vector<1xf32> to vector<1x1xf32>
    %308 = tpu.reciprocal %307 {approx = true} : vector<1x1xf32> -> vector<1x1xf32>
    %309 = vector.broadcast %308 : vector<1x1xf32> to vector<1x16xf32>
    %310 = arith.mulf %305, %309 : vector<1x16xf32>
    %c0_379 = arith.constant 0 : index
    %c0_380 = arith.constant 0 : index
    %311 = vector.load %arg20[%c0_379, %c0_380] : memref<256x16xf32, #tpu.memory_space<vmem>>, vector<256x16xf32>
    %312 = vector.shape_cast %311 : vector<256x16xf32> to vector<1x256x16xf32>
    %313 = vector.shape_cast %310 : vector<1x16xf32> to vector<1x1x16xf32>
    %314 = vector.broadcast %313 : vector<1x1x16xf32> to vector<1x256x16xf32>
    %315 = arith.mulf %312, %314 : vector<1x256x16xf32>
    %316 = vector.shape_cast %315 : vector<1x256x16xf32> to vector<256x16xf32>
    %317 = vector.shape_cast %316 : vector<256x16xf32> to vector<1x16x16x16xf32>
    %c0_381 = arith.constant 0 : index
    %c1_382 = arith.constant 1 : index
    %c1_383 = arith.constant 1 : index
    %c0_384 = arith.constant 0 : index
    %318 = vector.load %arg19[%c0_381, %c1_382, %c1_383, %c0_384] : memref<1x18x24x16xf32, #tpu.memory_space<vmem>>, vector<1x16x16x16xf32>
    tpu.vector_store %arg19[%c0_381, %c1_382, %c1_383, %c0_384], %317 {strides = array<i32>} : memref<1x18x24x16xf32, #tpu.memory_space<vmem>>, vector<1x16x16x16xf32>,
    %c0_385 = arith.constant 0 : index
    %c0_386 = arith.constant 0 : index
    %c0_387 = arith.constant 0 : index
    %c0_388 = arith.constant 0 : index
    %319 = vector.load %arg19[%c0_385, %c0_386, %c0_387, %c0_388] : memref<1x18x24x16xf32, #tpu.memory_space<vmem>>, vector<1x16x16x16xf32>
    %320 = vector.shape_cast %319 : vector<1x16x16x16xf32> to vector<256x16xf32>
    %c0_389 = arith.constant 0 : index
    %c0_390 = arith.constant 0 : index
    %c0_391 = arith.constant 0 : index
    %321 = vector.load %arg16[%c0_389, %c0_390, %c0_391] : memref<9x16x8xf32, #tpu.memory_space<vmem>>, vector<1x16x8xf32>
    %322 = vector.shape_cast %321 : vector<1x16x8xf32> to vector<16x8xf32>
    %cst_392 = arith.constant dense<0.000000e+00> : vector<256x8xf32>
    %323 = tpu.matmul %320, %322, %cst_392 {dimension_numbers = #tpu.dot_dimension_numbers<[1], [0], [0], [1], [0, 0, 1, 1], [], []>} : vector<256x16xf32>, vector<16x8xf32>, vector<256x8xf32> -> vector<256x8xf32>
    %c0_393 = arith.constant 0 : index
    %c0_394 = arith.constant 0 : index
    %c1_395 = arith.constant 1 : index
    %c0_396 = arith.constant 0 : index
    %324 = vector.load %arg19[%c0_393, %c0_394, %c1_395, %c0_396] : memref<1x18x24x16xf32, #tpu.memory_space<vmem>>, vector<1x16x16x16xf32>
    %325 = vector.shape_cast %324 : vector<1x16x16x16xf32> to vector<256x16xf32>
    %c1_397 = arith.constant 1 : index
    %c0_398 = arith.constant 0 : index
    %c0_399 = arith.constant 0 : index
    %326 = vector.load %arg16[%c1_397, %c0_398, %c0_399] : memref<9x16x8xf32, #tpu.memory_space<vmem>>, vector<1x16x8xf32>
    %327 = vector.shape_cast %326 : vector<1x16x8xf32> to vector<16x8xf32>
    %cst_400 = arith.constant dense<0.000000e+00> : vector<256x8xf32>
    %328 = tpu.matmul %325, %327, %cst_400 {dimension_numbers = #tpu.dot_dimension_numbers<[1], [0], [0], [1], [0, 0, 1, 1], [], []>} : vector<256x16xf32>, vector<16x8xf32>, vector<256x8xf32> -> vector<256x8xf32>
    %329 = arith.addf %323, %328 : vector<256x8xf32>
    %c0_401 = arith.constant 0 : index
    %c0_402 = arith.constant 0 : index
    %c2_403 = arith.constant 2 : index
    %c0_404 = arith.constant 0 : index
    %330 = vector.load %arg19[%c0_401, %c0_402, %c2_403, %c0_404] : memref<1x18x24x16xf32, #tpu.memory_space<vmem>>, vector<1x16x16x16xf32>
    %331 = vector.shape_cast %330 : vector<1x16x16x16xf32> to vector<256x16xf32>
    %c2_405 = arith.constant 2 : index
    %c0_406 = arith.constant 0 : index
    %c0_407 = arith.constant 0 : index
    %332 = vector.load %arg16[%c2_405, %c0_406, %c0_407] : memref<9x16x8xf32, #tpu.memory_space<vmem>>, vector<1x16x8xf32>
    %333 = vector.shape_cast %332 : vector<1x16x8xf32> to vector<16x8xf32>
    %cst_408 = arith.constant dense<0.000000e+00> : vector<256x8xf32>
    %334 = tpu.matmul %331, %333, %cst_408 {dimension_numbers = #tpu.dot_dimension_numbers<[1], [0], [0], [1], [0, 0, 1, 1], [], []>} : vector<256x16xf32>, vector<16x8xf32>, vector<256x8xf32> -> vector<256x8xf32>
    %335 = arith.addf %329, %334 : vector<256x8xf32>
    %c0_409 = arith.constant 0 : index
    %c1_410 = arith.constant 1 : index
    %c0_411 = arith.constant 0 : index
    %c0_412 = arith.constant 0 : index
    %336 = vector.load %arg19[%c0_409, %c1_410, %c0_411, %c0_412] : memref<1x18x24x16xf32, #tpu.memory_space<vmem>>, vector<1x16x16x16xf32>
    %337 = vector.shape_cast %336 : vector<1x16x16x16xf32> to vector<256x16xf32>
    %c3_413 = arith.constant 3 : index
    %c0_414 = arith.constant 0 : index
    %c0_415 = arith.constant 0 : index
    %338 = vector.load %arg16[%c3_413, %c0_414, %c0_415] : memref<9x16x8xf32, #tpu.memory_space<vmem>>, vector<1x16x8xf32>
    %339 = vector.shape_cast %338 : vector<1x16x8xf32> to vector<16x8xf32>
    %cst_416 = arith.constant dense<0.000000e+00> : vector<256x8xf32>
    %340 = tpu.matmul %337, %339, %cst_416 {dimension_numbers = #tpu.dot_dimension_numbers<[1], [0], [0], [1], [0, 0, 1, 1], [], []>} : vector<256x16xf32>, vector<16x8xf32>, vector<256x8xf32> -> vector<256x8xf32>
    %341 = arith.addf %335, %340 : vector<256x8xf32>
    %c0_417 = arith.constant 0 : index
    %c1_418 = arith.constant 1 : index
    %c1_419 = arith.constant 1 : index
    %c0_420 = arith.constant 0 : index
    %342 = vector.load %arg19[%c0_417, %c1_418, %c1_419, %c0_420] : memref<1x18x24x16xf32, #tpu.memory_space<vmem>>, vector<1x16x16x16xf32>
    %343 = vector.shape_cast %342 : vector<1x16x16x16xf32> to vector<256x16xf32>
    %c4_421 = arith.constant 4 : index
    %c0_422 = arith.constant 0 : index
    %c0_423 = arith.constant 0 : index
    %344 = vector.load %arg16[%c4_421, %c0_422, %c0_423] : memref<9x16x8xf32, #tpu.memory_space<vmem>>, vector<1x16x8xf32>
    %345 = vector.shape_cast %344 : vector<1x16x8xf32> to vector<16x8xf32>
    %cst_424 = arith.constant dense<0.000000e+00> : vector<256x8xf32>
    %346 = tpu.matmul %343, %345, %cst_424 {dimension_numbers = #tpu.dot_dimension_numbers<[1], [0], [0], [1], [0, 0, 1, 1], [], []>} : vector<256x16xf32>, vector<16x8xf32>, vector<256x8xf32> -> vector<256x8xf32>
    %347 = arith.addf %341, %346 : vector<256x8xf32>
    %c0_425 = arith.constant 0 : index
    %c1_426 = arith.constant 1 : index
    %c2_427 = arith.constant 2 : index
    %c0_428 = arith.constant 0 : index
    %348 = vector.load %arg19[%c0_425, %c1_426, %c2_427, %c0_428] : memref<1x18x24x16xf32, #tpu.memory_space<vmem>>, vector<1x16x16x16xf32>
    %349 = vector.shape_cast %348 : vector<1x16x16x16xf32> to vector<256x16xf32>
    %c5_429 = arith.constant 5 : index
    %c0_430 = arith.constant 0 : index
    %c0_431 = arith.constant 0 : index
    %350 = vector.load %arg16[%c5_429, %c0_430, %c0_431] : memref<9x16x8xf32, #tpu.memory_space<vmem>>, vector<1x16x8xf32>
    %351 = vector.shape_cast %350 : vector<1x16x8xf32> to vector<16x8xf32>
    %cst_432 = arith.constant dense<0.000000e+00> : vector<256x8xf32>
    %352 = tpu.matmul %349, %351, %cst_432 {dimension_numbers = #tpu.dot_dimension_numbers<[1], [0], [0], [1], [0, 0, 1, 1], [], []>} : vector<256x16xf32>, vector<16x8xf32>, vector<256x8xf32> -> vector<256x8xf32>
    %353 = arith.addf %347, %352 : vector<256x8xf32>
    %c0_433 = arith.constant 0 : index
    %c2_434 = arith.constant 2 : index
    %c0_435 = arith.constant 0 : index
    %c0_436 = arith.constant 0 : index
    %354 = vector.load %arg19[%c0_433, %c2_434, %c0_435, %c0_436] : memref<1x18x24x16xf32, #tpu.memory_space<vmem>>, vector<1x16x16x16xf32>
    %355 = vector.shape_cast %354 : vector<1x16x16x16xf32> to vector<256x16xf32>
    %c6_437 = arith.constant 6 : index
    %c0_438 = arith.constant 0 : index
    %c0_439 = arith.constant 0 : index
    %356 = vector.load %arg16[%c6_437, %c0_438, %c0_439] : memref<9x16x8xf32, #tpu.memory_space<vmem>>, vector<1x16x8xf32>
    %357 = vector.shape_cast %356 : vector<1x16x8xf32> to vector<16x8xf32>
    %cst_440 = arith.constant dense<0.000000e+00> : vector<256x8xf32>
    %358 = tpu.matmul %355, %357, %cst_440 {dimension_numbers = #tpu.dot_dimension_numbers<[1], [0], [0], [1], [0, 0, 1, 1], [], []>} : vector<256x16xf32>, vector<16x8xf32>, vector<256x8xf32> -> vector<256x8xf32>
    %359 = arith.addf %353, %358 : vector<256x8xf32>
    %c0_441 = arith.constant 0 : index
    %c2_442 = arith.constant 2 : index
    %c1_443 = arith.constant 1 : index
    %c0_444 = arith.constant 0 : index
    %360 = vector.load %arg19[%c0_441, %c2_442, %c1_443, %c0_444] : memref<1x18x24x16xf32, #tpu.memory_space<vmem>>, vector<1x16x16x16xf32>
    %361 = vector.shape_cast %360 : vector<1x16x16x16xf32> to vector<256x16xf32>
    %c7_445 = arith.constant 7 : index
    %c0_446 = arith.constant 0 : index
    %c0_447 = arith.constant 0 : index
    %362 = vector.load %arg16[%c7_445, %c0_446, %c0_447] : memref<9x16x8xf32, #tpu.memory_space<vmem>>, vector<1x16x8xf32>
    %363 = vector.shape_cast %362 : vector<1x16x8xf32> to vector<16x8xf32>
    %cst_448 = arith.constant dense<0.000000e+00> : vector<256x8xf32>
    %364 = tpu.matmul %361, %363, %cst_448 {dimension_numbers = #tpu.dot_dimension_numbers<[1], [0], [0], [1], [0, 0, 1, 1], [], []>} : vector<256x16xf32>, vector<16x8xf32>, vector<256x8xf32> -> vector<256x8xf32>
    %365 = arith.addf %359, %364 : vector<256x8xf32>
    %c0_449 = arith.constant 0 : index
    %c2_450 = arith.constant 2 : index
    %c2_451 = arith.constant 2 : index
    %c0_452 = arith.constant 0 : index
    %366 = vector.load %arg19[%c0_449, %c2_450, %c2_451, %c0_452] : memref<1x18x24x16xf32, #tpu.memory_space<vmem>>, vector<1x16x16x16xf32>
    %367 = vector.shape_cast %366 : vector<1x16x16x16xf32> to vector<256x16xf32>
    %c8_453 = arith.constant 8 : index
    %c0_454 = arith.constant 0 : index
    %c0_455 = arith.constant 0 : index
    %368 = vector.load %arg16[%c8_453, %c0_454, %c0_455] : memref<9x16x8xf32, #tpu.memory_space<vmem>>, vector<1x16x8xf32>
    %369 = vector.shape_cast %368 : vector<1x16x8xf32> to vector<16x8xf32>
    %cst_456 = arith.constant dense<0.000000e+00> : vector<256x8xf32>
    %370 = tpu.matmul %367, %369, %cst_456 {dimension_numbers = #tpu.dot_dimension_numbers<[1], [0], [0], [1], [0, 0, 1, 1], [], []>} : vector<256x16xf32>, vector<16x8xf32>, vector<256x8xf32> -> vector<256x8xf32>
    %371 = arith.addf %365, %370 : vector<256x8xf32>
    %c0_457 = arith.constant 0 : index
    %c0_458 = arith.constant 0 : index
    %372 = vector.load %arg17[%c0_457, %c0_458] : memref<1x8xf32, #tpu.memory_space<vmem>>, vector<1x8xf32>
    %373 = vector.broadcast %372 : vector<1x8xf32> to vector<256x8xf32>
    %374 = arith.addf %371, %373 : vector<256x8xf32>
    %375 = arith.addf %374, %9 : vector<256x8xf32>
    %cst_459 = arith.constant 0.000000e+00 : f32
    %376 = vector.broadcast %cst_459 : f32 to vector<256x8xf32>
    %377 = arith.maximumf %375, %376 : vector<256x8xf32>
    %378 = vector.shape_cast %377 : vector<256x8xf32> to vector<1x16x16x8xf32>
    %c0_460 = arith.constant 0 : index
    %c0_461 = arith.constant 0 : index
    %c0_462 = arith.constant 0 : index
    %c0_463 = arith.constant 0 : index
    %379 = vector.load %arg18[%c0_460, %c0_461, %c0_462, %c0_463] : memref<1x16x16x8xf32, #tpu.memory_space<vmem>>, vector<1x16x16x8xf32>
    tpu.vector_store %arg18[%c0_460, %c0_461, %c0_462, %c0_463], %378 {strides = array<i32>} : memref<1x16x16x8xf32, #tpu.memory_space<vmem>>, vector<1x16x16x8xf32>,
    return
  }
  func.func @transform_0(%arg0: i32) -> (i32, i32, i32, i32) {
    %c0_i32 = arith.constant 0 : i32
    %c0_i32_0 = arith.constant 0 : i32
    %c0_i32_1 = arith.constant 0 : i32
    %c0_i32_2 = arith.constant 0 : i32
    return %arg0, %c0_i32, %c0_i32_0, %c0_i32_1 : i32, i32, i32, i32
  }
  func.func @transform_1(%arg0: i32) -> (i32, i32) {
    %c0_i32 = arith.constant 0 : i32
    %c0_i32_0 = arith.constant 0 : i32
    %c0_i32_1 = arith.constant 0 : i32
    return %c0_i32, %c0_i32_0 : i32, i32
  }
  func.func @transform_2(%arg0: i32) -> (i32, i32) {
    %c0_i32 = arith.constant 0 : i32
    %c0_i32_0 = arith.constant 0 : i32
    %c0_i32_1 = arith.constant 0 : i32
    return %c0_i32, %c0_i32_0 : i32, i32
  }
  func.func @transform_3(%arg0: i32) -> (i32, i32, i32) {
    %c0_i32 = arith.constant 0 : i32
    %c0_i32_0 = arith.constant 0 : i32
    %c0_i32_1 = arith.constant 0 : i32
    %c0_i32_2 = arith.constant 0 : i32
    return %c0_i32, %c0_i32_0, %c0_i32_1 : i32, i32, i32
  }
  func.func @transform_4(%arg0: i32) -> (i32, i32) {
    %c0_i32 = arith.constant 0 : i32
    %c0_i32_0 = arith.constant 0 : i32
    %c0_i32_1 = arith.constant 0 : i32
    return %c0_i32, %c0_i32_0 : i32, i32
  }
  func.func @transform_5(%arg0: i32) -> (i32, i32, i32) {
    %c0_i32 = arith.constant 0 : i32
    %c0_i32_0 = arith.constant 0 : i32
    %c0_i32_1 = arith.constant 0 : i32
    %c0_i32_2 = arith.constant 0 : i32
    return %c0_i32, %c0_i32_0, %c0_i32_1 : i32, i32, i32
  }
  func.func @transform_6(%arg0: i32) -> (i32, i32) {
    %c0_i32 = arith.constant 0 : i32
    %c0_i32_0 = arith.constant 0 : i32
    %c0_i32_1 = arith.constant 0 : i32
    return %c0_i32, %c0_i32_0 : i32, i32
  }
  func.func @transform_7(%arg0: i32) -> (i32, i32, i32) {
    %c0_i32 = arith.constant 0 : i32
    %c0_i32_0 = arith.constant 0 : i32
    %c0_i32_1 = arith.constant 0 : i32
    %c0_i32_2 = arith.constant 0 : i32
    return %c0_i32, %c0_i32_0, %c0_i32_1 : i32, i32, i32
  }
  func.func @transform_8(%arg0: i32) -> (i32, i32) {
    %c0_i32 = arith.constant 0 : i32
    %c0_i32_0 = arith.constant 0 : i32
    %c0_i32_1 = arith.constant 0 : i32
    return %c0_i32, %c0_i32_0 : i32, i32
  }
  func.func @transform_9(%arg0: i32) -> (i32, i32, i32) {
    %c0_i32 = arith.constant 0 : i32
    %c0_i32_0 = arith.constant 0 : i32
    %c0_i32_1 = arith.constant 0 : i32
    %c0_i32_2 = arith.constant 0 : i32
    return %c0_i32, %c0_i32_0, %c0_i32_1 : i32, i32, i32
  }
  func.func @transform_10(%arg0: i32) -> (i32, i32) {
    %c0_i32 = arith.constant 0 : i32
    %c0_i32_0 = arith.constant 0 : i32
    %c0_i32_1 = arith.constant 0 : i32
    return %c0_i32, %c0_i32_0 : i32, i32
  }
  func.func @transform_11(%arg0: i32) -> (i32, i32) {
    %c0_i32 = arith.constant 0 : i32
    %c0_i32_0 = arith.constant 0 : i32
    %c0_i32_1 = arith.constant 0 : i32
    return %c0_i32, %c0_i32_0 : i32, i32
  }
  func.func @transform_12(%arg0: i32) -> (i32, i32) {
    %c0_i32 = arith.constant 0 : i32
    %c0_i32_0 = arith.constant 0 : i32
    %c0_i32_1 = arith.constant 0 : i32
    return %c0_i32, %c0_i32_0 : i32, i32
  }
  func.func @transform_13(%arg0: i32) -> (i32, i32) {
    %c0_i32 = arith.constant 0 : i32
    %c0_i32_0 = arith.constant 0 : i32
    %c0_i32_1 = arith.constant 0 : i32
    return %c0_i32, %c0_i32_0 : i32, i32
  }
  func.func @transform_14(%arg0: i32) -> (i32, i32) {
    %c0_i32 = arith.constant 0 : i32
    %c0_i32_0 = arith.constant 0 : i32
    %c0_i32_1 = arith.constant 0 : i32
    return %c0_i32, %c0_i32_0 : i32, i32
  }
  func.func @transform_15(%arg0: i32) -> (i32, i32, i32) {
    %c0_i32 = arith.constant 0 : i32
    %c0_i32_0 = arith.constant 0 : i32
    %c0_i32_1 = arith.constant 0 : i32
    %c0_i32_2 = arith.constant 0 : i32
    return %c0_i32, %c0_i32_0, %c0_i32_1 : i32, i32, i32
  }
  func.func @transform_16(%arg0: i32) -> (i32, i32) {
    %c0_i32 = arith.constant 0 : i32
    %c0_i32_0 = arith.constant 0 : i32
    %c0_i32_1 = arith.constant 0 : i32
    return %c0_i32, %c0_i32_0 : i32, i32
  }
  func.func @transform_17(%arg0: i32) -> (i32, i32, i32, i32) {
    %c0_i32 = arith.constant 0 : i32
    %c0_i32_0 = arith.constant 0 : i32
    %c0_i32_1 = arith.constant 0 : i32
    %c0_i32_2 = arith.constant 0 : i32
    return %arg0, %c0_i32, %c0_i32_0, %c0_i32_1 : i32, i32, i32, i32
  }
}

</mosaic_0001>

<bundles_post_ra>
// kernel: tpu_custom_call.1
= control target key start
LH: loop header
LB: loop body
LE: loop exit
PB: predicated region body
PF: predicated region fallthrough
CT: control target
= control target key end

     0   :  { %s27363_s24 = smov 0   ;;  %s33867_s0 = inlined_call_operand.vmem [shape: f32[2,16,16,8], index: 0, kind: input, shape index: {}]   ;;  %s33868_s1 = inlined_call_operand.vmem [shape: f32[8,16], index: 1, kind: input, shape index: {}]   ;;  %s33869_s2 = inlined_call_operand.vmem [shape: f32[1,16], index: 2, kind: input, shape index: {}]   ;;  %s33870_s3 = inlined_call_operand.vmem [shape: f32[9,4,12], index: 3, kind: input, shape index: {}]   ;;  %s33871_s4 = inlined_call_operand.vmem [shape: f32[1,12], index: 4, kind: input, shape index: {}]   ;;  %s33872_s5 = inlined_call_operand.vmem [shape: f32[9,8,12], index: 5, kind: input, shape index: {}]   ;;  %s33873_s6 = inlined_call_operand.vmem [shape: f32[1,12], index: 6, kind: input, shape index: {}]   ;;  %s33874_s7 = inlined_call_operand.vmem [shape: f32[9,8,12], index: 7, kind: input, shape index: {}]   ;;  %s33875_s8 = inlined_call_operand.vmem [shape: f32[1,12], index: 8, kind: input, shape index: {}]   ;;  %s33876_s9 = inlined_call_operand.vmem [shape: f32[9,8,8], index: 9, kind: input, shape index: {}]   ;;  %s33877_s10 = inlined_call_operand.vmem [shape: f32[1,8], index: 10, kind: input, shape index: {}]   ;;  %s33878_s11 = inlined_call_operand.vmem [shape: f32[16,4], index: 11, kind: input, shape index: {}]   ;;  %s33879_s12 = inlined_call_operand.vmem [shape: f32[1,4], index: 12, kind: input, shape index: {}]   ;;  %s33880_s13 = inlined_call_operand.vmem [shape: f32[4,16], index: 13, kind: input, shape index: {}]   ;;  %s33881_s14 = inlined_call_operand.vmem [shape: f32[1,16], index: 14, kind: input, shape index: {}]   ;;  %s33882_s15 = inlined_call_operand.vmem [shape: f32[9,16,8], index: 15, kind: input, shape index: {}]   ;;  %s33883_s16 = inlined_call_operand.vmem [shape: f32[1,8], index: 16, kind: input, shape index: {}]   ;;  %s33884_s17 = inlined_call_operand.vmem [shape: f32[2,16,16,8], index: 17, kind: output, shape index: {}]  }
   0x1   :  { %34244 = sst [smem:[#allocation113_spill]] %s33867_s0 }
   0x2   :  { %34245 = sst [smem:[#allocation114_spill]] %s33868_s1 }
   0x3 LB: > { %s20468_s25 = sadd.s32 4294967295, %s27262_s24   ;;  %p20472_p0 = scmp.ge.s32.totalorder %s27262_s24, 1  ;;  %s27262_s24 = sphi %s27363_s24, %s27_s24  }
   0x4   : > { %p487_p1 = scmp.lt.s32.totalorder %s27262_s24, 3 }
   0x6   : > { %p488_p2 = pnand %p20472_p0, %p487_p1 }
   0x8   : > { %491 = sbr.rel (%p488_p2) target bundleno = 4720 (0x1270), region = 88 }
   0xf   : > { %s34246_s28 = sld [smem:[#allocation114_spill]]  ;;  %p539_p3 = scmp.lt.s32.totalorder %s20468_s25, 1  ;;  %v20510_v1 = vld [vmem:[%s33870_s3 + $0x4] sm:$0xf]  ;;  %vm1185_vm0 = vcmask 1043456   ;;  %vm634_vm1 = vcmask 64512  }
  0x10   : > { %s34247_s1 = sld [smem:[#allocation113_spill]]  ;;  %vm549_vm2 = vcmask 130048   ;;  %v33885_v34 = vmov 0.0   ;;  %vm557_vm3 = vcmask 122880   ;;  %vm989_vm4 = vcmask 31744   ;;  %s27266_s23 = smov 120  }
  0x11   : > { %s35064_s25 = smov (!%p539_p3, %s20468_s25), 1  ;;  %550 = vst.msk [vmem:[#allocation2] sm:$0xff] %vm549_vm2, %v33885_v34  ;;  %551 = vst.msk [vmem:[#allocation2 + $0x8] sm:$0xff] %vm549_vm2, %v33885_v34  ;;  %v27542_v37 = vld [vmem:[%s33870_s3 + $0x10] sm:$0xf]  ;;  %s27267_s0 = smov 116  }
  0x12   : > { %s22017_s30 = sshll.u32 %s35064_s25, 8  ;;  %552 = vst.msk [vmem:[#allocation2 + $0x10] sm:$0xff] %vm549_vm2, %v33885_v34  ;;  %554 = vst.msk [vmem:[#allocation2 + $0x198] sm:$0xff] %vm549_vm2, %v33885_v34  ;;  %25920 = vmatprep.subr.msk.mxu1 %vm1185_vm0, %v27542_v37  ;;  %v1054_v38 = vld [vmem:[%s33870_s3] sm:$0xf]  ;;  %vm4892_vm5 = vcmask 64544  }
  0x13   : > { %555 = vst.msk [vmem:[#allocation2 + $0x1a0] sm:$0xff] %vm549_vm2, %v33885_v34  ;;  %556 = vst.msk [vmem:[#allocation2 + $0x1a8] sm:$0xff] %vm549_vm2, %v33885_v34  ;;  %25921 = vmatpush3.msk.msra.mxu1 %vm1185_vm0, %v27542_v37  ;;  %v27556_v39 = vld [vmem:[%s33870_s3 + $0x14] sm:$0xf]  ;;  %v27563_v40 = vld [vmem:[%s33870_s3 + $0x8] sm:$0xf]  ;;  %s33737_s26 = scalar_lea.vmem %s33884_s17, %s22017_s30 }
  0x14   : > { %558 = vst.msk [vmem:[#allocation2] sm:$0x1] %vm557_vm3, %v33885_v34  ;;  %559 = vst.msk [vmem:[#allocation2 + $0x18] sm:$0x1] %vm557_vm3, %v33885_v34  ;;  %23851 = vmatprep.subr.msk.mxu1 %vm1185_vm0, %v27556_v39  ;;  %v27570_v41 = vld [vmem:[%s33869_s2] ss:$0 sm:$0xff] }
  0x15   : > { %v626_v0 = vld [vmem:[%s34246_s28] sm:$0xff]  ;;  %560 = vst.msk [vmem:[#allocation2 + $0x30] sm:$0x1] %vm557_vm3, %v33885_v34  ;;  %561 = vst.msk [vmem:[#allocation2 + $0x48] sm:$0x1] %vm557_vm3, %v33885_v34  ;;  %vm12479_vm6 = vcmask 97344  }
  0x16   : > { %23551 = vmatprep.subr.mxu0 %v626_v0  ;;  %s27386_s20 = scalar_lea.vmem %s34247_s1, %s22017_s30  ;;  %562 = vst.msk [vmem:[#allocation2 + $0x60] sm:$0x1] %vm557_vm3, %v33885_v34  ;;  %563 = vst.msk [vmem:[#allocation2 + $0x78] sm:$0x1] %vm557_vm3, %v33885_v34  ;;  %s27265_s1 = smov 124   ;;  %vm27272_vm7 = vmmov 0  }
  0x17   : > { %23552 = vmatpush3.msra.mxu0 %v626_v0  ;;  %v594_v2 = vld [vmem:[%s27386_s20] sm:$0xff]  ;;  %v595_v3 = vld [vmem:[%s27386_s20 + $0x8] sm:$0xff]  ;;  %v596_v4 = vld [vmem:[%s27386_s20 + $0x10] sm:$0xff]  ;;  %564 = vst.msk [vmem:[#allocation2 + $0x90] sm:$0x1] %vm557_vm3, %v33885_v34  ;;  %s27270_s29 = smov 4  }
  0x18   : > { %23601 = vmatprep.subr.msk.mxu0 %vm1185_vm0, %v20510_v1  ;;  %23553 = vmatprep.mubr.msk.f32.mxu0 %vm634_vm1, %v594_v2  ;;  %v597_v5 = vld [vmem:[%s27386_s20 + $0x18] sm:$0xff]  ;;  %v598_v6 = vld [vmem:[%s27386_s20 + $0x20] sm:$0xff]  ;;  %v599_v7 = vld [vmem:[%s27386_s20 + $0x28] sm:$0xff]  ;;  %565 = vst.msk [vmem:[#allocation2 + $0xa8] sm:$0x1] %vm557_vm3, %v33885_v34  ;;  %vm16321_vm8 = vcmask 130144  }
  0x19   : > { %23554 = vmatmul.mubr.msk.f32.vlgmr.msra.gmra.mrb[0].mxu0 %vm634_vm1, %v595_v3  ;;  %v600_v8 = vld [vmem:[%s27386_s20 + $0x30] sm:$0xff]  ;;  %v601_v9 = vld [vmem:[%s27386_s20 + $0x38] sm:$0xff]  ;;  %v602_v10 = vld [vmem:[%s27386_s20 + $0x40] sm:$0xff]  ;;  %566 = vst.msk [vmem:[#allocation2 + $0xc0] sm:$0x1] %vm557_vm3, %v33885_v34 }
  0x1a   : > { %23556 = vmatprep.mubr.msk.f32.mxu0 %vm634_vm1, %v596_v4  ;;  %23602 = vmatpush3.msk.msra.mxu0 %vm1185_vm0, %v20510_v1  ;;  %v603_v11 = vld [vmem:[%s27386_s20 + $0x48] sm:$0xff]  ;;  %v604_v12 = vld [vmem:[%s27386_s20 + $0x50] sm:$0xff]  ;;  %v605_v13 = vld [vmem:[%s27386_s20 + $0x58] sm:$0xff]  ;;  %567 = vst.msk [vmem:[#allocation2 + $0xd8] sm:$0x1] %vm557_vm3, %v33885_v34 }
  0x1b   : > { %v606_v14 = vld [vmem:[%s27386_s20 + $0x60] sm:$0xff]  ;;  %v607_v15 = vld [vmem:[%s27386_s20 + $0x68] sm:$0xff]  ;;  %v608_v16 = vld [vmem:[%s27386_s20 + $0x70] sm:$0xff]  ;;  %568 = vst.msk [vmem:[#allocation2 + $0xf0] sm:$0x1] %vm557_vm3, %v33885_v34  ;;  %23651 = vmatprep.subr.msk.mxu0 %vm1185_vm0, %v1054_v38 }
  0x1c   : > { %v609_v17 = vld [vmem:[%s27386_s20 + $0x78] sm:$0xff]  ;;  %v610_v18 = vld [vmem:[%s27386_s20 + $0x80] sm:$0xff]  ;;  %v611_v19 = vld [vmem:[%s27386_s20 + $0x88] sm:$0xff]  ;;  %569 = vst.msk [vmem:[#allocation2 + $0x108] sm:$0x1] %vm557_vm3, %v33885_v34 }
  0x1d   : > { %23557 = vmatmul.mubr.msk.f32.gmra.mrb[2].mxu0 %vm634_vm1, %v597_v5  ;;  %v612_v20 = vld [vmem:[%s27386_s20 + $0x90] sm:$0xff]  ;;  %v613_v21 = vld [vmem:[%s27386_s20 + $0x98] sm:$0xff]  ;;  %v614_v22 = vld [vmem:[%s27386_s20 + $0xa0] sm:$0xff]  ;;  %570 = vst.msk [vmem:[#allocation2 + $0x120] sm:$0x1] %vm557_vm3, %v33885_v34 }
  0x1e   : > { %23559 = vmatprep.mubr.msk.f32.mxu0 %vm634_vm1, %v598_v6  ;;  %v615_v23 = vld [vmem:[%s27386_s20 + $0xa8] sm:$0xff]  ;;  %v616_v24 = vld [vmem:[%s27386_s20 + $0xb0] sm:$0xff]  ;;  %v617_v25 = vld [vmem:[%s27386_s20 + $0xb8] sm:$0xff]  ;;  %571 = vst.msk [vmem:[#allocation2 + $0x138] sm:$0x1] %vm557_vm3, %v33885_v34 }
  0x1f   : > { %v618_v26 = vld [vmem:[%s27386_s20 + $0xc0] sm:$0xff]  ;;  %v619_v27 = vld [vmem:[%s27386_s20 + $0xc8] sm:$0xff]  ;;  %v620_v28 = vld [vmem:[%s27386_s20 + $0xd0] sm:$0xff]  ;;  %572 = vst.msk [vmem:[#allocation2 + $0x150] sm:$0x1] %vm557_vm3, %v33885_v34 }
  0x20   : > { %v621_v29 = vld [vmem:[%s27386_s20 + $0xd8] sm:$0xff]  ;;  %v622_v30 = vld [vmem:[%s27386_s20 + $0xe0] sm:$0xff]  ;;  %v623_v31 = vld [vmem:[%s27386_s20 + $0xe8] sm:$0xff]  ;;  %573 = vst.msk [vmem:[#allocation2 + $0x168] sm:$0x1] %vm557_vm3, %v33885_v34 }
  0x21   : > { %23560 = vmatmul.mubr.msk.f32.gmra.mrb[4].mxu0 %vm634_vm1, %v599_v7  ;;  %v624_v32 = vld [vmem:[%s27386_s20 + $0xf0] sm:$0xff]  ;;  %v625_v33 = vld [vmem:[%s27386_s20 + $0xf8] sm:$0xff]  ;;  %574 = vst.msk [vmem:[#allocation2 + $0x180] sm:$0x1] %vm557_vm3, %v33885_v34  ;;  %575 = vst.msk [vmem:[#allocation2 + $0x198] sm:$0x1] %vm557_vm3, %v33885_v34 }
  0x22   : > { %23562 = vmatprep.mubr.msk.f32.mxu0 %vm634_vm1, %v600_v8  ;;  %576 = vst.msk [vmem:[#allocation2 + $0x11] sm:$0x1] %vm557_vm3, %v33885_v34  ;;  %577 = vst.msk [vmem:[#allocation2 + $0x29] sm:$0x1] %vm557_vm3, %v33885_v34  ;;  %v1055_v35 = vld [vmem:[#allocation2 + $0x1] sm:$0xff]  ;;  %v1056_v36 = vld [vmem:[#allocation2 + $0x9] sm:$0xff] }
  0x23   : > { %578 = vst.msk [vmem:[#allocation2 + $0x41] sm:$0x1] %vm557_vm3, %v33885_v34  ;;  %579 = vst.msk [vmem:[#allocation2 + $0x59] sm:$0x1] %vm557_vm3, %v33885_v34 }
  0x24   : > { %580 = vst.msk [vmem:[#allocation2 + $0x71] sm:$0x1] %vm557_vm3, %v33885_v34  ;;  %581 = vst.msk [vmem:[#allocation2 + $0x89] sm:$0x1] %vm557_vm3, %v33885_v34 }
  0x25   : > { %23563 = vmatmul.mubr.msk.f32.gmra.mrb[6].mxu0 %vm634_vm1, %v601_v9  ;;  %582 = vst.msk [vmem:[#allocation2 + $0xa1] sm:$0x1] %vm557_vm3, %v33885_v34  ;;  %583 = vst.msk [vmem:[#allocation2 + $0xb9] sm:$0x1] %vm557_vm3, %v33885_v34 }
  0x26   : > { %23565 = vmatprep.mubr.msk.f32.mxu0 %vm634_vm1, %v602_v10  ;;  %584 = vst.msk [vmem:[#allocation2 + $0xd1] sm:$0x1] %vm557_vm3, %v33885_v34  ;;  %585 = vst.msk [vmem:[#allocation2 + $0xe9] sm:$0x1] %vm557_vm3, %v33885_v34 }
  0x27   : > { %586 = vst.msk [vmem:[#allocation2 + $0x101] sm:$0x1] %vm557_vm3, %v33885_v34  ;;  %587 = vst.msk [vmem:[#allocation2 + $0x119] sm:$0x1] %vm557_vm3, %v33885_v34 }
  0x28   : > { %588 = vst.msk [vmem:[#allocation2 + $0x131] sm:$0x1] %vm557_vm3, %v33885_v34  ;;  %589 = vst.msk [vmem:[#allocation2 + $0x149] sm:$0x1] %vm557_vm3, %v33885_v34 }
  0x29   : > { %23566 = vmatmul.mubr.msk.f32.gmra.mrb[8].mxu0 %vm634_vm1, %v603_v11  ;;  %590 = vst.msk [vmem:[#allocation2 + $0x161] sm:$0x1] %vm557_vm3, %v33885_v34  ;;  %591 = vst.msk [vmem:[#allocation2 + $0x179] sm:$0x1] %vm557_vm3, %v33885_v34 }
  0x2a   : > { %23568 = vmatprep.mubr.msk.f32.mxu0 %vm634_vm1, %v604_v12  ;;  %592 = vst.msk [vmem:[#allocation2 + $0x191] sm:$0x1] %vm557_vm3, %v33885_v34  ;;  %593 = vst.msk [vmem:[#allocation2 + $0x1a9] sm:$0x1] %vm557_vm3, %v33885_v34 }
  0x2d   : > { %23569 = vmatmul.mubr.msk.f32.gmra.mrb[10].mxu0 %vm634_vm1, %v605_v13 }
  0x2e   : > { %23571 = vmatprep.mubr.msk.f32.mxu0 %vm634_vm1, %v606_v14 }
  0x31   : > { %23572 = vmatmul.mubr.msk.f32.gmra.mrb[12].mxu0 %vm634_vm1, %v607_v15 }
  0x32   : > { %23574 = vmatprep.mubr.msk.f32.mxu0 %vm634_vm1, %v608_v16 }
  0x35   : > { %23575 = vmatmul.mubr.msk.f32.gmra.mrb[14].mxu0 %vm634_vm1, %v609_v17  ;;  %v27652_v17 = vld [vmem:[%s33870_s3 + $0x18] sm:$0xf] }
  0x36   : > { %23577 = vmatprep.mubr.msk.f32.mxu0 %vm634_vm1, %v610_v18 }
  0x39   : > { %23578 = vmatmul.mubr.msk.f32.gmra.mrb[16].mxu0 %vm634_vm1, %v611_v19 }
  0x3a   : > { %23580 = vmatprep.mubr.msk.f32.mxu0 %vm634_vm1, %v612_v20 }
  0x3d   : > { %23581 = vmatmul.mubr.msk.f32.gmra.mrb[18].mxu0 %vm634_vm1, %v613_v21 }
  0x3e   : > { %23583 = vmatprep.mubr.msk.f32.mxu0 %vm634_vm1, %v614_v22 }
  0x41   : > { %23584 = vmatmul.mubr.msk.f32.gmra.mrb[20].mxu0 %vm634_vm1, %v615_v23 }
  0x42   : > { %23586 = vmatprep.mubr.msk.f32.mxu0 %vm634_vm1, %v616_v24 }
  0x45   : > { %23587 = vmatmul.mubr.msk.f32.gmra.mrb[22].mxu0 %vm634_vm1, %v617_v25 }
  0x46   : > { %23589 = vmatprep.mubr.msk.f32.mxu0 %vm634_vm1, %v618_v26 }
  0x49   : > { %23590 = vmatmul.mubr.msk.f32.gmra.mrb[24].mxu0 %vm634_vm1, %v619_v27 }
  0x4a   : > { %23592 = vmatprep.mubr.msk.f32.mxu0 %vm634_vm1, %v620_v28 }
  0x4d   : > { %23593 = vmatmul.mubr.msk.f32.gmra.mrb[26].mxu0 %vm634_vm1, %v621_v29 }
  0x4e   : > { %23595 = vmatprep.mubr.msk.f32.mxu0 %vm634_vm1, %v622_v30 }
  0x51   : > { %23596 = vmatmul.mubr.msk.f32.gmra.mrb[28].mxu0 %vm634_vm1, %v623_v31 }
  0x52   : > { %23598 = vmatprep.mubr.msk.f32.mxu0 %vm634_vm1, %v624_v32 }
  0x55   : > { %23599 = vmatmul.mubr.msk.f32.gmra.mrb[30].mxu0 %vm634_vm1, %v625_v33 }
  0x56   : > { %23603 = vmatprep.mubr.msk.f32.mxu0 %vm989_vm4, %v1055_v35 }
  0x59   : > { %23604 = vmatmul.mubr.msk.f32.vlgmr.msra.gmra.mrb[32].mxu0 %vm989_vm4, %v1056_v36 }
  0x5a   : > { %23652 = vmatpush3.msk.msra.mxu0 %vm1185_vm0, %v1054_v38 }
  0x5b   : > { %23701 = vmatprep.subr.msk.mxu0 %vm1185_vm0, %v27563_v40 }
  0xec   : > { %v23555_v42 = vpop.f32.mrb[0].mxu0 }
  0xed   : > { %v803_v43 = vadd.f32 %v23555_v42, %v27570_v41  ;;  %v797_v44 = vpop.f32.mrb[1].mxu0 }
  0xee   : > { %v798_v45 = vadd.f32 %v27570_v41, %v797_v44 }
  0xef   : > { %v27574_v46 = vmax.f32 %v803_v43, 0.0 }
  0xf0   : > { %v27576_v47 = vmax.f32 %v798_v45, 0.0  ;;  %v23558_v48 = vpop.f32.mrb[2].mxu0 }
  0xf1   : > { %991 = vst.msk [vmem:[#allocation2 + $0x21] sm:$0xff] %vm989_vm4, %v27574_v46  ;;  %v813_v49 = vadd.f32 %v23558_v48, %v27570_v41  ;;  %v807_v50 = vpop.f32.mrb[3].mxu0 }
  0xf2   : > { %990 = vst.msk [vmem:[#allocation2 + $0x19] sm:$0xff] %vm989_vm4, %v27576_v47  ;;  %v808_v51 = vadd.f32 %v27570_v41, %v807_v50  ;;  %4764 = vrot.lane.b32.xlu0 %v27576_v47, %s27265_s1 }
  0xf3   : > { %v27586_v52 = vmax.f32 %v813_v49, 0.0 }
  0xf4   : > { %v27588_v53 = vmax.f32 %v808_v51, 0.0  ;;  %v23561_v54 = vpop.f32.mrb[4].mxu0 }
  0xf5   : > { %993 = vst.msk [vmem:[#allocation2 + $0x39] sm:$0xff] %vm989_vm4, %v27586_v52  ;;  %v823_v55 = vadd.f32 %v23561_v54, %v27570_v41  ;;  %v817_v56 = vpop.f32.mrb[5].mxu0 }
  0xf6   : > { %992 = vst.msk [vmem:[#allocation2 + $0x31] sm:$0xff] %vm989_vm4, %v27588_v53  ;;  %v818_v57 = vadd.f32 %v27570_v41, %v817_v56  ;;  %4768 = vrot.lane.b32.xlu1 %v27588_v53, %s27265_s1  ;;  %4766 = vrot.lane.b32.xlu0 %v27574_v46, %s27265_s1 }
  0xf7   : > { %v27600_v58 = vmax.f32 %v823_v55, 0.0 }
  0xf8   : > { %v27602_v59 = vmax.f32 %v818_v57, 0.0  ;;  %v23564_v60 = vpop.f32.mrb[6].mxu0  ;;  %v1058_v2 = vld [vmem:[#allocation2 + $0x21] sm:$0xff] }
  0xf9   : > { %995 = vst.msk [vmem:[#allocation2 + $0x51] sm:$0xff] %vm989_vm4, %v27600_v58  ;;  %v833_v61 = vadd.f32 %v23564_v60, %v27570_v41  ;;  %v827_v62 = vpop.f32.mrb[7].mxu0  ;;  %v1057_v63 = vld [vmem:[#allocation2 + $0x19] sm:$0xff] }
  0xfa   : > { %994 = vst.msk [vmem:[#allocation2 + $0x49] sm:$0xff] %vm989_vm4, %v27602_v59  ;;  %v828_v0 = vadd.f32 %v27570_v41, %v827_v62  ;;  %4770 = vrot.lane.b32.xlu1 %v27586_v52, %s27265_s1  ;;  %4772 = vrot.lane.b32.xlu0 %v27602_v59, %s27265_s1 }
  0xfb   : > { %v27614_v1 = vmax.f32 %v833_v61, 0.0  ;;  %23606 = vmatprep.mubr.msk.f32.mxu0 %vm989_vm4, %v1057_v63 }
  0xfc   : > { %v27617_v3 = vmax.f32 %v828_v0, 0.0  ;;  %23607 = vmatmul.mubr.msk.f32.gmra.mrb[34].mxu0 %vm989_vm4, %v1058_v2  ;;  %v23567_v4 = vpop.f32.mrb[8].mxu0  ;;  %v1060_v10 = vld [vmem:[#allocation2 + $0x39] sm:$0xff] }
  0xfd   : > { %997 = vst.msk [vmem:[#allocation2 + $0x69] sm:$0xff] %vm989_vm4, %v27614_v1  ;;  %v843_v5 = vadd.f32 %v23567_v4, %v27570_v41  ;;  %v837_v6 = vpop.f32.mrb[9].mxu0  ;;  %v2520_v7 = vld [vmem:[#allocation2 + $0x31] sm:$0xff] }
  0xfe   : > { %996 = vst.msk [vmem:[#allocation2 + $0x61] sm:$0xff] %vm989_vm4, %v27617_v3  ;;  %v838_v8 = vadd.f32 %v27570_v41, %v837_v6  ;;  %4774 = vrot.lane.b32.xlu1 %v27600_v58, %s27265_s1  ;;  %23806 = vmatprep.mubr.msk.f32.mxu1 %vm989_vm4, %v2520_v7 }
  0xff   : > { %v27629_v9 = vmax.f32 %v843_v5, 0.0  ;;  %4776 = vrot.lane.b32.xlu0 %v27617_v3, %s27265_s1  ;;  %23609 = vmatprep.mubr.msk.f32.mxu0 %vm989_vm4, %v2520_v7 }
 0x100   : > { %v27634_v11 = vmax.f32 %v838_v8, 0.0  ;;  %23610 = vmatmul.mubr.msk.f32.gmra.mrb[36].mxu0 %vm989_vm4, %v1060_v10  ;;  %23807 = vmatmul.mubr.msk.f32.vlgmr.msra.gmra.mrb[0].mxu1 %vm989_vm4, %v1060_v10  ;;  %v23570_v12 = vpop.f32.mrb[10].mxu0  ;;  %v1062_v19 = vld [vmem:[#allocation2 + $0x51] sm:$0xff] }
 0x101   : > { %999 = vst.msk [vmem:[#allocation2 + $0x81] sm:$0xff] %vm989_vm4, %v27629_v9  ;;  %23852 = vmatpush3.msk.msra.mxu1 %vm1185_vm0, %v27556_v39  ;;  %v853_v13 = vadd.f32 %v23570_v12, %v27570_v41  ;;  %v847_v14 = vpop.f32.mrb[11].mxu0  ;;  %v2522_v15 = vld [vmem:[#allocation2 + $0x49] sm:$0xff] }
 0x102   : > { %998 = vst.msk [vmem:[#allocation2 + $0x79] sm:$0xff] %vm989_vm4, %v27634_v11  ;;  %v848_v16 = vadd.f32 %v27570_v41, %v847_v14  ;;  %4778 = vrot.lane.b32.xlu1 %v27614_v1, %s27265_s1  ;;  %23809 = vmatprep.mubr.msk.f32.mxu1 %vm989_vm4, %v2522_v15 }
 0x103   : > { %v27654_v18 = vmax.f32 %v853_v13, 0.0  ;;  %4780 = vrot.lane.b32.xlu0 %v27634_v11, %s27265_s1  ;;  %23612 = vmatprep.mubr.msk.f32.mxu0 %vm989_vm4, %v2522_v15 }
 0x104   : > { %v27659_v20 = vmax.f32 %v848_v16, 0.0  ;;  %23613 = vmatmul.mubr.msk.f32.gmra.mrb[38].mxu0 %vm989_vm4, %v1062_v19  ;;  %23810 = vmatmul.mubr.msk.f32.gmra.mrb[2].mxu1 %vm989_vm4, %v1062_v19  ;;  %v23573_v21 = vpop.f32.mrb[12].mxu0  ;;  %v1064_v27 = vld [vmem:[#allocation2 + $0x69] sm:$0xff] }
 0x105   : > { %1001 = vst.msk [vmem:[#allocation2 + $0x99] sm:$0xff] %vm989_vm4, %v27654_v18  ;;  %v863_v22 = vadd.f32 %v23573_v21, %v27570_v41  ;;  %v857_v23 = vpop.f32.mrb[13].mxu0  ;;  %v2524_v24 = vld [vmem:[#allocation2 + $0x61] sm:$0xff]  ;;  %23901 = vmatprep.subr.msk.mxu1 %vm1185_vm0, %v27652_v17 }
 0x106   : > { %1000 = vst.msk [vmem:[#allocation2 + $0x91] sm:$0xff] %vm989_vm4, %v27659_v20  ;;  %v858_v25 = vadd.f32 %v27570_v41, %v857_v23  ;;  %4782 = vrot.lane.b32.xlu1 %v27629_v9, %s27265_s1  ;;  %23812 = vmatprep.mubr.msk.f32.mxu1 %vm989_vm4, %v2524_v24 }
 0x107   : > { %v27674_v26 = vmax.f32 %v863_v22, 0.0  ;;  %4784 = vrot.lane.b32.xlu0 %v27659_v20, %s27265_s1  ;;  %23615 = vmatprep.mubr.msk.f32.mxu0 %vm989_vm4, %v2524_v24 }
 0x108   : > { %v27679_v28 = vmax.f32 %v858_v25, 0.0  ;;  %23616 = vmatmul.mubr.msk.f32.gmra.mrb[40].mxu0 %vm989_vm4, %v1064_v27  ;;  %23813 = vmatmul.mubr.msk.f32.gmra.mrb[4].mxu1 %vm989_vm4, %v1064_v27  ;;  %v23576_v29 = vpop.f32.mrb[14].mxu0  ;;  %v1066_v36 = vld [vmem:[#allocation2 + $0x81] sm:$0xff] }
 0x109   : > { %1003 = vst.msk [vmem:[#allocation2 + $0xb1] sm:$0xff] %vm989_vm4, %v27674_v26  ;;  %v873_v30 = vadd.f32 %v23576_v29, %v27570_v41  ;;  %v867_v31 = vpop.f32.mrb[15].mxu0  ;;  %v2526_v32 = vld [vmem:[#allocation2 + $0x79] sm:$0xff] }
 0x10a   : > { %1002 = vst.msk [vmem:[#allocation2 + $0xa9] sm:$0xff] %vm989_vm4, %v27679_v28  ;;  %v868_v33 = vadd.f32 %v27570_v41, %v867_v31  ;;  %4786 = vrot.lane.b32.xlu1 %v27654_v18, %s27265_s1  ;;  %23815 = vmatprep.mubr.msk.f32.mxu1 %vm989_vm4, %v2526_v32 }
 0x10b   : > { %v27692_v35 = vmax.f32 %v873_v30, 0.0  ;;  %4788 = vrot.lane.b32.xlu0 %v27679_v28, %s27265_s1  ;;  %23618 = vmatprep.mubr.msk.f32.mxu0 %vm989_vm4, %v2526_v32 }
 0x10c   : > { %v27697_v38 = vmax.f32 %v868_v33, 0.0  ;;  %23619 = vmatmul.mubr.msk.f32.gmra.mrb[42].mxu0 %vm989_vm4, %v1066_v36  ;;  %23816 = vmatmul.mubr.msk.f32.gmra.mrb[6].mxu1 %vm989_vm4, %v1066_v36  ;;  %v23579_v39 = vpop.f32.mrb[16].mxu0  ;;  %v1068_v49 = vld [vmem:[#allocation2 + $0x99] sm:$0xff] }
 0x10d   : > { %34248 = vst [vmem:[#allocation5_spill] sm:$0xff] %v27692_v35  ;;  %1005 = vst.msk [vmem:[#allocation2 + $0xc9] sm:$0xff] %vm989_vm4, %v27692_v35  ;;  %v883_v42 = vadd.f32 %v23579_v39, %v27570_v41  ;;  %v877_v43 = vpop.f32.mrb[17].mxu0  ;;  %v2528_v44 = vld [vmem:[#allocation2 + $0x91] sm:$0xff] }
 0x10e   : > { %1004 = vst.msk [vmem:[#allocation2 + $0xc1] sm:$0xff] %vm989_vm4, %v27697_v38  ;;  %v878_v45 = vadd.f32 %v27570_v41, %v877_v43  ;;  %4790 = vrot.lane.b32.xlu1 %v27674_v26, %s27265_s1  ;;  %23818 = vmatprep.mubr.msk.f32.mxu1 %vm989_vm4, %v2528_v44  ;;  %v28017_v34 = vld [vmem:[#allocation2 + $0x92] sm:$0xff] }
 0x10f   : > { %v27710_v48 = vmax.f32 %v883_v42, 0.0  ;;  %4792 = vrot.lane.b32.xlu0 %v27697_v38, %s27265_s1  ;;  %23621 = vmatprep.mubr.msk.f32.mxu0 %vm989_vm4, %v2528_v44 }
 0x110   : > { %v27715_v50 = vmax.f32 %v878_v45, 0.0  ;;  %23622 = vmatmul.mubr.msk.f32.gmra.mrb[44].mxu0 %vm989_vm4, %v1068_v49  ;;  %23819 = vmatmul.mubr.msk.f32.gmra.mrb[8].mxu1 %vm989_vm4, %v1068_v49  ;;  %v23582_v51 = vpop.f32.mrb[18].mxu0  ;;  %v1070_v61 = vld [vmem:[#allocation2 + $0xb1] sm:$0xff] }
 0x111   : > { %34249 = vst [vmem:[#allocation6_spill] sm:$0xff] %v27710_v48  ;;  %1007 = vst.msk [vmem:[#allocation2 + $0xe1] sm:$0xff] %vm989_vm4, %v27710_v48  ;;  %v893_v54 = vadd.f32 %v23582_v51, %v27570_v41  ;;  %v887_v55 = vpop.f32.mrb[19].mxu0  ;;  %v2530_v56 = vld [vmem:[#allocation2 + $0xa9] sm:$0xff] }
 0x112   : > { %34250 = vst [vmem:[#allocation7_spill] sm:$0xff] %v27715_v50  ;;  %1006 = vst.msk [vmem:[#allocation2 + $0xd9] sm:$0xff] %vm989_vm4, %v27715_v50  ;;  %v888_v57 = vadd.f32 %v27570_v41, %v887_v55  ;;  %4794 = vrot.lane.b32.xlu1 %v27692_v35, %s27265_s1  ;;  %23821 = vmatprep.mubr.msk.f32.mxu1 %vm989_vm4, %v2530_v56 }
 0x113   : > { %v27728_v60 = vmax.f32 %v893_v54, 0.0  ;;  %4796 = vrot.lane.b32.xlu0 %v27715_v50, %s27265_s1  ;;  %23624 = vmatprep.mubr.msk.f32.mxu0 %vm989_vm4, %v2530_v56 }
 0x114   : > { %v27733_v62 = vmax.f32 %v888_v57, 0.0  ;;  %23625 = vmatmul.mubr.msk.f32.gmra.mrb[46].mxu0 %vm989_vm4, %v1070_v61  ;;  %23822 = vmatmul.mubr.msk.f32.gmra.mrb[10].mxu1 %vm989_vm4, %v1070_v61  ;;  %v23585_v63 = vpop.f32.mrb[20].mxu0  ;;  %v1072_v7 = vld [vmem:[#allocation2 + $0xc9] sm:$0xff] }
 0x115   : > { %34251 = vst [vmem:[#allocation8_spill] sm:$0xff] %v27728_v60  ;;  %1009 = vst.msk [vmem:[#allocation2 + $0xf9] sm:$0xff] %vm989_vm4, %v27728_v60  ;;  %v903_v0 = vadd.f32 %v23585_v63, %v27570_v41  ;;  %v897_v2 = vpop.f32.mrb[21].mxu0  ;;  %v2532_v4 = vld [vmem:[#allocation2 + $0xc1] sm:$0xff] }
 0x116   : > { %34252 = vst [vmem:[#allocation9_spill] sm:$0xff] %v27733_v62  ;;  %1008 = vst.msk [vmem:[#allocation2 + $0xf1] sm:$0xff] %vm989_vm4, %v27733_v62  ;;  %v898_v5 = vadd.f32 %v27570_v41, %v897_v2  ;;  %4798 = vrot.lane.b32.xlu1 %v27710_v48, %s27265_s1  ;;  %23824 = vmatprep.mubr.msk.f32.mxu1 %vm989_vm4, %v2532_v4 }
 0x117   : > { %v27746_v6 = vmax.f32 %v903_v0, 0.0  ;;  %4800 = vrot.lane.b32.xlu0 %v27733_v62, %s27265_s1  ;;  %23627 = vmatprep.mubr.msk.f32.mxu0 %vm989_vm4, %v2532_v4 }
 0x118   : > { %v27751_v8 = vmax.f32 %v898_v5, 0.0  ;;  %23628 = vmatmul.mubr.msk.f32.gmra.mrb[48].mxu0 %vm989_vm4, %v1072_v7  ;;  %23825 = vmatmul.mubr.msk.f32.gmra.mrb[12].mxu1 %vm989_vm4, %v1072_v7  ;;  %v23588_v10 = vpop.f32.mrb[22].mxu0  ;;  %v1074_v19 = vld [vmem:[#allocation2 + $0xe1] sm:$0xff] }
 0x119   : > { %34253 = vst [vmem:[#allocation10_spill] sm:$0xff] %v27746_v6  ;;  %1011 = vst.msk [vmem:[#allocation2 + $0x111] sm:$0xff] %vm989_vm4, %v27746_v6  ;;  %v913_v12 = vadd.f32 %v23588_v10, %v27570_v41  ;;  %v907_v13 = vpop.f32.mrb[23].mxu0  ;;  %v2534_v14 = vld [vmem:[#allocation2 + $0xd9] sm:$0xff] }
 0x11a   : > { %34254 = vst [vmem:[#allocation11_spill] sm:$0xff] %v27751_v8  ;;  %1010 = vst.msk [vmem:[#allocation2 + $0x109] sm:$0xff] %vm989_vm4, %v27751_v8  ;;  %v908_v15 = vadd.f32 %v27570_v41, %v907_v13  ;;  %4802 = vrot.lane.b32.xlu1 %v27728_v60, %s27265_s1  ;;  %23827 = vmatprep.mubr.msk.f32.mxu1 %vm989_vm4, %v2534_v14 }
 0x11b   : > { %v27764_v16 = vmax.f32 %v913_v12, 0.0  ;;  %4804 = vrot.lane.b32.xlu0 %v27751_v8, %s27265_s1  ;;  %23630 = vmatprep.mubr.msk.f32.mxu0 %vm989_vm4, %v2534_v14 }
 0x11c   : > { %v27769_v21 = vmax.f32 %v908_v15, 0.0  ;;  %23631 = vmatmul.mubr.msk.f32.gmra.mrb[50].mxu0 %vm989_vm4, %v1074_v19  ;;  %23828 = vmatmul.mubr.msk.f32.gmra.mrb[14].mxu1 %vm989_vm4, %v1074_v19  ;;  %v23591_v22 = vpop.f32.mrb[24].mxu0  ;;  %v1076_v30 = vld [vmem:[#allocation2 + $0xf9] sm:$0xff] }
 0x11d   : > { %34255 = vst [vmem:[#allocation12_spill] sm:$0xff] %v27764_v16  ;;  %1013 = vst.msk [vmem:[#allocation2 + $0x129] sm:$0xff] %vm989_vm4, %v27764_v16  ;;  %v923_v23 = vadd.f32 %v23591_v22, %v27570_v41  ;;  %v917_v24 = vpop.f32.mrb[25].mxu0  ;;  %v2536_v25 = vld [vmem:[#allocation2 + $0xf1] sm:$0xff]  ;;  %v1022_v19 = vld [vmem:[#allocation2] sm:$0xff] }
 0x11e   : > { %34256 = vst [vmem:[#allocation13_spill] sm:$0xff] %v27769_v21  ;;  %1012 = vst.msk [vmem:[#allocation2 + $0x121] sm:$0xff] %vm989_vm4, %v27769_v21  ;;  %v918_v27 = vadd.f32 %v27570_v41, %v917_v24  ;;  %4806 = vrot.lane.b32.xlu1 %v27746_v6, %s27265_s1  ;;  %23830 = vmatprep.mubr.msk.f32.mxu1 %vm989_vm4, %v2536_v25  ;;  %v1023_v24 = vld [vmem:[#allocation2 + $0x8] sm:$0xff] }
 0x11f   : > { %v27782_v29 = vmax.f32 %v923_v23, 0.0  ;;  %4808 = vrot.lane.b32.xlu0 %v27769_v21, %s27265_s1  ;;  %23633 = vmatprep.mubr.msk.f32.mxu0 %vm989_vm4, %v2536_v25 }
 0x120   : > { %v27787_v31 = vmax.f32 %v918_v27, 0.0  ;;  %23634 = vmatmul.mubr.msk.f32.gmra.mrb[52].mxu0 %vm989_vm4, %v1076_v30  ;;  %23831 = vmatmul.mubr.msk.f32.gmra.mrb[16].mxu1 %vm989_vm4, %v1076_v30  ;;  %v23594_v32 = vpop.f32.mrb[26].mxu0  ;;  %v1078_v44 = vld [vmem:[#allocation2 + $0x111] sm:$0xff]  ;;  %v27900_v27 = vld [vmem:[#allocation2 + $0x1a] sm:$0xff] }
 0x121   : > { %34257 = vst [vmem:[#allocation14_spill] sm:$0xff] %v27782_v29  ;;  %1015 = vst.msk [vmem:[#allocation2 + $0x141] sm:$0xff] %vm989_vm4, %v27782_v29  ;;  %v933_v33 = vadd.f32 %v23594_v32, %v27570_v41  ;;  %v927_v36 = vpop.f32.mrb[27].mxu0  ;;  %v2538_v39 = vld [vmem:[#allocation2 + $0x109] sm:$0xff]  ;;  %v27905_v30 = vld [vmem:[#allocation2 + $0x18] sm:$0xff] }
 0x122   : > { %34258 = vst [vmem:[#allocation15_spill] sm:$0xff] %v27787_v31  ;;  %1014 = vst.msk [vmem:[#allocation2 + $0x139] sm:$0xff] %vm989_vm4, %v27787_v31  ;;  %v928_v42 = vadd.f32 %v27570_v41, %v927_v36  ;;  %4810 = vrot.lane.b32.xlu1 %v27764_v16, %s27265_s1  ;;  %23833 = vmatprep.mubr.msk.f32.mxu1 %vm989_vm4, %v2538_v39  ;;  %v27910_v32 = vld [vmem:[%s33870_s3 + $0xc] sm:$0xf]  ;;  %v27924_v36 = vld [vmem:[#allocation2 + $0x22] sm:$0xff] }
 0x123   : > { %v27800_v43 = vmax.f32 %v933_v33, 0.0  ;;  %4812 = vrot.lane.b32.xlu0 %v27787_v31, %s27265_s1  ;;  %23636 = vmatprep.mubr.msk.f32.mxu0 %vm989_vm4, %v2538_v39  ;;  %34272 = vst [vmem:[#allocation29_spill] sm:$0xff] %v27905_v30  ;;  %v27920_v33 = vld [vmem:[#allocation2 + $0x20] sm:$0xff]  ;;  %v27932_v39 = vld [vmem:[#allocation2 + $0x30] sm:$0xff] }
 0x124   : > { %v27805_v45 = vmax.f32 %v928_v42, 0.0  ;;  %23637 = vmatmul.mubr.msk.f32.gmra.mrb[54].mxu0 %vm989_vm4, %v1078_v44  ;;  %23834 = vmatmul.mubr.msk.f32.gmra.mrb[18].mxu1 %vm989_vm4, %v1078_v44  ;;  %v23597_v49 = vpop.f32.mrb[28].mxu0  ;;  %v1080_v61 = vld [vmem:[#allocation2 + $0x129] sm:$0xff]  ;;  %34273 = vst [vmem:[#allocation30_spill] sm:$0xff] %v27920_v33  ;;  %v27939_v42 = vld [vmem:[#allocation2 + $0x32] sm:$0xff] }
 0x125   : > { %34259 = vst [vmem:[#allocation16_spill] sm:$0xff] %v27800_v43  ;;  %1017 = vst.msk [vmem:[#allocation2 + $0x159] sm:$0xff] %vm989_vm4, %v27800_v43  ;;  %v943_v51 = vadd.f32 %v23597_v49, %v27570_v41  ;;  %v937_v54 = vpop.f32.mrb[29].mxu0  ;;  %v2540_v55 = vld [vmem:[#allocation2 + $0x121] sm:$0xff]  ;;  %v27949_v44 = vld [vmem:[#allocation2 + $0x38] sm:$0xff] }
 0x126   : > { %34260 = vst [vmem:[#allocation17_spill] sm:$0xff] %v27805_v45  ;;  %1016 = vst.msk [vmem:[#allocation2 + $0x151] sm:$0xff] %vm989_vm4, %v27805_v45  ;;  %v938_v56 = vadd.f32 %v27570_v41, %v937_v54  ;;  %4814 = vrot.lane.b32.xlu1 %v27782_v29, %s27265_s1  ;;  %23836 = vmatprep.mubr.msk.f32.mxu1 %vm989_vm4, %v2540_v55  ;;  %v27953_v49 = vld [vmem:[#allocation2 + $0x3a] sm:$0xff]  ;;  %v27971_v54 = vld [vmem:[#allocation2 + $0x50] sm:$0xff] }
 0x127   : > { %v27818_v57 = vmax.f32 %v943_v51, 0.0  ;;  %4816 = vrot.lane.b32.xlu0 %v27805_v45, %s27265_s1  ;;  %23639 = vmatprep.mubr.msk.f32.mxu0 %vm989_vm4, %v2540_v55  ;;  %v27963_v51 = vld [vmem:[#allocation2 + $0x48] sm:$0xff]  ;;  %v27975_v55 = vld [vmem:[#allocation2 + $0x52] sm:$0xff] }
 0x128   : > { %v27823_v63 = vmax.f32 %v938_v56, 0.0  ;;  %23640 = vmatmul.mubr.msk.f32.gmra.mrb[56].mxu0 %vm989_vm4, %v1080_v61  ;;  %23837 = vmatmul.mubr.msk.f32.gmra.mrb[20].mxu1 %vm989_vm4, %v1080_v61  ;;  %v23600_v0 = vpop.f32.mrb[30].mxu0  ;;  %v27845_v12 = vld [vmem:[#allocation2 + $0x141] sm:$0xff] }
 0x129   : > { %34261 = vst [vmem:[#allocation18_spill] sm:$0xff] %v27818_v57  ;;  %1019 = vst.msk [vmem:[#allocation2 + $0x171] sm:$0xff] %vm989_vm4, %v27818_v57  ;;  %v953_v2 = vadd.f32 %v23600_v0, %v27570_v41  ;;  %v947_v4 = vpop.f32.mrb[31].mxu0  ;;  %v27830_v5 = vld [vmem:[#allocation2 + $0x139] sm:$0xff]  ;;  %v27977_v56 = vld [vmem:[#allocation2 + $0x62] sm:$0xff] }
 0x12a   : > { %34262 = vst [vmem:[#allocation19_spill] sm:$0xff] %v27830_v5  ;;  %1018 = vst.msk [vmem:[#allocation2 + $0x169] sm:$0xff] %vm989_vm4, %v27823_v63  ;;  %v948_v7 = vadd.f32 %v27570_v41, %v947_v4  ;;  %4818 = vrot.lane.b32.xlu1 %v27800_v43, %s27265_s1  ;;  %23839 = vmatprep.mubr.msk.f32.mxu1 %vm989_vm4, %v27830_v5  ;;  %v27983_v61 = vld [vmem:[#allocation2 + $0x60] sm:$0xff]  ;;  %v27991_v0 = vld [vmem:[#allocation2 + $0x68] sm:$0xff] }
 0x12b   : > { %v27839_v10 = vmax.f32 %v953_v2, 0.0  ;;  %4820 = vrot.lane.b32.xlu0 %v27823_v63, %s27265_s1  ;;  %23642 = vmatprep.mubr.msk.f32.mxu0 %vm989_vm4, %v27830_v5  ;;  %34264 = vst [vmem:[#allocation21_spill] sm:$0xff] %v27845_v12  ;;  %v27995_v2 = vld [vmem:[#allocation2 + $0x6a] sm:$0xff]  ;;  %v27997_v4 = vld [vmem:[#allocation2 + $0x7a] sm:$0xff]  ;;  %v28057_v5 = vld [vmem:[#allocation2 + $0xc2] sm:$0xff] }
 0x12c   : > { %v27847_v13 = vmax.f32 %v948_v7, 0.0  ;;  %23643 = vmatmul.mubr.msk.f32.gmra.mrb[58].mxu0 %vm989_vm4, %v27845_v12  ;;  %23840 = vmatmul.mubr.msk.f32.gmra.mrb[22].mxu1 %vm989_vm4, %v27845_v12  ;;  %v27867_v14 = vld [vmem:[#allocation2 + $0x159] sm:$0xff]  ;;  %34276 = vst [vmem:[#allocation33_spill] sm:$0xff] %v28057_v5 }
 0x12d   : > { %34263 = vst [vmem:[#allocation20_spill] sm:$0xff] %v27839_v10  ;;  %1021 = vst.msk [vmem:[#allocation2 + $0x189] sm:$0xff] %vm989_vm4, %v27839_v10  ;;  %v27855_v41 = vld [vmem:[#allocation2 + $0x151] sm:$0xff] }
 0x12e   : > { %34265 = vst [vmem:[#allocation22_spill] sm:$0xff] %v27847_v13  ;;  %34266 = vst [vmem:[#allocation23_spill] sm:$0xff] %v27855_v41  ;;  %4822 = vrot.lane.b32.xlu1 %v27818_v57, %s27265_s1  ;;  %23842 = vmatprep.mubr.msk.f32.mxu1 %vm989_vm4, %v27855_v41  ;;  %v28003_v7 = vld [vmem:[#allocation2 + $0x78] sm:$0xff] }
 0x12f   : > { %1020 = vst.msk [vmem:[#allocation2 + $0x181] sm:$0xff] %vm989_vm4, %v27847_v13  ;;  %4824 = vrot.lane.b32.xlu0 %v27847_v13, %s27265_s1  ;;  %23645 = vmatprep.mubr.msk.f32.mxu0 %vm989_vm4, %v27855_v41  ;;  %34267 = vst [vmem:[#allocation24_spill] sm:$0xff] %v27867_v14  ;;  %v28051_v41 = vld [vmem:[#allocation2 + $0xb0] sm:$0xff] }
 0x130   : > { %23646 = vmatmul.mubr.msk.f32.gmra.mrb[60].mxu0 %vm989_vm4, %v27867_v14  ;;  %23843 = vmatmul.mubr.msk.f32.gmra.mrb[24].mxu1 %vm989_vm4, %v27867_v14  ;;  %v27883_v22 = vld [vmem:[#allocation2 + $0x171] sm:$0xff]  ;;  %v28043_v14 = vld [vmem:[#allocation2 + $0xa8] sm:$0xff] }
 0x131   : > { %v27873_v15 = vld [vmem:[#allocation2 + $0x169] sm:$0xff]  ;;  %34269 = vst [vmem:[#allocation26_spill] sm:$0xff] %v27883_v22  ;;  %v28055_v12 = vld [vmem:[#allocation2 + $0xb2] sm:$0xff] }
 0x132   : > { %34268 = vst [vmem:[#allocation25_spill] sm:$0xff] %v27873_v15  ;;  %4826 = vrot.lane.b32.xlu1 %v27839_v10, %s27265_s1  ;;  %23845 = vmatprep.mubr.msk.f32.mxu1 %vm989_vm4, %v27873_v15  ;;  %34275 = vst [vmem:[#allocation32_spill] sm:$0xff] %v28055_v12 }
 0x133   : > { %8702 = vrot.lane.b32.xlu0 %v27576_v47, %s27266_s23  ;;  %23648 = vmatprep.mubr.msk.f32.mxu0 %vm989_vm4, %v27873_v15  ;;  %v28037_v15 = vld [vmem:[#allocation2 + $0xaa] sm:$0xff] }
 0x134   : > { %23649 = vmatmul.mubr.msk.f32.gmra.mrb[62].mxu0 %vm989_vm4, %v27883_v22  ;;  %23846 = vmatmul.mubr.msk.f32.gmra.mrb[26].mxu1 %vm989_vm4, %v27883_v22  ;;  %v27898_v25 = vld [vmem:[#allocation2 + $0x189] sm:$0xff]  ;;  %v28035_v22 = vld [vmem:[#allocation2 + $0x9a] sm:$0xff]  ;;  %34274 = vst [vmem:[#allocation31_spill] sm:$0xff] %v28037_v15 }
 0x135   : > { %23653 = vmatprep.mubr.msk.f32.mxu0 %vm989_vm4, %v1022_v19  ;;  %34271 = vst [vmem:[#allocation28_spill] sm:$0xff] %v27898_v25  ;;  %v28011_v19 = vld [vmem:[#allocation2 + $0x80] sm:$0xff] }
 0x136   : > { %v27889_v23 = vld [vmem:[#allocation2 + $0x181] sm:$0xff]  ;;  %8704 = vrot.lane.b32.xlu1 %v27574_v46, %s27266_s23 }
 0x137   : > { %34270 = vst [vmem:[#allocation27_spill] sm:$0xff] %v27889_v23  ;;  %23848 = vmatprep.mubr.msk.f32.mxu1 %vm989_vm4, %v27889_v23  ;;  %8706 = vrot.lane.b32.xlu0 %v27588_v53, %s27266_s23  ;;  %v28031_v23 = vld [vmem:[#allocation2 + $0x98] sm:$0xff] }
 0x138   : > { %23654 = vmatmul.mubr.msk.f32.vlgmr.msra.gmra.mrb[32].mxu0 %vm989_vm4, %v1023_v24  ;;  %23849 = vmatmul.mubr.msk.f32.gmra.mrb[28].mxu1 %vm989_vm4, %v27898_v25  ;;  %v28015_v24 = vld [vmem:[#allocation2 + $0x82] sm:$0xff]  ;;  %v28023_v25 = vld [vmem:[#allocation2 + $0x90] sm:$0xff] }
 0x139   : > { %23656 = vmatprep.mubr.msk.f32.mxu0 %vm989_vm4, %v27905_v30  ;;  %23853 = vmatprep.mubr.msk.f32.mxu1 %vm989_vm4, %v27900_v27  ;;  %v28071_v30 = vld [vmem:[#allocation2 + $0xc8] sm:$0xff] }
 0x13a   : > { %8708 = vrot.lane.b32.xlu1 %v27586_v52, %s27266_s23  ;;  %23702 = vmatpush3.msk.msra.mxu0 %vm1185_vm0, %v27563_v40  ;;  %v27937_v40 = vld [vmem:[%s33870_s3 + $0x1c] sm:$0xf] }
 0x13b   : > { %8710 = vrot.lane.b32.xlu0 %v27602_v59, %s27266_s23  ;;  %23751 = vmatprep.subr.msk.mxu0 %vm1185_vm0, %v27910_v32 }
 0x13c   : > { %23657 = vmatmul.mubr.msk.f32.gmra.mrb[34].mxu0 %vm989_vm4, %v27920_v33  ;;  %23854 = vmatmul.mubr.msk.f32.vlgmr.msra.gmra.mrb[30].mxu1 %vm989_vm4, %v27924_v36  ;;  %v28063_v33 = vld [vmem:[#allocation2 + $0xc0] sm:$0xff] }
 0x13d   : > { %23902 = vmatpush3.msk.msra.mxu1 %vm1185_vm0, %v27652_v17  ;;  %23659 = vmatprep.mubr.msk.f32.mxu0 %vm989_vm4, %v27932_v39  ;;  %v27957_v17 = vld [vmem:[#allocation2 + $0x4a] sm:$0xff] }
 0x13e   : > { %23856 = vmatprep.mubr.msk.f32.mxu1 %vm989_vm4, %v27939_v42  ;;  %8712 = vrot.lane.b32.xlu1 %v27600_v58, %s27266_s23 }
 0x13f   : > { %8714 = vrot.lane.b32.xlu0 %v27617_v3, %s27266_s23  ;;  %23951 = vmatprep.subr.msk.mxu1 %vm1185_vm0, %v27937_v40 }
 0x140   : > { %23660 = vmatmul.mubr.msk.f32.gmra.mrb[36].mxu0 %vm989_vm4, %v27949_v44  ;;  %23857 = vmatmul.mubr.msk.f32.gmra.mrb[0].mxu1 %vm989_vm4, %v27953_v49 }
 0x141   : > { %23662 = vmatprep.mubr.msk.f32.mxu0 %vm989_vm4, %v27963_v51  ;;  %23859 = vmatprep.mubr.msk.f32.mxu1 %vm989_vm4, %v27957_v17 }
 0x142   : > { %8716 = vrot.lane.b32.xlu1 %v27614_v1, %s27266_s23 }
 0x143   : > { %8718 = vrot.lane.b32.xlu0 %v27634_v11, %s27266_s23 }
 0x144   : > { %23663 = vmatmul.mubr.msk.f32.gmra.mrb[38].mxu0 %vm989_vm4, %v27971_v54  ;;  %23860 = vmatmul.mubr.msk.f32.gmra.mrb[2].mxu1 %vm989_vm4, %v27975_v55 }
 0x145   : > { %23665 = vmatprep.mubr.msk.f32.mxu0 %vm989_vm4, %v27983_v61  ;;  %23862 = vmatprep.mubr.msk.f32.mxu1 %vm989_vm4, %v27977_v56 }
 0x146   : > { %8720 = vrot.lane.b32.xlu1 %v27629_v9, %s27266_s23 }
 0x147   : > { %8722 = vrot.lane.b32.xlu0 %v27659_v20, %s27266_s23 }
 0x148   : > { %23666 = vmatmul.mubr.msk.f32.gmra.mrb[40].mxu0 %vm989_vm4, %v27991_v0  ;;  %23863 = vmatmul.mubr.msk.f32.gmra.mrb[4].mxu1 %vm989_vm4, %v27995_v2 }
 0x149   : > { %23668 = vmatprep.mubr.msk.f32.mxu0 %vm989_vm4, %v28003_v7  ;;  %23865 = vmatprep.mubr.msk.f32.mxu1 %vm989_vm4, %v27997_v4 }
 0x14a   : > { %8724 = vrot.lane.b32.xlu1 %v27654_v18, %s27266_s23 }
 0x14b   : > { %8726 = vrot.lane.b32.xlu0 %v27679_v28, %s27266_s23 }
 0x14c   : > { %23669 = vmatmul.mubr.msk.f32.gmra.mrb[42].mxu0 %vm989_vm4, %v28011_v19  ;;  %23866 = vmatmul.mubr.msk.f32.gmra.mrb[6].mxu1 %vm989_vm4, %v28015_v24 }
 0x14d   : > { %23671 = vmatprep.mubr.msk.f32.mxu0 %vm989_vm4, %v28023_v25  ;;  %23868 = vmatprep.mubr.msk.f32.mxu1 %vm989_vm4, %v28017_v34 }
 0x14e   : > { %8728 = vrot.lane.b32.xlu1 %v27674_v26, %s27266_s23 }
 0x14f   : > { %8730 = vrot.lane.b32.xlu0 %v27697_v38, %s27266_s23 }
 0x150   : > { %23672 = vmatmul.mubr.msk.f32.gmra.mrb[44].mxu0 %vm989_vm4, %v28031_v23  ;;  %23869 = vmatmul.mubr.msk.f32.gmra.mrb[8].mxu1 %vm989_vm4, %v28035_v22 }
 0x151   : > { %23674 = vmatprep.mubr.msk.f32.mxu0 %vm989_vm4, %v28043_v14  ;;  %23871 = vmatprep.mubr.msk.f32.mxu1 %vm989_vm4, %v28037_v15 }
 0x152   : > { %8732 = vrot.lane.b32.xlu1 %v27692_v35, %s27266_s23  ;;  %v28077_v35 = vld [vmem:[#allocation2 + $0xda] sm:$0xff] }
 0x153   : > { %8734 = vrot.lane.b32.xlu0 %v27715_v50, %s27266_s23  ;;  %v28075_v50 = vld [vmem:[#allocation2 + $0xca] sm:$0xff]  ;;  %34278 = vst [vmem:[#allocation35_spill] sm:$0xff] %v28077_v35 }
 0x154   : > { %23675 = vmatmul.mubr.msk.f32.gmra.mrb[46].mxu0 %vm989_vm4, %v28051_v41  ;;  %23872 = vmatmul.mubr.msk.f32.gmra.mrb[10].mxu1 %vm989_vm4, %v28055_v12  ;;  %34277 = vst [vmem:[#allocation34_spill] sm:$0xff] %v28075_v50  ;;  %v28083_v12 = vld [vmem:[#allocation2 + $0xd8] sm:$0xff] }
 0x155   : > { %23677 = vmatprep.mubr.msk.f32.mxu0 %vm989_vm4, %v28063_v33  ;;  %23874 = vmatprep.mubr.msk.f32.mxu1 %vm989_vm4, %v28057_v5  ;;  %v28097_v5 = vld [vmem:[#allocation2 + $0xf2] sm:$0xff] }
 0x156   : > { %8736 = vrot.lane.b32.xlu1 %v27710_v48, %s27266_s23  ;;  %v28095_v48 = vld [vmem:[#allocation2 + $0xe2] sm:$0xff]  ;;  %34280 = vst [vmem:[#allocation37_spill] sm:$0xff] %v28097_v5 }
 0x157   : > { %8738 = vrot.lane.b32.xlu0 %v27733_v62, %s27266_s23  ;;  %v28091_v62 = vld [vmem:[#allocation2 + $0xe0] sm:$0xff]  ;;  %34279 = vst [vmem:[#allocation36_spill] sm:$0xff] %v28095_v48 }
 0x158   : > { %23678 = vmatmul.mubr.msk.f32.gmra.mrb[48].mxu0 %vm989_vm4, %v28071_v30  ;;  %23875 = vmatmul.mubr.msk.f32.gmra.mrb[12].mxu1 %vm989_vm4, %v28075_v50  ;;  %v28103_v50 = vld [vmem:[#allocation2 + $0xf0] sm:$0xff] }
 0x159   : > { %23680 = vmatprep.mubr.msk.f32.mxu0 %vm989_vm4, %v28083_v12  ;;  %23877 = vmatprep.mubr.msk.f32.mxu1 %vm989_vm4, %v28077_v35  ;;  %v28117_v35 = vld [vmem:[#allocation2 + $0x10a] sm:$0xff] }
 0x15a   : > { %8740 = vrot.lane.b32.xlu1 %v27728_v60, %s27266_s23  ;;  %v28115_v60 = vld [vmem:[#allocation2 + $0xfa] sm:$0xff]  ;;  %34282 = vst [vmem:[#allocation39_spill] sm:$0xff] %v28117_v35 }
 0x15b   : > { %8742 = vrot.lane.b32.xlu0 %v27751_v8, %s27266_s23  ;;  %v28111_v8 = vld [vmem:[#allocation2 + $0xf8] sm:$0xff]  ;;  %34281 = vst [vmem:[#allocation38_spill] sm:$0xff] %v28115_v60 }
 0x15c   : > { %23681 = vmatmul.mubr.msk.f32.gmra.mrb[50].mxu0 %vm989_vm4, %v28091_v62  ;;  %23878 = vmatmul.mubr.msk.f32.gmra.mrb[14].mxu1 %vm989_vm4, %v28095_v48  ;;  %v28123_v48 = vld [vmem:[#allocation2 + $0x108] sm:$0xff] }
 0x15d   : > { %23683 = vmatprep.mubr.msk.f32.mxu0 %vm989_vm4, %v28103_v50  ;;  %23880 = vmatprep.mubr.msk.f32.mxu1 %vm989_vm4, %v28097_v5  ;;  %34283 = vst [vmem:[#allocation40_spill] sm:$0xff] %v28123_v48  ;;  %v28137_v5 = vld [vmem:[#allocation2 + $0x122] sm:$0xff] }
 0x15e   : > { %8744 = vrot.lane.b32.xlu1 %v27746_v6, %s27266_s23  ;;  %v28135_v6 = vld [vmem:[#allocation2 + $0x112] sm:$0xff]  ;;  %34285 = vst [vmem:[#allocation42_spill] sm:$0xff] %v28137_v5 }
 0x15f   : > { %8746 = vrot.lane.b32.xlu0 %v27769_v21, %s27266_s23  ;;  %v28131_v21 = vld [vmem:[#allocation2 + $0x110] sm:$0xff]  ;;  %34284 = vst [vmem:[#allocation41_spill] sm:$0xff] %v28135_v6 }
 0x160   : > { %23684 = vmatmul.mubr.msk.f32.gmra.mrb[52].mxu0 %vm989_vm4, %v28111_v8  ;;  %23881 = vmatmul.mubr.msk.f32.gmra.mrb[16].mxu1 %vm989_vm4, %v28115_v60 }
 0x161   : > { %23686 = vmatprep.mubr.msk.f32.mxu0 %vm989_vm4, %v28123_v48  ;;  %23883 = vmatprep.mubr.msk.f32.mxu1 %vm989_vm4, %v28117_v35  ;;  %v28143_v35 = vld [vmem:[#allocation2 + $0x120] sm:$0xff] }
 0x162   : > { %8748 = vrot.lane.b32.xlu1 %v27764_v16, %s27266_s23  ;;  %34286 = vst [vmem:[#allocation43_spill] sm:$0xff] %v28143_v35  ;;  %v28145_v48 = vld [vmem:[#allocation2 + $0x19] sm:$0xff]  ;;  %v28160_v16 = vld [vmem:[#allocation2 + $0x21] sm:$0xff] }
 0x163   : > { %8750 = vrot.lane.b32.xlu0 %v27787_v31, %s27266_s23  ;;  %34287 = vst [vmem:[#allocation44_spill] sm:$0xff] %v28145_v48  ;;  %v28154_v31 = vld [vmem:[#allocation2 + $0x128] sm:$0xff]  ;;  %34289 = vst [vmem:[#allocation46_spill] sm:$0xff] %v28160_v16  ;;  %v28162_v48 = vld [vmem:[#allocation2 + $0x13a] sm:$0xff] }
 0x164   : > { %23687 = vmatmul.mubr.msk.f32.gmra.mrb[54].mxu0 %vm989_vm4, %v28131_v21  ;;  %23884 = vmatmul.mubr.msk.f32.gmra.mrb[18].mxu1 %vm989_vm4, %v28135_v6  ;;  %v4765_v60 = vpop.permute.xlu0 %4764  ;;  %v28158_v6 = vld [vmem:[#allocation2 + $0x12a] sm:$0xff]  ;;  %34290 = vst [vmem:[#allocation47_spill] sm:$0xff] %v28162_v48  ;;  %v28180_v16 = vld [vmem:[#allocation2 + $0x140] sm:$0xff] }
 0x165   : > { %23689 = vmatprep.mubr.msk.f32.mxu0 %vm989_vm4, %v28143_v35  ;;  %23886 = vmatprep.mubr.msk.f32.mxu1 %vm989_vm4, %v28137_v5  ;;  %4860 = vst.msk [vmem:[#allocation2 + $0x19] sm:$0xff] %vm989_vm4, %v4765_v60  ;;  %34288 = vst [vmem:[#allocation45_spill] sm:$0xff] %v28158_v6  ;;  %v28170_v35 = vld [vmem:[#allocation2 + $0x31] sm:$0xff] }
 0x166   : > { %8752 = vrot.lane.b32.xlu1 %v27782_v29, %s27266_s23  ;;  %v28168_v29 = vld [vmem:[#allocation2 + $0x138] sm:$0xff]  ;;  %34291 = vst [vmem:[#allocation48_spill] sm:$0xff] %v28170_v35 }
 0x167   : > { %8754 = vrot.lane.b32.xlu0 %v27805_v45, %s27266_s23  ;;  %v28186_v35 = vld [vmem:[#allocation2 + $0x39] sm:$0xff] }
 0x168   : > { %23690 = vmatmul.mubr.msk.f32.gmra.mrb[56].mxu0 %vm989_vm4, %v28154_v31  ;;  %23887 = vmatmul.mubr.msk.f32.gmra.mrb[20].mxu1 %vm989_vm4, %v28158_v6  ;;  %v4769_v60 = vpop.permute.xlu1 %4768  ;;  %v4767_v5 = vpop.permute.xlu0 %4766  ;;  %v28184_v6 = vld [vmem:[#allocation2 + $0x142] sm:$0xff]  ;;  %34293 = vst [vmem:[#allocation50_spill] sm:$0xff] %v28186_v35  ;;  %v28188_v45 = vld [vmem:[#allocation2 + $0x152] sm:$0xff] }
 0x169   : > { %23692 = vmatprep.mubr.msk.f32.mxu0 %vm989_vm4, %v28168_v29  ;;  %23889 = vmatprep.mubr.msk.f32.mxu1 %vm989_vm4, %v28162_v48  ;;  %4862 = vst.msk [vmem:[#allocation2 + $0x31] sm:$0xff] %vm989_vm4, %v4769_v60  ;;  %4861 = vst.msk [vmem:[#allocation2 + $0x21] sm:$0xff] %vm989_vm4, %v4767_v5  ;;  %v28196_v48 = vld [vmem:[#allocation2 + $0x49] sm:$0xff]  ;;  %v28206_v35 = vld [vmem:[#allocation2 + $0x158] sm:$0xff] }
 0x16a   : > { %8756 = vrot.lane.b32.xlu1 %v27800_v43, %s27266_s23  ;;  %34292 = vst [vmem:[#allocation49_spill] sm:$0xff] %v28184_v6  ;;  %34294 = vst [vmem:[#allocation51_spill] sm:$0xff] %v28188_v45  ;;  %v28194_v43 = vld [vmem:[#allocation2 + $0x150] sm:$0xff] }
 0x16b   : > { %8758 = vrot.lane.b32.xlu0 %v27823_v63, %s27266_s23  ;;  %34295 = vst [vmem:[#allocation52_spill] sm:$0xff] %v28196_v48  ;;  %34296 = vst [vmem:[#allocation53_spill] sm:$0xff] %v28206_v35  ;;  %v28212_v48 = vld [vmem:[#allocation2 + $0x16a] sm:$0xff] }
 0x16c   : > { %23693 = vmatmul.mubr.msk.f32.gmra.mrb[58].mxu0 %vm989_vm4, %v28180_v16  ;;  %23890 = vmatmul.mubr.msk.f32.gmra.mrb[22].mxu1 %vm989_vm4, %v28184_v6  ;;  %v4771_v5 = vpop.permute.xlu1 %4770  ;;  %v4773_v60 = vpop.permute.xlu0 %4772  ;;  %v28210_v6 = vld [vmem:[#allocation2 + $0x15a] sm:$0xff]  ;;  %34298 = vst [vmem:[#allocation55_spill] sm:$0xff] %v28212_v48 }
 0x16d   : > { %23695 = vmatprep.mubr.msk.f32.mxu0 %vm989_vm4, %v28194_v43  ;;  %23892 = vmatprep.mubr.msk.f32.mxu1 %vm989_vm4, %v28188_v45  ;;  %4864 = vst.msk [vmem:[#allocation2 + $0x49] sm:$0xff] %vm989_vm4, %v4773_v60  ;;  %4863 = vst.msk [vmem:[#allocation2 + $0x39] sm:$0xff] %vm989_vm4, %v4771_v5  ;;  %v28218_v5 = vld [vmem:[#allocation2 + $0x168] sm:$0xff]  ;;  %v28220_v45 = vld [vmem:[#allocation2 + $0x51] sm:$0xff] }
 0x16e   : > { %8760 = vrot.lane.b32.xlu1 %v27818_v57, %s27266_s23  ;;  %34297 = vst [vmem:[#allocation54_spill] sm:$0xff] %v28210_v6  ;;  %34299 = vst [vmem:[#allocation56_spill] sm:$0xff] %v28218_v5 }
 0x16f   : > { %8762 = vrot.lane.b32.xlu0 %v27847_v13, %s27266_s23  ;;  %34300 = vst [vmem:[#allocation57_spill] sm:$0xff] %v28220_v45  ;;  %v28226_v13 = vld [vmem:[#allocation2 + $0x61] sm:$0xff]  ;;  %v28236_v45 = vld [vmem:[#allocation2 + $0x172] sm:$0xff] }
 0x170   : > { %23696 = vmatmul.mubr.msk.f32.gmra.mrb[60].mxu0 %vm989_vm4, %v28206_v35  ;;  %23893 = vmatmul.mubr.msk.f32.gmra.mrb[24].mxu1 %vm989_vm4, %v28210_v6  ;;  %v4775_v60 = vpop.permute.xlu1 %4774  ;;  %34301 = vst [vmem:[#allocation58_spill] sm:$0xff] %v28226_v13  ;;  %v1738_v6 = vld [vmem:[#allocation2 + $0x2] sm:$0xff]  ;;  %v28232_v35 = vld [vmem:[#allocation2 + $0x170] sm:$0xff]  ;;  %34302 = vst [vmem:[#allocation59_spill] sm:$0xff] %v28236_v45 }
 0x171   : > { %v4777_v57 = vpop.permute.xlu0 %4776  ;;  %23698 = vmatprep.mubr.msk.f32.mxu0 %vm989_vm4, %v28218_v5  ;;  %23895 = vmatprep.mubr.msk.f32.mxu1 %vm989_vm4, %v28212_v48  ;;  %4865 = vst.msk [vmem:[#allocation2 + $0x51] sm:$0xff] %vm989_vm4, %v4775_v60  ;;  %v28238_v5 = vld [vmem:[#allocation2 + $0x182] sm:$0xff] }
 0x172   : > { %8764 = vrot.lane.b32.xlu1 %v27839_v10, %s27266_s23  ;;  %4866 = vst.msk [vmem:[#allocation2 + $0x61] sm:$0xff] %vm989_vm4, %v4777_v57  ;;  %34303 = vst [vmem:[#allocation60_spill] sm:$0xff] %v28238_v5  ;;  %v28244_v13 = vld [vmem:[#allocation2 + $0x69] sm:$0xff]  ;;  %v28249_v10 = vld [vmem:[#allocation2 + $0x79] sm:$0xff] }
 0x173   : > { %12544 = vrot.lane.b32.xlu0 %v27576_v47, %s27267_s0  ;;  %34304 = vst [vmem:[#allocation61_spill] sm:$0xff] %v28244_v13  ;;  %v1739_v47 = vld [vmem:[#allocation2 + $0xa] sm:$0xff]  ;;  %34305 = vst [vmem:[#allocation62_spill] sm:$0xff] %v28249_v10 }
 0x174   : > { %23699 = vmatmul.mubr.msk.f32.gmra.mrb[62].mxu0 %vm989_vm4, %v28232_v35  ;;  %23896 = vmatmul.mubr.msk.f32.gmra.mrb[26].mxu1 %vm989_vm4, %v28236_v45  ;;  %v4779_v60 = vpop.permute.xlu1 %4778  ;;  %v28257_v13 = vld [vmem:[#allocation2 + $0x18a] sm:$0xff] }
 0x175   : > { %v4781_v57 = vpop.permute.xlu0 %4780  ;;  %23898 = vmatprep.mubr.msk.f32.mxu1 %vm989_vm4, %v28238_v5  ;;  %23703 = vmatprep.mubr.msk.f32.mxu0 %vm989_vm4, %v1738_v6  ;;  %4867 = vst.msk [vmem:[#allocation2 + $0x69] sm:$0xff] %vm989_vm4, %v4779_v60  ;;  %34306 = vst [vmem:[#allocation63_spill] sm:$0xff] %v28257_v13  ;;  %v28262_v5 = vld [vmem:[#allocation2 + $0x81] sm:$0xff] }
 0x176   : > { %12546 = vrot.lane.b32.xlu1 %v27574_v46, %s27267_s0  ;;  %4868 = vst.msk [vmem:[#allocation2 + $0x79] sm:$0xff] %vm989_vm4, %v4781_v57  ;;  %v28268_v46 = vld [vmem:[#allocation2 + $0x91] sm:$0xff]  ;;  %v28347_v57 = vld [vmem:[#allocation2 + $0xe1] sm:$0xff] }
 0x177   : > { %12548 = vrot.lane.b32.xlu0 %v27588_v53, %s27267_s0 }
 0x178   : > { %23704 = vmatmul.mubr.msk.f32.vlgmr.msra.gmra.mrb[32].mxu0 %vm989_vm4, %v1739_v47  ;;  %23899 = vmatmul.mubr.msk.f32.gmra.mrb[28].mxu1 %vm989_vm4, %v28257_v13  ;;  %v4783_v6 = vpop.permute.xlu1 %4782  ;;  %v34314_v13 = vld [vmem:[#allocation35_spill] sm:$0xff] }
 0x179   : > { %v4785_v10 = vpop.permute.xlu0 %4784  ;;  %23706 = vmatprep.mubr.msk.f32.mxu0 %vm989_vm4, %v27900_v27  ;;  %23903 = vmatprep.mubr.msk.f32.mxu1 %vm989_vm4, %v27932_v39  ;;  %4869 = vst.msk [vmem:[#allocation2 + $0x81] sm:$0xff] %vm989_vm4, %v4783_v6  ;;  %v28289_v27 = vld [vmem:[#allocation2 + $0x99] sm:$0xff] }
 0x17a   : > { %12550 = vrot.lane.b32.xlu1 %v27586_v52, %s27267_s0  ;;  %23752 = vmatpush3.msk.msra.mxu0 %vm1185_vm0, %v27910_v32  ;;  %4870 = vst.msk [vmem:[#allocation2 + $0x91] sm:$0xff] %vm989_vm4, %v4785_v10  ;;  %v28287_v52 = vld [vmem:[%s33870_s3 + $0x20] sm:$0xf]  ;;  %v28311_v32 = vld [vmem:[#allocation2 + $0xb1] sm:$0xff] }
 0x17b   : > { %12552 = vrot.lane.b32.xlu0 %v27602_v59, %s27267_s0  ;;  %23801 = vmatprep.subr.msk.mxu0 %vm1185_vm0, %v27542_v37  ;;  %v28295_v37 = vld [vmem:[#allocation2 + $0xa9] sm:$0xff]  ;;  %v28365_v6 = vld [vmem:[#allocation2 + $0xf9] sm:$0xff] }
 0x17c   : > { %23707 = vmatmul.mubr.msk.f32.gmra.mrb[34].mxu0 %vm989_vm4, %v27924_v36  ;;  %23904 = vmatmul.mubr.msk.f32.vlgmr.msra.gmra.mrb[30].mxu1 %vm989_vm4, %v27949_v44  ;;  %v4787_v53 = vpop.permute.xlu1 %4786 }
 0x17d   : > { %23952 = vmatpush3.msk.msra.mxu1 %vm1185_vm0, %v27937_v40  ;;  %v4789_v59 = vpop.permute.xlu0 %4788  ;;  %23709 = vmatprep.mubr.msk.f32.mxu0 %vm989_vm4, %v27939_v42  ;;  %4871 = vst.msk [vmem:[#allocation2 + $0x99] sm:$0xff] %vm989_vm4, %v4787_v53  ;;  %v28329_v40 = vld [vmem:[#allocation2 + $0xc9] sm:$0xff] }
 0x17e   : > { %23906 = vmatprep.mubr.msk.f32.mxu1 %vm989_vm4, %v27963_v51  ;;  %12554 = vrot.lane.b32.xlu1 %v27600_v58, %s27267_s0  ;;  %4872 = vst.msk [vmem:[#allocation2 + $0xa9] sm:$0xff] %vm989_vm4, %v4789_v59  ;;  %v28317_v58 = vld [vmem:[#allocation2 + $0xc1] sm:$0xff]  ;;  %v28383_v59 = vld [vmem:[#allocation2 + $0x111] sm:$0xff] }
 0x17f   : > { %12556 = vrot.lane.b32.xlu0 %v27617_v3, %s27267_s0  ;;  %24001 = vmatprep.subr.msk.mxu1 %vm1185_vm0, %v28287_v52 }
 0x180   : > { %23710 = vmatmul.mubr.msk.f32.gmra.mrb[36].mxu0 %vm989_vm4, %v27953_v49  ;;  %23907 = vmatmul.mubr.msk.f32.gmra.mrb[0].mxu1 %vm989_vm4, %v27971_v54  ;;  %v4791_v10 = vpop.permute.xlu1 %4790 }
 0x181   : > { %v4793_v36 = vpop.permute.xlu0 %4792  ;;  %23712 = vmatprep.mubr.msk.f32.mxu0 %vm989_vm4, %v27957_v17  ;;  %23909 = vmatprep.mubr.msk.f32.mxu1 %vm989_vm4, %v27983_v61  ;;  %4873 = vst.msk [vmem:[#allocation2 + $0xb1] sm:$0xff] %vm989_vm4, %v4791_v10 }
 0x182   : > { %12558 = vrot.lane.b32.xlu1 %v27614_v1, %s27267_s0  ;;  %4874 = vst.msk [vmem:[#allocation2 + $0xc1] sm:$0xff] %vm989_vm4, %v4793_v36  ;;  %v28335_v1 = vld [vmem:[#allocation2 + $0xd9] sm:$0xff] }
 0x183   : > { %12560 = vrot.lane.b32.xlu0 %v27634_v11, %s27267_s0  ;;  %v34308_v36 = vld [vmem:[#allocation7_spill] sm:$0xff] }
 0x184   : > { %23713 = vmatmul.mubr.msk.f32.gmra.mrb[38].mxu0 %vm989_vm4, %v27975_v55  ;;  %23910 = vmatmul.mubr.msk.f32.gmra.mrb[2].mxu1 %vm989_vm4, %v27991_v0  ;;  %v4795_v3 = vpop.permute.xlu1 %4794 }
 0x185   : > { %v4797_v60 = vpop.permute.xlu0 %4796  ;;  %23715 = vmatprep.mubr.msk.f32.mxu0 %vm989_vm4, %v27977_v56  ;;  %23912 = vmatprep.mubr.msk.f32.mxu1 %vm989_vm4, %v28003_v7  ;;  %4875 = vst.msk [vmem:[#allocation2 + $0xc9] sm:$0xff] %vm989_vm4, %v4795_v3  ;;  %v34309_v3 = vld [vmem:[#allocation32_spill] sm:$0xff] }
 0x186   : > { %12562 = vrot.lane.b32.xlu1 %v27629_v9, %s27267_s0  ;;  %4876 = vst.msk [vmem:[#allocation2 + $0xd9] sm:$0xff] %vm989_vm4, %v4797_v60  ;;  %v28353_v9 = vld [vmem:[#allocation2 + $0xf1] sm:$0xff] }
 0x187   : > { %12564 = vrot.lane.b32.xlu0 %v27659_v20, %s27267_s0 }
 0x188   : > { %23716 = vmatmul.mubr.msk.f32.gmra.mrb[40].mxu0 %vm989_vm4, %v27995_v2  ;;  %23913 = vmatmul.mubr.msk.f32.gmra.mrb[4].mxu1 %vm989_vm4, %v28011_v19  ;;  %v4799_v11 = vpop.permute.xlu1 %4798 }
 0x189   : > { %v4801_v47 = vpop.permute.xlu0 %4800  ;;  %23718 = vmatprep.mubr.msk.f32.mxu0 %vm989_vm4, %v27997_v4  ;;  %23915 = vmatprep.mubr.msk.f32.mxu1 %vm989_vm4, %v28023_v25  ;;  %4877 = vst.msk [vmem:[#allocation2 + $0xe1] sm:$0xff] %vm989_vm4, %v4799_v11  ;;  %v28401_v11 = vld [vmem:[#allocation2 + $0x129] sm:$0xff] }
 0x18a   : > { %12566 = vrot.lane.b32.xlu1 %v27654_v18, %s27267_s0  ;;  %4878 = vst.msk [vmem:[#allocation2 + $0xf1] sm:$0xff] %vm989_vm4, %v4801_v47  ;;  %v28371_v18 = vld [vmem:[#allocation2 + $0x109] sm:$0xff] }
 0x18b   : > { %12568 = vrot.lane.b32.xlu0 %v27679_v28, %s27267_s0 }
 0x18c   : > { %23719 = vmatmul.mubr.msk.f32.gmra.mrb[42].mxu0 %vm989_vm4, %v28015_v24  ;;  %23916 = vmatmul.mubr.msk.f32.gmra.mrb[6].mxu1 %vm989_vm4, %v28031_v23  ;;  %v4803_v20 = vpop.permute.xlu1 %4802 }
 0x18d   : > { %v4805_v53 = vpop.permute.xlu0 %4804  ;;  %23721 = vmatprep.mubr.msk.f32.mxu0 %vm989_vm4, %v28017_v34  ;;  %23918 = vmatprep.mubr.msk.f32.mxu1 %vm989_vm4, %v28043_v14  ;;  %4879 = vst.msk [vmem:[#allocation2 + $0xf9] sm:$0xff] %vm989_vm4, %v4803_v20  ;;  %v34310_v20 = vld [vmem:[#allocation33_spill] sm:$0xff] }
 0x18e   : > { %12570 = vrot.lane.b32.xlu1 %v27674_v26, %s27267_s0  ;;  %4880 = vst.msk [vmem:[#allocation2 + $0x109] sm:$0xff] %vm989_vm4, %v4805_v53  ;;  %v28389_v26 = vld [vmem:[#allocation2 + $0x121] sm:$0xff]  ;;  %v34311_v53 = vld [vmem:[#allocation6_spill] sm:$0xff] }
 0x18f   : > { %12572 = vrot.lane.b32.xlu0 %v27697_v38, %s27267_s0  ;;  %v34307_v38 = vld [vmem:[#allocation5_spill] sm:$0xff] }
 0x190   : > { %23722 = vmatmul.mubr.msk.f32.gmra.mrb[44].mxu0 %vm989_vm4, %v28035_v22  ;;  %23919 = vmatmul.mubr.msk.f32.gmra.mrb[8].mxu1 %vm989_vm4, %v28051_v41  ;;  %v4807_v28 = vpop.permute.xlu1 %4806 }
 0x191   : > { %v4809_v10 = vpop.permute.xlu0 %4808  ;;  %23724 = vmatprep.mubr.msk.f32.mxu0 %vm989_vm4, %v28037_v15  ;;  %23921 = vmatprep.mubr.msk.f32.mxu1 %vm989_vm4, %v28063_v33  ;;  %4881 = vst.msk [vmem:[#allocation2 + $0x111] sm:$0xff] %vm989_vm4, %v4807_v28  ;;  %v34312_v28 = vld [vmem:[#allocation9_spill] sm:$0xff]  ;;  %v34328_v15 = vld [vmem:[#allocation42_spill] sm:$0xff] }
 0x192   : > { %12574 = vrot.lane.b32.xlu1 %v34307_v38, %s27267_s0  ;;  %4882 = vst.msk [vmem:[#allocation2 + $0x121] sm:$0xff] %vm989_vm4, %v4809_v10  ;;  %v34313_v10 = vld [vmem:[#allocation34_spill] sm:$0xff] }
 0x193   : > { %12576 = vrot.lane.b32.xlu0 %v34308_v36, %s27267_s0 }
 0x194   : > { %23725 = vmatmul.mubr.msk.f32.gmra.mrb[46].mxu0 %vm989_vm4, %v34309_v3  ;;  %23922 = vmatmul.mubr.msk.f32.gmra.mrb[10].mxu1 %vm989_vm4, %v28071_v30  ;;  %v4811_v60 = vpop.permute.xlu1 %4810  ;;  %v34323_v3 = vld [vmem:[#allocation39_spill] sm:$0xff] }
 0x195   : > { %v4813_v47 = vpop.permute.xlu0 %4812  ;;  %23727 = vmatprep.mubr.msk.f32.mxu0 %vm989_vm4, %v34310_v20  ;;  %23924 = vmatprep.mubr.msk.f32.mxu1 %vm989_vm4, %v28083_v12  ;;  %4883 = vst.msk [vmem:[#allocation2 + $0x129] sm:$0xff] %vm989_vm4, %v4811_v60  ;;  %v34315_v60 = vld [vmem:[#allocation8_spill] sm:$0xff] }
 0x196   : > { %12578 = vrot.lane.b32.xlu1 %v34311_v53, %s27267_s0  ;;  %4884 = vst.msk [vmem:[#allocation2 + $0x139] sm:$0xff] %vm989_vm4, %v4813_v47  ;;  %v34316_v47 = vld [vmem:[#allocation11_spill] sm:$0xff]  ;;  %v34317_v53 = vld [vmem:[#allocation36_spill] sm:$0xff] }
 0x197   : > { %12580 = vrot.lane.b32.xlu0 %v34312_v28, %s27267_s0 }
 0x198   : > { %23728 = vmatmul.mubr.msk.f32.gmra.mrb[48].mxu0 %vm989_vm4, %v34313_v10  ;;  %23925 = vmatmul.mubr.msk.f32.gmra.mrb[12].mxu1 %vm989_vm4, %v28091_v62  ;;  %v4815_v38 = vpop.permute.xlu1 %4814  ;;  %v34318_v10 = vld [vmem:[#allocation37_spill] sm:$0xff] }
 0x199   : > { %v4817_v36 = vpop.permute.xlu0 %4816  ;;  %23730 = vmatprep.mubr.msk.f32.mxu0 %vm989_vm4, %v34314_v13  ;;  %23927 = vmatprep.mubr.msk.f32.mxu1 %vm989_vm4, %v28103_v50  ;;  %4885 = vst.msk [vmem:[#allocation2 + $0x141] sm:$0xff] %vm989_vm4, %v4815_v38  ;;  %v34319_v38 = vld [vmem:[#allocation40_spill] sm:$0xff] }
 0x19a   : > { %12582 = vrot.lane.b32.xlu1 %v34315_v60, %s27267_s0  ;;  %4886 = vst.msk [vmem:[#allocation2 + $0x151] sm:$0xff] %vm989_vm4, %v4817_v36  ;;  %v34320_v36 = vld [vmem:[#allocation10_spill] sm:$0xff]  ;;  %v34321_v60 = vld [vmem:[#allocation13_spill] sm:$0xff] }
 0x19b   : > { %12584 = vrot.lane.b32.xlu0 %v34316_v47, %s27267_s0  ;;  %v34322_v47 = vld [vmem:[#allocation38_spill] sm:$0xff] }
 0x19c   : > { %23731 = vmatmul.mubr.msk.f32.gmra.mrb[50].mxu0 %vm989_vm4, %v34317_v53  ;;  %23928 = vmatmul.mubr.msk.f32.gmra.mrb[14].mxu1 %vm989_vm4, %v28111_v8  ;;  %v4819_v28 = vpop.permute.xlu1 %4818  ;;  %v28445_v53 = vld [vmem:[#allocation2 + $0x188] sm:$0xff] }
 0x19d   : > { %v4821_v13 = vpop.permute.xlu0 %4820  ;;  %23733 = vmatprep.mubr.msk.f32.mxu0 %vm989_vm4, %v34318_v10  ;;  %23930 = vmatprep.mubr.msk.f32.mxu1 %vm989_vm4, %v34319_v38  ;;  %4887 = vst.msk [vmem:[#allocation2 + $0x159] sm:$0xff] %vm989_vm4, %v4819_v28  ;;  %v34324_v28 = vld [vmem:[#allocation43_spill] sm:$0xff] }
 0x19e   : > { %12586 = vrot.lane.b32.xlu1 %v34320_v36, %s27267_s0  ;;  %4888 = vst.msk [vmem:[#allocation2 + $0x169] sm:$0xff] %vm989_vm4, %v4821_v13  ;;  %v28451_v13 = vld [vmem:[#allocation2 + $0x180] sm:$0xff]  ;;  %v34325_v36 = vld [vmem:[#allocation12_spill] sm:$0xff] }
 0x19f   : > { %12588 = vrot.lane.b32.xlu0 %v34321_v60, %s27267_s0  ;;  %v34326_v60 = vld [vmem:[#allocation15_spill] sm:$0xff] }
 0x1a0   : > { %23734 = vmatmul.mubr.msk.f32.gmra.mrb[52].mxu0 %vm989_vm4, %v34322_v47  ;;  %23931 = vmatmul.mubr.msk.f32.gmra.mrb[16].mxu1 %vm989_vm4, %v28131_v21  ;;  %v4823_v10 = vpop.permute.xlu1 %4822  ;;  %v34327_v47 = vld [vmem:[#allocation41_spill] sm:$0xff] }
 0x1a1   : > { %v4825_v20 = vpop.permute.xlu0 %4824  ;;  %23736 = vmatprep.mubr.msk.f32.mxu0 %vm989_vm4, %v34323_v3  ;;  %23933 = vmatprep.mubr.msk.f32.mxu1 %vm989_vm4, %v34324_v28  ;;  %4889 = vst.msk [vmem:[#allocation2 + $0x171] sm:$0xff] %vm989_vm4, %v4823_v10  ;;  %v34330_v10 = vld [vmem:[#allocation17_spill] sm:$0xff] }
 0x1a2   : > { %12590 = vrot.lane.b32.xlu1 %v34325_v36, %s27267_s0  ;;  %4890 = vst.msk [vmem:[#allocation2 + $0x181] sm:$0xff] %vm989_vm4, %v4825_v20  ;;  %v34329_v20 = vld [vmem:[#allocation14_spill] sm:$0xff]  ;;  %v34331_v36 = vld [vmem:[#allocation45_spill] sm:$0xff] }
 0x1a3   : > { %12592 = vrot.lane.b32.xlu0 %v34326_v60, %s27267_s0  ;;  %v34332_v60 = vld [vmem:[#allocation47_spill] sm:$0xff] }
 0x1a4   : > { %23737 = vmatmul.mubr.msk.f32.gmra.mrb[54].mxu0 %vm989_vm4, %v34327_v47  ;;  %23934 = vmatmul.mubr.msk.f32.gmra.mrb[18].mxu1 %vm989_vm4, %v28154_v31  ;;  %v4827_v3 = vpop.permute.xlu1 %4826  ;;  %v34340_v47 = vld [vmem:[#allocation54_spill] sm:$0xff] }
 0x1a5   : > { %23739 = vmatprep.mubr.msk.f32.mxu0 %vm989_vm4, %v34328_v15  ;;  %23936 = vmatprep.mubr.msk.f32.mxu1 %vm989_vm4, %v28168_v29  ;;  %4891 = vst.msk [vmem:[#allocation2 + $0x189] sm:$0xff] %vm989_vm4, %v4827_v3  ;;  %v34333_v3 = vld [vmem:[#allocation16_spill] sm:$0xff] }
 0x1a6   : > { %12594 = vrot.lane.b32.xlu1 %v34329_v20, %s27267_s0  ;;  %v34334_v20 = vld [vmem:[#allocation49_spill] sm:$0xff]  ;;  %v34337_v15 = vld [vmem:[#allocation56_spill] sm:$0xff] }
 0x1a7   : > { %12596 = vrot.lane.b32.xlu0 %v34330_v10, %s27267_s0  ;;  %v34335_v10 = vld [vmem:[#allocation53_spill] sm:$0xff] }
 0x1a8   : > { %23740 = vmatmul.mubr.msk.f32.gmra.mrb[56].mxu0 %vm989_vm4, %v34331_v36  ;;  %23937 = vmatmul.mubr.msk.f32.gmra.mrb[20].mxu1 %vm989_vm4, %v28180_v16  ;;  %v34336_v36 = vld [vmem:[#allocation51_spill] sm:$0xff] }
 0x1a9   : > { %23742 = vmatprep.mubr.msk.f32.mxu0 %vm989_vm4, %v34332_v60  ;;  %23939 = vmatprep.mubr.msk.f32.mxu1 %vm989_vm4, %v28194_v43  ;;  %v34338_v60 = vld [vmem:[#allocation18_spill] sm:$0xff] }
 0x1aa   : > { %12598 = vrot.lane.b32.xlu1 %v34333_v3, %s27267_s0  ;;  %v34339_v3 = vld [vmem:[#allocation22_spill] sm:$0xff] }
 0x1ab   : > { %12600 = vrot.lane.b32.xlu0 %v27823_v63, %s27267_s0  ;;  %v34341_v63 = vld [vmem:[#allocation20_spill] sm:$0xff] }
 0x1ac   : > { %23743 = vmatmul.mubr.msk.f32.gmra.mrb[58].mxu0 %vm989_vm4, %v34334_v20  ;;  %23940 = vmatmul.mubr.msk.f32.gmra.mrb[22].mxu1 %vm989_vm4, %v34335_v10 }
 0x1ad   : > { %23745 = vmatprep.mubr.msk.f32.mxu0 %vm989_vm4, %v34336_v36  ;;  %23942 = vmatprep.mubr.msk.f32.mxu1 %vm989_vm4, %v34337_v15  ;;  %v3329_v36 = vld [vmem:[#allocation2 + $0x198] sm:$0xff] }
 0x1ae   : > { %12602 = vrot.lane.b32.xlu1 %v34338_v60, %s27267_s0  ;;  %v34342_v60 = vld [vmem:[#allocation29_spill] sm:$0xff] }
 0x1af   : > { %12604 = vrot.lane.b32.xlu0 %v34339_v3, %s27267_s0  ;;  %v3330_v3 = vld [vmem:[#allocation2 + $0x1a0] sm:$0xff] }
 0x1b0   : > { %23746 = vmatmul.mubr.msk.f32.gmra.mrb[60].mxu0 %vm989_vm4, %v34340_v47  ;;  %23943 = vmatmul.mubr.msk.f32.gmra.mrb[24].mxu1 %vm989_vm4, %v28232_v35 }
 0x1b1   : > { %23748 = vmatprep.mubr.msk.f32.mxu0 %vm989_vm4, %v28212_v48  ;;  %23945 = vmatprep.mubr.msk.f32.mxu1 %vm989_vm4, %v28451_v13  ;;  %v34343_v48 = vld [vmem:[#allocation30_spill] sm:$0xff] }
 0x1b2   : > { %12606 = vrot.lane.b32.xlu1 %v34341_v63, %s27267_s0  ;;  %v34344_v63 = vld [vmem:[#allocation48_spill] sm:$0xff]  ;;  %s27271_s0 = smov 12  }
 0x1b4   : > { %23749 = vmatmul.mubr.msk.f32.gmra.mrb[62].mxu0 %vm989_vm4, %v28236_v45  ;;  %23946 = vmatmul.mubr.msk.f32.gmra.mrb[26].mxu1 %vm989_vm4, %v28445_v53  ;;  %v27223_v45 = vld [vmem:[%s33870_s3 + $0x10] sm:$0xf] }
 0x1b5   : > { %23753 = vmatprep.mubr.msk.f32.mxu0 %vm989_vm4, %v34342_v60  ;;  %23948 = vmatprep.mubr.msk.f32.mxu1 %vm989_vm4, %v3329_v36  ;;  %v34345_v36 = vld [vmem:[#allocation50_spill] sm:$0xff] }
 0x1b8   : > { %23754 = vmatmul.mubr.msk.f32.vlgmr.msra.gmra.mrb[32].mxu0 %vm989_vm4, %v34343_v48  ;;  %23949 = vmatmul.mubr.msk.f32.gmra.mrb[28].mxu1 %vm989_vm4, %v3330_v3  ;;  %v34346_v48 = vld [vmem:[#allocation52_spill] sm:$0xff] }
 0x1b9   : > { %23756 = vmatprep.mubr.msk.f32.mxu0 %vm989_vm4, %v27932_v39  ;;  %23953 = vmatprep.mubr.msk.f32.mxu1 %vm989_vm4, %v34344_v63  ;;  %v34347_v39 = vld [vmem:[#allocation57_spill] sm:$0xff] }
 0x1ba   : > { %23802 = vmatpush3.msk.msra.mxu0 %vm1185_vm0, %v27223_v45  ;;  %v34348_v45 = vld [vmem:[#allocation58_spill] sm:$0xff] }
 0x1bc   : > { %23757 = vmatmul.mubr.msk.f32.gmra.mrb[34].mxu0 %vm989_vm4, %v27949_v44  ;;  %23954 = vmatmul.mubr.msk.f32.vlgmr.msra.gmra.mrb[30].mxu1 %vm989_vm4, %v34345_v36  ;;  %v34349_v44 = vld [vmem:[#allocation61_spill] sm:$0xff] }
 0x1bd   : > { %24002 = vmatpush3.msk.msra.mxu1 %vm1185_vm0, %v28287_v52  ;;  %23759 = vmatprep.mubr.msk.f32.mxu0 %vm989_vm4, %v27963_v51  ;;  %v34350_v51 = vld [vmem:[#allocation62_spill] sm:$0xff]  ;;  %v4959_v52 = vld [vmem:[#allocation2 + $0x9] sm:$0xff] }
 0x1be   : > { %23956 = vmatprep.mubr.msk.f32.mxu1 %vm989_vm4, %v34346_v48 }
 0x1c0   : > { %23760 = vmatmul.mubr.msk.f32.gmra.mrb[36].mxu0 %vm989_vm4, %v27971_v54  ;;  %23957 = vmatmul.mubr.msk.f32.gmra.mrb[0].mxu1 %vm989_vm4, %v34347_v39  ;;  %v34371_v54 = vld [vmem:[#allocation42_spill] sm:$0xff] }
 0x1c1   : > { %23762 = vmatprep.mubr.msk.f32.mxu0 %vm989_vm4, %v27983_v61  ;;  %23959 = vmatprep.mubr.msk.f32.mxu1 %vm989_vm4, %v34348_v45  ;;  %v34374_v61 = vld [vmem:[#allocation51_spill] sm:$0xff] }
 0x1c4   : > { %23763 = vmatmul.mubr.msk.f32.gmra.mrb[38].mxu0 %vm989_vm4, %v27991_v0  ;;  %23960 = vmatmul.mubr.msk.f32.gmra.mrb[2].mxu1 %vm989_vm4, %v34349_v44  ;;  %v34375_v0 = vld [vmem:[#allocation55_spill] sm:$0xff] }
 0x1c5   : > { %23765 = vmatprep.mubr.msk.f32.mxu0 %vm989_vm4, %v28003_v7  ;;  %23962 = vmatprep.mubr.msk.f32.mxu1 %vm989_vm4, %v34350_v51  ;;  %v4109_v7 = vld [vmem:[#allocation2 + $0x19a] sm:$0xff] }
 0x1c8   : > { %23766 = vmatmul.mubr.msk.f32.gmra.mrb[40].mxu0 %vm989_vm4, %v28011_v19  ;;  %23963 = vmatmul.mubr.msk.f32.gmra.mrb[4].mxu1 %vm989_vm4, %v28262_v5  ;;  %v34378_v19 = vld [vmem:[#allocation63_spill] sm:$0xff]  ;;  %v20816_v5 = vld [vmem:[%s33872_s5 + $0x8] sm:$0xff] }
 0x1c9   : > { %23768 = vmatprep.mubr.msk.f32.mxu0 %vm989_vm4, %v28023_v25  ;;  %23965 = vmatprep.mubr.msk.f32.mxu1 %vm989_vm4, %v28268_v46  ;;  %v34363_v25 = vld [vmem:[#allocation33_spill] sm:$0xff]  ;;  %v4958_v46 = vld [vmem:[#allocation2 + $0x1] sm:$0xff] }
 0x1ca   : > { %24051 = vmatprep.subr.mxu0 %v20816_v5 }
 0x1cc   : > { %23769 = vmatmul.mubr.msk.f32.gmra.mrb[42].mxu0 %vm989_vm4, %v28031_v23  ;;  %23966 = vmatmul.mubr.msk.f32.gmra.mrb[6].mxu1 %vm989_vm4, %v28289_v27  ;;  %v34362_v23 = vld [vmem:[#allocation32_spill] sm:$0xff]  ;;  %v4957_v27 = vld [vmem:[%s33872_s5] sm:$0xff] }
 0x1cd   : > { %23771 = vmatprep.mubr.msk.f32.mxu0 %vm989_vm4, %v28043_v14  ;;  %23968 = vmatprep.mubr.msk.f32.mxu1 %vm989_vm4, %v28295_v37  ;;  %v34360_v14 = vld [vmem:[#allocation46_spill] sm:$0xff]  ;;  %v28718_v37 = vpop.permute.xlu1 %8704 }
 0x1d0   : > { %23772 = vmatmul.mubr.msk.f32.gmra.mrb[44].mxu0 %vm989_vm4, %v28051_v41  ;;  %23969 = vmatmul.mubr.msk.f32.gmra.mrb[8].mxu1 %vm989_vm4, %v28311_v32  ;;  %v34359_v41 = vld [vmem:[#allocation44_spill] sm:$0xff]  ;;  %v28720_v32 = vpop.permute.xlu0 %8702 }
 0x1d1   : > { %23774 = vmatprep.mubr.msk.f32.mxu0 %vm989_vm4, %v28063_v33  ;;  %23971 = vmatprep.mubr.msk.f32.mxu1 %vm989_vm4, %v28317_v58  ;;  %v34365_v33 = vld [vmem:[#allocation35_spill] sm:$0xff] }
 0x1d4   : > { %23775 = vmatmul.mubr.msk.f32.gmra.mrb[46].mxu0 %vm989_vm4, %v28071_v30  ;;  %23972 = vmatmul.mubr.msk.f32.gmra.mrb[10].mxu1 %vm989_vm4, %v28329_v40  ;;  %v34364_v30 = vld [vmem:[#allocation34_spill] sm:$0xff]  ;;  %v28724_v40 = vpop.permute.xlu1 %8708 }
 0x1d5   : > { %23777 = vmatprep.mubr.msk.f32.mxu0 %vm989_vm4, %v28083_v12  ;;  %23974 = vmatprep.mubr.msk.f32.mxu1 %vm989_vm4, %v28335_v1  ;;  %v34358_v12 = vld [vmem:[#allocation28_spill] sm:$0xff] }
 0x1d8   : > { %23778 = vmatmul.mubr.msk.f32.gmra.mrb[48].mxu0 %vm989_vm4, %v28091_v62  ;;  %23975 = vmatmul.mubr.msk.f32.gmra.mrb[12].mxu1 %vm989_vm4, %v28347_v57  ;;  %v34352_v62 = vld [vmem:[#allocation21_spill] sm:$0xff]  ;;  %v28728_v57 = vpop.permute.xlu0 %8706 }
 0x1d9   : > { %23780 = vmatprep.mubr.msk.f32.mxu0 %vm989_vm4, %v28103_v50  ;;  %23977 = vmatprep.mubr.msk.f32.mxu1 %vm989_vm4, %v28353_v9  ;;  %v34351_v50 = vld [vmem:[#allocation19_spill] sm:$0xff] }
 0x1dc   : > { %23781 = vmatmul.mubr.msk.f32.gmra.mrb[50].mxu0 %vm989_vm4, %v28111_v8  ;;  %23978 = vmatmul.mubr.msk.f32.gmra.mrb[14].mxu1 %vm989_vm4, %v28365_v6  ;;  %v34353_v8 = vld [vmem:[#allocation23_spill] sm:$0xff] }
 0x1dd   : > { %23783 = vmatprep.mubr.msk.f32.mxu0 %vm989_vm4, %v34319_v38  ;;  %23980 = vmatprep.mubr.msk.f32.mxu1 %vm989_vm4, %v28371_v18  ;;  %v28734_v18 = vpop.permute.xlu1 %8712 }
 0x1e0   : > { %23784 = vmatmul.mubr.msk.f32.gmra.mrb[52].mxu0 %vm989_vm4, %v28131_v21  ;;  %23981 = vmatmul.mubr.msk.f32.gmra.mrb[16].mxu1 %vm989_vm4, %v28383_v59  ;;  %v34354_v21 = vld [vmem:[#allocation24_spill] sm:$0xff]  ;;  %v28736_v59 = vpop.permute.xlu0 %8710 }
 0x1e1   : > { %23786 = vmatprep.mubr.msk.f32.mxu0 %vm989_vm4, %v34324_v28  ;;  %23983 = vmatprep.mubr.msk.f32.mxu1 %vm989_vm4, %v28389_v26 }
 0x1e4   : > { %23787 = vmatmul.mubr.msk.f32.gmra.mrb[54].mxu0 %vm989_vm4, %v28154_v31  ;;  %23984 = vmatmul.mubr.msk.f32.gmra.mrb[18].mxu1 %vm989_vm4, %v28401_v11  ;;  %v34357_v31 = vld [vmem:[#allocation27_spill] sm:$0xff] }
 0x1e5   : > { %23789 = vmatprep.mubr.msk.f32.mxu0 %vm989_vm4, %v28168_v29  ;;  %23986 = vmatprep.mubr.msk.f32.mxu1 %vm989_vm4, %v34351_v50  ;;  %v34355_v29 = vld [vmem:[#allocation25_spill] sm:$0xff] }
 0x1e8   : > { %23790 = vmatmul.mubr.msk.f32.gmra.mrb[56].mxu0 %vm989_vm4, %v28180_v16  ;;  %23987 = vmatmul.mubr.msk.f32.gmra.mrb[20].mxu1 %vm989_vm4, %v34352_v62  ;;  %v34356_v16 = vld [vmem:[#allocation26_spill] sm:$0xff] }
 0x1e9   : > { %23792 = vmatprep.mubr.msk.f32.mxu0 %vm989_vm4, %v28194_v43  ;;  %23989 = vmatprep.mubr.msk.f32.mxu1 %vm989_vm4, %v34353_v8  ;;  %v3719_v43 = vld [vmem:[#allocation2 + $0x199] sm:$0xff] }
 0x1ec   : > { %23793 = vmatmul.mubr.msk.f32.gmra.mrb[58].mxu0 %vm989_vm4, %v34335_v10  ;;  %23990 = vmatmul.mubr.msk.f32.gmra.mrb[22].mxu1 %vm989_vm4, %v34354_v21 }
 0x1ed   : > { %23795 = vmatprep.mubr.msk.f32.mxu0 %vm989_vm4, %v34337_v15  ;;  %23992 = vmatprep.mubr.msk.f32.mxu1 %vm989_vm4, %v34355_v29  ;;  %v34361_v15 = vld [vmem:[#allocation31_spill] sm:$0xff] }
 0x1f0   : > { %23796 = vmatmul.mubr.msk.f32.gmra.mrb[60].mxu0 %vm989_vm4, %v28232_v35  ;;  %23993 = vmatmul.mubr.msk.f32.gmra.mrb[24].mxu1 %vm989_vm4, %v34356_v16  ;;  %v3720_v35 = vld [vmem:[#allocation2 + $0x1a1] sm:$0xff] }
 0x1f1   : > { %23798 = vmatprep.mubr.msk.f32.mxu0 %vm989_vm4, %v28451_v13  ;;  %23995 = vmatprep.mubr.msk.f32.mxu1 %vm989_vm4, %v34357_v31  ;;  %v28754_v13 = vpop.permute.xlu0 %8714 }
 0x1f4   : > { %23799 = vmatmul.mubr.msk.f32.gmra.mrb[62].mxu0 %vm989_vm4, %v28445_v53  ;;  %23996 = vmatmul.mubr.msk.f32.gmra.mrb[26].mxu1 %vm989_vm4, %v34358_v12  ;;  %v28745_v53 = vld [vmem:[%s33872_s5 + $0x10] sm:$0xff] }
 0x1f5   : > { %23803 = vmatprep.mubr.msk.f32.mxu0 %vm989_vm4, %v34359_v41  ;;  %23998 = vmatprep.mubr.msk.f32.mxu1 %vm989_vm4, %v3719_v43  ;;  %34379 = vst [vmem:[#allocation5_spill] sm:$0xff] %v28745_v53  ;;  %v28762_v3 = vpop.permute.xlu0 %8718 }
 0x1f8   : > { %23804 = vmatmul.mubr.msk.f32.vlgmr.msra.gmra.mrb[32].mxu0 %vm989_vm4, %v34360_v14  ;;  %23999 = vmatmul.mubr.msk.f32.gmra.mrb[28].mxu1 %vm989_vm4, %v3720_v35 }
 0x1f9   : > { %24003 = vmatprep.mubr.msk.f32.mxu1 %vm989_vm4, %v27939_v42  ;;  %v34366_v42 = vld [vmem:[#allocation36_spill] sm:$0xff]  ;;  %24052 = vmatpush3.msra.mxu0 %v20816_v5  ;;  %v28774_v44 = vpop.permute.xlu0 %8722 }
 0x1fa   : > { %24053 = vmatprep.mubr.msk.f32.mxu0 %vm634_vm1, %v4958_v46  ;;  %24101 = vmatprep.subr.mxu0 %v4957_v27 }
 0x1fc   : > { %24004 = vmatmul.mubr.msk.f32.vlgmr.msra.gmra.mrb[30].mxu1 %vm989_vm4, %v27953_v49  ;;  %v34369_v49 = vld [vmem:[#allocation39_spill] sm:$0xff]  ;;  %24054 = vmatmul.mubr.msk.f32.vlgmr.msra.gmra.mrb[64].mxu0 %vm634_vm1, %v4959_v52 }
 0x1fd   : > { %24006 = vmatprep.mubr.msk.f32.mxu1 %vm989_vm4, %v27957_v17  ;;  %v34370_v17 = vld [vmem:[#allocation41_spill] sm:$0xff]  ;;  %24102 = vmatpush3.msra.mxu0 %v4957_v27  ;;  %v28782_v8 = vpop.permute.xlu0 %8726 }
 0x1fe   : > { %24151 = vmatprep.subr.mxu0 %v28745_v53 }
 0x200   : > { %24007 = vmatmul.mubr.msk.f32.gmra.mrb[0].mxu1 %vm989_vm4, %v27975_v55  ;;  %v34372_v55 = vld [vmem:[#allocation45_spill] sm:$0xff] }
 0x201   : > { %24009 = vmatprep.mubr.msk.f32.mxu1 %vm989_vm4, %v27977_v56  ;;  %v34373_v56 = vld [vmem:[#allocation47_spill] sm:$0xff]  ;;  %v28794_v12 = vpop.permute.xlu0 %8730 }
 0x204   : > { %24010 = vmatmul.mubr.msk.f32.gmra.mrb[2].mxu1 %vm989_vm4, %v27995_v2  ;;  %v34376_v2 = vld [vmem:[#allocation59_spill] sm:$0xff] }
 0x205   : > { %24012 = vmatprep.mubr.msk.f32.mxu1 %vm989_vm4, %v27997_v4  ;;  %v34377_v4 = vld [vmem:[#allocation60_spill] sm:$0xff] }
 0x208   : > { %24013 = vmatmul.mubr.msk.f32.gmra.mrb[4].mxu1 %vm989_vm4, %v28015_v24  ;;  %v4110_v24 = vld [vmem:[#allocation2 + $0x1a2] sm:$0xff] }
 0x209   : > { %24015 = vmatprep.mubr.msk.f32.mxu1 %vm989_vm4, %v28017_v34  ;;  %v34367_v34 = vld [vmem:[#allocation37_spill] sm:$0xff] }
 0x20c   : > { %24016 = vmatmul.mubr.msk.f32.gmra.mrb[6].mxu1 %vm989_vm4, %v28035_v22  ;;  %v34368_v22 = vld [vmem:[#allocation38_spill] sm:$0xff] }
 0x20d   : > { %24018 = vmatprep.mubr.msk.f32.mxu1 %vm989_vm4, %v34361_v15  ;;  %v28802_v15 = vpop.permute.xlu0 %8734 }
 0x210   : > { %24019 = vmatmul.mubr.msk.f32.gmra.mrb[8].mxu1 %vm989_vm4, %v34362_v23 }
 0x211   : > { %24021 = vmatprep.mubr.msk.f32.mxu1 %vm989_vm4, %v34363_v25 }
 0x214   : > { %24022 = vmatmul.mubr.msk.f32.gmra.mrb[10].mxu1 %vm989_vm4, %v34364_v30 }
 0x215   : > { %24024 = vmatprep.mubr.msk.f32.mxu1 %vm989_vm4, %v34365_v33 }
 0x218   : > { %24025 = vmatmul.mubr.msk.f32.gmra.mrb[12].mxu1 %vm989_vm4, %v34366_v42 }
 0x219   : > { %24027 = vmatprep.mubr.msk.f32.mxu1 %vm989_vm4, %v34367_v34  ;;  %v28814_v34 = vpop.permute.xlu0 %8738 }
 0x21c   : > { %24028 = vmatmul.mubr.msk.f32.gmra.mrb[14].mxu1 %vm989_vm4, %v34368_v22 }
 0x21d   : > { %24030 = vmatprep.mubr.msk.f32.mxu1 %vm989_vm4, %v34369_v49 }
 0x220   : > { %24031 = vmatmul.mubr.msk.f32.gmra.mrb[16].mxu1 %vm989_vm4, %v34370_v17 }
 0x221   : > { %24033 = vmatprep.mubr.msk.f32.mxu1 %vm989_vm4, %v34371_v54  ;;  %v28822_v54 = vpop.permute.xlu0 %8742 }
 0x222   : > { %34382 = vst [vmem:[#allocation9_spill] sm:$0xff] %v28822_v54 }
 0x224   : > { %24034 = vmatmul.mubr.msk.f32.gmra.mrb[18].mxu1 %vm989_vm4, %v34372_v55 }
 0x225   : > { %24036 = vmatprep.mubr.msk.f32.mxu1 %vm989_vm4, %v34373_v56 }
 0x228   : > { %24037 = vmatmul.mubr.msk.f32.gmra.mrb[20].mxu1 %vm989_vm4, %v34334_v20 }
 0x229   : > { %24039 = vmatprep.mubr.msk.f32.mxu1 %vm989_vm4, %v34374_v61 }
 0x22c   : > { %24040 = vmatmul.mubr.msk.f32.gmra.mrb[22].mxu1 %vm989_vm4, %v34340_v47  ;;  %v28750_v47 = vpop.permute.xlu1 %8716 }
 0x22d   : > { %24042 = vmatprep.mubr.msk.f32.mxu1 %vm989_vm4, %v34375_v0 }
 0x230   : > { %24043 = vmatmul.mubr.msk.f32.gmra.mrb[24].mxu1 %vm989_vm4, %v34376_v2  ;;  %v28760_v60 = vpop.permute.xlu1 %8720 }
 0x231   : > { %24045 = vmatprep.mubr.msk.f32.mxu1 %vm989_vm4, %v34377_v4  ;;  %v28830_v4 = vpop.permute.xlu0 %8746 }
 0x232   : > { %34386 = vst [vmem:[#allocation10_spill] sm:$0xff] %v28830_v4 }
 0x234   : > { %24046 = vmatmul.mubr.msk.f32.gmra.mrb[26].mxu1 %vm989_vm4, %v34378_v19  ;;  %v28770_v39 = vpop.permute.xlu1 %8724  ;;  %v28835_v19 = vld [vmem:[%s33871_s4] ss:$0 sm:$0xff] }
 0x235   : > { %24048 = vmatprep.mubr.msk.f32.mxu1 %vm989_vm4, %v4109_v7  ;;  %v28840_v53 = vpop.permute.xlu0 %8750 }
 0x238   : > { %24049 = vmatmul.mubr.msk.f32.gmra.mrb[28].mxu1 %vm989_vm4, %v4110_v24  ;;  %v28780_v62 = vpop.permute.xlu1 %8728 }
 0x23c   : > { %v28790_v31 = vpop.permute.xlu1 %8732 }
 0x240   : > { %v28800_v14 = vpop.permute.xlu1 %8736 }
 0x244   : > { %v28810_v33 = vpop.permute.xlu1 %8740 }
 0x248   : > { %v28820_v17 = vpop.permute.xlu1 %8744 }
 0x249   : > { %34381 = vst [vmem:[#allocation6_spill] sm:$0xff] %v28820_v17 }
 0x24c   : > { %v28828_v0 = vpop.permute.xlu1 %8748 }
 0x24d   : > { %34385 = vst [vmem:[#allocation40_spill] sm:$0xff] %v28828_v0 }
 0x250   : > { %v28837_v52 = vpop.permute.xlu1 %8752 }
 0x28f   : > { %v28722_v58 = vpop.f32.mrb[34].mxu0 }
 0x290   : > { %v28726_v1 = vpop.f32.mrb[35].mxu0 }
 0x293   : > { %v28730_v9 = vpop.f32.mrb[36].mxu0 }
 0x294   : > { %v28732_v6 = vpop.f32.mrb[37].mxu0 }
 0x297   : > { %v28738_v26 = vpop.f32.mrb[38].mxu0 }
 0x298   : > { %v28740_v11 = vpop.f32.mrb[39].mxu0 }
 0x29b   : > { %v28747_v38 = vpop.f32.mrb[40].mxu0 }
 0x29c   : > { %v28752_v28 = vpop.f32.mrb[41].mxu0 }
 0x29f   : > { %v28756_v20 = vpop.f32.mrb[42].mxu0 }
 0x2a0   : > { %v28758_v10 = vpop.f32.mrb[43].mxu0 }
 0x2a3   : > { %v28764_v63 = vpop.f32.mrb[44].mxu0 }
 0x2a4   : > { %v28766_v36 = vpop.f32.mrb[45].mxu0 }
 0x2a7   : > { %v28768_v48 = vpop.f32.mrb[46].mxu0 }
 0x2a8   : > { %v28772_v45 = vpop.f32.mrb[47].mxu0 }
 0x2ab   : > { %v28776_v51 = vpop.f32.mrb[48].mxu0 }
 0x2ac   : > { %v28778_v50 = vpop.f32.mrb[49].mxu0 }
 0x2af   : > { %v28784_v21 = vpop.f32.mrb[50].mxu0 }
 0x2b0   : > { %v28786_v29 = vpop.f32.mrb[51].mxu0 }
 0x2b3   : > { %v28788_v16 = vpop.f32.mrb[52].mxu0 }
 0x2b4   : > { %v28792_v43 = vpop.f32.mrb[53].mxu0 }
 0x2b7   : > { %v28796_v41 = vpop.f32.mrb[54].mxu0 }
 0x2b8   : > { %v28798_v35 = vpop.f32.mrb[55].mxu0 }
 0x2bb   : > { %v28804_v23 = vpop.f32.mrb[56].mxu0 }
 0x2bc   : > { %v28806_v25 = vpop.f32.mrb[57].mxu0 }
 0x2bf   : > { %v28808_v30 = vpop.f32.mrb[58].mxu0 }
 0x2c0   : > { %v28812_v42 = vpop.f32.mrb[59].mxu0 }
 0x2c3   : > { %v28816_v22 = vpop.f32.mrb[60].mxu0 }
 0x2c4   : > { %v28818_v49 = vpop.f32.mrb[61].mxu0 }
 0x2c5   : > { %34380 = vst [vmem:[#allocation7_spill] sm:$0xff] %v28818_v49 }
 0x2c7   : > { %v28824_v55 = vpop.f32.mrb[62].mxu0 }
 0x2c8   : > { %34383 = vst [vmem:[#allocation8_spill] sm:$0xff] %v28824_v55  ;;  %v28826_v56 = vpop.f32.mrb[63].mxu0 }
 0x2c9   : > { %34384 = vst [vmem:[#allocation11_spill] sm:$0xff] %v28826_v56 }
 0x2cb   : > { %v23805_v61 = vpop.f32.mrb[32].mxu0 }
 0x2cc   : > { %v2717_v2 = vpop.f32.mrb[33].mxu0 }
 0x2cf   : > { %v24005_v7 = vpop.f32.mrb[30].mxu1 }
 0x2d0   : > { %v25922_v24 = vadd.f32 %v24005_v7, %v23805_v61  ;;  %v4278_v5 = vpop.f32.mrb[31].mxu1 }
 0x2d1   : > { %v25923_v46 = vadd.f32 %v4278_v5, %v2717_v2 }
 0x2d2   : > { %v4477_v27 = vadd.f32 %v25922_v24, %v28835_v19 }
 0x2d3   : > { %v4476_v56 = vadd.f32 %v25923_v46, %v28835_v19  ;;  %v24008_v0 = vpop.f32.mrb[0].mxu1 }
 0x2d4   : > { %v4509_v4 = vmax.f32 %v4477_v27, 0.0  ;;  %v25924_v55 = vadd.f32 %v24008_v0, %v28722_v58  ;;  %v4288_v49 = vpop.f32.mrb[1].mxu1  ;;  %v28853_v58 = vpop.permute.xlu1 %8756 }
 0x2d5   : > { %v4508_v17 = vmax.f32 %v4476_v56, 0.0  ;;  %v25925_v54 = vadd.f32 %v4288_v49, %v28726_v1 }
 0x2d6   : > { %4541 = vst.msk [vmem:[#allocation3 + $0x8] sm:$0xff] %vm989_vm4, %v4509_v4  ;;  %v4479_v61 = vadd.f32 %v25924_v55, %v28835_v19  ;;  %4606 = vrot.lane.b32.xlu1 %v4509_v4, %s27266_s23  ;;  %v28856_v55 = vpop.permute.xlu0 %8754 }
 0x2d7   : > { %4894 = vst.msk [vmem:[#allocation2 + $0x21] sm:$0xff] %vm4892_vm5, %v4509_v4  ;;  %v4478_v2 = vadd.f32 %v25925_v54, %v28835_v19  ;;  %v24011_v7 = vpop.f32.mrb[2].mxu1  ;;  %4604 = vrot.lane.b32.xlu0 %v4508_v17, %s27266_s23  ;;  %4893 = vst.msk [vmem:[#allocation2 + $0x19] sm:$0xff] %vm4892_vm5, %v4508_v17 }
 0x2d8   : > { %4540 = vst.msk [vmem:[#allocation3] sm:$0xff] %vm989_vm4, %v4508_v17  ;;  %v4511_v1 = vmax.f32 %v4479_v61, 0.0  ;;  %v25926_v49 = vadd.f32 %v24011_v7, %v28730_v9  ;;  %v4298_v56 = vpop.f32.mrb[3].mxu1  ;;  %v28872_v7 = vpop.permute.xlu1 %8760 }
 0x2d9   : > { %v4510_v0 = vmax.f32 %v4478_v2, 0.0  ;;  %v25927_v4 = vadd.f32 %v4298_v56, %v28732_v6 }
 0x2da   : > { %4543 = vst.msk [vmem:[#allocation3 + $0x18] sm:$0xff] %vm989_vm4, %v4511_v1  ;;  %v4481_v54 = vadd.f32 %v25926_v49, %v28835_v19 }
 0x2db   : > { %4896 = vst.msk [vmem:[#allocation2 + $0x39] sm:$0xff] %vm4892_vm5, %v4511_v1  ;;  %v4480_v17 = vadd.f32 %v25927_v4, %v28835_v19  ;;  %v24014_v24 = vpop.f32.mrb[4].mxu1  ;;  %4610 = vrot.lane.b32.xlu0 %v4511_v1, %s27266_s23  ;;  %4895 = vst.msk [vmem:[#allocation2 + $0x31] sm:$0xff] %vm4892_vm5, %v4510_v0  ;;  %v28883_v4 = vpop.permute.xlu0 %8758 }
 0x2dc   : > { %4542 = vst.msk [vmem:[#allocation3 + $0x10] sm:$0xff] %vm989_vm4, %v4510_v0  ;;  %v4513_v9 = vmax.f32 %v4481_v54, 0.0  ;;  %v25928_v5 = vadd.f32 %v24014_v24, %v28738_v26  ;;  %v4308_v46 = vpop.f32.mrb[5].mxu1 }
 0x2dd   : > { %v4512_v6 = vmax.f32 %v4480_v17, 0.0  ;;  %v25929_v27 = vadd.f32 %v4308_v46, %v28740_v11 }
 0x2de   : > { %v28868_v61 = vld [vmem:[#allocation2 + $0x21] sm:$0xff]  ;;  %4545 = vst.msk [vmem:[#allocation3 + $0x28] sm:$0xff] %vm989_vm4, %v4513_v9  ;;  %v4483_v49 = vadd.f32 %v25928_v5, %v28835_v19  ;;  %v28876_v1 = vld [vmem:[#allocation2 + $0x19] sm:$0xff] }
 0x2df   : > { %34387 = vst [vmem:[#allocation13_spill] sm:$0xff] %v28868_v61  ;;  %v28870_v2 = vld [vmem:[#allocation2 + $0x22] sm:$0xff]  ;;  %34389 = vst [vmem:[#allocation12_spill] sm:$0xff] %v28876_v1  ;;  %v28879_v56 = vld [vmem:[#allocation2 + $0x18] sm:$0xff]  ;;  %v4482_v11 = vadd.f32 %v25929_v27, %v28835_v19  ;;  %v24017_v54 = vpop.f32.mrb[6].mxu1  ;;  %4612 = vrot.lane.b32.xlu1 %v4512_v6, %s27266_s23  ;;  %4608 = vrot.lane.b32.xlu0 %v4510_v0, %s27266_s23 }
 0x2e0   : > { %34388 = vst [vmem:[#allocation43_spill] sm:$0xff] %v28870_v2  ;;  %4898 = vst.msk [vmem:[#allocation2 + $0x51] sm:$0xff] %vm4892_vm5, %v4513_v9  ;;  %v28881_v26 = vld [vmem:[#allocation2 + $0x20] sm:$0xff]  ;;  %v4515_v24 = vmax.f32 %v4483_v49, 0.0  ;;  %v25930_v5 = vadd.f32 %v24017_v54, %v28747_v38  ;;  %24056 = vmatprep.mubr.msk.f32.mxu0 %vm634_vm1, %v28876_v1  ;;  %v4318_v46 = vpop.f32.mrb[7].mxu1 }
 0x2e1   : > { %4544 = vst.msk [vmem:[#allocation3 + $0x20] sm:$0xff] %vm989_vm4, %v4512_v6  ;;  %v28890_v17 = vld [vmem:[#allocation2 + $0x1a] sm:$0xff]  ;;  %v4514_v27 = vmax.f32 %v4482_v11, 0.0  ;;  %v25931_v0 = vadd.f32 %v4318_v46, %v28752_v28  ;;  %24057 = vmatmul.mubr.msk.f32.gmra.mrb[66].mxu0 %vm634_vm1, %v28868_v61  ;;  %v28926_v61 = vpop.permute.xlu1 %8764 }
 0x2e2   : > { %4897 = vst.msk [vmem:[#allocation2 + $0x49] sm:$0xff] %vm4892_vm5, %v4512_v6  ;;  %v28902_v6 = vld [vmem:[#allocation2 + $0x39] sm:$0xff]  ;;  %v4485_v54 = vadd.f32 %v25930_v5, %v28835_v19  ;;  %4900 = vst.msk [vmem:[#allocation2 + $0x69] sm:$0xff] %vm4892_vm5, %v4515_v24 }
 0x2e3   : > { %8798 = vst.msk [vmem:[#allocation2 + $0x19] sm:$0xff] %vm989_vm4, %v28720_v32  ;;  %8799 = vst.msk [vmem:[#allocation2 + $0x21] sm:$0xff] %vm989_vm4, %v28718_v37  ;;  %v28904_v49 = vld [vmem:[#allocation2 + $0x3a] sm:$0xff]  ;;  %v28911_v32 = vld [vmem:[#allocation2 + $0x31] sm:$0xff]  ;;  %v4484_v11 = vadd.f32 %v25931_v0, %v28835_v19  ;;  %v24020_v46 = vpop.f32.mrb[8].mxu1  ;;  %4616 = vrot.lane.b32.xlu1 %v4514_v27, %s27266_s23  ;;  %4614 = vrot.lane.b32.xlu0 %v4513_v9, %s27266_s23  ;;  %v28935_v9 = vpop.permute.xlu0 %8762 }
 0x2e4   : > { %34390 = vst [vmem:[#allocation15_spill] sm:$0xff] %v28902_v6  ;;  %34391 = vst [vmem:[#allocation14_spill] sm:$0xff] %v28904_v49  ;;  %v28906_v38 = vld [vmem:[#allocation2 + $0x39] sm:$0xff]  ;;  %v28913_v37 = vld [vmem:[#allocation2 + $0x30] sm:$0xff]  ;;  %v4517_v1 = vmax.f32 %v4485_v54, 0.0  ;;  %v25932_v49 = vadd.f32 %v24020_v46, %v28756_v20  ;;  %24059 = vmatprep.mubr.msk.f32.mxu0 %vm634_vm1, %v28911_v32  ;;  %v4328_v2 = vpop.f32.mrb[9].mxu1 }
 0x2e5   : > { %34392 = vst [vmem:[#allocation17_spill] sm:$0xff] %v28906_v38  ;;  %4547 = vst.msk [vmem:[#allocation3 + $0x38] sm:$0xff] %vm989_vm4, %v4515_v24  ;;  %v28915_v28 = vld [vmem:[#allocation2 + $0x38] sm:$0xff]  ;;  %v25933_v0 = vadd.f32 %v4328_v2, %v28758_v10  ;;  %24060 = vmatmul.mubr.msk.f32.gmra.mrb[68].mxu0 %vm634_vm1, %v28902_v6 }
 0x2e6   : > { %34393 = vst [vmem:[#allocation16_spill] sm:$0xff] %v28911_v32  ;;  %4546 = vst.msk [vmem:[#allocation3 + $0x30] sm:$0xff] %vm989_vm4, %v4514_v27  ;;  %v28922_v5 = vld [vmem:[#allocation2 + $0x32] sm:$0xff] }
 0x2e7   : > { %4899 = vst.msk [vmem:[#allocation2 + $0x61] sm:$0xff] %vm4892_vm5, %v4514_v27  ;;  %v28924_v38 = vld [vmem:[#allocation2 + $0x31] sm:$0xff]  ;;  %v4516_v27 = vmax.f32 %v4484_v11, 0.0  ;;  %4902 = vst.msk [vmem:[#allocation2 + $0x81] sm:$0xff] %vm4892_vm5, %v4517_v1  ;;  %v4486_v2 = vadd.f32 %v25933_v0, %v28835_v19  ;;  %4618 = vrot.lane.b32.xlu0 %v4515_v24, %s27266_s23 }
 0x2e8   : > { %34394 = vst [vmem:[#allocation49_spill] sm:$0xff] %v28924_v38  ;;  %8800 = vst.msk [vmem:[#allocation2 + $0x31] sm:$0xff] %vm989_vm4, %v28728_v57  ;;  %v28940_v54 = vld [vmem:[#allocation2 + $0x51] sm:$0xff]  ;;  %v24023_v38 = vpop.f32.mrb[10].mxu1 }
 0x2e9   : > { %8801 = vst.msk [vmem:[#allocation2 + $0x39] sm:$0xff] %vm989_vm4, %v28724_v40  ;;  %34395 = vst [vmem:[#allocation53_spill] sm:$0xff] %v28940_v54  ;;  %v28942_v20 = vld [vmem:[#allocation2 + $0x52] sm:$0xff]  ;;  %v4487_v40 = vadd.f32 %v25932_v49, %v28835_v19  ;;  %v28949_v57 = vld [vmem:[#allocation2 + $0x49] sm:$0xff]  ;;  %4620 = vrot.lane.b32.xlu1 %v4516_v27, %s27266_s23  ;;  %v25934_v32 = vadd.f32 %v24023_v38, %v28764_v63  ;;  %v28980_v38 = vpop.permute.xlu1 %12546 }
 0x2ea   : > { %34396 = vst [vmem:[#allocation56_spill] sm:$0xff] %v28942_v20  ;;  %v28944_v46 = vld [vmem:[#allocation2 + $0x51] sm:$0xff]  ;;  %4549 = vst.msk [vmem:[#allocation3 + $0x48] sm:$0xff] %vm989_vm4, %v4517_v1  ;;  %v28951_v11 = vld [vmem:[#allocation2 + $0x48] sm:$0xff]  ;;  %24062 = vmatprep.mubr.msk.f32.mxu0 %vm634_vm1, %v28949_v57  ;;  %v4338_v20 = vpop.f32.mrb[11].mxu1 }
 0x2eb   : > { %34397 = vst [vmem:[#allocation18_spill] sm:$0xff] %v28944_v46  ;;  %34398 = vst [vmem:[#allocation22_spill] sm:$0xff] %v28949_v57  ;;  %v28953_v10 = vld [vmem:[#allocation2 + $0x50] sm:$0xff]  ;;  %v4519_v6 = vmax.f32 %v4487_v40, 0.0  ;;  %v25935_v24 = vadd.f32 %v4338_v20, %v28766_v36  ;;  %24063 = vmatmul.mubr.msk.f32.gmra.mrb[70].mxu0 %vm634_vm1, %v28940_v54  ;;  %4622 = vrot.lane.b32.xlu0 %v4517_v1, %s27266_s23 }
 0x2ec   : > { %4548 = vst.msk [vmem:[#allocation3 + $0x40] sm:$0xff] %vm989_vm4, %v4516_v27  ;;  %v28960_v46 = vld [vmem:[#allocation2 + $0x4a] sm:$0xff]  ;;  %34402 = vst [vmem:[#allocation30_spill] sm:$0xff] %v28980_v38 }
 0x2ed   : > { %4901 = vst.msk [vmem:[#allocation2 + $0x79] sm:$0xff] %vm4892_vm5, %v4516_v27  ;;  %v28962_v49 = vld [vmem:[#allocation2 + $0x49] sm:$0xff]  ;;  %v4518_v27 = vmax.f32 %v4486_v2, 0.0  ;;  %4904 = vst.msk [vmem:[#allocation2 + $0x99] sm:$0xff] %vm4892_vm5, %v4519_v6  ;;  %v28991_v2 = vpop.permute.xlu0 %12544  ;;  %v4488_v38 = vadd.f32 %v25935_v24, %v28835_v19 }
 0x2ee   : > { %34399 = vst [vmem:[#allocation54_spill] sm:$0xff] %v28962_v49  ;;  %8802 = vst.msk [vmem:[#allocation2 + $0x49] sm:$0xff] %vm989_vm4, %v28736_v59  ;;  %v28974_v0 = vld [vmem:[#allocation2 + $0x69] sm:$0xff]  ;;  %v28985_v59 = vld [vmem:[#allocation2 + $0x61] sm:$0xff] }
 0x2ef   : > { %8803 = vst.msk [vmem:[#allocation2 + $0x51] sm:$0xff] %vm989_vm4, %v28734_v18  ;;  %34400 = vst [vmem:[#allocation20_spill] sm:$0xff] %v28974_v0  ;;  %v28976_v40 = vld [vmem:[#allocation2 + $0x6a] sm:$0xff]  ;;  %v4489_v18 = vadd.f32 %v25934_v32, %v28835_v19  ;;  %v28987_v36 = vld [vmem:[#allocation2 + $0x60] sm:$0xff]  ;;  %4624 = vrot.lane.b32.xlu1 %v4518_v27, %s27266_s23  ;;  %24065 = vmatprep.mubr.msk.f32.mxu0 %vm634_vm1, %v28985_v59 }
 0x2f0   : > { %v28978_v63 = vld [vmem:[#allocation2 + $0x69] sm:$0xff]  ;;  %4551 = vst.msk [vmem:[#allocation3 + $0x58] sm:$0xff] %vm989_vm4, %v4519_v6  ;;  %34403 = vst [vmem:[#allocation48_spill] sm:$0xff] %v28985_v59  ;;  %v29000_v49 = vld [vmem:[#allocation2 + $0x61] sm:$0xff]  ;;  %24066 = vmatmul.mubr.msk.f32.gmra.mrb[72].mxu0 %vm634_vm1, %v28974_v0  ;;  %4626 = vrot.lane.b32.xlu0 %v4519_v6, %s27266_s23 }
 0x2f1   : > { %34401 = vst [vmem:[#allocation29_spill] sm:$0xff] %v28978_v63  ;;  %v28989_v20 = vld [vmem:[#allocation2 + $0x68] sm:$0xff]  ;;  %34404 = vst [vmem:[#allocation50_spill] sm:$0xff] %v28991_v2  ;;  %v24026_v63 = vpop.f32.mrb[12].mxu1  ;;  %v4521_v54 = vmax.f32 %v4489_v18, 0.0  ;;  %v29045_v6 = vpop.permute.xlu0 %12548 }
 0x2f2   : > { %4550 = vst.msk [vmem:[#allocation3 + $0x50] sm:$0xff] %vm989_vm4, %v4518_v27  ;;  %v28998_v32 = vld [vmem:[#allocation2 + $0x62] sm:$0xff]  ;;  %34405 = vst [vmem:[#allocation52_spill] sm:$0xff] %v29000_v49  ;;  %v25936_v57 = vadd.f32 %v24026_v63, %v28768_v48  ;;  %v4348_v2 = vpop.f32.mrb[13].mxu1  ;;  %v29036_v49 = vpop.permute.xlu1 %12550 }
 0x2f3   : > { %4903 = vst.msk [vmem:[#allocation2 + $0x91] sm:$0xff] %vm4892_vm5, %v4518_v27  ;;  %v4520_v27 = vmax.f32 %v4488_v38, 0.0  ;;  %v25937_v1 = vadd.f32 %v4348_v2, %v28772_v45  ;;  %v29012_v24 = vld [vmem:[#allocation2 + $0x81] sm:$0xff]  ;;  %4906 = vst.msk [vmem:[#allocation2 + $0xb1] sm:$0xff] %vm4892_vm5, %v4521_v54  ;;  %v24029_v2 = vpop.f32.mrb[14].mxu1 }
 0x2f4   : > { %8804 = vst.msk [vmem:[#allocation2 + $0x61] sm:$0xff] %vm989_vm4, %v28754_v13  ;;  %8805 = vst.msk [vmem:[#allocation2 + $0x69] sm:$0xff] %vm989_vm4, %v28750_v47  ;;  %v29014_v18 = vld [vmem:[#allocation2 + $0x82] sm:$0xff]  ;;  %v4491_v13 = vadd.f32 %v25936_v57, %v28835_v19  ;;  %v29021_v63 = vld [vmem:[#allocation2 + $0x79] sm:$0xff]  ;;  %v25938_v59 = vadd.f32 %v24029_v2, %v28776_v51  ;;  %4630 = vrot.lane.b32.xlu0 %v4521_v54, %s27266_s23 }
 0x2f5   : > { %34406 = vst [vmem:[#allocation57_spill] sm:$0xff] %v29012_v24  ;;  %34407 = vst [vmem:[#allocation58_spill] sm:$0xff] %v29014_v18  ;;  %v29016_v48 = vld [vmem:[#allocation2 + $0x81] sm:$0xff]  ;;  %v29023_v47 = vld [vmem:[#allocation2 + $0x78] sm:$0xff]  ;;  %v4490_v38 = vadd.f32 %v25937_v1, %v28835_v19  ;;  %4628 = vrot.lane.b32.xlu1 %v4520_v27, %s27266_s23  ;;  %24068 = vmatprep.mubr.msk.f32.mxu0 %vm634_vm1, %v29021_v63  ;;  %v4358_v18 = vpop.f32.mrb[15].mxu1 }
 0x2f6   : > { %34408 = vst [vmem:[#allocation61_spill] sm:$0xff] %v29016_v48  ;;  %4553 = vst.msk [vmem:[#allocation3 + $0x68] sm:$0xff] %vm989_vm4, %v4521_v54  ;;  %v29025_v45 = vld [vmem:[#allocation2 + $0x80] sm:$0xff]  ;;  %v4523_v0 = vmax.f32 %v4491_v13, 0.0  ;;  %v25939_v1 = vadd.f32 %v4358_v18, %v28778_v50  ;;  %24069 = vmatmul.mubr.msk.f32.gmra.mrb[74].mxu0 %vm634_vm1, %v29012_v24 }
 0x2f7   : > { %34409 = vst [vmem:[#allocation62_spill] sm:$0xff] %v29021_v63  ;;  %4552 = vst.msk [vmem:[#allocation3 + $0x60] sm:$0xff] %vm989_vm4, %v4520_v27  ;;  %v29032_v48 = vld [vmem:[#allocation2 + $0x7a] sm:$0xff] }
 0x2f8   : > { %4905 = vst.msk [vmem:[#allocation2 + $0xa9] sm:$0xff] %vm4892_vm5, %v4520_v27  ;;  %v29034_v57 = vld [vmem:[#allocation2 + $0x79] sm:$0xff]  ;;  %34411 = vst [vmem:[#allocation21_spill] sm:$0xff] %v29036_v49  ;;  %v4522_v27 = vmax.f32 %v4490_v38, 0.0  ;;  %v4492_v18 = vadd.f32 %v25939_v1, %v28835_v19  ;;  %v24032_v49 = vpop.f32.mrb[16].mxu1  ;;  %4634 = vrot.lane.b32.xlu0 %v4523_v0, %s27266_s23 }
 0x2f9   : > { %34410 = vst [vmem:[#allocation19_spill] sm:$0xff] %v29034_v57  ;;  %8806 = vst.msk [vmem:[#allocation2 + $0x79] sm:$0xff] %vm989_vm4, %v28762_v3  ;;  %v29050_v13 = vld [vmem:[#allocation2 + $0x99] sm:$0xff]  ;;  %v25940_v57 = vadd.f32 %v24032_v49, %v28784_v21  ;;  %v4368_v24 = vpop.f32.mrb[17].mxu1  ;;  %v29090_v49 = vpop.permute.xlu1 %12554 }
 0x2fa   : > { %8807 = vst.msk [vmem:[#allocation2 + $0x81] sm:$0xff] %vm989_vm4, %v28760_v60  ;;  %34412 = vst [vmem:[#allocation23_spill] sm:$0xff] %v29045_v6  ;;  %v29052_v51 = vld [vmem:[#allocation2 + $0x9a] sm:$0xff]  ;;  %v4493_v60 = vadd.f32 %v25938_v59, %v28835_v19  ;;  %v29059_v3 = vld [vmem:[#allocation2 + $0x91] sm:$0xff]  ;;  %4632 = vrot.lane.b32.xlu1 %v4522_v27, %s27266_s23  ;;  %v25941_v54 = vadd.f32 %v4368_v24, %v28786_v29 }
 0x2fb   : > { %34413 = vst [vmem:[#allocation24_spill] sm:$0xff] %v29050_v13  ;;  %v29054_v2 = vld [vmem:[#allocation2 + $0x99] sm:$0xff]  ;;  %4555 = vst.msk [vmem:[#allocation3 + $0x78] sm:$0xff] %vm989_vm4, %v4523_v0  ;;  %v29061_v38 = vld [vmem:[#allocation2 + $0x90] sm:$0xff]  ;;  %24071 = vmatprep.mubr.msk.f32.mxu0 %vm634_vm1, %v29059_v3 }
 0x2fc   : > { %34414 = vst [vmem:[#allocation25_spill] sm:$0xff] %v29054_v2  ;;  %4908 = vst.msk [vmem:[#allocation2 + $0xc9] sm:$0xff] %vm4892_vm5, %v4523_v0  ;;  %v29063_v50 = vld [vmem:[#allocation2 + $0x98] sm:$0xff]  ;;  %v4525_v2 = vmax.f32 %v4493_v60, 0.0  ;;  %24072 = vmatmul.mubr.msk.f32.gmra.mrb[76].mxu0 %vm634_vm1, %v29050_v13 }
 0x2fd   : > { %34415 = vst [vmem:[#allocation26_spill] sm:$0xff] %v29059_v3  ;;  %4554 = vst.msk [vmem:[#allocation3 + $0x70] sm:$0xff] %vm989_vm4, %v4522_v27  ;;  %v29070_v6 = vld [vmem:[#allocation2 + $0x92] sm:$0xff] }
 0x2fe   : > { %4907 = vst.msk [vmem:[#allocation2 + $0xc1] sm:$0xff] %vm4892_vm5, %v4522_v27  ;;  %v29072_v59 = vld [vmem:[#allocation2 + $0x91] sm:$0xff]  ;;  %v4524_v27 = vmax.f32 %v4492_v18, 0.0  ;;  %34419 = vst [vmem:[#allocation46_spill] sm:$0xff] %v29090_v49  ;;  %v29101_v18 = vpop.permute.xlu0 %12552  ;;  %v4494_v49 = vadd.f32 %v25941_v54, %v28835_v19  ;;  %4638 = vrot.lane.b32.xlu0 %v4525_v2, %s27266_s23 }
 0x2ff   : > { %34416 = vst [vmem:[#allocation27_spill] sm:$0xff] %v29072_v59  ;;  %8808 = vst.msk [vmem:[#allocation2 + $0x91] sm:$0xff] %vm989_vm4, %v28774_v44  ;;  %v29084_v1 = vld [vmem:[#allocation2 + $0xb1] sm:$0xff]  ;;  %v29095_v44 = vld [vmem:[#allocation2 + $0xa9] sm:$0xff] }
 0x300   : > { %8809 = vst.msk [vmem:[#allocation2 + $0x99] sm:$0xff] %vm989_vm4, %v28770_v39  ;;  %34417 = vst [vmem:[#allocation28_spill] sm:$0xff] %v29084_v1  ;;  %v29086_v60 = vld [vmem:[#allocation2 + $0xb2] sm:$0xff]  ;;  %v4495_v39 = vadd.f32 %v25940_v57, %v28835_v19  ;;  %v29097_v29 = vld [vmem:[#allocation2 + $0xa8] sm:$0xff]  ;;  %4636 = vrot.lane.b32.xlu1 %v4524_v27, %s27266_s23  ;;  %24074 = vmatprep.mubr.msk.f32.mxu0 %vm634_vm1, %v29095_v44 }
 0x301   : > { %v29088_v21 = vld [vmem:[#allocation2 + $0xb1] sm:$0xff]  ;;  %4557 = vst.msk [vmem:[#allocation3 + $0x88] sm:$0xff] %vm989_vm4, %v4525_v2  ;;  %34420 = vst [vmem:[#allocation31_spill] sm:$0xff] %v29095_v44  ;;  %v29110_v59 = vld [vmem:[#allocation2 + $0xa9] sm:$0xff]  ;;  %24075 = vmatmul.mubr.msk.f32.gmra.mrb[78].mxu0 %vm634_vm1, %v29084_v1 }
 0x302   : > { %34418 = vst [vmem:[#allocation44_spill] sm:$0xff] %v29088_v21  ;;  %4910 = vst.msk [vmem:[#allocation2 + $0xe1] sm:$0xff] %vm4892_vm5, %v4525_v2  ;;  %v29099_v24 = vld [vmem:[#allocation2 + $0xb0] sm:$0xff]  ;;  %v24035_v21 = vpop.f32.mrb[18].mxu1  ;;  %v4527_v13 = vmax.f32 %v4495_v39, 0.0  ;;  %v29155_v2 = vpop.permute.xlu0 %12556 }
 0x303   : > { %34421 = vst [vmem:[#allocation32_spill] sm:$0xff] %v29101_v18  ;;  %4556 = vst.msk [vmem:[#allocation3 + $0x80] sm:$0xff] %vm989_vm4, %v4524_v27  ;;  %v29108_v57 = vld [vmem:[#allocation2 + $0xaa] sm:$0xff]  ;;  %v25942_v3 = vadd.f32 %v24035_v21, %v28788_v16  ;;  %v4378_v18 = vpop.f32.mrb[19].mxu1 }
 0x304   : > { %4909 = vst.msk [vmem:[#allocation2 + $0xd9] sm:$0xff] %vm4892_vm5, %v4524_v27  ;;  %34422 = vst [vmem:[#allocation33_spill] sm:$0xff] %v29110_v59  ;;  %v4526_v27 = vmax.f32 %v4494_v49, 0.0  ;;  %v25943_v0 = vadd.f32 %v4378_v18, %v28792_v43  ;;  %v29122_v54 = vld [vmem:[#allocation2 + $0xc9] sm:$0xff]  ;;  %v24038_v18 = vpop.f32.mrb[20].mxu1  ;;  %v29146_v59 = vpop.permute.xlu1 %12558  ;;  %4642 = vrot.lane.b32.xlu0 %v4527_v13, %s27266_s23 }
 0x305   : > { %8810 = vst.msk [vmem:[#allocation2 + $0xa9] sm:$0xff] %vm989_vm4, %v28782_v8  ;;  %8811 = vst.msk [vmem:[#allocation2 + $0xb1] sm:$0xff] %vm989_vm4, %v28780_v62  ;;  %v29124_v39 = vld [vmem:[#allocation2 + $0xca] sm:$0xff]  ;;  %v4497_v8 = vadd.f32 %v25942_v3, %v28835_v19  ;;  %v29131_v21 = vld [vmem:[#allocation2 + $0xc1] sm:$0xff]  ;;  %v25944_v44 = vadd.f32 %v24038_v18, %v28796_v41  ;;  %v4388_v63 = vpop.f32.mrb[21].mxu1 }
 0x306   : > { %34423 = vst [vmem:[#allocation34_spill] sm:$0xff] %v29122_v54  ;;  %34424 = vst [vmem:[#allocation35_spill] sm:$0xff] %v29124_v39  ;;  %v29126_v16 = vld [vmem:[#allocation2 + $0xc9] sm:$0xff]  ;;  %v29133_v62 = vld [vmem:[#allocation2 + $0xc0] sm:$0xff]  ;;  %v4496_v49 = vadd.f32 %v25943_v0, %v28835_v19  ;;  %4640 = vrot.lane.b32.xlu1 %v4526_v27, %s27266_s23  ;;  %24077 = vmatprep.mubr.msk.f32.mxu0 %vm634_vm1, %v29131_v21  ;;  %v25945_v0 = vadd.f32 %v4388_v63, %v28798_v35 }
 0x307   : > { %34425 = vst [vmem:[#allocation36_spill] sm:$0xff] %v29126_v16  ;;  %4559 = vst.msk [vmem:[#allocation3 + $0x98] sm:$0xff] %vm989_vm4, %v4527_v13  ;;  %v29135_v43 = vld [vmem:[#allocation2 + $0xc8] sm:$0xff]  ;;  %v4529_v1 = vmax.f32 %v4497_v8, 0.0  ;;  %24078 = vmatmul.mubr.msk.f32.gmra.mrb[80].mxu0 %vm634_vm1, %v29122_v54 }
 0x308   : > { %4912 = vst.msk [vmem:[#allocation2 + $0xf9] sm:$0xff] %vm4892_vm5, %v4527_v13  ;;  %34426 = vst [vmem:[#allocation37_spill] sm:$0xff] %v29131_v21  ;;  %v29142_v16 = vld [vmem:[#allocation2 + $0xc2] sm:$0xff]  ;;  %v4498_v63 = vadd.f32 %v25945_v0, %v28835_v19 }
 0x309   : > { %4558 = vst.msk [vmem:[#allocation3 + $0x90] sm:$0xff] %vm989_vm4, %v4526_v27  ;;  %34427 = vst [vmem:[#allocation38_spill] sm:$0xff] %v29142_v16  ;;  %v29144_v3 = vld [vmem:[#allocation2 + $0xc1] sm:$0xff]  ;;  %4646 = vrot.lane.b32.xlu0 %v4529_v1, %s27266_s23 }
 0x30a   : > { %4911 = vst.msk [vmem:[#allocation2 + $0xf1] sm:$0xff] %vm4892_vm5, %v4526_v27  ;;  %34428 = vst [vmem:[#allocation39_spill] sm:$0xff] %v29144_v3  ;;  %v4528_v27 = vmax.f32 %v4496_v49, 0.0  ;;  %v29160_v8 = vld [vmem:[#allocation2 + $0xe1] sm:$0xff] }
 0x30b   : > { %34429 = vst [vmem:[#allocation41_spill] sm:$0xff] %v29146_v59  ;;  %8812 = vst.msk [vmem:[#allocation2 + $0xc1] sm:$0xff] %vm989_vm4, %v28794_v12  ;;  %v29162_v41 = vld [vmem:[#allocation2 + $0xe2] sm:$0xff]  ;;  %v29169_v12 = vld [vmem:[#allocation2 + $0xd9] sm:$0xff]  ;;  %v24041_v59 = vpop.f32.mrb[22].mxu1 }
 0x30c   : > { %8813 = vst.msk [vmem:[#allocation2 + $0xc9] sm:$0xff] %vm989_vm4, %v28790_v31  ;;  %34430 = vst [vmem:[#allocation42_spill] sm:$0xff] %v29155_v2  ;;  %v29164_v18 = vld [vmem:[#allocation2 + $0xe1] sm:$0xff]  ;;  %v4499_v31 = vadd.f32 %v25944_v44, %v28835_v19  ;;  %v29171_v49 = vld [vmem:[#allocation2 + $0xd8] sm:$0xff]  ;;  %4644 = vrot.lane.b32.xlu1 %v4528_v27, %s27266_s23  ;;  %v25946_v3 = vadd.f32 %v24041_v59, %v28804_v23  ;;  %24080 = vmatprep.mubr.msk.f32.mxu0 %vm634_vm1, %v29169_v12  ;;  %v4398_v54 = vpop.f32.mrb[23].mxu1  ;;  %v29200_v59 = vpop.permute.xlu1 %12562 }
 0x30d   : > { %34431 = vst [vmem:[#allocation45_spill] sm:$0xff] %v29160_v8  ;;  %34432 = vst [vmem:[#allocation47_spill] sm:$0xff] %v29162_v41  ;;  %v29173_v35 = vld [vmem:[#allocation2 + $0xe0] sm:$0xff]  ;;  %v25947_v13 = vadd.f32 %v4398_v54, %v28806_v25  ;;  %24081 = vmatmul.mubr.msk.f32.gmra.mrb[82].mxu0 %vm634_vm1, %v29160_v8 }
 0x30e   : > { %34433 = vst [vmem:[#allocation51_spill] sm:$0xff] %v29164_v18  ;;  %4561 = vst.msk [vmem:[#allocation3 + $0xa8] sm:$0xff] %vm989_vm4, %v4529_v1  ;;  %v29180_v2 = vld [vmem:[#allocation2 + $0xda] sm:$0xff]  ;;  %v4531_v18 = vmax.f32 %v4499_v31, 0.0 }
 0x30f   : > { %4914 = vst.msk [vmem:[#allocation2 + $0x111] sm:$0xff] %vm4892_vm5, %v4529_v1  ;;  %34434 = vst [vmem:[#allocation55_spill] sm:$0xff] %v29169_v12  ;;  %v29182_v44 = vld [vmem:[#allocation2 + $0xd9] sm:$0xff] }
 0x310   : > { %4560 = vst.msk [vmem:[#allocation3 + $0xa0] sm:$0xff] %vm989_vm4, %v4528_v27  ;;  %34435 = vst [vmem:[#allocation59_spill] sm:$0xff] %v29180_v2  ;;  %v29194_v0 = vld [vmem:[#allocation2 + $0xf9] sm:$0xff]  ;;  %4650 = vrot.lane.b32.xlu0 %v4531_v18, %s27266_s23 }
 0x311   : > { %4913 = vst.msk [vmem:[#allocation2 + $0x109] sm:$0xff] %vm4892_vm5, %v4528_v27  ;;  %34436 = vst [vmem:[#allocation60_spill] sm:$0xff] %v29182_v44  ;;  %v4530_v27 = vmax.f32 %v4498_v63, 0.0  ;;  %v29196_v31 = vld [vmem:[#allocation2 + $0xfa] sm:$0xff]  ;;  %v29207_v25 = vld [vmem:[#allocation2 + $0xf0] sm:$0xff]  ;;  %v29211_v63 = vpop.permute.xlu0 %12560 }
 0x312   : > { %8814 = vst.msk [vmem:[#allocation2 + $0xd9] sm:$0xff] %vm989_vm4, %v28802_v15  ;;  %8815 = vst.msk [vmem:[#allocation2 + $0xe1] sm:$0xff] %vm989_vm4, %v28800_v14  ;;  %v29198_v23 = vld [vmem:[#allocation2 + $0xf9] sm:$0xff]  ;;  %v4501_v14 = vadd.f32 %v25946_v3, %v28835_v19  ;;  %v29205_v15 = vld [vmem:[#allocation2 + $0xf1] sm:$0xff] }
 0x313   : > { %34437 = vst [vmem:[#allocation63_spill] sm:$0xff] %v29194_v0  ;;  %34438 = vst [vmem:[#allocation64_spill] sm:$0xff] %v29196_v31  ;;  %v29209_v54 = vld [vmem:[#allocation2 + $0xf8] sm:$0xff]  ;;  %4648 = vrot.lane.b32.xlu1 %v4530_v27, %s27266_s23  ;;  %24083 = vmatprep.mubr.msk.f32.mxu0 %vm634_vm1, %v29205_v15 }
 0x314   : > { %34439 = vst [vmem:[#allocation65_spill] sm:$0xff] %v29198_v23  ;;  %34440 = vst [vmem:[#allocation66_spill] sm:$0xff] %v29200_v59  ;;  %v4500_v59 = vadd.f32 %v25947_v13, %v28835_v19  ;;  %v24044_v23 = vpop.f32.mrb[24].mxu1  ;;  %v29218_v3 = vld [vmem:[#allocation2 + $0xf2] sm:$0xff]  ;;  %v4533_v8 = vmax.f32 %v4501_v14, 0.0  ;;  %24084 = vmatmul.mubr.msk.f32.gmra.mrb[84].mxu0 %vm634_vm1, %v29194_v0 }
 0x315   : > { %4563 = vst.msk [vmem:[#allocation3 + $0xb8] sm:$0xff] %vm989_vm4, %v4531_v18  ;;  %34441 = vst [vmem:[#allocation67_spill] sm:$0xff] %v29205_v15  ;;  %v29220_v44 = vld [vmem:[#allocation2 + $0xf1] sm:$0xff]  ;;  %v25948_v12 = vadd.f32 %v24044_v23, %v28808_v30 }
 0x316   : > { %4916 = vst.msk [vmem:[#allocation2 + $0x129] sm:$0xff] %vm4892_vm5, %v4531_v18  ;;  %34442 = vst [vmem:[#allocation68_spill] sm:$0xff] %v29211_v63  ;;  %v4408_v63 = vpop.f32.mrb[25].mxu1  ;;  %v29232_v13 = vld [vmem:[#allocation2 + $0x111] sm:$0xff]  ;;  %v29265_v18 = vpop.permute.xlu0 %12564  ;;  %4654 = vrot.lane.b32.xlu0 %v4533_v8, %s27266_s23 }
 0x317   : > { %4562 = vst.msk [vmem:[#allocation3 + $0xb0] sm:$0xff] %vm989_vm4, %v4530_v27  ;;  %34443 = vst [vmem:[#allocation69_spill] sm:$0xff] %v29218_v3  ;;  %v25949_v1 = vadd.f32 %v4408_v63, %v28812_v42  ;;  %v29234_v14 = vld [vmem:[#allocation2 + $0x112] sm:$0xff]  ;;  %v24047_v63 = vpop.f32.mrb[26].mxu1  ;;  %v34464_v3 = vld [vmem:[#allocation11_spill] sm:$0xff] }
 0x318   : > { %4915 = vst.msk [vmem:[#allocation2 + $0x121] sm:$0xff] %vm4892_vm5, %v4530_v27  ;;  %34444 = vst [vmem:[#allocation70_spill] sm:$0xff] %v29220_v44  ;;  %v4532_v27 = vmax.f32 %v4500_v59, 0.0  ;;  %v29236_v30 = vld [vmem:[#allocation2 + $0x111] sm:$0xff]  ;;  %v29241_v23 = vld [vmem:[#allocation2 + $0x109] sm:$0xff]  ;;  %v29256_v44 = vpop.permute.xlu1 %12566  ;;  %v25950_v15 = vadd.f32 %v24047_v63, %v28816_v22  ;;  %v4418_v21 = vpop.f32.mrb[27].mxu1 }
 0x319   : > { %8816 = vst.msk [vmem:[#allocation2 + $0xf1] sm:$0xff] %vm989_vm4, %v28814_v34  ;;  %8817 = vst.msk [vmem:[#allocation2 + $0xf9] sm:$0xff] %vm989_vm4, %v28810_v33  ;;  %v4503_v34 = vadd.f32 %v25948_v12, %v28835_v19  ;;  %v29243_v33 = vld [vmem:[#allocation2 + $0x108] sm:$0xff]  ;;  %v29245_v42 = vld [vmem:[#allocation2 + $0x110] sm:$0xff]  ;;  %v4502_v59 = vadd.f32 %v25949_v1, %v28835_v19  ;;  %24086 = vmatprep.mubr.msk.f32.mxu0 %vm634_vm1, %v29241_v23 }
 0x31a   : > { %34445 = vst [vmem:[#allocation71_spill] sm:$0xff] %v29232_v13  ;;  %34446 = vst [vmem:[#allocation72_spill] sm:$0xff] %v29234_v14  ;;  %4652 = vrot.lane.b32.xlu1 %v4532_v27, %s27266_s23  ;;  %v29254_v12 = vld [vmem:[#allocation2 + $0x109] sm:$0xff]  ;;  %v34453_v1 = vld [vmem:[#allocation6_spill] sm:$0xff]  ;;  %24087 = vmatmul.mubr.msk.f32.gmra.mrb[86].mxu0 %vm634_vm1, %v29232_v13 }
 0x31b   : > { %34447 = vst [vmem:[#allocation73_spill] sm:$0xff] %v29236_v30  ;;  %4565 = vst.msk [vmem:[#allocation3 + $0xc8] sm:$0xff] %vm989_vm4, %v4533_v8  ;;  %v29252_v30 = vld [vmem:[#allocation2 + $0x10a] sm:$0xff]  ;;  %v4535_v0 = vmax.f32 %v4503_v34, 0.0  ;;  %v34462_v31 = vld [vmem:[#allocation10_spill] sm:$0xff] }
 0x31c   : > { %4918 = vst.msk [vmem:[#allocation2 + $0x141] sm:$0xff] %vm4892_vm5, %v4533_v8  ;;  %34448 = vst [vmem:[#allocation74_spill] sm:$0xff] %v29241_v23  ;;  %v34452_v14 = vld [vmem:[#allocation9_spill] sm:$0xff]  ;;  %v34461_v13 = vld [vmem:[#allocation8_spill] sm:$0xff] }
 0x31d   : > { %4564 = vst.msk [vmem:[#allocation3 + $0xc0] sm:$0xff] %vm989_vm4, %v4532_v27  ;;  %34449 = vst [vmem:[#allocation75_spill] sm:$0xff] %v29252_v30  ;;  %v34455_v30 = vld [vmem:[#allocation7_spill] sm:$0xff]  ;;  %v29270_v34 = vld [vmem:[#allocation2 + $0x129] sm:$0xff]  ;;  %4658 = vrot.lane.b32.xlu0 %v4535_v0, %s27266_s23 }
 0x31e   : > { %4917 = vst.msk [vmem:[#allocation2 + $0x139] sm:$0xff] %vm4892_vm5, %v4532_v27  ;;  %34450 = vst [vmem:[#allocation76_spill] sm:$0xff] %v29254_v12  ;;  %v4534_v27 = vmax.f32 %v4502_v59, 0.0  ;;  %v25951_v12 = vadd.f32 %v4418_v21, %v34455_v30  ;;  %v29272_v22 = vld [vmem:[#allocation2 + $0x12a] sm:$0xff] }
 0x31f   : > { %34451 = vst [vmem:[#allocation77_spill] sm:$0xff] %v29256_v44  ;;  %8818 = vst.msk [vmem:[#allocation2 + $0x109] sm:$0xff] %vm989_vm4, %v34452_v14  ;;  %v29274_v63 = vld [vmem:[#allocation2 + $0x129] sm:$0xff]  ;;  %v4505_v14 = vadd.f32 %v25950_v15, %v28835_v19  ;;  %v29281_v59 = vld [vmem:[#allocation2 + $0x120] sm:$0xff]  ;;  %v24050_v44 = vpop.f32.mrb[28].mxu1 }
 0x320   : > { %8819 = vst.msk [vmem:[#allocation2 + $0x111] sm:$0xff] %vm989_vm4, %v34453_v1  ;;  %34454 = vst [vmem:[#allocation9_spill] sm:$0xff] %v29265_v18  ;;  %v29279_v1 = vld [vmem:[#allocation2 + $0x121] sm:$0xff]  ;;  %v4504_v30 = vadd.f32 %v25951_v12, %v28835_v19  ;;  %4656 = vrot.lane.b32.xlu1 %v4534_v27, %s27266_s23  ;;  %v25952_v23 = vadd.f32 %v24050_v44, %v34461_v13  ;;  %v29310_v13 = vpop.permute.xlu1 %12570 }
 0x321   : > { %34456 = vst [vmem:[#allocation6_spill] sm:$0xff] %v29270_v34  ;;  %34457 = vst [vmem:[#allocation7_spill] sm:$0xff] %v29272_v22  ;;  %v29283_v21 = vld [vmem:[#allocation2 + $0x128] sm:$0xff]  ;;  %24089 = vmatprep.mubr.msk.f32.mxu0 %vm634_vm1, %v29279_v1  ;;  %v4428_v22 = vpop.f32.mrb[29].mxu1 }
 0x322   : > { %34458 = vst [vmem:[#allocation78_spill] sm:$0xff] %v29274_v63  ;;  %4567 = vst.msk [vmem:[#allocation3 + $0xd8] sm:$0xff] %vm989_vm4, %v4535_v0  ;;  %v29290_v18 = vld [vmem:[#allocation2 + $0x122] sm:$0xff]  ;;  %v4537_v63 = vmax.f32 %v4505_v14, 0.0  ;;  %v25953_v8 = vadd.f32 %v4428_v22, %v34464_v3  ;;  %24090 = vmatmul.mubr.msk.f32.gmra.mrb[88].mxu0 %vm634_vm1, %v29270_v34 }
 0x323   : > { %4920 = vst.msk [vmem:[#allocation2 + $0x159] sm:$0xff] %vm4892_vm5, %v4535_v0  ;;  %34459 = vst [vmem:[#allocation79_spill] sm:$0xff] %v29279_v1  ;;  %v29292_v15 = vld [vmem:[#allocation2 + $0x121] sm:$0xff] }
 0x324   : > { %4566 = vst.msk [vmem:[#allocation3 + $0xd0] sm:$0xff] %vm989_vm4, %v4534_v27  ;;  %34460 = vst [vmem:[#allocation80_spill] sm:$0xff] %v29292_v15  ;;  %v34463_v12 = vld [vmem:[#allocation40_spill] sm:$0xff]  ;;  %4662 = vrot.lane.b32.xlu0 %v4537_v63, %s27266_s23 }
 0x325   : > { %4919 = vst.msk [vmem:[#allocation2 + $0x151] sm:$0xff] %vm4892_vm5, %v4534_v27  ;;  %v4536_v27 = vmax.f32 %v4504_v30, 0.0  ;;  %v29304_v15 = vld [vmem:[#allocation2 + $0x141] sm:$0xff]  ;;  %34467 = vst [vmem:[#allocation40_spill] sm:$0xff] %v29310_v13  ;;  %v29315_v30 = vld [vmem:[#allocation2 + $0x139] sm:$0xff]  ;;  %v4506_v13 = vadd.f32 %v25953_v8, %v28835_v19 }
 0x326   : > { %8820 = vst.msk [vmem:[#allocation2 + $0x121] sm:$0xff] %vm989_vm4, %v34462_v31  ;;  %8821 = vst.msk [vmem:[#allocation2 + $0x129] sm:$0xff] %vm989_vm4, %v34463_v12  ;;  %v29306_v14 = vld [vmem:[#allocation2 + $0x142] sm:$0xff]  ;;  %v4507_v31 = vadd.f32 %v25952_v23, %v28835_v19  ;;  %v29317_v3 = vld [vmem:[#allocation2 + $0x138] sm:$0xff]  ;;  %v29321_v12 = vpop.permute.xlu0 %12568  ;;  %24092 = vmatprep.mubr.msk.f32.mxu0 %vm634_vm1, %v29315_v30 }
 0x327   : > { %34465 = vst [vmem:[#allocation8_spill] sm:$0xff] %v29304_v15  ;;  %v29308_v44 = vld [vmem:[#allocation2 + $0x141] sm:$0xff]  ;;  %4569 = vst.msk [vmem:[#allocation3 + $0xe8] sm:$0xff] %vm989_vm4, %v4537_v63  ;;  %4660 = vrot.lane.b32.xlu1 %v4536_v27, %s27266_s23  ;;  %v29330_v23 = vld [vmem:[#allocation2 + $0x139] sm:$0xff]  ;;  %24093 = vmatmul.mubr.msk.f32.gmra.mrb[90].mxu0 %vm634_vm1, %v29304_v15 }
 0x328   : > { %34466 = vst [vmem:[#allocation10_spill] sm:$0xff] %v29308_v44  ;;  %4922 = vst.msk [vmem:[#allocation2 + $0x171] sm:$0xff] %vm4892_vm5, %v4537_v63  ;;  %v29319_v22 = vld [vmem:[#allocation2 + $0x140] sm:$0xff]  ;;  %v4539_v34 = vmax.f32 %v4507_v31, 0.0 }
 0x329   : > { %34468 = vst [vmem:[#allocation11_spill] sm:$0xff] %v29315_v30  ;;  %34469 = vst [vmem:[#allocation81_spill] sm:$0xff] %v29321_v12  ;;  %v29328_v44 = vld [vmem:[#allocation2 + $0x13a] sm:$0xff]  ;;  %v4538_v12 = vmax.f32 %v4506_v13, 0.0 }
 0x32a   : > { %4568 = vst.msk [vmem:[#allocation3 + $0xe0] sm:$0xff] %vm989_vm4, %v4536_v27  ;;  %34470 = vst [vmem:[#allocation82_spill] sm:$0xff] %v29330_v23  ;;  %v29340_v19 = vld [vmem:[#allocation2 + $0x159] sm:$0xff]  ;;  %v29370_v23 = vpop.permute.xlu0 %12572  ;;  %4666 = vrot.lane.b32.xlu0 %v4539_v34, %s27266_s23 }
 0x32b   : > { %4921 = vst.msk [vmem:[#allocation2 + $0x169] sm:$0xff] %vm4892_vm5, %v4536_v27  ;;  %34471 = vst [vmem:[#allocation83_spill] sm:$0xff] %v29340_v19  ;;  %v29342_v0 = vld [vmem:[#allocation2 + $0x15a] sm:$0xff]  ;;  %4664 = vrot.lane.b32.xlu1 %v4538_v12, %s27266_s23  ;;  %s27268_s23 = smov 8  }
 0x32c   : > { %8822 = vst.msk [vmem:[#allocation2 + $0x139] sm:$0xff] %vm989_vm4, %v28840_v53  ;;  %8823 = vst.msk [vmem:[#allocation2 + $0x141] sm:$0xff] %vm989_vm4, %v28837_v52  ;;  %v29344_v27 = vld [vmem:[#allocation2 + $0x159] sm:$0xff]  ;;  %v29348_v8 = vld [vmem:[#allocation2 + $0x151] sm:$0xff] }
 0x32d   : > { %34472 = vst [vmem:[#allocation84_spill] sm:$0xff] %v29344_v27  ;;  %4924 = vst.msk [vmem:[#allocation2 + $0x189] sm:$0xff] %vm4892_vm5, %v4539_v34  ;;  %v29350_v53 = vld [vmem:[#allocation2 + $0x150] sm:$0xff]  ;;  %v29352_v31 = vld [vmem:[#allocation2 + $0x158] sm:$0xff]  ;;  %v29362_v27 = vpop.permute.xlu1 %12574  ;;  %24095 = vmatprep.mubr.msk.f32.mxu0 %vm634_vm1, %v29348_v8 }
 0x32e   : > { %4571 = vst.msk [vmem:[#allocation3 + $0xf8] sm:$0xff] %vm989_vm4, %v4539_v34  ;;  %34473 = vst [vmem:[#allocation85_spill] sm:$0xff] %v29348_v8  ;;  %v29358_v52 = vld [vmem:[#allocation2 + $0x152] sm:$0xff]  ;;  %24096 = vmatmul.mubr.msk.f32.gmra.mrb[92].mxu0 %vm634_vm1, %v29340_v19 }
 0x32f   : > { %4570 = vst.msk [vmem:[#allocation3 + $0xf0] sm:$0xff] %vm989_vm4, %v4538_v12  ;;  %v29360_v13 = vld [vmem:[#allocation2 + $0x151] sm:$0xff]  ;;  %34475 = vst [vmem:[#allocation87_spill] sm:$0xff] %v29362_v27 }
 0x330   : > { %4923 = vst.msk [vmem:[#allocation2 + $0x181] sm:$0xff] %vm4892_vm5, %v4538_v12  ;;  %34474 = vst [vmem:[#allocation86_spill] sm:$0xff] %v29360_v13  ;;  %v29374_v63 = vld [vmem:[#allocation2 + $0x171] sm:$0xff] }
 0x331   : > { %8824 = vst.msk [vmem:[#allocation2 + $0x151] sm:$0xff] %vm989_vm4, %v28856_v55  ;;  %8825 = vst.msk [vmem:[#allocation2 + $0x159] sm:$0xff] %vm989_vm4, %v28853_v58  ;;  %v29376_v12 = vld [vmem:[#allocation2 + $0x172] sm:$0xff]  ;;  %v4925_v58 = vld [vmem:[#allocation2] sm:$0xff]  ;;  %v29403_v19 = vpop.permute.xlu1 %12578 }
 0x332   : > { %34476 = vst [vmem:[#allocation88_spill] sm:$0xff] %v29370_v23  ;;  %v29378_v13 = vld [vmem:[#allocation2 + $0x171] sm:$0xff]  ;;  %v29380_v27 = vld [vmem:[#allocation2 + $0x169] sm:$0xff]  ;;  %34483 = vst [vmem:[#allocation95_spill] sm:$0xff] %v29403_v19 }
 0x333   : > { %34477 = vst [vmem:[#allocation89_spill] sm:$0xff] %v29378_v13  ;;  %34478 = vst [vmem:[#allocation90_spill] sm:$0xff] %v29380_v27  ;;  %v29382_v8 = vld [vmem:[#allocation2 + $0x168] sm:$0xff]  ;;  %v29384_v15 = vld [vmem:[#allocation2 + $0x170] sm:$0xff]  ;;  %24098 = vmatprep.mubr.msk.f32.mxu0 %vm634_vm1, %v29380_v27 }
 0x334   : > { %34479 = vst [vmem:[#allocation91_spill] sm:$0xff] %v29384_v15  ;;  %v29389_v55 = vld [vmem:[#allocation2 + $0x16a] sm:$0xff]  ;;  %24099 = vmatmul.mubr.msk.f32.gmra.mrb[94].mxu0 %vm634_vm1, %v29374_v63 }
 0x335   : > { %v29391_v23 = vld [vmem:[#allocation2 + $0x169] sm:$0xff]  ;;  %8827 = vst.msk [vmem:[#allocation2 + $0x171] sm:$0xff] %vm989_vm4, %v28872_v7  ;;  %24103 = vmatprep.mubr.msk.f32.mxu0 %vm634_vm1, %v4925_v58  ;;  %v29430_v19 = vpop.permute.xlu1 %12582 }
 0x336   : > { %34480 = vst [vmem:[#allocation92_spill] sm:$0xff] %v29391_v23  ;;  %8826 = vst.msk [vmem:[#allocation2 + $0x169] sm:$0xff] %vm989_vm4, %v28883_v4  ;;  %v29399_v13 = vld [vmem:[#allocation2 + $0x189] sm:$0xff]  ;;  %v29410_v4 = vpop.permute.xlu0 %12576 }
 0x337   : > { %34481 = vst [vmem:[#allocation93_spill] sm:$0xff] %v29399_v13  ;;  %v29401_v34 = vld [vmem:[#allocation2 + $0x18a] sm:$0xff]  ;;  %v29406_v30 = vld [vmem:[#allocation2 + $0x180] sm:$0xff]  ;;  %34486 = vst [vmem:[#allocation98_spill] sm:$0xff] %v29410_v4 }
 0x338   : > { %34482 = vst [vmem:[#allocation94_spill] sm:$0xff] %v29401_v34  ;;  %v4926_v27 = vld [vmem:[#allocation2 + $0x8] sm:$0xff]  ;;  %34484 = vst [vmem:[#allocation96_spill] sm:$0xff] %v29406_v30  ;;  %v29419_v13 = vld [vmem:[%s33872_s5 + $0x18] sm:$0xff] }
 0x339   : > { %v29408_v23 = vld [vmem:[#allocation2 + $0x188] sm:$0xff]  ;;  %24104 = vmatmul.mubr.msk.f32.vlgmr.msra.gmra.mrb[64].mxu0 %vm634_vm1, %v4926_v27  ;;  %v34488_v58 = vld [vmem:[#allocation5_spill] sm:$0xff] }
 0x33a   : > { %34485 = vst [vmem:[#allocation97_spill] sm:$0xff] %v29408_v23  ;;  %v29412_v1 = vld [vmem:[#allocation2 + $0x181] sm:$0xff]  ;;  %24152 = vmatpush3.msra.mxu0 %v34488_v58  ;;  %24106 = vmatprep.mubr.msk.f32.mxu0 %vm634_vm1, %v28879_v56  ;;  %34489 = vst [vmem:[#allocation5_spill] sm:$0xff] %v29430_v19  ;;  %v29432_v4 = vpop.permute.xlu0 %12580 }
 0x33b   : > { %v29414_v7 = vld [vmem:[#allocation2 + $0x182] sm:$0xff]  ;;  %24201 = vmatprep.subr.mxu0 %v29419_v13  ;;  %34490 = vst [vmem:[#allocation100_spill] sm:$0xff] %v29432_v4  ;;  %v5635_v4 = vld [vmem:[#allocation2 + $0xa] sm:$0xff] }
 0x33c   : > { %34487 = vst [vmem:[#allocation99_spill] sm:$0xff] %v29414_v7  ;;  %8828 = vst.msk [vmem:[#allocation2 + $0x181] sm:$0xff] %vm989_vm4, %v28935_v9  ;;  %v5634_v19 = vld [vmem:[#allocation2 + $0x2] sm:$0xff]  ;;  %v34506_v7 = vld [vmem:[#allocation58_spill] sm:$0xff] }
 0x33d   : > { %8829 = vst.msk [vmem:[#allocation2 + $0x189] sm:$0xff] %vm989_vm4, %v28926_v61  ;;  %24107 = vmatmul.mubr.msk.f32.gmra.mrb[66].mxu0 %vm634_vm1, %v28881_v26  ;;  %v29440_v61 = vpop.permute.xlu1 %12586 }
 0x33e   : > { %24109 = vmatprep.mubr.msk.f32.mxu0 %vm634_vm1, %v28913_v37  ;;  %34491 = vst [vmem:[#allocation101_spill] sm:$0xff] %v29440_v61  ;;  %v29444_v9 = vpop.permute.xlu0 %12584 }
 0x33f   : > { %34492 = vst [vmem:[#allocation102_spill] sm:$0xff] %v29444_v9 }
 0x341   : > { %24110 = vmatmul.mubr.msk.f32.gmra.mrb[68].mxu0 %vm634_vm1, %v28915_v28  ;;  %v29450_v27 = vpop.permute.xlu1 %12590 }
 0x342   : > { %24112 = vmatprep.mubr.msk.f32.mxu0 %vm634_vm1, %v28951_v11  ;;  %34493 = vst [vmem:[#allocation103_spill] sm:$0xff] %v29450_v27  ;;  %v29452_v58 = vpop.permute.xlu0 %12588 }
 0x343   : > { %34494 = vst [vmem:[#allocation104_spill] sm:$0xff] %v29452_v58 }
 0x345   : > { %24113 = vmatmul.mubr.msk.f32.gmra.mrb[70].mxu0 %vm634_vm1, %v28953_v10  ;;  %v29460_v61 = vpop.permute.xlu1 %12594 }
 0x346   : > { %24115 = vmatprep.mubr.msk.f32.mxu0 %vm634_vm1, %v28987_v36  ;;  %34495 = vst [vmem:[#allocation105_spill] sm:$0xff] %v29460_v61  ;;  %v29464_v9 = vpop.permute.xlu0 %12592 }
 0x347   : > { %34496 = vst [vmem:[#allocation106_spill] sm:$0xff] %v29464_v9 }
 0x349   : > { %24116 = vmatmul.mubr.msk.f32.gmra.mrb[72].mxu0 %vm634_vm1, %v28989_v20  ;;  %v29470_v27 = vpop.permute.xlu1 %12598 }
 0x34a   : > { %24118 = vmatprep.mubr.msk.f32.mxu0 %vm634_vm1, %v29023_v47  ;;  %34497 = vst [vmem:[#allocation107_spill] sm:$0xff] %v29470_v27  ;;  %v29472_v58 = vpop.permute.xlu0 %12596 }
 0x34b   : > { %34498 = vst [vmem:[#allocation108_spill] sm:$0xff] %v29472_v58 }
 0x34d   : > { %24119 = vmatmul.mubr.msk.f32.gmra.mrb[74].mxu0 %vm634_vm1, %v29025_v45  ;;  %v29480_v61 = vpop.permute.xlu1 %12602 }
 0x34e   : > { %24121 = vmatprep.mubr.msk.f32.mxu0 %vm634_vm1, %v29061_v38  ;;  %34499 = vst [vmem:[#allocation109_spill] sm:$0xff] %v29480_v61  ;;  %v29484_v9 = vpop.permute.xlu0 %12600 }
 0x34f   : > { %34500 = vst [vmem:[#allocation110_spill] sm:$0xff] %v29484_v9 }
 0x351   : > { %24122 = vmatmul.mubr.msk.f32.gmra.mrb[76].mxu0 %vm634_vm1, %v29063_v50  ;;  %v29490_v27 = vpop.permute.xlu1 %12606 }
 0x352   : > { %24124 = vmatprep.mubr.msk.f32.mxu0 %vm634_vm1, %v29097_v29  ;;  %34501 = vst [vmem:[#allocation111_spill] sm:$0xff] %v29490_v27  ;;  %v29492_v58 = vpop.permute.xlu0 %12604 }
 0x353   : > { %34502 = vst [vmem:[#allocation112_spill] sm:$0xff] %v29492_v58 }
 0x355   : > { %24125 = vmatmul.mubr.msk.f32.gmra.mrb[78].mxu0 %vm634_vm1, %v29099_v24  ;;  %v4607_v61 = vpop.permute.xlu1 %4606 }
 0x356   : > { %24127 = vmatprep.mubr.msk.f32.mxu0 %vm634_vm1, %v29133_v62  ;;  %4701 = vst.msk [vmem:[#allocation4 + $0x8] sm:$0xff] %vm989_vm4, %v4607_v61  ;;  %v4605_v9 = vpop.permute.xlu0 %4604 }
 0x357   : > { %4700 = vst.msk [vmem:[#allocation4] sm:$0xff] %vm989_vm4, %v4605_v9 }
 0x359   : > { %24128 = vmatmul.mubr.msk.f32.gmra.mrb[80].mxu0 %vm634_vm1, %v29135_v43  ;;  %v4613_v61 = vpop.permute.xlu1 %4612 }
 0x35a   : > { %24130 = vmatprep.mubr.msk.f32.mxu0 %vm634_vm1, %v29171_v49  ;;  %v4611_v27 = vpop.permute.xlu0 %4610  ;;  %4704 = vst.msk [vmem:[#allocation4 + $0x20] sm:$0xff] %vm989_vm4, %v4613_v61 }
 0x35b   : > { %4703 = vst.msk [vmem:[#allocation4 + $0x18] sm:$0xff] %vm989_vm4, %v4611_v27 }
 0x35d   : > { %24131 = vmatmul.mubr.msk.f32.gmra.mrb[82].mxu0 %vm634_vm1, %v29173_v35  ;;  %v4617_v9 = vpop.permute.xlu1 %4616 }
 0x35e   : > { %24133 = vmatprep.mubr.msk.f32.mxu0 %vm634_vm1, %v29207_v25  ;;  %v4609_v58 = vpop.permute.xlu0 %4608  ;;  %4706 = vst.msk [vmem:[#allocation4 + $0x30] sm:$0xff] %vm989_vm4, %v4617_v9  ;;  %v29529_v9 = vld [vmem:[%s33872_s5 + $0x20] sm:$0xff] }
 0x35f   : > { %4702 = vst.msk [vmem:[#allocation4 + $0x10] sm:$0xff] %vm989_vm4, %v4609_v58 }
 0x361   : > { %24134 = vmatmul.mubr.msk.f32.gmra.mrb[84].mxu0 %vm634_vm1, %v29209_v54  ;;  %v4621_v58 = vpop.permute.xlu1 %4620 }
 0x362   : > { %24136 = vmatprep.mubr.msk.f32.mxu0 %vm634_vm1, %v29243_v33  ;;  %v4615_v27 = vpop.permute.xlu0 %4614  ;;  %4708 = vst.msk [vmem:[#allocation4 + $0x40] sm:$0xff] %vm989_vm4, %v4621_v58 }
 0x363   : > { %4705 = vst.msk [vmem:[#allocation4 + $0x28] sm:$0xff] %vm989_vm4, %v4615_v27 }
 0x365   : > { %24137 = vmatmul.mubr.msk.f32.gmra.mrb[86].mxu0 %vm634_vm1, %v29245_v42  ;;  %v4625_v27 = vpop.permute.xlu1 %4624 }
 0x366   : > { %24139 = vmatprep.mubr.msk.f32.mxu0 %vm634_vm1, %v29281_v59  ;;  %v4619_v61 = vpop.permute.xlu0 %4618  ;;  %4710 = vst.msk [vmem:[#allocation4 + $0x50] sm:$0xff] %vm989_vm4, %v4625_v27  ;;  %v34505_v27 = vld [vmem:[#allocation56_spill] sm:$0xff] }
 0x367   : > { %4707 = vst.msk [vmem:[#allocation4 + $0x38] sm:$0xff] %vm989_vm4, %v4619_v61 }
 0x369   : > { %24140 = vmatmul.mubr.msk.f32.gmra.mrb[88].mxu0 %vm634_vm1, %v29283_v21  ;;  %v4629_v58 = vpop.permute.xlu1 %4628 }
 0x36a   : > { %24142 = vmatprep.mubr.msk.f32.mxu0 %vm634_vm1, %v29317_v3  ;;  %v4623_v34 = vpop.permute.xlu0 %4622  ;;  %4712 = vst.msk [vmem:[#allocation4 + $0x60] sm:$0xff] %vm989_vm4, %v4629_v58 }
 0x36b   : > { %4709 = vst.msk [vmem:[#allocation4 + $0x48] sm:$0xff] %vm989_vm4, %v4623_v34 }
 0x36d   : > { %24143 = vmatmul.mubr.msk.f32.gmra.mrb[90].mxu0 %vm634_vm1, %v29319_v22  ;;  %v4633_v34 = vpop.permute.xlu1 %4632 }
 0x36e   : > { %24145 = vmatprep.mubr.msk.f32.mxu0 %vm634_vm1, %v29350_v53  ;;  %v4627_v61 = vpop.permute.xlu0 %4626  ;;  %4714 = vst.msk [vmem:[#allocation4 + $0x70] sm:$0xff] %vm989_vm4, %v4633_v34 }
 0x36f   : > { %4711 = vst.msk [vmem:[#allocation4 + $0x58] sm:$0xff] %vm989_vm4, %v4627_v61 }
 0x371   : > { %24146 = vmatmul.mubr.msk.f32.gmra.mrb[92].mxu0 %vm634_vm1, %v29352_v31 }
 0x372   : > { %24148 = vmatprep.mubr.msk.f32.mxu0 %vm634_vm1, %v29382_v8  ;;  %v4637_v58 = vpop.permute.xlu1 %4636 }
 0x373   : > { %4716 = vst.msk [vmem:[#allocation4 + $0x80] sm:$0xff] %vm989_vm4, %v4637_v58 }
 0x375   : > { %24149 = vmatmul.mubr.msk.f32.gmra.mrb[94].mxu0 %vm634_vm1, %v29384_v15 }
 0x376   : > { %24153 = vmatprep.mubr.msk.f32.mxu0 %vm634_vm1, %v5634_v19  ;;  %v34503_v19 = vld [vmem:[#allocation43_spill] sm:$0xff] }
 0x378   : > { %v4641_v34 = vpop.permute.xlu1 %4640 }
 0x379   : > { %24154 = vmatmul.mubr.msk.f32.vlgmr.msra.gmra.mrb[64].mxu0 %vm634_vm1, %v5635_v4  ;;  %v4631_v4 = vpop.permute.xlu0 %4630  ;;  %4718 = vst.msk [vmem:[#allocation4 + $0x90] sm:$0xff] %vm989_vm4, %v4641_v34 }
 0x37a   : > { %24202 = vmatpush3.msra.mxu0 %v29419_v13  ;;  %24156 = vmatprep.mubr.msk.f32.mxu0 %vm634_vm1, %v28890_v17  ;;  %v34504_v13 = vld [vmem:[#allocation14_spill] sm:$0xff]  ;;  %4713 = vst.msk [vmem:[#allocation4 + $0x68] sm:$0xff] %vm989_vm4, %v4631_v4 }
 0x37b   : > { %24251 = vmatprep.subr.mxu0 %v29529_v9 }
 0x37d   : > { %24157 = vmatmul.mubr.msk.f32.gmra.mrb[66].mxu0 %vm634_vm1, %v34503_v19  ;;  %v4635_v61 = vpop.permute.xlu0 %4634 }
 0x37e   : > { %24159 = vmatprep.mubr.msk.f32.mxu0 %vm634_vm1, %v28922_v5  ;;  %4715 = vst.msk [vmem:[#allocation4 + $0x78] sm:$0xff] %vm989_vm4, %v4635_v61  ;;  %v4645_v58 = vpop.permute.xlu1 %4644 }
 0x37f   : > { %4720 = vst.msk [vmem:[#allocation4 + $0xa0] sm:$0xff] %vm989_vm4, %v4645_v58 }
 0x381   : > { %24160 = vmatmul.mubr.msk.f32.gmra.mrb[68].mxu0 %vm634_vm1, %v34504_v13  ;;  %v4639_v4 = vpop.permute.xlu0 %4638 }
 0x382   : > { %24162 = vmatprep.mubr.msk.f32.mxu0 %vm634_vm1, %v28960_v46  ;;  %4717 = vst.msk [vmem:[#allocation4 + $0x88] sm:$0xff] %vm989_vm4, %v4639_v4 }
 0x385   : > { %24163 = vmatmul.mubr.msk.f32.gmra.mrb[70].mxu0 %vm634_vm1, %v34505_v27  ;;  %v4643_v61 = vpop.permute.xlu0 %4642  ;;  %v4649_v34 = vpop.permute.xlu1 %4648 }
 0x386   : > { %24165 = vmatprep.mubr.msk.f32.mxu0 %vm634_vm1, %v28998_v32  ;;  %4719 = vst.msk [vmem:[#allocation4 + $0x98] sm:$0xff] %vm989_vm4, %v4643_v61  ;;  %4722 = vst.msk [vmem:[#allocation4 + $0xb0] sm:$0xff] %vm989_vm4, %v4649_v34 }
 0x389   : > { %24166 = vmatmul.mubr.msk.f32.gmra.mrb[72].mxu0 %vm634_vm1, %v28976_v40  ;;  %v4647_v4 = vpop.permute.xlu0 %4646 }
 0x38a   : > { %24168 = vmatprep.mubr.msk.f32.mxu0 %vm634_vm1, %v29032_v48  ;;  %4721 = vst.msk [vmem:[#allocation4 + $0xa8] sm:$0xff] %vm989_vm4, %v4647_v4 }
 0x38c   : > { %v4653_v58 = vpop.permute.xlu1 %4652 }
 0x38d   : > { %24169 = vmatmul.mubr.msk.f32.gmra.mrb[74].mxu0 %vm634_vm1, %v34506_v7  ;;  %v4651_v61 = vpop.permute.xlu0 %4650  ;;  %4724 = vst.msk [vmem:[#allocation4 + $0xc0] sm:$0xff] %vm989_vm4, %v4653_v58 }
 0x38e   : > { %24171 = vmatprep.mubr.msk.f32.mxu0 %vm634_vm1, %v29070_v6  ;;  %4723 = vst.msk [vmem:[#allocation4 + $0xb8] sm:$0xff] %vm989_vm4, %v4651_v61 }
 0x391   : > { %24172 = vmatmul.mubr.msk.f32.gmra.mrb[76].mxu0 %vm634_vm1, %v29052_v51  ;;  %v4655_v4 = vpop.permute.xlu0 %4654 }
 0x392   : > { %24174 = vmatprep.mubr.msk.f32.mxu0 %vm634_vm1, %v29108_v57  ;;  %v4657_v34 = vpop.permute.xlu1 %4656  ;;  %4725 = vst.msk [vmem:[#allocation4 + $0xc8] sm:$0xff] %vm989_vm4, %v4655_v4 }
 0x393   : > { %4726 = vst.msk [vmem:[#allocation4 + $0xd0] sm:$0xff] %vm989_vm4, %v4657_v34 }
 0x395   : > { %24175 = vmatmul.mubr.msk.f32.gmra.mrb[78].mxu0 %vm634_vm1, %v29086_v60  ;;  %v4659_v61 = vpop.permute.xlu0 %4658 }
 0x396   : > { %24177 = vmatprep.mubr.msk.f32.mxu0 %vm634_vm1, %v29142_v16  ;;  %4727 = vst.msk [vmem:[#allocation4 + $0xd8] sm:$0xff] %vm989_vm4, %v4659_v61  ;;  %v34507_v16 = vld [vmem:[#allocation69_spill] sm:$0xff]  ;;  %v34511_v61 = vld [vmem:[#allocation7_spill] sm:$0xff] }
 0x399   : > { %24178 = vmatmul.mubr.msk.f32.gmra.mrb[80].mxu0 %vm634_vm1, %v29124_v39  ;;  %v4661_v58 = vpop.permute.xlu1 %4660  ;;  %v34508_v39 = vld [vmem:[#allocation64_spill] sm:$0xff]  ;;  %v4663_v4 = vpop.permute.xlu0 %4662 }
 0x39a   : > { %24180 = vmatprep.mubr.msk.f32.mxu0 %vm634_vm1, %v29180_v2  ;;  %4728 = vst.msk [vmem:[#allocation4 + $0xe0] sm:$0xff] %vm989_vm4, %v4661_v58  ;;  %4729 = vst.msk [vmem:[#allocation4 + $0xe8] sm:$0xff] %vm989_vm4, %v4663_v4  ;;  %v34509_v2 = vld [vmem:[#allocation75_spill] sm:$0xff]  ;;  %v34514_v4 = vld [vmem:[#allocation16_spill] sm:$0xff] }
 0x39d   : > { %24181 = vmatmul.mubr.msk.f32.gmra.mrb[82].mxu0 %vm634_vm1, %v29162_v41  ;;  %v4665_v34 = vpop.permute.xlu1 %4664  ;;  %v34510_v41 = vld [vmem:[#allocation72_spill] sm:$0xff]  ;;  %v4667_v58 = vpop.permute.xlu0 %4666 }
 0x39e   : > { %24183 = vmatprep.mubr.msk.f32.mxu0 %vm634_vm1, %v34507_v16  ;;  %4730 = vst.msk [vmem:[#allocation4 + $0xf0] sm:$0xff] %vm989_vm4, %v4665_v34  ;;  %4731 = vst.msk [vmem:[#allocation4 + $0xf8] sm:$0xff] %vm989_vm4, %v4667_v58  ;;  %v20980_v34 = vld [vmem:[%s33872_s5 + $0x28] sm:$0xff]  ;;  %v34515_v58 = vld [vmem:[#allocation15_spill] sm:$0xff] }
 0x3a1   : > { %24184 = vmatmul.mubr.msk.f32.gmra.mrb[84].mxu0 %vm634_vm1, %v34508_v39 }
 0x3a2   : > { %24186 = vmatprep.mubr.msk.f32.mxu0 %vm634_vm1, %v34509_v2 }
 0x3a5   : > { %24187 = vmatmul.mubr.msk.f32.gmra.mrb[86].mxu0 %vm634_vm1, %v34510_v41 }
 0x3a6   : > { %24189 = vmatprep.mubr.msk.f32.mxu0 %vm634_vm1, %v29290_v18 }
 0x3a9   : > { %24190 = vmatmul.mubr.msk.f32.gmra.mrb[88].mxu0 %vm634_vm1, %v34511_v61 }
 0x3aa   : > { %24192 = vmatprep.mubr.msk.f32.mxu0 %vm634_vm1, %v29328_v44 }
 0x3ad   : > { %24193 = vmatmul.mubr.msk.f32.gmra.mrb[90].mxu0 %vm634_vm1, %v29306_v14 }
 0x3ae   : > { %24195 = vmatprep.mubr.msk.f32.mxu0 %vm634_vm1, %v29358_v52 }
 0x3b1   : > { %24196 = vmatmul.mubr.msk.f32.gmra.mrb[92].mxu0 %vm634_vm1, %v29342_v0 }
 0x3b2   : > { %24198 = vmatprep.mubr.msk.f32.mxu0 %vm634_vm1, %v29389_v55 }
 0x3b5   : > { %24199 = vmatmul.mubr.msk.f32.gmra.mrb[94].mxu0 %vm634_vm1, %v29376_v12 }
 0x3b6   : > { %24203 = vmatprep.mubr.msk.f32.mxu0 %vm634_vm1, %v28879_v56  ;;  %v34512_v56 = vld [vmem:[#allocation12_spill] sm:$0xff] }
 0x3b9   : > { %24204 = vmatmul.mubr.msk.f32.vlgmr.msra.gmra.mrb[64].mxu0 %vm634_vm1, %v28881_v26  ;;  %v21013_v26 = vld [vmem:[%s33872_s5 + $0x30] sm:$0xff] }
 0x3ba   : > { %24252 = vmatpush3.msra.mxu0 %v29529_v9  ;;  %24206 = vmatprep.mubr.msk.f32.mxu0 %vm634_vm1, %v28913_v37  ;;  %v34513_v9 = vld [vmem:[#allocation13_spill] sm:$0xff] }
 0x3bb   : > { %24301 = vmatprep.subr.mxu0 %v20980_v34 }
 0x3bd   : > { %24207 = vmatmul.mubr.msk.f32.gmra.mrb[66].mxu0 %vm634_vm1, %v28915_v28 }
 0x3be   : > { %24209 = vmatprep.mubr.msk.f32.mxu0 %vm634_vm1, %v28951_v11 }
 0x3c1   : > { %24210 = vmatmul.mubr.msk.f32.gmra.mrb[68].mxu0 %vm634_vm1, %v28953_v10 }
 0x3c2   : > { %24212 = vmatprep.mubr.msk.f32.mxu0 %vm634_vm1, %v28987_v36 }
 0x3c5   : > { %24213 = vmatmul.mubr.msk.f32.gmra.mrb[70].mxu0 %vm634_vm1, %v28989_v20 }
 0x3c6   : > { %24215 = vmatprep.mubr.msk.f32.mxu0 %vm634_vm1, %v29023_v47 }
 0x3c9   : > { %24216 = vmatmul.mubr.msk.f32.gmra.mrb[72].mxu0 %vm634_vm1, %v29025_v45 }
 0x3ca   : > { %24218 = vmatprep.mubr.msk.f32.mxu0 %vm634_vm1, %v29061_v38 }
 0x3cd   : > { %24219 = vmatmul.mubr.msk.f32.gmra.mrb[74].mxu0 %vm634_vm1, %v29063_v50 }
 0x3ce   : > { %24221 = vmatprep.mubr.msk.f32.mxu0 %vm634_vm1, %v29097_v29 }
 0x3d1   : > { %24222 = vmatmul.mubr.msk.f32.gmra.mrb[76].mxu0 %vm634_vm1, %v29099_v24 }
 0x3d2   : > { %24224 = vmatprep.mubr.msk.f32.mxu0 %vm634_vm1, %v29133_v62 }
 0x3d5   : > { %24225 = vmatmul.mubr.msk.f32.gmra.mrb[78].mxu0 %vm634_vm1, %v29135_v43 }
 0x3d6   : > { %24227 = vmatprep.mubr.msk.f32.mxu0 %vm634_vm1, %v29171_v49 }
 0x3d9   : > { %24228 = vmatmul.mubr.msk.f32.gmra.mrb[80].mxu0 %vm634_vm1, %v29173_v35 }
 0x3da   : > { %24230 = vmatprep.mubr.msk.f32.mxu0 %vm634_vm1, %v29207_v25 }
 0x3dd   : > { %24231 = vmatmul.mubr.msk.f32.gmra.mrb[82].mxu0 %vm634_vm1, %v29209_v54 }
 0x3de   : > { %24233 = vmatprep.mubr.msk.f32.mxu0 %vm634_vm1, %v29243_v33 }
 0x3e1   : > { %24234 = vmatmul.mubr.msk.f32.gmra.mrb[84].mxu0 %vm634_vm1, %v29245_v42 }
 0x3e2   : > { %24236 = vmatprep.mubr.msk.f32.mxu0 %vm634_vm1, %v29281_v59 }
 0x3e5   : > { %24237 = vmatmul.mubr.msk.f32.gmra.mrb[86].mxu0 %vm634_vm1, %v29283_v21 }
 0x3e6   : > { %24239 = vmatprep.mubr.msk.f32.mxu0 %vm634_vm1, %v29317_v3 }
 0x3e9   : > { %24240 = vmatmul.mubr.msk.f32.gmra.mrb[88].mxu0 %vm634_vm1, %v29319_v22 }
 0x3ea   : > { %24242 = vmatprep.mubr.msk.f32.mxu0 %vm634_vm1, %v29350_v53 }
 0x3ed   : > { %24243 = vmatmul.mubr.msk.f32.gmra.mrb[90].mxu0 %vm634_vm1, %v29352_v31 }
 0x3ee   : > { %24245 = vmatprep.mubr.msk.f32.mxu0 %vm634_vm1, %v29382_v8 }
 0x3f1   : > { %24246 = vmatmul.mubr.msk.f32.gmra.mrb[92].mxu0 %vm634_vm1, %v29384_v15  ;;  %v34519_v15 = vld [vmem:[#allocation20_spill] sm:$0xff] }
 0x3f2   : > { %24248 = vmatprep.mubr.msk.f32.mxu0 %vm634_vm1, %v29406_v30  ;;  %v34516_v30 = vld [vmem:[#allocation22_spill] sm:$0xff] }
 0x3f5   : > { %24249 = vmatmul.mubr.msk.f32.gmra.mrb[94].mxu0 %vm634_vm1, %v29408_v23  ;;  %v34517_v23 = vld [vmem:[#allocation53_spill] sm:$0xff] }
 0x3f6   : > { %24253 = vmatprep.mubr.msk.f32.mxu0 %vm634_vm1, %v34512_v56  ;;  %v34518_v56 = vld [vmem:[#allocation48_spill] sm:$0xff] }
 0x3f9   : > { %24254 = vmatmul.mubr.msk.f32.vlgmr.msra.gmra.mrb[64].mxu0 %vm634_vm1, %v34513_v9  ;;  %v34521_v9 = vld [vmem:[#allocation57_spill] sm:$0xff] }
 0x3fa   : > { %24302 = vmatpush3.msra.mxu0 %v20980_v34  ;;  %24256 = vmatprep.mubr.msk.f32.mxu0 %vm634_vm1, %v34514_v4  ;;  %v34520_v34 = vld [vmem:[#allocation62_spill] sm:$0xff] }
 0x3fb   : > { %24351 = vmatprep.subr.mxu0 %v21013_v26  ;;  %v34522_v4 = vld [vmem:[#allocation26_spill] sm:$0xff] }
 0x3fd   : > { %24257 = vmatmul.mubr.msk.f32.gmra.mrb[66].mxu0 %vm634_vm1, %v34515_v58  ;;  %v34523_v58 = vld [vmem:[#allocation24_spill] sm:$0xff] }
 0x3fe   : > { %24259 = vmatprep.mubr.msk.f32.mxu0 %vm634_vm1, %v34516_v30  ;;  %v34524_v30 = vld [vmem:[#allocation31_spill] sm:$0xff] }
 0x401   : > { %24260 = vmatmul.mubr.msk.f32.gmra.mrb[68].mxu0 %vm634_vm1, %v34517_v23  ;;  %v34525_v23 = vld [vmem:[#allocation28_spill] sm:$0xff] }
 0x402   : > { %24262 = vmatprep.mubr.msk.f32.mxu0 %vm634_vm1, %v34518_v56  ;;  %v34526_v56 = vld [vmem:[#allocation37_spill] sm:$0xff] }
 0x405   : > { %24263 = vmatmul.mubr.msk.f32.gmra.mrb[70].mxu0 %vm634_vm1, %v34519_v15  ;;  %v34527_v15 = vld [vmem:[#allocation34_spill] sm:$0xff] }
 0x406   : > { %24265 = vmatprep.mubr.msk.f32.mxu0 %vm634_vm1, %v34520_v34  ;;  %v34528_v34 = vld [vmem:[#allocation55_spill] sm:$0xff] }
 0x409   : > { %24266 = vmatmul.mubr.msk.f32.gmra.mrb[72].mxu0 %vm634_vm1, %v34521_v9  ;;  %v34529_v9 = vld [vmem:[#allocation45_spill] sm:$0xff] }
 0x40a   : > { %24268 = vmatprep.mubr.msk.f32.mxu0 %vm634_vm1, %v34522_v4  ;;  %v34530_v4 = vld [vmem:[#allocation67_spill] sm:$0xff] }
 0x40d   : > { %24269 = vmatmul.mubr.msk.f32.gmra.mrb[74].mxu0 %vm634_vm1, %v34523_v58  ;;  %v34531_v58 = vld [vmem:[#allocation63_spill] sm:$0xff] }
 0x40e   : > { %24271 = vmatprep.mubr.msk.f32.mxu0 %vm634_vm1, %v34524_v30  ;;  %v34532_v30 = vld [vmem:[#allocation74_spill] sm:$0xff] }
 0x411   : > { %24272 = vmatmul.mubr.msk.f32.gmra.mrb[76].mxu0 %vm634_vm1, %v34525_v23  ;;  %v34533_v23 = vld [vmem:[#allocation71_spill] sm:$0xff] }
 0x412   : > { %24274 = vmatprep.mubr.msk.f32.mxu0 %vm634_vm1, %v34526_v56  ;;  %v34534_v56 = vld [vmem:[#allocation79_spill] sm:$0xff] }
 0x415   : > { %24275 = vmatmul.mubr.msk.f32.gmra.mrb[78].mxu0 %vm634_vm1, %v34527_v15  ;;  %v34535_v15 = vld [vmem:[#allocation6_spill] sm:$0xff] }
 0x416   : > { %24277 = vmatprep.mubr.msk.f32.mxu0 %vm634_vm1, %v34528_v34  ;;  %v34536_v34 = vld [vmem:[#allocation11_spill] sm:$0xff] }
 0x419   : > { %24278 = vmatmul.mubr.msk.f32.gmra.mrb[80].mxu0 %vm634_vm1, %v34529_v9  ;;  %v34537_v9 = vld [vmem:[#allocation8_spill] sm:$0xff] }
 0x41a   : > { %24280 = vmatprep.mubr.msk.f32.mxu0 %vm634_vm1, %v34530_v4  ;;  %v34538_v4 = vld [vmem:[#allocation85_spill] sm:$0xff] }
 0x41d   : > { %24281 = vmatmul.mubr.msk.f32.gmra.mrb[82].mxu0 %vm634_vm1, %v34531_v58  ;;  %v34539_v58 = vld [vmem:[#allocation83_spill] sm:$0xff] }
 0x41e   : > { %24283 = vmatprep.mubr.msk.f32.mxu0 %vm634_vm1, %v34532_v30  ;;  %v34540_v30 = vld [vmem:[#allocation90_spill] sm:$0xff] }
 0x421   : > { %24284 = vmatmul.mubr.msk.f32.gmra.mrb[84].mxu0 %vm634_vm1, %v34533_v23  ;;  %v34541_v23 = vld [vmem:[#allocation93_spill] sm:$0xff] }
 0x422   : > { %24286 = vmatprep.mubr.msk.f32.mxu0 %vm634_vm1, %v34534_v56  ;;  %v21046_v56 = vld [vmem:[%s33872_s5 + $0x38] sm:$0xff] }
 0x425   : > { %24287 = vmatmul.mubr.msk.f32.gmra.mrb[86].mxu0 %vm634_vm1, %v34535_v15  ;;  %v34546_v15 = vld [vmem:[#allocation99_spill] sm:$0xff] }
 0x426   : > { %24289 = vmatprep.mubr.msk.f32.mxu0 %vm634_vm1, %v34536_v34  ;;  %v34547_v34 = vld [vmem:[#allocation94_spill] sm:$0xff] }
 0x429   : > { %24290 = vmatmul.mubr.msk.f32.gmra.mrb[88].mxu0 %vm634_vm1, %v34537_v9  ;;  %v21079_v9 = vld [vmem:[%s33872_s5 + $0x40] sm:$0xff] }
 0x42a   : > { %24292 = vmatprep.mubr.msk.f32.mxu0 %vm634_vm1, %v34538_v4  ;;  %v34572_v4 = vld [vmem:[#allocation78_spill] sm:$0xff] }
 0x42d   : > { %24293 = vmatmul.mubr.msk.f32.gmra.mrb[90].mxu0 %vm634_vm1, %v34539_v58  ;;  %v34573_v58 = vld [vmem:[#allocation82_spill] sm:$0xff] }
 0x42e   : > { %24295 = vmatprep.mubr.msk.f32.mxu0 %vm634_vm1, %v34540_v30  ;;  %v34574_v30 = vld [vmem:[#allocation10_spill] sm:$0xff] }
 0x431   : > { %24296 = vmatmul.mubr.msk.f32.gmra.mrb[92].mxu0 %vm634_vm1, %v29374_v63  ;;  %v34543_v63 = vld [vmem:[#allocation35_spill] sm:$0xff] }
 0x432   : > { %24298 = vmatprep.mubr.msk.f32.mxu0 %vm634_vm1, %v29412_v1 }
 0x435   : > { %24299 = vmatmul.mubr.msk.f32.gmra.mrb[94].mxu0 %vm634_vm1, %v34541_v23 }
 0x436   : > { %24303 = vmatprep.mubr.msk.f32.mxu0 %vm634_vm1, %v28890_v17  ;;  %v34542_v17 = vld [vmem:[#allocation38_spill] sm:$0xff] }
 0x439   : > { %24304 = vmatmul.mubr.msk.f32.vlgmr.msra.gmra.mrb[64].mxu0 %vm634_vm1, %v34503_v19  ;;  %v34544_v19 = vld [vmem:[#allocation59_spill] sm:$0xff] }
 0x43a   : > { %24352 = vmatpush3.msra.mxu0 %v21013_v26  ;;  %24306 = vmatprep.mubr.msk.f32.mxu0 %vm634_vm1, %v28922_v5  ;;  %v34545_v26 = vld [vmem:[#allocation47_spill] sm:$0xff] }
 0x43b   : > { %24401 = vmatprep.subr.mxu0 %v21046_v56 }
 0x43d   : > { %24307 = vmatmul.mubr.msk.f32.gmra.mrb[66].mxu0 %vm634_vm1, %v34504_v13 }
 0x43e   : > { %24309 = vmatprep.mubr.msk.f32.mxu0 %vm634_vm1, %v28960_v46 }
 0x441   : > { %24310 = vmatmul.mubr.msk.f32.gmra.mrb[68].mxu0 %vm634_vm1, %v34505_v27 }
 0x442   : > { %24312 = vmatprep.mubr.msk.f32.mxu0 %vm634_vm1, %v28998_v32 }
 0x445   : > { %24313 = vmatmul.mubr.msk.f32.gmra.mrb[70].mxu0 %vm634_vm1, %v28976_v40 }
 0x446   : > { %24315 = vmatprep.mubr.msk.f32.mxu0 %vm634_vm1, %v29032_v48 }
 0x449   : > { %24316 = vmatmul.mubr.msk.f32.gmra.mrb[72].mxu0 %vm634_vm1, %v34506_v7 }
 0x44a   : > { %24318 = vmatprep.mubr.msk.f32.mxu0 %vm634_vm1, %v29070_v6 }
 0x44d   : > { %24319 = vmatmul.mubr.msk.f32.gmra.mrb[74].mxu0 %vm634_vm1, %v29052_v51 }
 0x44e   : > { %24321 = vmatprep.mubr.msk.f32.mxu0 %vm634_vm1, %v29108_v57 }
 0x451   : > { %24322 = vmatmul.mubr.msk.f32.gmra.mrb[76].mxu0 %vm634_vm1, %v29086_v60 }
 0x452   : > { %24324 = vmatprep.mubr.msk.f32.mxu0 %vm634_vm1, %v34542_v17 }
 0x455   : > { %24325 = vmatmul.mubr.msk.f32.gmra.mrb[78].mxu0 %vm634_vm1, %v34543_v63 }
 0x456   : > { %24327 = vmatprep.mubr.msk.f32.mxu0 %vm634_vm1, %v34544_v19 }
 0x459   : > { %24328 = vmatmul.mubr.msk.f32.gmra.mrb[80].mxu0 %vm634_vm1, %v34545_v26 }
 0x45a   : > { %24330 = vmatprep.mubr.msk.f32.mxu0 %vm634_vm1, %v34507_v16 }
 0x45d   : > { %24331 = vmatmul.mubr.msk.f32.gmra.mrb[82].mxu0 %vm634_vm1, %v34508_v39 }
 0x45e   : > { %24333 = vmatprep.mubr.msk.f32.mxu0 %vm634_vm1, %v34509_v2 }
 0x461   : > { %24334 = vmatmul.mubr.msk.f32.gmra.mrb[84].mxu0 %vm634_vm1, %v34510_v41 }
 0x462   : > { %24336 = vmatprep.mubr.msk.f32.mxu0 %vm634_vm1, %v29290_v18 }
 0x465   : > { %24337 = vmatmul.mubr.msk.f32.gmra.mrb[86].mxu0 %vm634_vm1, %v34511_v61 }
 0x466   : > { %24339 = vmatprep.mubr.msk.f32.mxu0 %vm634_vm1, %v29328_v44 }
 0x469   : > { %24340 = vmatmul.mubr.msk.f32.gmra.mrb[88].mxu0 %vm634_vm1, %v29306_v14 }
 0x46a   : > { %24342 = vmatprep.mubr.msk.f32.mxu0 %vm634_vm1, %v29358_v52 }
 0x46d   : > { %24343 = vmatmul.mubr.msk.f32.gmra.mrb[90].mxu0 %vm634_vm1, %v29342_v0 }
 0x46e   : > { %24345 = vmatprep.mubr.msk.f32.mxu0 %vm634_vm1, %v29389_v55 }
 0x471   : > { %24346 = vmatmul.mubr.msk.f32.gmra.mrb[92].mxu0 %vm634_vm1, %v29376_v12 }
 0x472   : > { %24348 = vmatprep.mubr.msk.f32.mxu0 %vm634_vm1, %v34546_v15 }
 0x475   : > { %24349 = vmatmul.mubr.msk.f32.gmra.mrb[94].mxu0 %vm634_vm1, %v34547_v34 }
 0x476   : > { %24353 = vmatprep.mubr.msk.f32.mxu0 %vm634_vm1, %v28913_v37  ;;  %v34548_v37 = vld [vmem:[#allocation91_spill] sm:$0xff] }
 0x479   : > { %24354 = vmatmul.mubr.msk.f32.vlgmr.msra.gmra.mrb[64].mxu0 %vm634_vm1, %v28915_v28  ;;  %v34549_v28 = vld [vmem:[#allocation96_spill] sm:$0xff] }
 0x47a   : > { %24402 = vmatpush3.msra.mxu0 %v21046_v56  ;;  %24356 = vmatprep.mubr.msk.f32.mxu0 %vm634_vm1, %v28951_v11  ;;  %v7212_v11 = vld [vmem:[#allocation2 + $0x198] sm:$0xff] }
 0x47b   : > { %24451 = vmatprep.subr.mxu0 %v21079_v9  ;;  %v34575_v56 = vld [vmem:[#allocation86_spill] sm:$0xff] }
 0x47d   : > { %24357 = vmatmul.mubr.msk.f32.gmra.mrb[66].mxu0 %vm634_vm1, %v28953_v10  ;;  %v34550_v10 = vld [vmem:[#allocation97_spill] sm:$0xff] }
 0x47e   : > { %24359 = vmatprep.mubr.msk.f32.mxu0 %vm634_vm1, %v28987_v36  ;;  %v7213_v36 = vld [vmem:[#allocation2 + $0x1a0] sm:$0xff] }
 0x481   : > { %24360 = vmatmul.mubr.msk.f32.gmra.mrb[68].mxu0 %vm634_vm1, %v28989_v20  ;;  %v21113_v20 = vld [vmem:[%s33874_s7 + $0x8] sm:$0xff] }
 0x482   : > { %24362 = vmatprep.mubr.msk.f32.mxu0 %vm634_vm1, %v29023_v47  ;;  %v34551_v47 = vld [vmem:[#allocation49_spill] sm:$0xff]  ;;  %24501 = vmatprep.subr.mxu1 %v21113_v20 }
 0x483   : > { %24502 = vmatpush3.msra.mxu1 %v21113_v20 }
 0x485   : > { %24363 = vmatmul.mubr.msk.f32.gmra.mrb[70].mxu0 %vm634_vm1, %v29025_v45  ;;  %v34552_v45 = vld [vmem:[#allocation17_spill] sm:$0xff] }
 0x486   : > { %24365 = vmatprep.mubr.msk.f32.mxu0 %vm634_vm1, %v29061_v38  ;;  %v34553_v38 = vld [vmem:[#allocation54_spill] sm:$0xff] }
 0x489   : > { %24366 = vmatmul.mubr.msk.f32.gmra.mrb[72].mxu0 %vm634_vm1, %v29063_v50  ;;  %v34554_v50 = vld [vmem:[#allocation18_spill] sm:$0xff] }
 0x48a   : > { %24368 = vmatprep.mubr.msk.f32.mxu0 %vm634_vm1, %v29097_v29  ;;  %v34555_v29 = vld [vmem:[#allocation52_spill] sm:$0xff] }
 0x48d   : > { %24369 = vmatmul.mubr.msk.f32.gmra.mrb[74].mxu0 %vm634_vm1, %v29099_v24  ;;  %v34556_v24 = vld [vmem:[#allocation29_spill] sm:$0xff] }
 0x48e   : > { %24371 = vmatprep.mubr.msk.f32.mxu0 %vm634_vm1, %v29133_v62  ;;  %v34557_v62 = vld [vmem:[#allocation19_spill] sm:$0xff] }
 0x491   : > { %24372 = vmatmul.mubr.msk.f32.gmra.mrb[76].mxu0 %vm634_vm1, %v29135_v43  ;;  %v34558_v43 = vld [vmem:[#allocation61_spill] sm:$0xff] }
 0x492   : > { %24374 = vmatprep.mubr.msk.f32.mxu0 %vm634_vm1, %v29171_v49  ;;  %v34559_v49 = vld [vmem:[#allocation27_spill] sm:$0xff] }
 0x495   : > { %24375 = vmatmul.mubr.msk.f32.gmra.mrb[78].mxu0 %vm634_vm1, %v29173_v35  ;;  %v34560_v35 = vld [vmem:[#allocation25_spill] sm:$0xff] }
 0x496   : > { %24377 = vmatprep.mubr.msk.f32.mxu0 %vm634_vm1, %v29207_v25  ;;  %v34561_v25 = vld [vmem:[#allocation33_spill] sm:$0xff] }
 0x499   : > { %24378 = vmatmul.mubr.msk.f32.gmra.mrb[80].mxu0 %vm634_vm1, %v29209_v54  ;;  %v34562_v54 = vld [vmem:[#allocation44_spill] sm:$0xff] }
 0x49a   : > { %24380 = vmatprep.mubr.msk.f32.mxu0 %vm634_vm1, %v29243_v33  ;;  %v34563_v33 = vld [vmem:[#allocation39_spill] sm:$0xff] }
 0x49d   : > { %24381 = vmatmul.mubr.msk.f32.gmra.mrb[82].mxu0 %vm634_vm1, %v29245_v42  ;;  %v34564_v42 = vld [vmem:[#allocation36_spill] sm:$0xff] }
 0x49e   : > { %24383 = vmatprep.mubr.msk.f32.mxu0 %vm634_vm1, %v29281_v59  ;;  %v34565_v59 = vld [vmem:[#allocation60_spill] sm:$0xff] }
 0x4a1   : > { %24384 = vmatmul.mubr.msk.f32.gmra.mrb[84].mxu0 %vm634_vm1, %v29283_v21  ;;  %v34566_v21 = vld [vmem:[#allocation51_spill] sm:$0xff] }
 0x4a2   : > { %24386 = vmatprep.mubr.msk.f32.mxu0 %vm634_vm1, %v29317_v3  ;;  %v34567_v3 = vld [vmem:[#allocation70_spill] sm:$0xff] }
 0x4a5   : > { %24387 = vmatmul.mubr.msk.f32.gmra.mrb[86].mxu0 %vm634_vm1, %v29319_v22  ;;  %v34568_v22 = vld [vmem:[#allocation65_spill] sm:$0xff] }
 0x4a6   : > { %24389 = vmatprep.mubr.msk.f32.mxu0 %vm634_vm1, %v29350_v53  ;;  %v34570_v53 = vld [vmem:[#allocation73_spill] sm:$0xff] }
 0x4a9   : > { %24390 = vmatmul.mubr.msk.f32.gmra.mrb[88].mxu0 %vm634_vm1, %v29352_v31  ;;  %v34571_v31 = vld [vmem:[#allocation80_spill] sm:$0xff] }
 0x4aa   : > { %24392 = vmatprep.mubr.msk.f32.mxu0 %vm634_vm1, %v29382_v8  ;;  %v34569_v8 = vld [vmem:[#allocation76_spill] sm:$0xff] }
 0x4ad   : > { %24393 = vmatmul.mubr.msk.f32.gmra.mrb[90].mxu0 %vm634_vm1, %v34548_v37  ;;  %v34577_v37 = vld [vmem:[#allocation92_spill] sm:$0xff] }
 0x4ae   : > { %24395 = vmatprep.mubr.msk.f32.mxu0 %vm634_vm1, %v34549_v28  ;;  %v34578_v28 = vld [vmem:[#allocation89_spill] sm:$0xff] }
 0x4b1   : > { %24396 = vmatmul.mubr.msk.f32.gmra.mrb[92].mxu0 %vm634_vm1, %v34550_v10  ;;  %v7600_v10 = vld [vmem:[#allocation2 + $0x1a1] sm:$0xff] }
 0x4b2   : > { %24398 = vmatprep.mubr.msk.f32.mxu0 %vm634_vm1, %v7212_v11  ;;  %v7599_v11 = vld [vmem:[#allocation2 + $0x199] sm:$0xff] }
 0x4b5   : > { %24399 = vmatmul.mubr.msk.f32.gmra.mrb[94].mxu0 %vm634_vm1, %v7213_v36 }
 0x4b6   : > { %24403 = vmatprep.mubr.msk.f32.mxu0 %vm634_vm1, %v34551_v47 }
 0x4b9   : > { %24404 = vmatmul.mubr.msk.f32.vlgmr.msra.gmra.mrb[64].mxu0 %vm634_vm1, %v34552_v45 }
 0x4ba   : > { %24452 = vmatpush3.msra.mxu0 %v21079_v9  ;;  %24406 = vmatprep.mubr.msk.f32.mxu0 %vm634_vm1, %v34553_v38  ;;  %v34576_v9 = vld [vmem:[#allocation84_spill] sm:$0xff]  ;;  %v34588_v38 = vld [vmem:[#allocation50_spill] sm:$0xff] }
 0x4bd   : > { %24407 = vmatmul.mubr.msk.f32.gmra.mrb[66].mxu0 %vm634_vm1, %v34554_v50  ;;  %v34589_v50 = vld [vmem:[#allocation30_spill] sm:$0xff] }
 0x4be   : > { %24409 = vmatprep.mubr.msk.f32.mxu0 %vm634_vm1, %v34555_v29 }
 0x4c1   : > { %24410 = vmatmul.mubr.msk.f32.gmra.mrb[68].mxu0 %vm634_vm1, %v34556_v24 }
 0x4c2   : > { %24412 = vmatprep.mubr.msk.f32.mxu0 %vm634_vm1, %v34557_v62 }
 0x4c5   : > { %24413 = vmatmul.mubr.msk.f32.gmra.mrb[70].mxu0 %vm634_vm1, %v34558_v43 }
 0x4c6   : > { %24415 = vmatprep.mubr.msk.f32.mxu0 %vm634_vm1, %v34559_v49 }
 0x4c9   : > { %24416 = vmatmul.mubr.msk.f32.gmra.mrb[72].mxu0 %vm634_vm1, %v34560_v35 }
 0x4ca   : > { %24418 = vmatprep.mubr.msk.f32.mxu0 %vm634_vm1, %v34561_v25 }
 0x4cd   : > { %24419 = vmatmul.mubr.msk.f32.gmra.mrb[74].mxu0 %vm634_vm1, %v34562_v54 }
 0x4ce   : > { %24421 = vmatprep.mubr.msk.f32.mxu0 %vm634_vm1, %v34563_v33 }
 0x4d1   : > { %24422 = vmatmul.mubr.msk.f32.gmra.mrb[76].mxu0 %vm634_vm1, %v34564_v42 }
 0x4d2   : > { %24424 = vmatprep.mubr.msk.f32.mxu0 %vm634_vm1, %v34565_v59 }
 0x4d5   : > { %24425 = vmatmul.mubr.msk.f32.gmra.mrb[78].mxu0 %vm634_vm1, %v34566_v21 }
 0x4d6   : > { %24427 = vmatprep.mubr.msk.f32.mxu0 %vm634_vm1, %v34567_v3 }
 0x4d9   : > { %24428 = vmatmul.mubr.msk.f32.gmra.mrb[80].mxu0 %vm634_vm1, %v34568_v22 }
 0x4da   : > { %24430 = vmatprep.mubr.msk.f32.mxu0 %vm634_vm1, %v34569_v8  ;;  %v34596_v8 = vld [vmem:[#allocation23_spill] sm:$0xff] }
 0x4dd   : > { %24431 = vmatmul.mubr.msk.f32.gmra.mrb[82].mxu0 %vm634_vm1, %v34570_v53  ;;  %v34597_v53 = vld [vmem:[#allocation21_spill] sm:$0xff] }
 0x4de   : > { %24433 = vmatprep.mubr.msk.f32.mxu0 %vm634_vm1, %v34571_v31 }
 0x4e1   : > { %24434 = vmatmul.mubr.msk.f32.gmra.mrb[84].mxu0 %vm634_vm1, %v34572_v4 }
 0x4e2   : > { %24436 = vmatprep.mubr.msk.f32.mxu0 %vm634_vm1, %v34573_v58 }
 0x4e5   : > { %24437 = vmatmul.mubr.msk.f32.gmra.mrb[86].mxu0 %vm634_vm1, %v34574_v30 }
 0x4e6   : > { %24439 = vmatprep.mubr.msk.f32.mxu0 %vm634_vm1, %v34575_v56 }
 0x4e9   : > { %24440 = vmatmul.mubr.msk.f32.gmra.mrb[88].mxu0 %vm634_vm1, %v34576_v9 }
 0x4ea   : > { %24442 = vmatprep.mubr.msk.f32.mxu0 %vm634_vm1, %v34577_v37 }
 0x4ed   : > { %24443 = vmatmul.mubr.msk.f32.gmra.mrb[90].mxu0 %vm634_vm1, %v34578_v28 }
 0x4ee   : > { %24445 = vmatprep.mubr.msk.f32.mxu0 %vm634_vm1, %v29412_v1 }
 0x4f1   : > { %24446 = vmatmul.mubr.msk.f32.gmra.mrb[92].mxu0 %vm634_vm1, %v34541_v23 }
 0x4f2   : > { %24448 = vmatprep.mubr.msk.f32.mxu0 %vm634_vm1, %v7599_v11 }
 0x4f5   : > { %24449 = vmatmul.mubr.msk.f32.gmra.mrb[94].mxu0 %vm634_vm1, %v7600_v10 }
 0x4f6   : > { %24453 = vmatprep.mubr.msk.f32.mxu0 %vm634_vm1, %v28922_v5  ;;  %v7986_v5 = vld [vmem:[#allocation2 + $0x19a] sm:$0xff] }
 0x4f9   : > { %24454 = vmatmul.mubr.msk.f32.vlgmr.msra.gmra.mrb[64].mxu0 %vm634_vm1, %v34504_v13 }
 0x4fa   : > { %24456 = vmatprep.mubr.msk.f32.mxu0 %vm634_vm1, %v28960_v46  ;;  %v7987_v46 = vld [vmem:[#allocation2 + $0x1a2] sm:$0xff] }
 0x4fd   : > { %24457 = vmatmul.mubr.msk.f32.gmra.mrb[66].mxu0 %vm634_vm1, %v34505_v27 }
 0x4fe   : > { %24459 = vmatprep.mubr.msk.f32.mxu0 %vm634_vm1, %v28998_v32  ;;  %v8896_v32 = vld [vmem:[#allocation2 + $0x9] sm:$0xff] }
 0x501   : > { %24460 = vmatmul.mubr.msk.f32.gmra.mrb[68].mxu0 %vm634_vm1, %v28976_v40  ;;  %v8895_v40 = vld [vmem:[#allocation2 + $0x1] sm:$0xff] }
 0x502   : > { %24462 = vmatprep.mubr.msk.f32.mxu0 %vm634_vm1, %v29032_v48  ;;  %24503 = vmatprep.mubr.msk.f32.mxu1 %vm634_vm1, %v8895_v40  ;;  %v8894_v48 = vld [vmem:[%s33874_s7] sm:$0xff] }
 0x503   : > { %24504 = vmatmul.mubr.msk.f32.vlgmr.msra.gmra.mrb[32].mxu1 %vm634_vm1, %v8896_v32  ;;  %24551 = vmatprep.subr.mxu1 %v8894_v48 }
 0x504   : > { %24552 = vmatpush3.msra.mxu1 %v8894_v48  ;;  %v34604_v48 = vld [vmem:[#allocation32_spill] sm:$0xff] }
 0x505   : > { %24463 = vmatmul.mubr.msk.f32.gmra.mrb[70].mxu0 %vm634_vm1, %v34506_v7 }
 0x506   : > { %24465 = vmatprep.mubr.msk.f32.mxu0 %vm634_vm1, %v29070_v6  ;;  %v30019_v6 = vld [vmem:[%s33874_s7 + $0x10] sm:$0xff] }
 0x507   : > { %24601 = vmatprep.subr.mxu1 %v30019_v6 }
 0x509   : > { %24466 = vmatmul.mubr.msk.f32.gmra.mrb[72].mxu0 %vm634_vm1, %v29052_v51  ;;  %v30025_v51 = vld [vmem:[%s33873_s6] ss:$0 sm:$0xff] }
 0x50a   : > { %24468 = vmatprep.mubr.msk.f32.mxu0 %vm634_vm1, %v29108_v57 }
 0x50d   : > { %24469 = vmatmul.mubr.msk.f32.gmra.mrb[74].mxu0 %vm634_vm1, %v29086_v60 }
 0x50e   : > { %24471 = vmatprep.mubr.msk.f32.mxu0 %vm634_vm1, %v34542_v17 }
 0x511   : > { %24472 = vmatmul.mubr.msk.f32.gmra.mrb[76].mxu0 %vm634_vm1, %v34543_v63 }
 0x512   : > { %24474 = vmatprep.mubr.msk.f32.mxu0 %vm634_vm1, %v34544_v19 }
 0x515   : > { %24475 = vmatmul.mubr.msk.f32.gmra.mrb[78].mxu0 %vm634_vm1, %v34545_v26 }
 0x516   : > { %24477 = vmatprep.mubr.msk.f32.mxu0 %vm634_vm1, %v34507_v16 }
 0x519   : > { %24478 = vmatmul.mubr.msk.f32.gmra.mrb[80].mxu0 %vm634_vm1, %v34508_v39 }
 0x51a   : > { %24480 = vmatprep.mubr.msk.f32.mxu0 %vm634_vm1, %v34509_v2 }
 0x51d   : > { %24481 = vmatmul.mubr.msk.f32.gmra.mrb[82].mxu0 %vm634_vm1, %v34510_v41 }
 0x51e   : > { %24483 = vmatprep.mubr.msk.f32.mxu0 %vm634_vm1, %v29290_v18 }
 0x521   : > { %24484 = vmatmul.mubr.msk.f32.gmra.mrb[84].mxu0 %vm634_vm1, %v34511_v61 }
 0x522   : > { %24486 = vmatprep.mubr.msk.f32.mxu0 %vm634_vm1, %v29328_v44 }
 0x525   : > { %24487 = vmatmul.mubr.msk.f32.gmra.mrb[86].mxu0 %vm634_vm1, %v29306_v14 }
 0x526   : > { %24489 = vmatprep.mubr.msk.f32.mxu0 %vm634_vm1, %v29358_v52 }
 0x529   : > { %24490 = vmatmul.mubr.msk.f32.gmra.mrb[88].mxu0 %vm634_vm1, %v29342_v0 }
 0x52a   : > { %24492 = vmatprep.mubr.msk.f32.mxu0 %vm634_vm1, %v29389_v55 }
 0x52d   : > { %24493 = vmatmul.mubr.msk.f32.gmra.mrb[90].mxu0 %vm634_vm1, %v29376_v12 }
 0x52e   : > { %24495 = vmatprep.mubr.msk.f32.mxu0 %vm634_vm1, %v34546_v15 }
 0x531   : > { %24496 = vmatmul.mubr.msk.f32.gmra.mrb[92].mxu0 %vm634_vm1, %v34547_v34 }
 0x532   : > { %24498 = vmatprep.mubr.msk.f32.mxu0 %vm634_vm1, %v7986_v5 }
 0x535   : > { %24499 = vmatmul.mubr.msk.f32.gmra.mrb[94].mxu0 %vm634_vm1, %v7987_v46 }
 0x5cc   : > { %v24455_v60 = vpop.f32.mrb[64].mxu0 }
 0x5cd   : > { %v8351_v57 = vadd.f32 %v24455_v60, %v30025_v51  ;;  %v8152_v39 = vpop.f32.mrb[65].mxu0  ;;  %v34605_v60 = vld [vmem:[#allocation46_spill] sm:$0xff] }
 0x5ce   : > { %v8350_v16 = vadd.f32 %v30025_v51, %v8152_v39 }
 0x5cf   : > { %v30029_v2 = vmax.f32 %v8351_v57, 0.0 }
 0x5d0   : > { %v30031_v41 = vmax.f32 %v8350_v16, 0.0  ;;  %v24458_v18 = vpop.f32.mrb[66].mxu0 }
 0x5d1   : > { %34579 = vst [vmem:[#allocation43_spill] sm:$0xff] %v30029_v2  ;;  %8831 = vst.msk [vmem:[#allocation2 + $0x21] sm:$0xff] %vm4892_vm5, %v30029_v2  ;;  %v8353_v1 = vadd.f32 %v24458_v18, %v30025_v51  ;;  %8576 = vrot.lane.b32.xlu1 %v30029_v2, %s27265_s1  ;;  %v8162_v14 = vpop.f32.mrb[67].mxu0  ;;  %v34637_v2 = vld [vmem:[#allocation40_spill] sm:$0xff] }
 0x5d2   : > { %34580 = vst [vmem:[#allocation14_spill] sm:$0xff] %v30031_v41  ;;  %8830 = vst.msk [vmem:[#allocation2 + $0x19] sm:$0xff] %vm4892_vm5, %v30031_v41  ;;  %v8352_v44 = vadd.f32 %v30025_v51, %v8162_v14  ;;  %8574 = vrot.lane.b32.xlu0 %v30031_v41, %s27265_s1  ;;  %v34636_v41 = vld [vmem:[#allocation81_spill] sm:$0xff] }
 0x5d3   : > { %v30043_v0 = vmax.f32 %v8353_v1, 0.0 }
 0x5d4   : > { %v30045_v52 = vmax.f32 %v8352_v44, 0.0  ;;  %v24461_v12 = vpop.f32.mrb[68].mxu0 }
 0x5d5   : > { %34581 = vst [vmem:[#allocation56_spill] sm:$0xff] %v30043_v0  ;;  %8833 = vst.msk [vmem:[#allocation2 + $0x39] sm:$0xff] %vm4892_vm5, %v30043_v0  ;;  %v8355_v55 = vadd.f32 %v24461_v12, %v30025_v51  ;;  %8580 = vrot.lane.b32.xlu1 %v30043_v0, %s27265_s1  ;;  %v8172_v7 = vpop.f32.mrb[69].mxu0 }
 0x5d6   : > { %34582 = vst [vmem:[#allocation58_spill] sm:$0xff] %v30045_v52  ;;  %8832 = vst.msk [vmem:[#allocation2 + $0x31] sm:$0xff] %vm4892_vm5, %v30045_v52  ;;  %v8354_v13 = vadd.f32 %v30025_v51, %v8172_v7 }
 0x5d7   : > { %v30055_v27 = vmax.f32 %v8355_v55, 0.0 }
 0x5d8   : > { %v30057_v61 = vmax.f32 %v8354_v13, 0.0  ;;  %v24464_v23 = vpop.f32.mrb[70].mxu0  ;;  %v30059_v17 = vld [vmem:[#allocation2 + $0x21] sm:$0xff] }
 0x5d9   : > { %34583 = vst [vmem:[#allocation69_spill] sm:$0xff] %v30055_v27  ;;  %34585 = vst [vmem:[#allocation75_spill] sm:$0xff] %v30059_v17  ;;  %v30061_v63 = vld [vmem:[#allocation2 + $0x22] sm:$0xff]  ;;  %v8357_v19 = vadd.f32 %v24464_v23, %v30025_v51  ;;  %8578 = vrot.lane.b32.xlu1 %v30045_v52, %s27265_s1  ;;  %v8182_v26 = vpop.f32.mrb[71].mxu0  ;;  %v30068_v15 = vld [vmem:[#allocation2 + $0x19] sm:$0xff] }
 0x5da   : > { %34584 = vst [vmem:[#allocation64_spill] sm:$0xff] %v30057_v61  ;;  %8835 = vst.msk [vmem:[#allocation2 + $0x51] sm:$0xff] %vm4892_vm5, %v30055_v27  ;;  %v30070_v34 = vld [vmem:[#allocation2 + $0x18] sm:$0xff]  ;;  %v30072_v36 = vld [vmem:[#allocation2 + $0x20] sm:$0xff]  ;;  %v8356_v20 = vadd.f32 %v30025_v51, %v8182_v26  ;;  %24506 = vmatprep.mubr.msk.f32.mxu1 %vm634_vm1, %v30068_v15  ;;  %8582 = vrot.lane.b32.xlu0 %v30057_v61, %s27265_s1 }
 0x5db   : > { %34586 = vst [vmem:[#allocation72_spill] sm:$0xff] %v30068_v15  ;;  %8834 = vst.msk [vmem:[#allocation2 + $0x49] sm:$0xff] %vm4892_vm5, %v30057_v61  ;;  %v30081_v47 = vld [vmem:[#allocation2 + $0x1a] sm:$0xff]  ;;  %v30083_v45 = vmax.f32 %v8357_v19, 0.0  ;;  %24507 = vmatmul.mubr.msk.f32.gmra.mrb[34].mxu1 %vm634_vm1, %v30059_v17 }
 0x5dc   : > { %12640 = vst.msk [vmem:[#allocation2 + $0x19] sm:$0xff] %vm989_vm4, %v34588_v38  ;;  %12641 = vst.msk [vmem:[#allocation2 + $0x21] sm:$0xff] %vm989_vm4, %v34589_v50  ;;  %v30091_v29 = vmax.f32 %v8356_v20, 0.0  ;;  %v24467_v24 = vpop.f32.mrb[72].mxu0  ;;  %v30093_v62 = vld [vmem:[#allocation2 + $0x39] sm:$0xff]  ;;  %v34613_v38 = vld [vmem:[#allocation41_spill] sm:$0xff] }
 0x5dd   : > { %34587 = vst [vmem:[#allocation7_spill] sm:$0xff] %v30083_v45  ;;  %34591 = vst [vmem:[#allocation13_spill] sm:$0xff] %v30093_v62  ;;  %v30095_v43 = vld [vmem:[#allocation2 + $0x3a] sm:$0xff]  ;;  %v8359_v35 = vadd.f32 %v24467_v24, %v30025_v51  ;;  %8584 = vrot.lane.b32.xlu1 %v30055_v27, %s27265_s1  ;;  %v8192_v25 = vpop.f32.mrb[73].mxu0  ;;  %v30104_v54 = vld [vmem:[#allocation2 + $0x31] sm:$0xff] }
 0x5de   : > { %34590 = vst [vmem:[#allocation12_spill] sm:$0xff] %v30091_v29  ;;  %v30097_v49 = vld [vmem:[#allocation2 + $0x39] sm:$0xff]  ;;  %8837 = vst.msk [vmem:[#allocation2 + $0x69] sm:$0xff] %vm4892_vm5, %v30083_v45  ;;  %v30106_v33 = vld [vmem:[#allocation2 + $0x30] sm:$0xff]  ;;  %v8358_v59 = vadd.f32 %v30025_v51, %v8192_v25  ;;  %24509 = vmatprep.mubr.msk.f32.mxu1 %vm634_vm1, %v30104_v54  ;;  %8586 = vrot.lane.b32.xlu0 %v30091_v29, %s27265_s1 }
 0x5df   : > { %34592 = vst [vmem:[#allocation16_spill] sm:$0xff] %v30097_v49  ;;  %34593 = vst [vmem:[#allocation15_spill] sm:$0xff] %v30104_v54  ;;  %v30108_v42 = vld [vmem:[#allocation2 + $0x38] sm:$0xff]  ;;  %v30121_v22 = vmax.f32 %v8359_v35, 0.0  ;;  %24510 = vmatmul.mubr.msk.f32.gmra.mrb[36].mxu1 %vm634_vm1, %v30093_v62  ;;  %v34678_v62 = vld [vmem:[#allocation103_spill] sm:$0xff] }
 0x5e0   : > { %8836 = vst.msk [vmem:[#allocation2 + $0x61] sm:$0xff] %vm4892_vm5, %v30091_v29  ;;  %v30117_v21 = vld [vmem:[#allocation2 + $0x32] sm:$0xff]  ;;  %v30129_v31 = vmax.f32 %v8358_v59, 0.0  ;;  %v24470_v4 = vpop.f32.mrb[74].mxu0 }
 0x5e1   : > { %v30119_v3 = vld [vmem:[#allocation2 + $0x31] sm:$0xff]  ;;  %34595 = vst [vmem:[#allocation53_spill] sm:$0xff] %v30121_v22  ;;  %12643 = vst.msk [vmem:[#allocation2 + $0x39] sm:$0xff] %vm989_vm4, %v34597_v53  ;;  %v8361_v9 = vadd.f32 %v24470_v4, %v30025_v51  ;;  %8588 = vrot.lane.b32.xlu1 %v30083_v45, %s27265_s1  ;;  %v8202_v37 = vpop.f32.mrb[75].mxu0 }
 0x5e2   : > { %34594 = vst [vmem:[#allocation22_spill] sm:$0xff] %v30119_v3  ;;  %12642 = vst.msk [vmem:[#allocation2 + $0x31] sm:$0xff] %vm989_vm4, %v34596_v8  ;;  %v30131_v58 = vld [vmem:[#allocation2 + $0x51] sm:$0xff]  ;;  %v30142_v28 = vld [vmem:[#allocation2 + $0x49] sm:$0xff]  ;;  %v8360_v5 = vadd.f32 %v30025_v51, %v8202_v37  ;;  %8590 = vrot.lane.b32.xlu0 %v30129_v31, %s27265_s1 }
 0x5e3   : > { %34598 = vst [vmem:[#allocation48_spill] sm:$0xff] %v30129_v31  ;;  %34599 = vst [vmem:[#allocation20_spill] sm:$0xff] %v30131_v58  ;;  %v30133_v30 = vld [vmem:[#allocation2 + $0x52] sm:$0xff]  ;;  %v30144_v11 = vld [vmem:[#allocation2 + $0x48] sm:$0xff]  ;;  %24512 = vmatprep.mubr.msk.f32.mxu1 %vm634_vm1, %v30142_v28  ;;  %v30159_v32 = vmax.f32 %v8361_v9, 0.0 }
 0x5e4   : > { %v30135_v56 = vld [vmem:[#allocation2 + $0x51] sm:$0xff]  ;;  %8839 = vst.msk [vmem:[#allocation2 + $0x81] sm:$0xff] %vm4892_vm5, %v30121_v22  ;;  %34601 = vst [vmem:[#allocation57_spill] sm:$0xff] %v30142_v28  ;;  %v30157_v40 = vld [vmem:[#allocation2 + $0x49] sm:$0xff]  ;;  %24513 = vmatmul.mubr.msk.f32.gmra.mrb[38].mxu1 %vm634_vm1, %v30131_v58  ;;  %v30167_v57 = vmax.f32 %v8360_v5, 0.0  ;;  %v24473_v39 = vpop.f32.mrb[76].mxu0 }
 0x5e5   : > { %34600 = vst [vmem:[#allocation62_spill] sm:$0xff] %v30135_v56  ;;  %v30146_v10 = vld [vmem:[#allocation2 + $0x50] sm:$0xff]  ;;  %8838 = vst.msk [vmem:[#allocation2 + $0x79] sm:$0xff] %vm4892_vm5, %v30129_v31  ;;  %v8363_v14 = vadd.f32 %v24473_v39, %v30025_v51  ;;  %8592 = vrot.lane.b32.xlu1 %v30121_v22, %s27265_s1  ;;  %v8212_v44 = vpop.f32.mrb[77].mxu0  ;;  %v34612_v20 = vld [vmem:[#allocation42_spill] sm:$0xff] }
 0x5e6   : > { %v30155_v46 = vld [vmem:[#allocation2 + $0x4a] sm:$0xff]  ;;  %34602 = vst [vmem:[#allocation26_spill] sm:$0xff] %v30157_v40  ;;  %34603 = vst [vmem:[#allocation24_spill] sm:$0xff] %v30159_v32  ;;  %v8362_v13 = vadd.f32 %v30025_v51, %v8212_v44  ;;  %8594 = vrot.lane.b32.xlu0 %v30167_v57, %s27265_s1  ;;  %v34621_v44 = vld [vmem:[#allocation66_spill] sm:$0xff] }
 0x5e7   : > { %12644 = vst.msk [vmem:[#allocation2 + $0x49] sm:$0xff] %vm989_vm4, %v34604_v48  ;;  %12645 = vst.msk [vmem:[#allocation2 + $0x51] sm:$0xff] %vm989_vm4, %v34605_v60  ;;  %v30169_v16 = vld [vmem:[#allocation2 + $0x69] sm:$0xff]  ;;  %v30180_v12 = vld [vmem:[#allocation2 + $0x61] sm:$0xff]  ;;  %v30197_v26 = vmax.f32 %v8363_v14, 0.0 }
 0x5e8   : > { %34606 = vst [vmem:[#allocation31_spill] sm:$0xff] %v30167_v57  ;;  %34607 = vst [vmem:[#allocation28_spill] sm:$0xff] %v30169_v16  ;;  %v30171_v18 = vld [vmem:[#allocation2 + $0x6a] sm:$0xff]  ;;  %v30182_v55 = vld [vmem:[#allocation2 + $0x60] sm:$0xff]  ;;  %24515 = vmatprep.mubr.msk.f32.mxu1 %vm634_vm1, %v30180_v12  ;;  %v30205_v50 = vmax.f32 %v8362_v13, 0.0  ;;  %v24476_v24 = vpop.f32.mrb[78].mxu0 }
 0x5e9   : > { %v30173_v1 = vld [vmem:[#allocation2 + $0x69] sm:$0xff]  ;;  %8841 = vst.msk [vmem:[#allocation2 + $0x99] sm:$0xff] %vm4892_vm5, %v30159_v32  ;;  %34609 = vst [vmem:[#allocation34_spill] sm:$0xff] %v30180_v12  ;;  %v30195_v19 = vld [vmem:[#allocation2 + $0x61] sm:$0xff]  ;;  %24516 = vmatmul.mubr.msk.f32.gmra.mrb[40].mxu1 %vm634_vm1, %v30169_v16  ;;  %v8365_v8 = vadd.f32 %v24476_v24, %v30025_v51  ;;  %8596 = vrot.lane.b32.xlu1 %v30159_v32, %s27265_s1  ;;  %v8222_v53 = vpop.f32.mrb[79].mxu0 }
 0x5ea   : > { %34608 = vst [vmem:[#allocation37_spill] sm:$0xff] %v30173_v1  ;;  %v30184_v7 = vld [vmem:[#allocation2 + $0x68] sm:$0xff]  ;;  %8840 = vst.msk [vmem:[#allocation2 + $0x91] sm:$0xff] %vm4892_vm5, %v30167_v57  ;;  %v8364_v5 = vadd.f32 %v30025_v51, %v8222_v53  ;;  %8598 = vrot.lane.b32.xlu0 %v30205_v50, %s27265_s1  ;;  %v34628_v32 = vld [vmem:[#allocation9_spill] sm:$0xff] }
 0x5eb   : > { %v30193_v23 = vld [vmem:[#allocation2 + $0x62] sm:$0xff]  ;;  %34610 = vst [vmem:[#allocation55_spill] sm:$0xff] %v30195_v19  ;;  %34611 = vst [vmem:[#allocation45_spill] sm:$0xff] %v30197_v26  ;;  %v30235_v39 = vmax.f32 %v8365_v8, 0.0  ;;  %v34629_v22 = vld [vmem:[#allocation77_spill] sm:$0xff] }
 0x5ec   : > { %12646 = vst.msk [vmem:[#allocation2 + $0x61] sm:$0xff] %vm989_vm4, %v34612_v20  ;;  %12647 = vst.msk [vmem:[#allocation2 + $0x69] sm:$0xff] %vm989_vm4, %v34613_v38  ;;  %v30207_v35 = vld [vmem:[#allocation2 + $0x81] sm:$0xff]  ;;  %v30218_v4 = vld [vmem:[#allocation2 + $0x79] sm:$0xff]  ;;  %v30243_v13 = vmax.f32 %v8364_v5, 0.0  ;;  %v24479_v20 = vpop.f32.mrb[80].mxu0 }
 0x5ed   : > { %34614 = vst [vmem:[#allocation67_spill] sm:$0xff] %v30205_v50  ;;  %34615 = vst [vmem:[#allocation63_spill] sm:$0xff] %v30207_v35  ;;  %v30209_v25 = vld [vmem:[#allocation2 + $0x82] sm:$0xff]  ;;  %v30220_v9 = vld [vmem:[#allocation2 + $0x78] sm:$0xff]  ;;  %24518 = vmatprep.mubr.msk.f32.mxu1 %vm634_vm1, %v30218_v4  ;;  %v8367_v8 = vadd.f32 %v24479_v20, %v30025_v51  ;;  %8600 = vrot.lane.b32.xlu1 %v30197_v26, %s27265_s1 }
 0x5ee   : > { %v30211_v59 = vld [vmem:[#allocation2 + $0x81] sm:$0xff]  ;;  %8843 = vst.msk [vmem:[#allocation2 + $0xb1] sm:$0xff] %vm4892_vm5, %v30197_v26  ;;  %34617 = vst [vmem:[#allocation71_spill] sm:$0xff] %v30218_v4  ;;  %v30233_v60 = vld [vmem:[#allocation2 + $0x79] sm:$0xff]  ;;  %24519 = vmatmul.mubr.msk.f32.gmra.mrb[42].mxu1 %vm634_vm1, %v30207_v35  ;;  %8602 = vrot.lane.b32.xlu0 %v30243_v13, %s27265_s1 }
 0x5ef   : > { %34616 = vst [vmem:[#allocation74_spill] sm:$0xff] %v30211_v59  ;;  %v30222_v37 = vld [vmem:[#allocation2 + $0x80] sm:$0xff]  ;;  %8842 = vst.msk [vmem:[#allocation2 + $0xa9] sm:$0xff] %vm4892_vm5, %v30205_v50  ;;  %v34620_v14 = vld [vmem:[#allocation68_spill] sm:$0xff]  ;;  %v30273_v26 = vmax.f32 %v8367_v8, 0.0 }
 0x5f0   : > { %v30231_v48 = vld [vmem:[#allocation2 + $0x7a] sm:$0xff]  ;;  %34618 = vst [vmem:[#allocation79_spill] sm:$0xff] %v30233_v60  ;;  %34619 = vst [vmem:[#allocation6_spill] sm:$0xff] %v30235_v39  ;;  %v34644_v60 = vld [vmem:[#allocation88_spill] sm:$0xff] }
 0x5f1   : > { %12648 = vst.msk [vmem:[#allocation2 + $0x79] sm:$0xff] %vm989_vm4, %v34620_v14  ;;  %12649 = vst.msk [vmem:[#allocation2 + $0x81] sm:$0xff] %vm989_vm4, %v34621_v44  ;;  %v30245_v38 = vld [vmem:[#allocation2 + $0x99] sm:$0xff]  ;;  %v8232_v14 = vpop.f32.mrb[81].mxu0  ;;  %v30256_v50 = vld [vmem:[#allocation2 + $0x91] sm:$0xff]  ;;  %8604 = vrot.lane.b32.xlu1 %v30235_v39, %s27265_s1 }
 0x5f2   : > { %34622 = vst [vmem:[#allocation11_spill] sm:$0xff] %v30243_v13  ;;  %34623 = vst [vmem:[#allocation8_spill] sm:$0xff] %v30245_v38  ;;  %v30247_v24 = vld [vmem:[#allocation2 + $0x9a] sm:$0xff]  ;;  %v30258_v5 = vld [vmem:[#allocation2 + $0x90] sm:$0xff]  ;;  %v8366_v57 = vadd.f32 %v30025_v51, %v8232_v14  ;;  %24521 = vmatprep.mubr.msk.f32.mxu1 %vm634_vm1, %v30256_v50  ;;  %v24482_v29 = vpop.f32.mrb[82].mxu0 }
 0x5f3   : > { %v30249_v53 = vld [vmem:[#allocation2 + $0x99] sm:$0xff]  ;;  %8845 = vst.msk [vmem:[#allocation2 + $0xc9] sm:$0xff] %vm4892_vm5, %v30235_v39  ;;  %34625 = vst [vmem:[#allocation83_spill] sm:$0xff] %v30256_v50  ;;  %v30271_v31 = vld [vmem:[#allocation2 + $0x91] sm:$0xff]  ;;  %24522 = vmatmul.mubr.msk.f32.gmra.mrb[44].mxu1 %vm634_vm1, %v30245_v38  ;;  %v8369_v8 = vadd.f32 %v24482_v29, %v30025_v51 }
 0x5f4   : > { %34624 = vst [vmem:[#allocation85_spill] sm:$0xff] %v30249_v53  ;;  %v30260_v44 = vld [vmem:[#allocation2 + $0x98] sm:$0xff]  ;;  %8844 = vst.msk [vmem:[#allocation2 + $0xc1] sm:$0xff] %vm4892_vm5, %v30243_v13  ;;  %v30281_v14 = vmax.f32 %v8366_v57, 0.0  ;;  %v34645_v1 = vld [vmem:[#allocation87_spill] sm:$0xff] }
 0x5f5   : > { %v30269_v20 = vld [vmem:[#allocation2 + $0x92] sm:$0xff]  ;;  %34626 = vst [vmem:[#allocation90_spill] sm:$0xff] %v30271_v31  ;;  %34627 = vst [vmem:[#allocation93_spill] sm:$0xff] %v30273_v26  ;;  %v30311_v0 = vmax.f32 %v8369_v8, 0.0  ;;  %8608 = vrot.lane.b32.xlu1 %v30273_v26, %s27265_s1  ;;  %v34677_v28 = vld [vmem:[#allocation104_spill] sm:$0xff] }
 0x5f6   : > { %12650 = vst.msk [vmem:[#allocation2 + $0x91] sm:$0xff] %vm989_vm4, %v34628_v32  ;;  %12651 = vst.msk [vmem:[#allocation2 + $0x99] sm:$0xff] %vm989_vm4, %v34629_v22  ;;  %v30283_v45 = vld [vmem:[#allocation2 + $0xb1] sm:$0xff]  ;;  %v8242_v32 = vpop.f32.mrb[83].mxu0  ;;  %v30294_v27 = vld [vmem:[#allocation2 + $0xa9] sm:$0xff]  ;;  %8606 = vrot.lane.b32.xlu0 %v30281_v14, %s27265_s1 }
 0x5f7   : > { %34630 = vst [vmem:[#allocation38_spill] sm:$0xff] %v30281_v14  ;;  %34631 = vst [vmem:[#allocation35_spill] sm:$0xff] %v30283_v45  ;;  %v30285_v13 = vld [vmem:[#allocation2 + $0xb2] sm:$0xff]  ;;  %v30296_v22 = vld [vmem:[#allocation2 + $0xa8] sm:$0xff]  ;;  %v8368_v52 = vadd.f32 %v30025_v51, %v8242_v32  ;;  %24524 = vmatprep.mubr.msk.f32.mxu1 %vm634_vm1, %v30294_v27 }
 0x5f8   : > { %v30287_v61 = vld [vmem:[#allocation2 + $0xb1] sm:$0xff]  ;;  %8847 = vst.msk [vmem:[#allocation2 + $0xe1] sm:$0xff] %vm4892_vm5, %v30273_v26  ;;  %34633 = vst [vmem:[#allocation47_spill] sm:$0xff] %v30294_v27  ;;  %v30309_v39 = vld [vmem:[#allocation2 + $0xa9] sm:$0xff]  ;;  %24525 = vmatmul.mubr.msk.f32.gmra.mrb[46].mxu1 %vm634_vm1, %v30283_v45 }
 0x5f9   : > { %34632 = vst [vmem:[#allocation59_spill] sm:$0xff] %v30287_v61  ;;  %v30298_v57 = vld [vmem:[#allocation2 + $0xb0] sm:$0xff]  ;;  %8846 = vst.msk [vmem:[#allocation2 + $0xd9] sm:$0xff] %vm4892_vm5, %v30281_v14  ;;  %v30319_v32 = vmax.f32 %v8368_v52, 0.0  ;;  %v24485_v61 = vpop.f32.mrb[84].mxu0  ;;  %8612 = vrot.lane.b32.xlu1 %v30311_v0, %s27265_s1  ;;  %v34652_v3 = vld [vmem:[#allocation98_spill] sm:$0xff] }
 0x5fa   : > { %v30307_v29 = vld [vmem:[#allocation2 + $0xaa] sm:$0xff]  ;;  %34634 = vst [vmem:[#allocation99_spill] sm:$0xff] %v30309_v39  ;;  %34635 = vst [vmem:[#allocation94_spill] sm:$0xff] %v30311_v0  ;;  %v8371_v8 = vadd.f32 %v24485_v61, %v30025_v51  ;;  %v34668_v4 = vld [vmem:[#allocation102_spill] sm:$0xff] }
 0x5fb   : > { %12652 = vst.msk [vmem:[#allocation2 + $0xa9] sm:$0xff] %vm989_vm4, %v34636_v41  ;;  %12653 = vst.msk [vmem:[#allocation2 + $0xb1] sm:$0xff] %vm989_vm4, %v34637_v2  ;;  %v30321_v53 = vld [vmem:[#allocation2 + $0xc9] sm:$0xff]  ;;  %v8252_v41 = vpop.f32.mrb[85].mxu0  ;;  %v30332_v39 = vld [vmem:[#allocation2 + $0xc1] sm:$0xff]  ;;  %8610 = vrot.lane.b32.xlu0 %v30319_v32, %s27265_s1 }
 0x5fc   : > { %34638 = vst [vmem:[#allocation91_spill] sm:$0xff] %v30319_v32  ;;  %34639 = vst [vmem:[#allocation96_spill] sm:$0xff] %v30321_v53  ;;  %v30323_v14 = vld [vmem:[#allocation2 + $0xca] sm:$0xff]  ;;  %v30334_v2 = vld [vmem:[#allocation2 + $0xc0] sm:$0xff]  ;;  %24527 = vmatprep.mubr.msk.f32.mxu1 %vm634_vm1, %v30332_v39  ;;  %v30349_v59 = vmax.f32 %v8371_v8, 0.0  ;;  %v24488_v19 = vpop.f32.mrb[86].mxu0 }
 0x5fd   : > { %v30325_v31 = vld [vmem:[#allocation2 + $0xc9] sm:$0xff]  ;;  %8849 = vst.msk [vmem:[#allocation2 + $0xf9] sm:$0xff] %vm4892_vm5, %v30311_v0  ;;  %34641 = vst [vmem:[#allocation49_spill] sm:$0xff] %v30332_v39  ;;  %v30347_v26 = vld [vmem:[#allocation2 + $0xc1] sm:$0xff]  ;;  %24528 = vmatmul.mubr.msk.f32.gmra.mrb[48].mxu1 %vm634_vm1, %v30321_v53  ;;  %v8373_v8 = vadd.f32 %v24488_v19, %v30025_v51 }
 0x5fe   : > { %34640 = vst [vmem:[#allocation97_spill] sm:$0xff] %v30325_v31  ;;  %v30336_v52 = vld [vmem:[#allocation2 + $0xc8] sm:$0xff]  ;;  %8848 = vst.msk [vmem:[#allocation2 + $0xf1] sm:$0xff] %vm4892_vm5, %v30319_v32  ;;  %v8370_v31 = vadd.f32 %v30025_v51, %v8252_v41  ;;  %v34653_v53 = vld [vmem:[#allocation95_spill] sm:$0xff]  ;;  %8616 = vrot.lane.b32.xlu1 %v30349_v59, %s27265_s1 }
 0x5ff   : > { %v30345_v61 = vld [vmem:[#allocation2 + $0xc2] sm:$0xff]  ;;  %34642 = vst [vmem:[#allocation17_spill] sm:$0xff] %v30347_v26  ;;  %34643 = vst [vmem:[#allocation54_spill] sm:$0xff] %v30349_v59  ;;  %v30387_v49 = vmax.f32 %v8373_v8, 0.0  ;;  %v34661_v38 = vld [vmem:[#allocation5_spill] sm:$0xff] }
 0x600   : > { %12654 = vst.msk [vmem:[#allocation2 + $0xc1] sm:$0xff] %vm989_vm4, %v34644_v60  ;;  %12655 = vst.msk [vmem:[#allocation2 + $0xc9] sm:$0xff] %vm989_vm4, %v34645_v1  ;;  %v30357_v41 = vmax.f32 %v8370_v31, 0.0  ;;  %v30359_v56 = vld [vmem:[#allocation2 + $0xe1] sm:$0xff]  ;;  %v8262_v60 = vpop.f32.mrb[87].mxu0  ;;  %v30370_v26 = vld [vmem:[#allocation2 + $0xd9] sm:$0xff] }
 0x601   : > { %34647 = vst [vmem:[#allocation52_spill] sm:$0xff] %v30359_v56  ;;  %v30361_v32 = vld [vmem:[#allocation2 + $0xe2] sm:$0xff]  ;;  %8851 = vst.msk [vmem:[#allocation2 + $0x111] sm:$0xff] %vm4892_vm5, %v30349_v59  ;;  %v30372_v31 = vld [vmem:[#allocation2 + $0xd8] sm:$0xff]  ;;  %24530 = vmatprep.mubr.msk.f32.mxu1 %vm634_vm1, %v30370_v26 }
 0x602   : > { %34646 = vst [vmem:[#allocation18_spill] sm:$0xff] %v30357_v41  ;;  %v30363_v40 = vld [vmem:[#allocation2 + $0xe1] sm:$0xff]  ;;  %34649 = vst [vmem:[#allocation19_spill] sm:$0xff] %v30370_v26  ;;  %8614 = vrot.lane.b32.xlu0 %v30357_v41, %s27265_s1  ;;  %v30385_v0 = vld [vmem:[#allocation2 + $0xd9] sm:$0xff]  ;;  %24531 = vmatmul.mubr.msk.f32.gmra.mrb[50].mxu1 %vm634_vm1, %v30359_v56  ;;  %v24491_v26 = vpop.f32.mrb[88].mxu0 }
 0x603   : > { %34648 = vst [vmem:[#allocation29_spill] sm:$0xff] %v30363_v40  ;;  %v30374_v1 = vld [vmem:[#allocation2 + $0xe0] sm:$0xff]  ;;  %8850 = vst.msk [vmem:[#allocation2 + $0x109] sm:$0xff] %vm4892_vm5, %v30357_v41  ;;  %v8372_v40 = vadd.f32 %v30025_v51, %v8262_v60  ;;  %v8375_v8 = vadd.f32 %v24491_v26, %v30025_v51  ;;  %v34660_v27 = vld [vmem:[#allocation100_spill] sm:$0xff]  ;;  %8620 = vrot.lane.b32.xlu1 %v30387_v49, %s27265_s1 }
 0x604   : > { %v30383_v19 = vld [vmem:[#allocation2 + $0xda] sm:$0xff]  ;;  %34650 = vst [vmem:[#allocation61_spill] sm:$0xff] %v30385_v0  ;;  %34651 = vst [vmem:[#allocation27_spill] sm:$0xff] %v30387_v49  ;;  %v34669_v16 = vld [vmem:[#allocation101_spill] sm:$0xff] }
 0x605   : > { %12656 = vst.msk [vmem:[#allocation2 + $0xd9] sm:$0xff] %vm989_vm4, %v34652_v3  ;;  %12657 = vst.msk [vmem:[#allocation2 + $0xe1] sm:$0xff] %vm989_vm4, %v34653_v53  ;;  %v30395_v60 = vmax.f32 %v8372_v40, 0.0  ;;  %v30397_v39 = vld [vmem:[#allocation2 + $0xf9] sm:$0xff]  ;;  %v8272_v3 = vpop.f32.mrb[89].mxu0  ;;  %v30408_v0 = vld [vmem:[#allocation2 + $0xf1] sm:$0xff] }
 0x606   : > { %34655 = vst [vmem:[#allocation33_spill] sm:$0xff] %v30397_v39  ;;  %v30399_v41 = vld [vmem:[#allocation2 + $0xfa] sm:$0xff]  ;;  %8853 = vst.msk [vmem:[#allocation2 + $0x129] sm:$0xff] %vm4892_vm5, %v30387_v49  ;;  %v30410_v40 = vld [vmem:[#allocation2 + $0xf0] sm:$0xff]  ;;  %24533 = vmatprep.mubr.msk.f32.mxu1 %vm634_vm1, %v30408_v0  ;;  %v30425_v56 = vmax.f32 %v8375_v8, 0.0 }
 0x607   : > { %34654 = vst [vmem:[#allocation25_spill] sm:$0xff] %v30395_v60  ;;  %v30401_v45 = vld [vmem:[#allocation2 + $0xf9] sm:$0xff]  ;;  %34657 = vst [vmem:[#allocation39_spill] sm:$0xff] %v30408_v0  ;;  %8618 = vrot.lane.b32.xlu0 %v30395_v60, %s27265_s1  ;;  %v30423_v59 = vld [vmem:[#allocation2 + $0xf1] sm:$0xff]  ;;  %24534 = vmatmul.mubr.msk.f32.gmra.mrb[52].mxu1 %vm634_vm1, %v30397_v39  ;;  %v24494_v0 = vpop.f32.mrb[90].mxu0 }
 0x608   : > { %34656 = vst [vmem:[#allocation44_spill] sm:$0xff] %v30401_v45  ;;  %v30412_v53 = vld [vmem:[#allocation2 + $0xf8] sm:$0xff]  ;;  %8852 = vst.msk [vmem:[#allocation2 + $0x121] sm:$0xff] %vm4892_vm5, %v30395_v60  ;;  %v8374_v45 = vadd.f32 %v30025_v51, %v8272_v3  ;;  %v8377_v8 = vadd.f32 %v24494_v0, %v30025_v51  ;;  %8624 = vrot.lane.b32.xlu1 %v30425_v56, %s27265_s1 }
 0x609   : > { %v30421_v26 = vld [vmem:[#allocation2 + $0xf2] sm:$0xff]  ;;  %34658 = vst [vmem:[#allocation36_spill] sm:$0xff] %v30423_v59  ;;  %34659 = vst [vmem:[#allocation60_spill] sm:$0xff] %v30425_v56 }
 0x60a   : > { %12658 = vst.msk [vmem:[#allocation2 + $0xf1] sm:$0xff] %vm989_vm4, %v34660_v27  ;;  %12659 = vst.msk [vmem:[#allocation2 + $0xf9] sm:$0xff] %vm989_vm4, %v34661_v38  ;;  %v30433_v3 = vmax.f32 %v8374_v45, 0.0  ;;  %v30435_v50 = vld [vmem:[#allocation2 + $0x111] sm:$0xff]  ;;  %v8282_v27 = vpop.f32.mrb[91].mxu0  ;;  %v30446_v59 = vld [vmem:[#allocation2 + $0x109] sm:$0xff] }
 0x60b   : > { %34663 = vst [vmem:[#allocation70_spill] sm:$0xff] %v30435_v50  ;;  %v30437_v60 = vld [vmem:[#allocation2 + $0x112] sm:$0xff]  ;;  %8855 = vst.msk [vmem:[#allocation2 + $0x141] sm:$0xff] %vm4892_vm5, %v30425_v56  ;;  %v30448_v45 = vld [vmem:[#allocation2 + $0x108] sm:$0xff]  ;;  %24536 = vmatprep.mubr.msk.f32.mxu1 %vm634_vm1, %v30446_v59  ;;  %v30463_v39 = vmax.f32 %v8377_v8, 0.0 }
 0x60c   : > { %34662 = vst [vmem:[#allocation51_spill] sm:$0xff] %v30433_v3  ;;  %v30439_v35 = vld [vmem:[#allocation2 + $0x111] sm:$0xff]  ;;  %34665 = vst [vmem:[#allocation76_spill] sm:$0xff] %v30446_v59  ;;  %8622 = vrot.lane.b32.xlu0 %v30433_v3, %s27265_s1  ;;  %v30461_v49 = vld [vmem:[#allocation2 + $0x109] sm:$0xff]  ;;  %24537 = vmatmul.mubr.msk.f32.gmra.mrb[54].mxu1 %vm634_vm1, %v30435_v50  ;;  %v24497_v59 = vpop.f32.mrb[92].mxu0 }
 0x60d   : > { %34664 = vst [vmem:[#allocation65_spill] sm:$0xff] %v30439_v35  ;;  %v30450_v38 = vld [vmem:[#allocation2 + $0x110] sm:$0xff]  ;;  %8854 = vst.msk [vmem:[#allocation2 + $0x139] sm:$0xff] %vm4892_vm5, %v30433_v3  ;;  %v8376_v35 = vadd.f32 %v30025_v51, %v8282_v27  ;;  %v8379_v8 = vadd.f32 %v24497_v59, %v30025_v51  ;;  %8628 = vrot.lane.b32.xlu1 %v30463_v39, %s27265_s1  ;;  %v34687_v15 = vld [vmem:[#allocation106_spill] sm:$0xff] }
 0x60e   : > { %v30459_v0 = vld [vmem:[#allocation2 + $0x10a] sm:$0xff]  ;;  %34666 = vst [vmem:[#allocation73_spill] sm:$0xff] %v30461_v49  ;;  %34667 = vst [vmem:[#allocation80_spill] sm:$0xff] %v30463_v39 }
 0x60f   : > { %12660 = vst.msk [vmem:[#allocation2 + $0x109] sm:$0xff] %vm989_vm4, %v34668_v4  ;;  %12661 = vst.msk [vmem:[#allocation2 + $0x111] sm:$0xff] %vm989_vm4, %v34669_v16  ;;  %v30471_v27 = vmax.f32 %v8376_v35, 0.0  ;;  %v30473_v12 = vld [vmem:[#allocation2 + $0x129] sm:$0xff]  ;;  %v8292_v4 = vpop.f32.mrb[93].mxu0  ;;  %v30484_v49 = vld [vmem:[#allocation2 + $0x121] sm:$0xff] }
 0x610   : > { %34671 = vst [vmem:[#allocation82_spill] sm:$0xff] %v30473_v12  ;;  %v30475_v3 = vld [vmem:[#allocation2 + $0x12a] sm:$0xff]  ;;  %8857 = vst.msk [vmem:[#allocation2 + $0x159] sm:$0xff] %vm4892_vm5, %v30463_v39  ;;  %v30486_v16 = vld [vmem:[#allocation2 + $0x120] sm:$0xff]  ;;  %24539 = vmatprep.mubr.msk.f32.mxu1 %vm634_vm1, %v30484_v49  ;;  %v30501_v50 = vmax.f32 %v8379_v8, 0.0 }
 0x611   : > { %34670 = vst [vmem:[#allocation78_spill] sm:$0xff] %v30471_v27  ;;  %34672 = vst [vmem:[#allocation10_spill] sm:$0xff] %v30475_v3  ;;  %v30477_v58 = vld [vmem:[#allocation2 + $0x129] sm:$0xff]  ;;  %8626 = vrot.lane.b32.xlu0 %v30471_v27, %s27265_s1  ;;  %v30499_v56 = vld [vmem:[#allocation2 + $0x121] sm:$0xff]  ;;  %24540 = vmatmul.mubr.msk.f32.gmra.mrb[56].mxu1 %vm634_vm1, %v30473_v12 }
 0x612   : > { %34673 = vst [vmem:[#allocation86_spill] sm:$0xff] %v30477_v58  ;;  %34674 = vst [vmem:[#allocation84_spill] sm:$0xff] %v30484_v49  ;;  %v30488_v35 = vld [vmem:[#allocation2 + $0x128] sm:$0xff]  ;;  %v8378_v58 = vadd.f32 %v30025_v51, %v8292_v4  ;;  %v24500_v49 = vpop.f32.mrb[94].mxu0  ;;  %8632 = vrot.lane.b32.xlu1 %v30501_v50, %s27265_s1 }
 0x613   : > { %8856 = vst.msk [vmem:[#allocation2 + $0x151] sm:$0xff] %vm4892_vm5, %v30471_v27  ;;  %v30497_v59 = vld [vmem:[#allocation2 + $0x122] sm:$0xff]  ;;  %34675 = vst [vmem:[#allocation92_spill] sm:$0xff] %v30499_v56  ;;  %v8381_v8 = vadd.f32 %v24500_v49, %v30025_v51 }
 0x614   : > { %34676 = vst [vmem:[#allocation89_spill] sm:$0xff] %v30501_v50  ;;  %12662 = vst.msk [vmem:[#allocation2 + $0x121] sm:$0xff] %vm989_vm4, %v34677_v28  ;;  %v30509_v4 = vmax.f32 %v8378_v58, 0.0  ;;  %v30511_v54 = vld [vmem:[#allocation2 + $0x141] sm:$0xff]  ;;  %v8302_v28 = vpop.f32.mrb[95].mxu0  ;;  %v30522_v56 = vld [vmem:[#allocation2 + $0x139] sm:$0xff] }
 0x615   : > { %12663 = vst.msk [vmem:[#allocation2 + $0x129] sm:$0xff] %vm989_vm4, %v34678_v62  ;;  %34680 = vst [vmem:[#allocation30_spill] sm:$0xff] %v30511_v54  ;;  %v30513_v27 = vld [vmem:[#allocation2 + $0x142] sm:$0xff]  ;;  %v30524_v62 = vld [vmem:[#allocation2 + $0x138] sm:$0xff]  ;;  %24542 = vmatprep.mubr.msk.f32.mxu1 %vm634_vm1, %v30522_v56  ;;  %v30539_v12 = vmax.f32 %v8381_v8, 0.0 }
 0x616   : > { %34679 = vst [vmem:[#allocation50_spill] sm:$0xff] %v30509_v4  ;;  %34681 = vst [vmem:[#allocation23_spill] sm:$0xff] %v30513_v27  ;;  %v30515_v17 = vld [vmem:[#allocation2 + $0x141] sm:$0xff]  ;;  %8630 = vrot.lane.b32.xlu0 %v30509_v4, %s27265_s1  ;;  %v30537_v39 = vld [vmem:[#allocation2 + $0x139] sm:$0xff]  ;;  %24543 = vmatmul.mubr.msk.f32.gmra.mrb[58].mxu1 %vm634_vm1, %v30511_v54 }
 0x617   : > { %34682 = vst [vmem:[#allocation21_spill] sm:$0xff] %v30515_v17  ;;  %8859 = vst.msk [vmem:[#allocation2 + $0x171] sm:$0xff] %vm4892_vm5, %v30501_v50  ;;  %v30526_v58 = vld [vmem:[#allocation2 + $0x140] sm:$0xff]  ;;  %v8380_v17 = vadd.f32 %v30025_v51, %v8302_v28  ;;  %v34688_v27 = vld [vmem:[#allocation105_spill] sm:$0xff]  ;;  %8636 = vrot.lane.b32.xlu1 %v30539_v12, %s27265_s1 }
 0x618   : > { %34683 = vst [vmem:[#allocation32_spill] sm:$0xff] %v30522_v56  ;;  %8858 = vst.msk [vmem:[#allocation2 + $0x169] sm:$0xff] %vm4892_vm5, %v30509_v4  ;;  %v30535_v49 = vld [vmem:[#allocation2 + $0x13a] sm:$0xff] }
 0x619   : > { %34684 = vst [vmem:[#allocation46_spill] sm:$0xff] %v30535_v49  ;;  %34685 = vst [vmem:[#allocation42_spill] sm:$0xff] %v30537_v39  ;;  %v30547_v51 = vmax.f32 %v8380_v17, 0.0  ;;  %v30549_v28 = vld [vmem:[#allocation2 + $0x159] sm:$0xff] }
 0x61a   : > { %34686 = vst [vmem:[#allocation41_spill] sm:$0xff] %v30539_v12  ;;  %12664 = vst.msk [vmem:[#allocation2 + $0x139] sm:$0xff] %vm989_vm4, %v34687_v15  ;;  %v30551_v4 = vld [vmem:[#allocation2 + $0x15a] sm:$0xff]  ;;  %v30559_v8 = vld [vmem:[#allocation2 + $0x151] sm:$0xff] }
 0x61b   : > { %12665 = vst.msk [vmem:[#allocation2 + $0x141] sm:$0xff] %vm989_vm4, %v34688_v27  ;;  %34689 = vst [vmem:[#allocation68_spill] sm:$0xff] %v30547_v51  ;;  %v30553_v56 = vld [vmem:[#allocation2 + $0x159] sm:$0xff]  ;;  %v30561_v15 = vld [vmem:[#allocation2 + $0x150] sm:$0xff]  ;;  %24545 = vmatprep.mubr.msk.f32.mxu1 %vm634_vm1, %v30559_v8  ;;  %8634 = vrot.lane.b32.xlu0 %v30547_v51, %s27265_s1 }
 0x61c   : > { %34690 = vst [vmem:[#allocation66_spill] sm:$0xff] %v30549_v28  ;;  %34691 = vst [vmem:[#allocation9_spill] sm:$0xff] %v30551_v4  ;;  %v30563_v39 = vld [vmem:[#allocation2 + $0x158] sm:$0xff]  ;;  %24546 = vmatmul.mubr.msk.f32.gmra.mrb[60].mxu1 %vm634_vm1, %v30549_v28  ;;  %v8862_v50 = vld [vmem:[#allocation2] sm:$0xff] }
 0x61d   : > { %34692 = vst [vmem:[#allocation77_spill] sm:$0xff] %v30553_v56  ;;  %8861 = vst.msk [vmem:[#allocation2 + $0x189] sm:$0xff] %vm4892_vm5, %v30539_v12  ;;  %v30571_v17 = vld [vmem:[#allocation2 + $0x152] sm:$0xff]  ;;  %v34697_v56 = vld [vmem:[#allocation108_spill] sm:$0xff] }
 0x61e   : > { %34693 = vst [vmem:[#allocation81_spill] sm:$0xff] %v30559_v8  ;;  %34694 = vst [vmem:[#allocation40_spill] sm:$0xff] %v30563_v39  ;;  %v30573_v27 = vld [vmem:[#allocation2 + $0x151] sm:$0xff]  ;;  %v34698_v54 = vld [vmem:[#allocation107_spill] sm:$0xff] }
 0x61f   : > { %8860 = vst.msk [vmem:[#allocation2 + $0x181] sm:$0xff] %vm4892_vm5, %v30547_v51  ;;  %34695 = vst [vmem:[#allocation88_spill] sm:$0xff] %v30571_v17  ;;  %v30581_v4 = vld [vmem:[#allocation2 + $0x171] sm:$0xff]  ;;  %v30589_v51 = vld [vmem:[#allocation2 + $0x169] sm:$0xff] }
 0x620   : > { %34696 = vst [vmem:[#allocation87_spill] sm:$0xff] %v30573_v27  ;;  %12666 = vst.msk [vmem:[#allocation2 + $0x151] sm:$0xff] %vm989_vm4, %v34697_v56  ;;  %v30583_v8 = vld [vmem:[#allocation2 + $0x172] sm:$0xff]  ;;  %v30591_v27 = vld [vmem:[#allocation2 + $0x168] sm:$0xff]  ;;  %24548 = vmatprep.mubr.msk.f32.mxu1 %vm634_vm1, %v30589_v51 }
 0x621   : > { %12667 = vst.msk [vmem:[#allocation2 + $0x159] sm:$0xff] %vm989_vm4, %v34698_v54  ;;  %34699 = vst [vmem:[#allocation98_spill] sm:$0xff] %v30581_v4  ;;  %v30585_v49 = vld [vmem:[#allocation2 + $0x171] sm:$0xff]  ;;  %v30599_v54 = vld [vmem:[#allocation2 + $0x169] sm:$0xff]  ;;  %24549 = vmatmul.mubr.msk.f32.gmra.mrb[62].mxu1 %vm634_vm1, %v30581_v4 }
 0x622   : > { %34700 = vst [vmem:[#allocation95_spill] sm:$0xff] %v30583_v8  ;;  %34701 = vst [vmem:[#allocation100_spill] sm:$0xff] %v30585_v49  ;;  %v30593_v28 = vld [vmem:[#allocation2 + $0x170] sm:$0xff]  ;;  %v34707_v49 = vld [vmem:[#allocation110_spill] sm:$0xff]  ;;  %24553 = vmatprep.mubr.msk.f32.mxu1 %vm634_vm1, %v8862_v50 }
 0x623   : > { %34702 = vst [vmem:[#allocation5_spill] sm:$0xff] %v30589_v51  ;;  %34703 = vst [vmem:[#allocation102_spill] sm:$0xff] %v30591_v27  ;;  %v30597_v56 = vld [vmem:[#allocation2 + $0x16a] sm:$0xff]  ;;  %v34715_v50 = vld [vmem:[#allocation111_spill] sm:$0xff] }
 0x624   : > { %34704 = vst [vmem:[#allocation101_spill] sm:$0xff] %v30593_v28  ;;  %34705 = vst [vmem:[#allocation104_spill] sm:$0xff] %v30597_v56  ;;  %v34708_v12 = vld [vmem:[#allocation109_spill] sm:$0xff]  ;;  %v8863_v8 = vld [vmem:[#allocation2 + $0x8] sm:$0xff] }
 0x625   : > { %34706 = vst [vmem:[#allocation103_spill] sm:$0xff] %v30599_v54  ;;  %12668 = vst.msk [vmem:[#allocation2 + $0x169] sm:$0xff] %vm989_vm4, %v34707_v49  ;;  %v30608_v17 = vld [vmem:[#allocation2 + $0x189] sm:$0xff]  ;;  %v21211_v49 = vld [vmem:[%s33874_s7 + $0x18] sm:$0xff]  ;;  %24554 = vmatmul.mubr.msk.f32.vlgmr.msra.gmra.mrb[32].mxu1 %vm634_vm1, %v8863_v8 }
 0x626   : > { %12669 = vst.msk [vmem:[#allocation2 + $0x171] sm:$0xff] %vm989_vm4, %v34708_v12  ;;  %34709 = vst [vmem:[#allocation106_spill] sm:$0xff] %v30608_v17  ;;  %v30610_v3 = vld [vmem:[#allocation2 + $0x18a] sm:$0xff]  ;;  %v30612_v51 = vld [vmem:[#allocation2 + $0x180] sm:$0xff]  ;;  %24602 = vmatpush3.msra.mxu1 %v30019_v6  ;;  %24556 = vmatprep.mubr.msk.f32.mxu1 %vm634_vm1, %v30070_v34 }
 0x627   : > { %34710 = vst [vmem:[#allocation105_spill] sm:$0xff] %v30610_v3  ;;  %34711 = vst [vmem:[#allocation108_spill] sm:$0xff] %v30612_v51  ;;  %v30614_v56 = vld [vmem:[#allocation2 + $0x188] sm:$0xff]  ;;  %24651 = vmatprep.subr.mxu1 %v21211_v49 }
 0x628   : > { %34712 = vst [vmem:[#allocation107_spill] sm:$0xff] %v30614_v56  ;;  %v30616_v54 = vld [vmem:[#allocation2 + $0x181] sm:$0xff] }
 0x629   : > { %v30621_v4 = vld [vmem:[#allocation2 + $0x182] sm:$0xff]  ;;  %24557 = vmatmul.mubr.msk.f32.gmra.mrb[34].mxu1 %vm634_vm1, %v30072_v36 }
 0x62a   : > { %34713 = vst [vmem:[#allocation110_spill] sm:$0xff] %v30621_v4  ;;  %v34714_v12 = vld [vmem:[#allocation112_spill] sm:$0xff]  ;;  %12671 = vst.msk [vmem:[#allocation2 + $0x189] sm:$0xff] %vm989_vm4, %v34715_v50  ;;  %24559 = vmatprep.mubr.msk.f32.mxu1 %vm634_vm1, %v30106_v33 }
 0x62b   : > { %12670 = vst.msk [vmem:[#allocation2 + $0x181] sm:$0xff] %vm989_vm4, %v34714_v12  ;;  %v9571_v3 = vld [vmem:[#allocation2 + $0x2] sm:$0xff]  ;;  %v9572_v4 = vld [vmem:[#allocation2 + $0xa] sm:$0xff] }
 0x62d   : > { %24560 = vmatmul.mubr.msk.f32.gmra.mrb[36].mxu1 %vm634_vm1, %v30108_v42 }
 0x62e   : > { %24562 = vmatprep.mubr.msk.f32.mxu1 %vm634_vm1, %v30144_v11 }
 0x631   : > { %24563 = vmatmul.mubr.msk.f32.gmra.mrb[38].mxu1 %vm634_vm1, %v30146_v10 }
 0x632   : > { %24565 = vmatprep.mubr.msk.f32.mxu1 %vm634_vm1, %v30182_v55 }
 0x635   : > { %24566 = vmatmul.mubr.msk.f32.gmra.mrb[40].mxu1 %vm634_vm1, %v30184_v7 }
 0x636   : > { %24568 = vmatprep.mubr.msk.f32.mxu1 %vm634_vm1, %v30220_v9 }
 0x639   : > { %24569 = vmatmul.mubr.msk.f32.gmra.mrb[42].mxu1 %vm634_vm1, %v30222_v37 }
 0x63a   : > { %24571 = vmatprep.mubr.msk.f32.mxu1 %vm634_vm1, %v30258_v5 }
 0x63d   : > { %24572 = vmatmul.mubr.msk.f32.gmra.mrb[44].mxu1 %vm634_vm1, %v30260_v44 }
 0x63e   : > { %24574 = vmatprep.mubr.msk.f32.mxu1 %vm634_vm1, %v30296_v22 }
 0x641   : > { %24575 = vmatmul.mubr.msk.f32.gmra.mrb[46].mxu1 %vm634_vm1, %v30298_v57 }
 0x642   : > { %24577 = vmatprep.mubr.msk.f32.mxu1 %vm634_vm1, %v30334_v2 }
 0x643   : > { %v8577_v6 = vpop.permute.xlu1 %8576 }
 0x644   : > { %8671 = vst.msk [vmem:[#allocation4 + $0x8] sm:$0xff] %vm4892_vm5, %v8577_v6  ;;  %v8575_v8 = vpop.permute.xlu0 %8574 }
 0x645   : > { %24578 = vmatmul.mubr.msk.f32.gmra.mrb[48].mxu1 %vm634_vm1, %v30336_v52  ;;  %8670 = vst.msk [vmem:[#allocation4] sm:$0xff] %vm4892_vm5, %v8575_v8 }
 0x646   : > { %24580 = vmatprep.mubr.msk.f32.mxu1 %vm634_vm1, %v30372_v31 }
 0x647   : > { %v8581_v12 = vpop.permute.xlu1 %8580 }
 0x648   : > { %8673 = vst.msk [vmem:[#allocation4 + $0x18] sm:$0xff] %vm4892_vm5, %v8581_v12 }
 0x649   : > { %24581 = vmatmul.mubr.msk.f32.gmra.mrb[50].mxu1 %vm634_vm1, %v30374_v1 }
 0x64a   : > { %24583 = vmatprep.mubr.msk.f32.mxu1 %vm634_vm1, %v30410_v40 }
 0x64b   : > { %v8579_v50 = vpop.permute.xlu1 %8578 }
 0x64c   : > { %8672 = vst.msk [vmem:[#allocation4 + $0x10] sm:$0xff] %vm4892_vm5, %v8579_v50  ;;  %v8583_v6 = vpop.permute.xlu0 %8582 }
 0x64d   : > { %24584 = vmatmul.mubr.msk.f32.gmra.mrb[52].mxu1 %vm634_vm1, %v30412_v53  ;;  %8674 = vst.msk [vmem:[#allocation4 + $0x20] sm:$0xff] %vm4892_vm5, %v8583_v6 }
 0x64e   : > { %24586 = vmatprep.mubr.msk.f32.mxu1 %vm634_vm1, %v30448_v45 }
 0x64f   : > { %v8585_v8 = vpop.permute.xlu1 %8584 }
 0x650   : > { %8675 = vst.msk [vmem:[#allocation4 + $0x28] sm:$0xff] %vm4892_vm5, %v8585_v8  ;;  %v8587_v12 = vpop.permute.xlu0 %8586  ;;  %v30702_v8 = vld [vmem:[%s33874_s7 + $0x20] sm:$0xff] }
 0x651   : > { %24587 = vmatmul.mubr.msk.f32.gmra.mrb[54].mxu1 %vm634_vm1, %v30450_v38  ;;  %8676 = vst.msk [vmem:[#allocation4 + $0x30] sm:$0xff] %vm4892_vm5, %v8587_v12 }
 0x652   : > { %24589 = vmatprep.mubr.msk.f32.mxu1 %vm634_vm1, %v30486_v16 }
 0x653   : > { %v8589_v50 = vpop.permute.xlu1 %8588 }
 0x654   : > { %8677 = vst.msk [vmem:[#allocation4 + $0x38] sm:$0xff] %vm4892_vm5, %v8589_v50  ;;  %v8591_v6 = vpop.permute.xlu0 %8590 }
 0x655   : > { %24590 = vmatmul.mubr.msk.f32.gmra.mrb[56].mxu1 %vm634_vm1, %v30488_v35  ;;  %8678 = vst.msk [vmem:[#allocation4 + $0x40] sm:$0xff] %vm4892_vm5, %v8591_v6 }
 0x656   : > { %24592 = vmatprep.mubr.msk.f32.mxu1 %vm634_vm1, %v30524_v62 }
 0x657   : > { %v8593_v17 = vpop.permute.xlu1 %8592 }
 0x658   : > { %8679 = vst.msk [vmem:[#allocation4 + $0x48] sm:$0xff] %vm4892_vm5, %v8593_v17  ;;  %v8595_v12 = vpop.permute.xlu0 %8594 }
 0x659   : > { %24593 = vmatmul.mubr.msk.f32.gmra.mrb[58].mxu1 %vm634_vm1, %v30526_v58  ;;  %8680 = vst.msk [vmem:[#allocation4 + $0x50] sm:$0xff] %vm4892_vm5, %v8595_v12 }
 0x65a   : > { %24595 = vmatprep.mubr.msk.f32.mxu1 %vm634_vm1, %v30561_v15 }
 0x65c   : > { %v8599_v50 = vpop.permute.xlu0 %8598 }
 0x65d   : > { %24596 = vmatmul.mubr.msk.f32.gmra.mrb[60].mxu1 %vm634_vm1, %v30563_v39  ;;  %8682 = vst.msk [vmem:[#allocation4 + $0x60] sm:$0xff] %vm4892_vm5, %v8599_v50 }
 0x65e   : > { %24598 = vmatprep.mubr.msk.f32.mxu1 %vm634_vm1, %v30591_v27 }
 0x660   : > { %v8603_v17 = vpop.permute.xlu0 %8602 }
 0x661   : > { %24599 = vmatmul.mubr.msk.f32.gmra.mrb[62].mxu1 %vm634_vm1, %v30593_v28  ;;  %8684 = vst.msk [vmem:[#allocation4 + $0x70] sm:$0xff] %vm4892_vm5, %v8603_v17 }
 0x662   : > { %24603 = vmatprep.mubr.msk.f32.mxu1 %vm634_vm1, %v9571_v3  ;;  %v8597_v3 = vpop.permute.xlu1 %8596 }
 0x663   : > { %8681 = vst.msk [vmem:[#allocation4 + $0x58] sm:$0xff] %vm4892_vm5, %v8597_v3 }
 0x665   : > { %24604 = vmatmul.mubr.msk.f32.vlgmr.msra.gmra.mrb[32].mxu1 %vm634_vm1, %v9572_v4 }
 0x666   : > { %24652 = vmatpush3.msra.mxu1 %v21211_v49  ;;  %24606 = vmatprep.mubr.msk.f32.mxu1 %vm634_vm1, %v30081_v47  ;;  %v8601_v4 = vpop.permute.xlu1 %8600 }
 0x667   : > { %24701 = vmatprep.subr.mxu1 %v30702_v8  ;;  %8683 = vst.msk [vmem:[#allocation4 + $0x68] sm:$0xff] %vm4892_vm5, %v8601_v4 }
 0x668   : > { %v8607_v6 = vpop.permute.xlu0 %8606 }
 0x669   : > { %24607 = vmatmul.mubr.msk.f32.gmra.mrb[34].mxu1 %vm634_vm1, %v30061_v63  ;;  %8686 = vst.msk [vmem:[#allocation4 + $0x80] sm:$0xff] %vm4892_vm5, %v8607_v6 }
 0x66a   : > { %24609 = vmatprep.mubr.msk.f32.mxu1 %vm634_vm1, %v30117_v21  ;;  %v8605_v49 = vpop.permute.xlu1 %8604 }
 0x66b   : > { %8685 = vst.msk [vmem:[#allocation4 + $0x78] sm:$0xff] %vm4892_vm5, %v8605_v49 }
 0x66d   : > { %24610 = vmatmul.mubr.msk.f32.gmra.mrb[36].mxu1 %vm634_vm1, %v30095_v43  ;;  %v8611_v3 = vpop.permute.xlu0 %8610 }
 0x66e   : > { %24612 = vmatprep.mubr.msk.f32.mxu1 %vm634_vm1, %v30155_v46  ;;  %v8609_v12 = vpop.permute.xlu1 %8608  ;;  %8688 = vst.msk [vmem:[#allocation4 + $0x90] sm:$0xff] %vm4892_vm5, %v8611_v3 }
 0x66f   : > { %8687 = vst.msk [vmem:[#allocation4 + $0x88] sm:$0xff] %vm4892_vm5, %v8609_v12 }
 0x671   : > { %24613 = vmatmul.mubr.msk.f32.gmra.mrb[38].mxu1 %vm634_vm1, %v30133_v30 }
 0x672   : > { %24615 = vmatprep.mubr.msk.f32.mxu1 %vm634_vm1, %v30193_v23  ;;  %v8613_v50 = vpop.permute.xlu1 %8612 }
 0x673   : > { %8689 = vst.msk [vmem:[#allocation4 + $0x98] sm:$0xff] %vm4892_vm5, %v8613_v50 }
 0x674   : > { %v8615_v4 = vpop.permute.xlu0 %8614 }
 0x675   : > { %24616 = vmatmul.mubr.msk.f32.gmra.mrb[40].mxu1 %vm634_vm1, %v30171_v18  ;;  %8690 = vst.msk [vmem:[#allocation4 + $0xa0] sm:$0xff] %vm4892_vm5, %v8615_v4 }
 0x676   : > { %24618 = vmatprep.mubr.msk.f32.mxu1 %vm634_vm1, %v30231_v48  ;;  %v8617_v17 = vpop.permute.xlu1 %8616 }
 0x677   : > { %8691 = vst.msk [vmem:[#allocation4 + $0xa8] sm:$0xff] %vm4892_vm5, %v8617_v17 }
 0x679   : > { %24619 = vmatmul.mubr.msk.f32.gmra.mrb[42].mxu1 %vm634_vm1, %v30209_v25  ;;  %v8619_v49 = vpop.permute.xlu0 %8618 }
 0x67a   : > { %24621 = vmatprep.mubr.msk.f32.mxu1 %vm634_vm1, %v30269_v20  ;;  %8692 = vst.msk [vmem:[#allocation4 + $0xb0] sm:$0xff] %vm4892_vm5, %v8619_v49  ;;  %v8621_v6 = vpop.permute.xlu1 %8620 }
 0x67b   : > { %8693 = vst.msk [vmem:[#allocation4 + $0xb8] sm:$0xff] %vm4892_vm5, %v8621_v6 }
 0x67d   : > { %24622 = vmatmul.mubr.msk.f32.gmra.mrb[44].mxu1 %vm634_vm1, %v30247_v24 }
 0x67e   : > { %24624 = vmatprep.mubr.msk.f32.mxu1 %vm634_vm1, %v30307_v29  ;;  %v8623_v12 = vpop.permute.xlu0 %8622  ;;  %v8625_v3 = vpop.permute.xlu1 %8624 }
 0x67f   : > { %8694 = vst.msk [vmem:[#allocation4 + $0xc0] sm:$0xff] %vm4892_vm5, %v8623_v12  ;;  %8695 = vst.msk [vmem:[#allocation4 + $0xc8] sm:$0xff] %vm4892_vm5, %v8625_v3  ;;  %v34716_v3 = vld [vmem:[#allocation10_spill] sm:$0xff] }
 0x681   : > { %24625 = vmatmul.mubr.msk.f32.gmra.mrb[46].mxu1 %vm634_vm1, %v30285_v13 }
 0x682   : > { %24627 = vmatprep.mubr.msk.f32.mxu1 %vm634_vm1, %v30345_v61  ;;  %v8629_v4 = vpop.permute.xlu1 %8628 }
 0x683   : > { %v8627_v50 = vpop.permute.xlu0 %8626  ;;  %8697 = vst.msk [vmem:[#allocation4 + $0xd8] sm:$0xff] %vm4892_vm5, %v8629_v4  ;;  %v34718_v4 = vld [vmem:[#allocation23_spill] sm:$0xff] }
 0x684   : > { %8696 = vst.msk [vmem:[#allocation4 + $0xd0] sm:$0xff] %vm4892_vm5, %v8627_v50  ;;  %v34717_v50 = vld [vmem:[#allocation46_spill] sm:$0xff] }
 0x685   : > { %24628 = vmatmul.mubr.msk.f32.gmra.mrb[48].mxu1 %vm634_vm1, %v30323_v14 }
 0x686   : > { %24630 = vmatprep.mubr.msk.f32.mxu1 %vm634_vm1, %v30383_v19  ;;  %v8633_v49 = vpop.permute.xlu1 %8632 }
 0x687   : > { %8699 = vst.msk [vmem:[#allocation4 + $0xe8] sm:$0xff] %vm4892_vm5, %v8633_v49  ;;  %v34720_v49 = vld [vmem:[#allocation9_spill] sm:$0xff] }
 0x688   : > { %v8631_v17 = vpop.permute.xlu0 %8630 }
 0x689   : > { %24631 = vmatmul.mubr.msk.f32.gmra.mrb[50].mxu1 %vm634_vm1, %v30361_v32  ;;  %8698 = vst.msk [vmem:[#allocation4 + $0xe0] sm:$0xff] %vm4892_vm5, %v8631_v17  ;;  %v34719_v17 = vld [vmem:[#allocation88_spill] sm:$0xff] }
 0x68a   : > { %24633 = vmatprep.mubr.msk.f32.mxu1 %vm634_vm1, %v30421_v26  ;;  %v8637_v12 = vpop.permute.xlu1 %8636 }
 0x68b   : > { %8701 = vst.msk [vmem:[#allocation4 + $0xf8] sm:$0xff] %vm4892_vm5, %v8637_v12  ;;  %v34722_v12 = vld [vmem:[#allocation95_spill] sm:$0xff] }
 0x68d   : > { %24634 = vmatmul.mubr.msk.f32.gmra.mrb[52].mxu1 %vm634_vm1, %v30399_v41  ;;  %v8635_v6 = vpop.permute.xlu0 %8634 }
 0x68e   : > { %24636 = vmatprep.mubr.msk.f32.mxu1 %vm634_vm1, %v30459_v0  ;;  %8700 = vst.msk [vmem:[#allocation4 + $0xf0] sm:$0xff] %vm4892_vm5, %v8635_v6  ;;  %v34721_v6 = vld [vmem:[#allocation104_spill] sm:$0xff] }
 0x691   : > { %24637 = vmatmul.mubr.msk.f32.gmra.mrb[54].mxu1 %vm634_vm1, %v30437_v60 }
 0x692   : > { %24639 = vmatprep.mubr.msk.f32.mxu1 %vm634_vm1, %v30497_v59 }
 0x695   : > { %24640 = vmatmul.mubr.msk.f32.gmra.mrb[56].mxu1 %vm634_vm1, %v34716_v3 }
 0x696   : > { %24642 = vmatprep.mubr.msk.f32.mxu1 %vm634_vm1, %v34717_v50  ;;  %v21277_v50 = vld [vmem:[%s33874_s7 + $0x28] sm:$0xff] }
 0x699   : > { %24643 = vmatmul.mubr.msk.f32.gmra.mrb[58].mxu1 %vm634_vm1, %v34718_v4 }
 0x69a   : > { %24645 = vmatprep.mubr.msk.f32.mxu1 %vm634_vm1, %v34719_v17 }
 0x69d   : > { %24646 = vmatmul.mubr.msk.f32.gmra.mrb[60].mxu1 %vm634_vm1, %v34720_v49 }
 0x69e   : > { %24648 = vmatprep.mubr.msk.f32.mxu1 %vm634_vm1, %v34721_v6 }
 0x6a1   : > { %24649 = vmatmul.mubr.msk.f32.gmra.mrb[62].mxu1 %vm634_vm1, %v34722_v12 }
 0x6a2   : > { %24653 = vmatprep.mubr.msk.f32.mxu1 %vm634_vm1, %v30070_v34  ;;  %v34723_v34 = vld [vmem:[#allocation72_spill] sm:$0xff] }
 0x6a5   : > { %24654 = vmatmul.mubr.msk.f32.vlgmr.msra.gmra.mrb[32].mxu1 %vm634_vm1, %v30072_v36  ;;  %v21310_v36 = vld [vmem:[%s33874_s7 + $0x30] sm:$0xff] }
 0x6a6   : > { %24702 = vmatpush3.msra.mxu1 %v30702_v8  ;;  %24656 = vmatprep.mubr.msk.f32.mxu1 %vm634_vm1, %v30106_v33  ;;  %v34724_v8 = vld [vmem:[#allocation75_spill] sm:$0xff] }
 0x6a7   : > { %24751 = vmatprep.subr.mxu1 %v21277_v50 }
 0x6a9   : > { %24657 = vmatmul.mubr.msk.f32.gmra.mrb[34].mxu1 %vm634_vm1, %v30108_v42 }
 0x6aa   : > { %24659 = vmatprep.mubr.msk.f32.mxu1 %vm634_vm1, %v30144_v11 }
 0x6ad   : > { %24660 = vmatmul.mubr.msk.f32.gmra.mrb[36].mxu1 %vm634_vm1, %v30146_v10 }
 0x6ae   : > { %24662 = vmatprep.mubr.msk.f32.mxu1 %vm634_vm1, %v30182_v55 }
 0x6b1   : > { %24663 = vmatmul.mubr.msk.f32.gmra.mrb[38].mxu1 %vm634_vm1, %v30184_v7 }
 0x6b2   : > { %24665 = vmatprep.mubr.msk.f32.mxu1 %vm634_vm1, %v30220_v9 }
 0x6b5   : > { %24666 = vmatmul.mubr.msk.f32.gmra.mrb[40].mxu1 %vm634_vm1, %v30222_v37 }
 0x6b6   : > { %24668 = vmatprep.mubr.msk.f32.mxu1 %vm634_vm1, %v30258_v5 }
 0x6b9   : > { %24669 = vmatmul.mubr.msk.f32.gmra.mrb[42].mxu1 %vm634_vm1, %v30260_v44 }
 0x6ba   : > { %24671 = vmatprep.mubr.msk.f32.mxu1 %vm634_vm1, %v30296_v22 }
 0x6bd   : > { %24672 = vmatmul.mubr.msk.f32.gmra.mrb[44].mxu1 %vm634_vm1, %v30298_v57 }
 0x6be   : > { %24674 = vmatprep.mubr.msk.f32.mxu1 %vm634_vm1, %v30334_v2 }
 0x6c1   : > { %24675 = vmatmul.mubr.msk.f32.gmra.mrb[46].mxu1 %vm634_vm1, %v30336_v52 }
 0x6c2   : > { %24677 = vmatprep.mubr.msk.f32.mxu1 %vm634_vm1, %v30372_v31 }
 0x6c5   : > { %24678 = vmatmul.mubr.msk.f32.gmra.mrb[48].mxu1 %vm634_vm1, %v30374_v1 }
 0x6c6   : > { %24680 = vmatprep.mubr.msk.f32.mxu1 %vm634_vm1, %v30410_v40 }
 0x6c9   : > { %24681 = vmatmul.mubr.msk.f32.gmra.mrb[50].mxu1 %vm634_vm1, %v30412_v53 }
 0x6ca   : > { %24683 = vmatprep.mubr.msk.f32.mxu1 %vm634_vm1, %v30448_v45 }
 0x6cd   : > { %24684 = vmatmul.mubr.msk.f32.gmra.mrb[52].mxu1 %vm634_vm1, %v30450_v38 }
 0x6ce   : > { %24686 = vmatprep.mubr.msk.f32.mxu1 %vm634_vm1, %v30486_v16 }
 0x6d1   : > { %24687 = vmatmul.mubr.msk.f32.gmra.mrb[54].mxu1 %vm634_vm1, %v30488_v35 }
 0x6d2   : > { %24689 = vmatprep.mubr.msk.f32.mxu1 %vm634_vm1, %v30524_v62 }
 0x6d5   : > { %24690 = vmatmul.mubr.msk.f32.gmra.mrb[56].mxu1 %vm634_vm1, %v30526_v58 }
 0x6d6   : > { %24692 = vmatprep.mubr.msk.f32.mxu1 %vm634_vm1, %v30561_v15 }
 0x6d9   : > { %24693 = vmatmul.mubr.msk.f32.gmra.mrb[58].mxu1 %vm634_vm1, %v30563_v39  ;;  %v34730_v39 = vld [vmem:[#allocation28_spill] sm:$0xff] }
 0x6da   : > { %24695 = vmatprep.mubr.msk.f32.mxu1 %vm634_vm1, %v30591_v27  ;;  %v34725_v27 = vld [vmem:[#allocation15_spill] sm:$0xff] }
 0x6dd   : > { %24696 = vmatmul.mubr.msk.f32.gmra.mrb[60].mxu1 %vm634_vm1, %v30593_v28  ;;  %v34726_v28 = vld [vmem:[#allocation13_spill] sm:$0xff] }
 0x6de   : > { %24698 = vmatprep.mubr.msk.f32.mxu1 %vm634_vm1, %v30612_v51  ;;  %v34727_v51 = vld [vmem:[#allocation57_spill] sm:$0xff] }
 0x6e1   : > { %24699 = vmatmul.mubr.msk.f32.gmra.mrb[62].mxu1 %vm634_vm1, %v30614_v56  ;;  %v34728_v56 = vld [vmem:[#allocation20_spill] sm:$0xff] }
 0x6e2   : > { %24703 = vmatprep.mubr.msk.f32.mxu1 %vm634_vm1, %v34723_v34  ;;  %v34729_v34 = vld [vmem:[#allocation34_spill] sm:$0xff] }
 0x6e5   : > { %24704 = vmatmul.mubr.msk.f32.vlgmr.msra.gmra.mrb[32].mxu1 %vm634_vm1, %v34724_v8  ;;  %v34733_v8 = vld [vmem:[#allocation83_spill] sm:$0xff] }
 0x6e6   : > { %24752 = vmatpush3.msra.mxu1 %v21277_v50  ;;  %24706 = vmatprep.mubr.msk.f32.mxu1 %vm634_vm1, %v34725_v27  ;;  %v34731_v50 = vld [vmem:[#allocation71_spill] sm:$0xff] }
 0x6e7   : > { %24801 = vmatprep.subr.mxu1 %v21310_v36  ;;  %v34732_v27 = vld [vmem:[#allocation63_spill] sm:$0xff] }
 0x6e9   : > { %24707 = vmatmul.mubr.msk.f32.gmra.mrb[34].mxu1 %vm634_vm1, %v34726_v28  ;;  %v34734_v28 = vld [vmem:[#allocation8_spill] sm:$0xff] }
 0x6ea   : > { %24709 = vmatprep.mubr.msk.f32.mxu1 %vm634_vm1, %v34727_v51  ;;  %v34735_v51 = vld [vmem:[#allocation47_spill] sm:$0xff] }
 0x6ed   : > { %24710 = vmatmul.mubr.msk.f32.gmra.mrb[36].mxu1 %vm634_vm1, %v34728_v56  ;;  %v34736_v56 = vld [vmem:[#allocation35_spill] sm:$0xff] }
 0x6ee   : > { %24712 = vmatprep.mubr.msk.f32.mxu1 %vm634_vm1, %v34729_v34  ;;  %v34737_v34 = vld [vmem:[#allocation49_spill] sm:$0xff] }
 0x6f1   : > { %24713 = vmatmul.mubr.msk.f32.gmra.mrb[38].mxu1 %vm634_vm1, %v34730_v39  ;;  %v34738_v39 = vld [vmem:[#allocation96_spill] sm:$0xff] }
 0x6f2   : > { %24715 = vmatprep.mubr.msk.f32.mxu1 %vm634_vm1, %v34731_v50  ;;  %v34739_v50 = vld [vmem:[#allocation19_spill] sm:$0xff] }
 0x6f5   : > { %24716 = vmatmul.mubr.msk.f32.gmra.mrb[40].mxu1 %vm634_vm1, %v34732_v27  ;;  %v34740_v27 = vld [vmem:[#allocation52_spill] sm:$0xff] }
 0x6f6   : > { %24718 = vmatprep.mubr.msk.f32.mxu1 %vm634_vm1, %v34733_v8  ;;  %v34741_v8 = vld [vmem:[#allocation39_spill] sm:$0xff] }
 0x6f9   : > { %24719 = vmatmul.mubr.msk.f32.gmra.mrb[42].mxu1 %vm634_vm1, %v34734_v28  ;;  %v34742_v28 = vld [vmem:[#allocation33_spill] sm:$0xff] }
 0x6fa   : > { %24721 = vmatprep.mubr.msk.f32.mxu1 %vm634_vm1, %v34735_v51  ;;  %v34743_v51 = vld [vmem:[#allocation76_spill] sm:$0xff] }
 0x6fd   : > { %24722 = vmatmul.mubr.msk.f32.gmra.mrb[44].mxu1 %vm634_vm1, %v34736_v56  ;;  %v34744_v56 = vld [vmem:[#allocation70_spill] sm:$0xff] }
 0x6fe   : > { %24724 = vmatprep.mubr.msk.f32.mxu1 %vm634_vm1, %v34737_v34  ;;  %v34745_v34 = vld [vmem:[#allocation84_spill] sm:$0xff] }
 0x701   : > { %24725 = vmatmul.mubr.msk.f32.gmra.mrb[46].mxu1 %vm634_vm1, %v34738_v39  ;;  %v34746_v39 = vld [vmem:[#allocation82_spill] sm:$0xff] }
 0x702   : > { %24727 = vmatprep.mubr.msk.f32.mxu1 %vm634_vm1, %v34739_v50  ;;  %v34747_v50 = vld [vmem:[#allocation32_spill] sm:$0xff] }
 0x705   : > { %24728 = vmatmul.mubr.msk.f32.gmra.mrb[48].mxu1 %vm634_vm1, %v34740_v27  ;;  %v34748_v27 = vld [vmem:[#allocation30_spill] sm:$0xff] }
 0x706   : > { %24730 = vmatprep.mubr.msk.f32.mxu1 %vm634_vm1, %v34741_v8  ;;  %v34749_v8 = vld [vmem:[#allocation81_spill] sm:$0xff] }
 0x709   : > { %24731 = vmatmul.mubr.msk.f32.gmra.mrb[50].mxu1 %vm634_vm1, %v34742_v28  ;;  %v34750_v28 = vld [vmem:[#allocation66_spill] sm:$0xff] }
 0x70a   : > { %24733 = vmatprep.mubr.msk.f32.mxu1 %vm634_vm1, %v34743_v51  ;;  %v34751_v51 = vld [vmem:[#allocation5_spill] sm:$0xff] }
 0x70d   : > { %24734 = vmatmul.mubr.msk.f32.gmra.mrb[52].mxu1 %vm634_vm1, %v34744_v56  ;;  %v34752_v56 = vld [vmem:[#allocation98_spill] sm:$0xff] }
 0x70e   : > { %24736 = vmatprep.mubr.msk.f32.mxu1 %vm634_vm1, %v34745_v34  ;;  %v34753_v34 = vld [vmem:[#allocation106_spill] sm:$0xff] }
 0x711   : > { %24737 = vmatmul.mubr.msk.f32.gmra.mrb[54].mxu1 %vm634_vm1, %v34746_v39  ;;  %v21343_v39 = vld [vmem:[%s33874_s7 + $0x38] sm:$0xff] }
 0x712   : > { %24739 = vmatprep.mubr.msk.f32.mxu1 %vm634_vm1, %v34747_v50  ;;  %v21376_v50 = vld [vmem:[%s33874_s7 + $0x40] sm:$0xff] }
 0x715   : > { %24740 = vmatmul.mubr.msk.f32.gmra.mrb[56].mxu1 %vm634_vm1, %v34748_v27  ;;  %v34779_v27 = vld [vmem:[#allocation44_spill] sm:$0xff] }
 0x716   : > { %24742 = vmatprep.mubr.msk.f32.mxu1 %vm634_vm1, %v34749_v8  ;;  %v34780_v8 = vld [vmem:[#allocation73_spill] sm:$0xff] }
 0x719   : > { %24743 = vmatmul.mubr.msk.f32.gmra.mrb[58].mxu1 %vm634_vm1, %v34750_v28  ;;  %v34781_v28 = vld [vmem:[#allocation65_spill] sm:$0xff] }
 0x71a   : > { %24745 = vmatprep.mubr.msk.f32.mxu1 %vm634_vm1, %v34751_v51  ;;  %v34782_v51 = vld [vmem:[#allocation92_spill] sm:$0xff] }
 0x71d   : > { %24746 = vmatmul.mubr.msk.f32.gmra.mrb[60].mxu1 %vm634_vm1, %v34752_v56  ;;  %v34783_v56 = vld [vmem:[#allocation86_spill] sm:$0xff] }
 0x71e   : > { %24748 = vmatprep.mubr.msk.f32.mxu1 %vm634_vm1, %v30616_v54 }
 0x721   : > { %24749 = vmatmul.mubr.msk.f32.gmra.mrb[62].mxu1 %vm634_vm1, %v34753_v34 }
 0x722   : > { %24753 = vmatprep.mubr.msk.f32.mxu1 %vm634_vm1, %v30081_v47  ;;  %v34755_v47 = vld [vmem:[#allocation110_spill] sm:$0xff] }
 0x725   : > { %24754 = vmatmul.mubr.msk.f32.vlgmr.msra.gmra.mrb[32].mxu1 %vm634_vm1, %v30061_v63  ;;  %v34754_v63 = vld [vmem:[#allocation46_spill] sm:$0xff] }
 0x726   : > { %24802 = vmatpush3.msra.mxu1 %v21310_v36  ;;  %24756 = vmatprep.mubr.msk.f32.mxu1 %vm634_vm1, %v30117_v21  ;;  %v34756_v36 = vld [vmem:[#allocation105_spill] sm:$0xff] }
 0x727   : > { %24851 = vmatprep.subr.mxu1 %v21343_v39 }
 0x729   : > { %24757 = vmatmul.mubr.msk.f32.gmra.mrb[34].mxu1 %vm634_vm1, %v30095_v43 }
 0x72a   : > { %24759 = vmatprep.mubr.msk.f32.mxu1 %vm634_vm1, %v30155_v46 }
 0x72d   : > { %24760 = vmatmul.mubr.msk.f32.gmra.mrb[36].mxu1 %vm634_vm1, %v30133_v30 }
 0x72e   : > { %24762 = vmatprep.mubr.msk.f32.mxu1 %vm634_vm1, %v30193_v23 }
 0x731   : > { %24763 = vmatmul.mubr.msk.f32.gmra.mrb[38].mxu1 %vm634_vm1, %v30171_v18 }
 0x732   : > { %24765 = vmatprep.mubr.msk.f32.mxu1 %vm634_vm1, %v30231_v48 }
 0x735   : > { %24766 = vmatmul.mubr.msk.f32.gmra.mrb[40].mxu1 %vm634_vm1, %v30209_v25 }
 0x736   : > { %24768 = vmatprep.mubr.msk.f32.mxu1 %vm634_vm1, %v30269_v20 }
 0x739   : > { %24769 = vmatmul.mubr.msk.f32.gmra.mrb[42].mxu1 %vm634_vm1, %v30247_v24 }
 0x73a   : > { %24771 = vmatprep.mubr.msk.f32.mxu1 %vm634_vm1, %v30307_v29 }
 0x73d   : > { %24772 = vmatmul.mubr.msk.f32.gmra.mrb[44].mxu1 %vm634_vm1, %v30285_v13 }
 0x73e   : > { %24774 = vmatprep.mubr.msk.f32.mxu1 %vm634_vm1, %v30345_v61 }
 0x741   : > { %24775 = vmatmul.mubr.msk.f32.gmra.mrb[46].mxu1 %vm634_vm1, %v30323_v14 }
 0x742   : > { %24777 = vmatprep.mubr.msk.f32.mxu1 %vm634_vm1, %v30383_v19 }
 0x745   : > { %24778 = vmatmul.mubr.msk.f32.gmra.mrb[48].mxu1 %vm634_vm1, %v30361_v32 }
 0x746   : > { %24780 = vmatprep.mubr.msk.f32.mxu1 %vm634_vm1, %v30421_v26 }
 0x749   : > { %24781 = vmatmul.mubr.msk.f32.gmra.mrb[50].mxu1 %vm634_vm1, %v30399_v41 }
 0x74a   : > { %24783 = vmatprep.mubr.msk.f32.mxu1 %vm634_vm1, %v30459_v0 }
 0x74d   : > { %24784 = vmatmul.mubr.msk.f32.gmra.mrb[52].mxu1 %vm634_vm1, %v30437_v60 }
 0x74e   : > { %24786 = vmatprep.mubr.msk.f32.mxu1 %vm634_vm1, %v30497_v59 }
 0x751   : > { %24787 = vmatmul.mubr.msk.f32.gmra.mrb[54].mxu1 %vm634_vm1, %v34716_v3 }
 0x752   : > { %24789 = vmatprep.mubr.msk.f32.mxu1 %vm634_vm1, %v34754_v63 }
 0x755   : > { %24790 = vmatmul.mubr.msk.f32.gmra.mrb[56].mxu1 %vm634_vm1, %v34718_v4 }
 0x756   : > { %24792 = vmatprep.mubr.msk.f32.mxu1 %vm634_vm1, %v34719_v17 }
 0x759   : > { %24793 = vmatmul.mubr.msk.f32.gmra.mrb[58].mxu1 %vm634_vm1, %v34720_v49 }
 0x75a   : > { %24795 = vmatprep.mubr.msk.f32.mxu1 %vm634_vm1, %v34721_v6 }
 0x75d   : > { %24796 = vmatmul.mubr.msk.f32.gmra.mrb[60].mxu1 %vm634_vm1, %v34722_v12 }
 0x75e   : > { %24798 = vmatprep.mubr.msk.f32.mxu1 %vm634_vm1, %v34755_v47 }
 0x761   : > { %24799 = vmatmul.mubr.msk.f32.gmra.mrb[62].mxu1 %vm634_vm1, %v34756_v36 }
 0x762   : > { %24803 = vmatprep.mubr.msk.f32.mxu1 %vm634_vm1, %v30106_v33  ;;  %v34757_v33 = vld [vmem:[#allocation40_spill] sm:$0xff] }
 0x765   : > { %24804 = vmatmul.mubr.msk.f32.vlgmr.msra.gmra.mrb[32].mxu1 %vm634_vm1, %v30108_v42  ;;  %v34758_v42 = vld [vmem:[#allocation102_spill] sm:$0xff] }
 0x766   : > { %24852 = vmatpush3.msra.mxu1 %v21343_v39  ;;  %24806 = vmatprep.mubr.msk.f32.mxu1 %vm634_vm1, %v30144_v11  ;;  %v34759_v11 = vld [vmem:[#allocation101_spill] sm:$0xff]  ;;  %v34784_v39 = vld [vmem:[#allocation42_spill] sm:$0xff] }
 0x767   : > { %24901 = vmatprep.subr.mxu1 %v21376_v50 }
 0x769   : > { %24807 = vmatmul.mubr.msk.f32.gmra.mrb[34].mxu1 %vm634_vm1, %v30146_v10  ;;  %v34760_v10 = vld [vmem:[#allocation108_spill] sm:$0xff] }
 0x76a   : > { %24809 = vmatprep.mubr.msk.f32.mxu1 %vm634_vm1, %v30182_v55  ;;  %v11149_v55 = vld [vmem:[#allocation2 + $0x198] sm:$0xff] }
 0x76d   : > { %24810 = vmatmul.mubr.msk.f32.gmra.mrb[36].mxu1 %vm634_vm1, %v30184_v7  ;;  %v34761_v7 = vld [vmem:[#allocation107_spill] sm:$0xff] }
 0x76e   : > { %24812 = vmatprep.mubr.msk.f32.mxu1 %vm634_vm1, %v30220_v9  ;;  %v11150_v9 = vld [vmem:[#allocation2 + $0x1a0] sm:$0xff] }
 0x771   : > { %24813 = vmatmul.mubr.msk.f32.gmra.mrb[38].mxu1 %vm634_vm1, %v30222_v37  ;;  %v21410_v37 = vld [vmem:[%s33876_s9 + $0x8] sm:$0xff] }
 0x772   : > { %24815 = vmatprep.mubr.msk.f32.mxu1 %vm634_vm1, %v30258_v5  ;;  %v34762_v5 = vld [vmem:[#allocation22_spill] sm:$0xff]  ;;  %24951 = vmatprep.subr.mxu0 %v21410_v37 }
 0x773   : > { %24952 = vmatpush3.msra.mxu0 %v21410_v37 }
 0x775   : > { %24816 = vmatmul.mubr.msk.f32.gmra.mrb[40].mxu1 %vm634_vm1, %v30260_v44  ;;  %v34763_v44 = vld [vmem:[#allocation16_spill] sm:$0xff] }
 0x776   : > { %24818 = vmatprep.mubr.msk.f32.mxu1 %vm634_vm1, %v30296_v22  ;;  %v34764_v22 = vld [vmem:[#allocation26_spill] sm:$0xff] }
 0x779   : > { %24819 = vmatmul.mubr.msk.f32.gmra.mrb[42].mxu1 %vm634_vm1, %v30298_v57  ;;  %v34765_v57 = vld [vmem:[#allocation62_spill] sm:$0xff] }
 0x77a   : > { %24821 = vmatprep.mubr.msk.f32.mxu1 %vm634_vm1, %v30334_v2  ;;  %v34766_v2 = vld [vmem:[#allocation55_spill] sm:$0xff] }
 0x77d   : > { %24822 = vmatmul.mubr.msk.f32.gmra.mrb[44].mxu1 %vm634_vm1, %v30336_v52  ;;  %v34767_v52 = vld [vmem:[#allocation37_spill] sm:$0xff] }
 0x77e   : > { %24824 = vmatprep.mubr.msk.f32.mxu1 %vm634_vm1, %v30372_v31  ;;  %v34768_v31 = vld [vmem:[#allocation79_spill] sm:$0xff] }
 0x781   : > { %24825 = vmatmul.mubr.msk.f32.gmra.mrb[46].mxu1 %vm634_vm1, %v30374_v1  ;;  %v34769_v1 = vld [vmem:[#allocation74_spill] sm:$0xff] }
 0x782   : > { %24827 = vmatprep.mubr.msk.f32.mxu1 %vm634_vm1, %v30410_v40  ;;  %v34770_v40 = vld [vmem:[#allocation90_spill] sm:$0xff] }
 0x785   : > { %24828 = vmatmul.mubr.msk.f32.gmra.mrb[48].mxu1 %vm634_vm1, %v30412_v53  ;;  %v34771_v53 = vld [vmem:[#allocation85_spill] sm:$0xff] }
 0x786   : > { %24830 = vmatprep.mubr.msk.f32.mxu1 %vm634_vm1, %v30448_v45  ;;  %v34772_v45 = vld [vmem:[#allocation99_spill] sm:$0xff] }
 0x789   : > { %24831 = vmatmul.mubr.msk.f32.gmra.mrb[50].mxu1 %vm634_vm1, %v30450_v38  ;;  %v34773_v38 = vld [vmem:[#allocation59_spill] sm:$0xff] }
 0x78a   : > { %24833 = vmatprep.mubr.msk.f32.mxu1 %vm634_vm1, %v30486_v16  ;;  %v34774_v16 = vld [vmem:[#allocation17_spill] sm:$0xff] }
 0x78d   : > { %24834 = vmatmul.mubr.msk.f32.gmra.mrb[52].mxu1 %vm634_vm1, %v30488_v35  ;;  %v34775_v35 = vld [vmem:[#allocation97_spill] sm:$0xff] }
 0x78e   : > { %24836 = vmatprep.mubr.msk.f32.mxu1 %vm634_vm1, %v30524_v62  ;;  %v34776_v62 = vld [vmem:[#allocation61_spill] sm:$0xff] }
 0x791   : > { %24837 = vmatmul.mubr.msk.f32.gmra.mrb[54].mxu1 %vm634_vm1, %v30526_v58  ;;  %v34777_v58 = vld [vmem:[#allocation29_spill] sm:$0xff] }
 0x792   : > { %24839 = vmatprep.mubr.msk.f32.mxu1 %vm634_vm1, %v30561_v15  ;;  %v34778_v15 = vld [vmem:[#allocation36_spill] sm:$0xff] }
 0x795   : > { %24840 = vmatmul.mubr.msk.f32.gmra.mrb[56].mxu1 %vm634_vm1, %v34757_v33  ;;  %v34786_v33 = vld [vmem:[#allocation87_spill] sm:$0xff] }
 0x796   : > { %24842 = vmatprep.mubr.msk.f32.mxu1 %vm634_vm1, %v34758_v42  ;;  %v34787_v42 = vld [vmem:[#allocation77_spill] sm:$0xff] }
 0x799   : > { %24843 = vmatmul.mubr.msk.f32.gmra.mrb[58].mxu1 %vm634_vm1, %v34759_v11  ;;  %v34788_v11 = vld [vmem:[#allocation103_spill] sm:$0xff] }
 0x79a   : > { %24845 = vmatprep.mubr.msk.f32.mxu1 %vm634_vm1, %v34760_v10  ;;  %v34789_v10 = vld [vmem:[#allocation100_spill] sm:$0xff] }
 0x79d   : > { %24846 = vmatmul.mubr.msk.f32.gmra.mrb[60].mxu1 %vm634_vm1, %v34761_v7  ;;  %v11537_v7 = vld [vmem:[#allocation2 + $0x1a1] sm:$0xff] }
 0x79e   : > { %24848 = vmatprep.mubr.msk.f32.mxu1 %vm634_vm1, %v11149_v55  ;;  %v11536_v55 = vld [vmem:[#allocation2 + $0x199] sm:$0xff] }
 0x7a1   : > { %24849 = vmatmul.mubr.msk.f32.gmra.mrb[62].mxu1 %vm634_vm1, %v11150_v9 }
 0x7a2   : > { %24853 = vmatprep.mubr.msk.f32.mxu1 %vm634_vm1, %v34762_v5 }
 0x7a5   : > { %24854 = vmatmul.mubr.msk.f32.vlgmr.msra.gmra.mrb[32].mxu1 %vm634_vm1, %v34763_v44 }
 0x7a6   : > { %24902 = vmatpush3.msra.mxu1 %v21376_v50  ;;  %24856 = vmatprep.mubr.msk.f32.mxu1 %vm634_vm1, %v34764_v22  ;;  %v34785_v50 = vld [vmem:[#allocation21_spill] sm:$0xff] }
 0x7a9   : > { %24857 = vmatmul.mubr.msk.f32.gmra.mrb[34].mxu1 %vm634_vm1, %v34765_v57 }
 0x7aa   : > { %24859 = vmatprep.mubr.msk.f32.mxu1 %vm634_vm1, %v34766_v2 }
 0x7ad   : > { %24860 = vmatmul.mubr.msk.f32.gmra.mrb[36].mxu1 %vm634_vm1, %v34767_v52 }
 0x7ae   : > { %24862 = vmatprep.mubr.msk.f32.mxu1 %vm634_vm1, %v34768_v31 }
 0x7b1   : > { %24863 = vmatmul.mubr.msk.f32.gmra.mrb[38].mxu1 %vm634_vm1, %v34769_v1 }
 0x7b2   : > { %24865 = vmatprep.mubr.msk.f32.mxu1 %vm634_vm1, %v34770_v40 }
 0x7b5   : > { %24866 = vmatmul.mubr.msk.f32.gmra.mrb[40].mxu1 %vm634_vm1, %v34771_v53 }
 0x7b6   : > { %24868 = vmatprep.mubr.msk.f32.mxu1 %vm634_vm1, %v34772_v45 }
 0x7b9   : > { %24869 = vmatmul.mubr.msk.f32.gmra.mrb[42].mxu1 %vm634_vm1, %v34773_v38 }
 0x7ba   : > { %24871 = vmatprep.mubr.msk.f32.mxu1 %vm634_vm1, %v34774_v16 }
 0x7bd   : > { %24872 = vmatmul.mubr.msk.f32.gmra.mrb[44].mxu1 %vm634_vm1, %v34775_v35 }
 0x7be   : > { %24874 = vmatprep.mubr.msk.f32.mxu1 %vm634_vm1, %v34776_v62 }
 0x7c1   : > { %24875 = vmatmul.mubr.msk.f32.gmra.mrb[46].mxu1 %vm634_vm1, %v34777_v58 }
 0x7c2   : > { %24877 = vmatprep.mubr.msk.f32.mxu1 %vm634_vm1, %v34778_v15 }
 0x7c5   : > { %24878 = vmatmul.mubr.msk.f32.gmra.mrb[48].mxu1 %vm634_vm1, %v34779_v27 }
 0x7c6   : > { %24880 = vmatprep.mubr.msk.f32.mxu1 %vm634_vm1, %v34780_v8 }
 0x7c9   : > { %24881 = vmatmul.mubr.msk.f32.gmra.mrb[50].mxu1 %vm634_vm1, %v34781_v28 }
 0x7ca   : > { %24883 = vmatprep.mubr.msk.f32.mxu1 %vm634_vm1, %v34782_v51 }
 0x7cd   : > { %24884 = vmatmul.mubr.msk.f32.gmra.mrb[52].mxu1 %vm634_vm1, %v34783_v56 }
 0x7ce   : > { %24886 = vmatprep.mubr.msk.f32.mxu1 %vm634_vm1, %v34784_v39 }
 0x7d1   : > { %24887 = vmatmul.mubr.msk.f32.gmra.mrb[54].mxu1 %vm634_vm1, %v34785_v50 }
 0x7d2   : > { %24889 = vmatprep.mubr.msk.f32.mxu1 %vm634_vm1, %v34786_v33 }
 0x7d5   : > { %24890 = vmatmul.mubr.msk.f32.gmra.mrb[56].mxu1 %vm634_vm1, %v34787_v42 }
 0x7d6   : > { %24892 = vmatprep.mubr.msk.f32.mxu1 %vm634_vm1, %v34788_v11 }
 0x7d9   : > { %24893 = vmatmul.mubr.msk.f32.gmra.mrb[58].mxu1 %vm634_vm1, %v34789_v10 }
 0x7da   : > { %24895 = vmatprep.mubr.msk.f32.mxu1 %vm634_vm1, %v30616_v54 }
 0x7dd   : > { %24896 = vmatmul.mubr.msk.f32.gmra.mrb[60].mxu1 %vm634_vm1, %v34753_v34 }
 0x7de   : > { %24898 = vmatprep.mubr.msk.f32.mxu1 %vm634_vm1, %v11536_v55 }
 0x7e1   : > { %24899 = vmatmul.mubr.msk.f32.gmra.mrb[62].mxu1 %vm634_vm1, %v11537_v7 }
 0x7e2   : > { %24903 = vmatprep.mubr.msk.f32.mxu1 %vm634_vm1, %v30117_v21  ;;  %v11924_v21 = vld [vmem:[#allocation2 + $0x1a2] sm:$0xff] }
 0x7e5   : > { %24904 = vmatmul.mubr.msk.f32.vlgmr.msra.gmra.mrb[32].mxu1 %vm634_vm1, %v30095_v43  ;;  %v11923_v43 = vld [vmem:[#allocation2 + $0x19a] sm:$0xff] }
 0x7e6   : > { %24906 = vmatprep.mubr.msk.f32.mxu1 %vm634_vm1, %v30155_v46  ;;  %v12738_v46 = vld [vmem:[#allocation2 + $0x9] sm:$0xff] }
 0x7e9   : > { %24907 = vmatmul.mubr.msk.f32.gmra.mrb[34].mxu1 %vm634_vm1, %v30133_v30  ;;  %v12737_v30 = vld [vmem:[#allocation2 + $0x1] sm:$0xff] }
 0x7ea   : > { %24909 = vmatprep.mubr.msk.f32.mxu1 %vm634_vm1, %v30193_v23  ;;  %24953 = vmatprep.mubr.msk.f32.mxu0 %vm634_vm1, %v12737_v30  ;;  %v31191_v23 = vld [vmem:[%s33876_s9 + $0x10] sm:$0xff] }
 0x7eb   : > { %24954 = vmatmul.mubr.msk.f32.vlgmr.msra.gmra.mrb[96].mxu0 %vm634_vm1, %v12738_v46 }
 0x7ed   : > { %24910 = vmatmul.mubr.msk.f32.gmra.mrb[36].mxu1 %vm634_vm1, %v30171_v18  ;;  %v12736_v18 = vld [vmem:[%s33876_s9] sm:$0xff] }
 0x7ee   : > { %24912 = vmatprep.mubr.msk.f32.mxu1 %vm634_vm1, %v30231_v48  ;;  %25001 = vmatprep.subr.mxu0 %v12736_v18 }
 0x7ef   : > { %25002 = vmatpush3.msra.mxu0 %v12736_v18 }
 0x7f0   : > { %25051 = vmatprep.subr.mxu0 %v31191_v23 }
 0x7f1   : > { %24913 = vmatmul.mubr.msk.f32.gmra.mrb[38].mxu1 %vm634_vm1, %v30209_v25  ;;  %v31197_v25 = vld [vmem:[%s33875_s8] ss:$0 sm:$0xff] }
 0x7f2   : > { %24915 = vmatprep.mubr.msk.f32.mxu1 %vm634_vm1, %v30269_v20 }
 0x7f5   : > { %24916 = vmatmul.mubr.msk.f32.gmra.mrb[40].mxu1 %vm634_vm1, %v30247_v24 }
 0x7f6   : > { %24918 = vmatprep.mubr.msk.f32.mxu1 %vm634_vm1, %v30307_v29 }
 0x7f9   : > { %24919 = vmatmul.mubr.msk.f32.gmra.mrb[42].mxu1 %vm634_vm1, %v30285_v13 }
 0x7fa   : > { %24921 = vmatprep.mubr.msk.f32.mxu1 %vm634_vm1, %v30345_v61 }
 0x7fd   : > { %24922 = vmatmul.mubr.msk.f32.gmra.mrb[44].mxu1 %vm634_vm1, %v30323_v14 }
 0x7fe   : > { %24924 = vmatprep.mubr.msk.f32.mxu1 %vm634_vm1, %v30383_v19 }
 0x801   : > { %24925 = vmatmul.mubr.msk.f32.gmra.mrb[46].mxu1 %vm634_vm1, %v30361_v32 }
 0x802   : > { %24927 = vmatprep.mubr.msk.f32.mxu1 %vm634_vm1, %v30421_v26 }
 0x805   : > { %24928 = vmatmul.mubr.msk.f32.gmra.mrb[48].mxu1 %vm634_vm1, %v30399_v41 }
 0x806   : > { %24930 = vmatprep.mubr.msk.f32.mxu1 %vm634_vm1, %v30459_v0 }
 0x809   : > { %24931 = vmatmul.mubr.msk.f32.gmra.mrb[50].mxu1 %vm634_vm1, %v30437_v60 }
 0x80a   : > { %24933 = vmatprep.mubr.msk.f32.mxu1 %vm634_vm1, %v30497_v59 }
 0x80d   : > { %24934 = vmatmul.mubr.msk.f32.gmra.mrb[52].mxu1 %vm634_vm1, %v34716_v3 }
 0x80e   : > { %24936 = vmatprep.mubr.msk.f32.mxu1 %vm634_vm1, %v34754_v63 }
 0x811   : > { %24937 = vmatmul.mubr.msk.f32.gmra.mrb[54].mxu1 %vm634_vm1, %v34718_v4 }
 0x812   : > { %24939 = vmatprep.mubr.msk.f32.mxu1 %vm634_vm1, %v34719_v17 }
 0x815   : > { %24940 = vmatmul.mubr.msk.f32.gmra.mrb[56].mxu1 %vm634_vm1, %v34720_v49 }
 0x816   : > { %24942 = vmatprep.mubr.msk.f32.mxu1 %vm634_vm1, %v34721_v6 }
 0x819   : > { %24943 = vmatmul.mubr.msk.f32.gmra.mrb[58].mxu1 %vm634_vm1, %v34722_v12 }
 0x81a   : > { %24945 = vmatprep.mubr.msk.f32.mxu1 %vm634_vm1, %v34755_v47 }
 0x81d   : > { %24946 = vmatmul.mubr.msk.f32.gmra.mrb[60].mxu1 %vm634_vm1, %v34756_v36 }
 0x81e   : > { %24948 = vmatprep.mubr.msk.f32.mxu1 %vm634_vm1, %v11923_v43 }
 0x821   : > { %24949 = vmatmul.mubr.msk.f32.gmra.mrb[62].mxu1 %vm634_vm1, %v11924_v21 }
 0x8b8   : > { %v24905_v48 = vpop.f32.mrb[32].mxu1 }
 0x8b9   : > { %v12288_v13 = vadd.f32 %v24905_v48, %v31197_v25  ;;  %v12089_v24 = vpop.f32.mrb[33].mxu1 }
 0x8ba   : > { %v12287_v20 = vadd.f32 %v31197_v25, %v12089_v24 }
 0x8bb   : > { %v31201_v14 = vmax.f32 %v12288_v13, 0.0 }
 0x8bc   : > { %v31203_v29 = vmax.f32 %v12287_v20, 0.0  ;;  %v24908_v32 = vpop.f32.mrb[34].mxu1 }
 0x8bd   : > { %34790 = vst [vmem:[#allocation109_spill] sm:$0xff] %v31201_v14  ;;  %12673 = vst.msk [vmem:[#allocation2 + $0x21] sm:$0xff] %vm4892_vm5, %v31201_v14  ;;  %v12290_v61 = vadd.f32 %v24908_v32, %v31197_v25  ;;  %v12099_v41 = vpop.f32.mrb[35].mxu1 }
 0x8be   : > { %34791 = vst [vmem:[#allocation112_spill] sm:$0xff] %v31203_v29  ;;  %12513 = vst.msk [vmem:[#allocation4 + $0x8] sm:$0xff] %vm12479_vm6, %v31201_v14  ;;  %v12289_v19 = vadd.f32 %v31197_v25, %v12099_v41  ;;  %v31676_v14 = vld [vmem:[%s33876_s9 + $0x20] sm:$0xff] }
 0x8bf   : > { %12672 = vst.msk [vmem:[#allocation2 + $0x19] sm:$0xff] %vm4892_vm5, %v31203_v29  ;;  %v31215_v60 = vmax.f32 %v12290_v61, 0.0 }
 0x8c0   : > { %12512 = vst.msk [vmem:[#allocation4] sm:$0xff] %vm12479_vm6, %v31203_v29  ;;  %v31217_v26 = vmax.f32 %v12289_v19, 0.0  ;;  %v24911_v0 = vpop.f32.mrb[36].mxu1  ;;  %v13414_v29 = vld [vmem:[#allocation2 + $0xa] sm:$0xff] }
 0x8c1   : > { %34792 = vst [vmem:[#allocation111_spill] sm:$0xff] %v31215_v60  ;;  %12675 = vst.msk [vmem:[#allocation2 + $0x39] sm:$0xff] %vm4892_vm5, %v31215_v60  ;;  %v12292_v59 = vadd.f32 %v24911_v0, %v31197_v25  ;;  %v12109_v54 = vpop.f32.mrb[37].mxu1 }
 0x8c2   : > { %34793 = vst [vmem:[#allocation10_spill] sm:$0xff] %v31217_v26  ;;  %12515 = vst.msk [vmem:[#allocation4 + $0x18] sm:$0xff] %vm12479_vm6, %v31215_v60  ;;  %v12291_v3 = vadd.f32 %v31197_v25, %v12109_v54 }
 0x8c3   : > { %12674 = vst.msk [vmem:[#allocation2 + $0x31] sm:$0xff] %vm4892_vm5, %v31217_v26  ;;  %v31229_v4 = vmax.f32 %v12292_v59, 0.0 }
 0x8c4   : > { %12514 = vst.msk [vmem:[#allocation4 + $0x10] sm:$0xff] %vm12479_vm6, %v31217_v26  ;;  %v31231_v17 = vmax.f32 %v12291_v3, 0.0  ;;  %v24914_v49 = vpop.f32.mrb[38].mxu1  ;;  %v31245_v47 = vld [vmem:[#allocation2 + $0x21] sm:$0xff] }
 0x8c5   : > { %34794 = vst [vmem:[#allocation23_spill] sm:$0xff] %v31229_v4  ;;  %12677 = vst.msk [vmem:[#allocation2 + $0x51] sm:$0xff] %vm4892_vm5, %v31229_v4  ;;  %v12294_v6 = vadd.f32 %v24914_v49, %v31197_v25  ;;  %v12119_v12 = vpop.f32.mrb[39].mxu1  ;;  %v13413_v26 = vld [vmem:[#allocation2 + $0x2] sm:$0xff] }
 0x8c6   : > { %34795 = vst [vmem:[#allocation88_spill] sm:$0xff] %v31231_v17  ;;  %v31236_v34 = vld [vmem:[#allocation2 + $0x19] sm:$0xff]  ;;  %12517 = vst.msk [vmem:[#allocation4 + $0x28] sm:$0xff] %vm12479_vm6, %v31229_v4  ;;  %v12293_v63 = vadd.f32 %v31197_v25, %v12119_v12 }
 0x8c7   : > { %12676 = vst.msk [vmem:[#allocation2 + $0x49] sm:$0xff] %vm4892_vm5, %v31231_v17  ;;  %24956 = vmatprep.mubr.msk.f32.mxu0 %vm634_vm1, %v31236_v34  ;;  %v31249_v36 = vmax.f32 %v12294_v6, 0.0 }
 0x8c8   : > { %12516 = vst.msk [vmem:[#allocation4 + $0x20] sm:$0xff] %vm12479_vm6, %v31231_v17  ;;  %24957 = vmatmul.mubr.msk.f32.gmra.mrb[98].mxu0 %vm634_vm1, %v31245_v47  ;;  %v31253_v9 = vmax.f32 %v12293_v63, 0.0  ;;  %v24917_v37 = vpop.f32.mrb[40].mxu1  ;;  %v31267_v2 = vld [vmem:[#allocation2 + $0x39] sm:$0xff] }
 0x8c9   : > { %34796 = vst [vmem:[#allocation9_spill] sm:$0xff] %v31249_v36  ;;  %12679 = vst.msk [vmem:[#allocation2 + $0x69] sm:$0xff] %vm4892_vm5, %v31249_v36  ;;  %v12296_v5 = vadd.f32 %v24917_v37, %v31197_v25  ;;  %v12129_v44 = vpop.f32.mrb[41].mxu1 }
 0x8ca   : > { %34797 = vst [vmem:[#allocation104_spill] sm:$0xff] %v31253_v9  ;;  %v31258_v22 = vld [vmem:[#allocation2 + $0x31] sm:$0xff]  ;;  %12519 = vst.msk [vmem:[#allocation4 + $0x38] sm:$0xff] %vm12479_vm6, %v31249_v36  ;;  %v12295_v57 = vadd.f32 %v31197_v25, %v12129_v44 }
 0x8cb   : > { %12678 = vst.msk [vmem:[#allocation2 + $0x61] sm:$0xff] %vm4892_vm5, %v31253_v9  ;;  %24959 = vmatprep.mubr.msk.f32.mxu0 %vm634_vm1, %v31258_v22  ;;  %v31271_v52 = vmax.f32 %v12296_v5, 0.0 }
 0x8cc   : > { %12518 = vst.msk [vmem:[#allocation4 + $0x30] sm:$0xff] %vm12479_vm6, %v31253_v9  ;;  %24960 = vmatmul.mubr.msk.f32.gmra.mrb[100].mxu0 %vm634_vm1, %v31267_v2  ;;  %v31275_v31 = vmax.f32 %v12295_v57, 0.0  ;;  %v24920_v1 = vpop.f32.mrb[42].mxu1  ;;  %v31289_v16 = vld [vmem:[#allocation2 + $0x51] sm:$0xff] }
 0x8cd   : > { %34798 = vst [vmem:[#allocation95_spill] sm:$0xff] %v31271_v52  ;;  %12681 = vst.msk [vmem:[#allocation2 + $0x81] sm:$0xff] %vm4892_vm5, %v31271_v52  ;;  %v12298_v40 = vadd.f32 %v24920_v1, %v31197_v25  ;;  %v12139_v53 = vpop.f32.mrb[43].mxu1 }
 0x8ce   : > { %34799 = vst [vmem:[#allocation72_spill] sm:$0xff] %v31275_v31  ;;  %v31280_v45 = vld [vmem:[#allocation2 + $0x49] sm:$0xff]  ;;  %12521 = vst.msk [vmem:[#allocation4 + $0x48] sm:$0xff] %vm12479_vm6, %v31271_v52  ;;  %v12297_v38 = vadd.f32 %v31197_v25, %v12139_v53 }
 0x8cf   : > { %12680 = vst.msk [vmem:[#allocation2 + $0x79] sm:$0xff] %vm4892_vm5, %v31275_v31  ;;  %24962 = vmatprep.mubr.msk.f32.mxu0 %vm634_vm1, %v31280_v45  ;;  %v31293_v35 = vmax.f32 %v12298_v40, 0.0 }
 0x8d0   : > { %12520 = vst.msk [vmem:[#allocation4 + $0x40] sm:$0xff] %vm12479_vm6, %v31275_v31  ;;  %24963 = vmatmul.mubr.msk.f32.gmra.mrb[102].mxu0 %vm634_vm1, %v31289_v16  ;;  %v31297_v62 = vmax.f32 %v12297_v38, 0.0  ;;  %v24923_v58 = vpop.f32.mrb[44].mxu1  ;;  %v31311_v51 = vld [vmem:[#allocation2 + $0x69] sm:$0xff] }
 0x8d1   : > { %34800 = vst [vmem:[#allocation75_spill] sm:$0xff] %v31293_v35  ;;  %12683 = vst.msk [vmem:[#allocation2 + $0x99] sm:$0xff] %vm4892_vm5, %v31293_v35  ;;  %v12300_v15 = vadd.f32 %v24923_v58, %v31197_v25  ;;  %v12149_v27 = vpop.f32.mrb[45].mxu1 }
 0x8d2   : > { %34801 = vst [vmem:[#allocation15_spill] sm:$0xff] %v31297_v62  ;;  %v31302_v8 = vld [vmem:[#allocation2 + $0x61] sm:$0xff]  ;;  %12523 = vst.msk [vmem:[#allocation4 + $0x58] sm:$0xff] %vm12479_vm6, %v31293_v35  ;;  %v12299_v28 = vadd.f32 %v31197_v25, %v12149_v27 }
 0x8d3   : > { %12682 = vst.msk [vmem:[#allocation2 + $0x91] sm:$0xff] %vm4892_vm5, %v31297_v62  ;;  %24965 = vmatprep.mubr.msk.f32.mxu0 %vm634_vm1, %v31302_v8  ;;  %v31315_v56 = vmax.f32 %v12300_v15, 0.0 }
 0x8d4   : > { %12522 = vst.msk [vmem:[#allocation4 + $0x50] sm:$0xff] %vm12479_vm6, %v31297_v62  ;;  %24966 = vmatmul.mubr.msk.f32.gmra.mrb[104].mxu0 %vm634_vm1, %v31311_v51  ;;  %v31319_v39 = vmax.f32 %v12299_v28, 0.0  ;;  %v24926_v50 = vpop.f32.mrb[46].mxu1  ;;  %v31333_v55 = vld [vmem:[#allocation2 + $0x81] sm:$0xff] }
 0x8d5   : > { %34802 = vst [vmem:[#allocation13_spill] sm:$0xff] %v31315_v56  ;;  %12685 = vst.msk [vmem:[#allocation2 + $0xb1] sm:$0xff] %vm4892_vm5, %v31315_v56  ;;  %v12302_v33 = vadd.f32 %v24926_v50, %v31197_v25  ;;  %v12159_v42 = vpop.f32.mrb[47].mxu1 }
 0x8d6   : > { %34803 = vst [vmem:[#allocation57_spill] sm:$0xff] %v31319_v39  ;;  %v31324_v11 = vld [vmem:[#allocation2 + $0x79] sm:$0xff]  ;;  %12525 = vst.msk [vmem:[#allocation4 + $0x68] sm:$0xff] %vm12479_vm6, %v31315_v56  ;;  %v12301_v10 = vadd.f32 %v31197_v25, %v12159_v42 }
 0x8d7   : > { %12684 = vst.msk [vmem:[#allocation2 + $0xa9] sm:$0xff] %vm4892_vm5, %v31319_v39  ;;  %24968 = vmatprep.mubr.msk.f32.mxu0 %vm634_vm1, %v31324_v11  ;;  %v31337_v7 = vmax.f32 %v12302_v33, 0.0 }
 0x8d8   : > { %12524 = vst.msk [vmem:[#allocation4 + $0x60] sm:$0xff] %vm12479_vm6, %v31319_v39  ;;  %24969 = vmatmul.mubr.msk.f32.gmra.mrb[106].mxu0 %vm634_vm1, %v31333_v55  ;;  %v31341_v43 = vmax.f32 %v12301_v10, 0.0  ;;  %v24929_v21 = vpop.f32.mrb[48].mxu1  ;;  %v31355_v13 = vld [vmem:[#allocation2 + $0x99] sm:$0xff] }
 0x8d9   : > { %34804 = vst [vmem:[#allocation20_spill] sm:$0xff] %v31337_v7  ;;  %12687 = vst.msk [vmem:[#allocation2 + $0xc9] sm:$0xff] %vm4892_vm5, %v31337_v7  ;;  %v12304_v30 = vadd.f32 %v24929_v21, %v31197_v25  ;;  %v12169_v46 = vpop.f32.mrb[49].mxu1 }
 0x8da   : > { %34805 = vst [vmem:[#allocation34_spill] sm:$0xff] %v31341_v43  ;;  %v31346_v18 = vld [vmem:[#allocation2 + $0x91] sm:$0xff]  ;;  %12527 = vst.msk [vmem:[#allocation4 + $0x78] sm:$0xff] %vm12479_vm6, %v31337_v7  ;;  %v12303_v48 = vadd.f32 %v31197_v25, %v12169_v46 }
 0x8db   : > { %12686 = vst.msk [vmem:[#allocation2 + $0xc1] sm:$0xff] %vm4892_vm5, %v31341_v43  ;;  %24971 = vmatprep.mubr.msk.f32.mxu0 %vm634_vm1, %v31346_v18  ;;  %v31359_v24 = vmax.f32 %v12304_v30, 0.0 }
 0x8dc   : > { %12526 = vst.msk [vmem:[#allocation4 + $0x70] sm:$0xff] %vm12479_vm6, %v31341_v43  ;;  %24972 = vmatmul.mubr.msk.f32.gmra.mrb[108].mxu0 %vm634_vm1, %v31355_v13  ;;  %v31363_v20 = vmax.f32 %v12303_v48, 0.0  ;;  %v24932_v32 = vpop.f32.mrb[50].mxu1  ;;  %v31377_v59 = vld [vmem:[#allocation2 + $0xb1] sm:$0xff] }
 0x8dd   : > { %34806 = vst [vmem:[#allocation28_spill] sm:$0xff] %v31359_v24  ;;  %12689 = vst.msk [vmem:[#allocation2 + $0xe1] sm:$0xff] %vm4892_vm5, %v31359_v24  ;;  %v12306_v61 = vadd.f32 %v24932_v32, %v31197_v25  ;;  %v12179_v41 = vpop.f32.mrb[51].mxu1 }
 0x8de   : > { %34807 = vst [vmem:[#allocation71_spill] sm:$0xff] %v31363_v20  ;;  %v31368_v19 = vld [vmem:[#allocation2 + $0xa9] sm:$0xff]  ;;  %12529 = vst.msk [vmem:[#allocation4 + $0x88] sm:$0xff] %vm12479_vm6, %v31359_v24  ;;  %v12305_v0 = vadd.f32 %v31197_v25, %v12179_v41 }
 0x8df   : > { %12688 = vst.msk [vmem:[#allocation2 + $0xd9] sm:$0xff] %vm4892_vm5, %v31363_v20  ;;  %24974 = vmatprep.mubr.msk.f32.mxu0 %vm634_vm1, %v31368_v19  ;;  %v31381_v54 = vmax.f32 %v12306_v61, 0.0 }
 0x8e0   : > { %12528 = vst.msk [vmem:[#allocation4 + $0x80] sm:$0xff] %vm12479_vm6, %v31363_v20  ;;  %24975 = vmatmul.mubr.msk.f32.gmra.mrb[110].mxu0 %vm634_vm1, %v31377_v59  ;;  %v31385_v3 = vmax.f32 %v12305_v0, 0.0  ;;  %v24935_v49 = vpop.f32.mrb[52].mxu1  ;;  %v31399_v5 = vld [vmem:[#allocation2 + $0xc9] sm:$0xff] }
 0x8e1   : > { %34808 = vst [vmem:[#allocation63_spill] sm:$0xff] %v31381_v54  ;;  %12691 = vst.msk [vmem:[#allocation2 + $0xf9] sm:$0xff] %vm4892_vm5, %v31381_v54  ;;  %v12308_v6 = vadd.f32 %v24935_v49, %v31197_v25  ;;  %v12189_v12 = vpop.f32.mrb[53].mxu1  ;;  %v31604_v20 = vld [vmem:[#allocation2 + $0xb0] sm:$0xff] }
 0x8e2   : > { %34809 = vst [vmem:[#allocation83_spill] sm:$0xff] %v31385_v3  ;;  %v31390_v63 = vld [vmem:[#allocation2 + $0xc1] sm:$0xff]  ;;  %12531 = vst.msk [vmem:[#allocation4 + $0x98] sm:$0xff] %vm12479_vm6, %v31381_v54  ;;  %v12307_v37 = vadd.f32 %v31197_v25, %v12189_v12 }
 0x8e3   : > { %12690 = vst.msk [vmem:[#allocation2 + $0xf1] sm:$0xff] %vm4892_vm5, %v31385_v3  ;;  %24977 = vmatprep.mubr.msk.f32.mxu0 %vm634_vm1, %v31390_v63  ;;  %v31403_v44 = vmax.f32 %v12308_v6, 0.0  ;;  %v31608_v43 = vld [vmem:[#allocation2 + $0xc0] sm:$0xff]  ;;  %v31612_v39 = vld [vmem:[#allocation2 + $0xc8] sm:$0xff] }
 0x8e4   : > { %12530 = vst.msk [vmem:[#allocation4 + $0x90] sm:$0xff] %vm12479_vm6, %v31385_v3  ;;  %24978 = vmatmul.mubr.msk.f32.gmra.mrb[112].mxu0 %vm634_vm1, %v31399_v5  ;;  %v31407_v57 = vmax.f32 %v12307_v37, 0.0  ;;  %v24938_v1 = vpop.f32.mrb[54].mxu1  ;;  %v31421_v15 = vld [vmem:[#allocation2 + $0xe1] sm:$0xff] }
 0x8e5   : > { %34810 = vst [vmem:[#allocation8_spill] sm:$0xff] %v31403_v44  ;;  %12693 = vst.msk [vmem:[#allocation2 + $0x111] sm:$0xff] %vm4892_vm5, %v31403_v44  ;;  %v12310_v40 = vadd.f32 %v24938_v1, %v31197_v25  ;;  %v12199_v53 = vpop.f32.mrb[55].mxu1  ;;  %v31600_v3 = vld [vmem:[#allocation2 + $0xa8] sm:$0xff] }
 0x8e6   : > { %34811 = vst [vmem:[#allocation47_spill] sm:$0xff] %v31407_v57  ;;  %v31412_v38 = vld [vmem:[#allocation2 + $0xd9] sm:$0xff]  ;;  %12533 = vst.msk [vmem:[#allocation4 + $0xa8] sm:$0xff] %vm12479_vm6, %v31403_v44  ;;  %v12309_v58 = vadd.f32 %v31197_v25, %v12199_v53 }
 0x8e7   : > { %12692 = vst.msk [vmem:[#allocation2 + $0x109] sm:$0xff] %vm4892_vm5, %v31407_v57  ;;  %24980 = vmatprep.mubr.msk.f32.mxu0 %vm634_vm1, %v31412_v38  ;;  %v31425_v27 = vmax.f32 %v12310_v40, 0.0  ;;  %v31616_v62 = vld [vmem:[#allocation2 + $0xd8] sm:$0xff]  ;;  %v31620_v31 = vld [vmem:[#allocation2 + $0xe0] sm:$0xff] }
 0x8e8   : > { %12532 = vst.msk [vmem:[#allocation4 + $0xa0] sm:$0xff] %vm12479_vm6, %v31407_v57  ;;  %24981 = vmatmul.mubr.msk.f32.gmra.mrb[114].mxu0 %vm634_vm1, %v31421_v15  ;;  %v31429_v28 = vmax.f32 %v12309_v58, 0.0  ;;  %v24941_v50 = vpop.f32.mrb[56].mxu1  ;;  %v31443_v30 = vld [vmem:[#allocation2 + $0xf9] sm:$0xff] }
 0x8e9   : > { %34812 = vst [vmem:[#allocation35_spill] sm:$0xff] %v31425_v27  ;;  %12695 = vst.msk [vmem:[#allocation2 + $0x129] sm:$0xff] %vm4892_vm5, %v31425_v27  ;;  %v12312_v33 = vadd.f32 %v24941_v50, %v31197_v25  ;;  %v12209_v42 = vpop.f32.mrb[57].mxu1  ;;  %v31596_v57 = vld [vmem:[#allocation2 + $0x98] sm:$0xff] }
 0x8ea   : > { %34813 = vst [vmem:[#allocation49_spill] sm:$0xff] %v31429_v28  ;;  %v31434_v10 = vld [vmem:[#allocation2 + $0xf1] sm:$0xff]  ;;  %12535 = vst.msk [vmem:[#allocation4 + $0xb8] sm:$0xff] %vm12479_vm6, %v31425_v27  ;;  %v12311_v21 = vadd.f32 %v31197_v25, %v12209_v42 }
 0x8eb   : > { %12694 = vst.msk [vmem:[#allocation2 + $0x121] sm:$0xff] %vm4892_vm5, %v31429_v28  ;;  %24983 = vmatprep.mubr.msk.f32.mxu0 %vm634_vm1, %v31434_v10  ;;  %v31447_v46 = vmax.f32 %v12312_v33, 0.0  ;;  %v31572_v27 = vld [vmem:[#allocation2 + $0x50] sm:$0xff]  ;;  %v31628_v44 = vld [vmem:[#allocation2 + $0xf8] sm:$0xff] }
 0x8ec   : > { %12534 = vst.msk [vmem:[#allocation4 + $0xb0] sm:$0xff] %vm12479_vm6, %v31429_v28  ;;  %24984 = vmatmul.mubr.msk.f32.gmra.mrb[116].mxu0 %vm634_vm1, %v31443_v30  ;;  %v31451_v48 = vmax.f32 %v12311_v21, 0.0  ;;  %v24944_v32 = vpop.f32.mrb[58].mxu1  ;;  %v31465_v6 = vld [vmem:[#allocation2 + $0x111] sm:$0xff] }
 0x8ed   : > { %34814 = vst [vmem:[#allocation96_spill] sm:$0xff] %v31447_v46  ;;  %12697 = vst.msk [vmem:[#allocation2 + $0x141] sm:$0xff] %vm4892_vm5, %v31447_v46  ;;  %v12314_v61 = vadd.f32 %v24944_v32, %v31197_v25  ;;  %v12219_v41 = vpop.f32.mrb[59].mxu1  ;;  %v31592_v28 = vld [vmem:[#allocation2 + $0x90] sm:$0xff] }
 0x8ee   : > { %34815 = vst [vmem:[#allocation19_spill] sm:$0xff] %v31451_v48  ;;  %v31456_v0 = vld [vmem:[#allocation2 + $0x109] sm:$0xff]  ;;  %12537 = vst.msk [vmem:[#allocation4 + $0xc8] sm:$0xff] %vm12479_vm6, %v31447_v46  ;;  %v12313_v49 = vadd.f32 %v31197_v25, %v12219_v41  ;;  %v31556_v46 = vld [vmem:[#allocation2 + $0x20] sm:$0xff] }
 0x8ef   : > { %12696 = vst.msk [vmem:[#allocation2 + $0x139] sm:$0xff] %vm4892_vm5, %v31451_v48  ;;  %24986 = vmatprep.mubr.msk.f32.mxu0 %vm634_vm1, %v31456_v0  ;;  %v31469_v12 = vmax.f32 %v12314_v61, 0.0  ;;  %v31624_v9 = vld [vmem:[#allocation2 + $0xf0] sm:$0xff]  ;;  %v31632_v54 = vld [vmem:[#allocation2 + $0x108] sm:$0xff] }
 0x8f0   : > { %12536 = vst.msk [vmem:[#allocation4 + $0xc0] sm:$0xff] %vm12479_vm6, %v31451_v48  ;;  %24987 = vmatmul.mubr.msk.f32.gmra.mrb[118].mxu0 %vm634_vm1, %v31465_v6  ;;  %v31473_v37 = vmax.f32 %v12313_v49, 0.0  ;;  %v24947_v1 = vpop.f32.mrb[60].mxu1  ;;  %v31487_v33 = vld [vmem:[#allocation2 + $0x129] sm:$0xff]  ;;  %v31588_v48 = vld [vmem:[#allocation2 + $0x80] sm:$0xff] }
 0x8f1   : > { %34816 = vst [vmem:[#allocation52_spill] sm:$0xff] %v31469_v12  ;;  %12699 = vst.msk [vmem:[#allocation2 + $0x159] sm:$0xff] %vm4892_vm5, %v31469_v12  ;;  %v12316_v40 = vadd.f32 %v24947_v1, %v31197_v25  ;;  %v12229_v53 = vpop.f32.mrb[61].mxu1  ;;  %v31636_v24 = vld [vmem:[#allocation2 + $0x110] sm:$0xff] }
 0x8f2   : > { %34817 = vst [vmem:[#allocation39_spill] sm:$0xff] %v31473_v37  ;;  %v31478_v58 = vld [vmem:[#allocation2 + $0x121] sm:$0xff]  ;;  %12539 = vst.msk [vmem:[#allocation4 + $0xd8] sm:$0xff] %vm12479_vm6, %v31469_v12  ;;  %v12315_v50 = vadd.f32 %v31197_v25, %v12229_v53  ;;  %v31550_v12 = vld [vmem:[#allocation2 + $0x18] sm:$0xff] }
 0x8f3   : > { %12698 = vst.msk [vmem:[#allocation2 + $0x151] sm:$0xff] %vm4892_vm5, %v31473_v37  ;;  %24989 = vmatprep.mubr.msk.f32.mxu0 %vm634_vm1, %v31478_v58  ;;  %v31491_v42 = vmax.f32 %v12316_v40, 0.0  ;;  %v31640_v7 = vld [vmem:[#allocation2 + $0x120] sm:$0xff]  ;;  %v31644_v56 = vld [vmem:[#allocation2 + $0x128] sm:$0xff] }
 0x8f4   : > { %12538 = vst.msk [vmem:[#allocation4 + $0xd0] sm:$0xff] %vm12479_vm6, %v31473_v37  ;;  %24990 = vmatmul.mubr.msk.f32.gmra.mrb[120].mxu0 %vm634_vm1, %v31487_v33  ;;  %v31495_v21 = vmax.f32 %v12315_v50, 0.0  ;;  %v24950_v32 = vpop.f32.mrb[62].mxu1  ;;  %v31509_v40 = vld [vmem:[#allocation2 + $0x141] sm:$0xff]  ;;  %v31584_v37 = vld [vmem:[#allocation2 + $0x78] sm:$0xff] }
 0x8f5   : > { %34818 = vst [vmem:[#allocation33_spill] sm:$0xff] %v31491_v42  ;;  %12701 = vst.msk [vmem:[#allocation2 + $0x171] sm:$0xff] %vm4892_vm5, %v31491_v42  ;;  %v12318_v61 = vadd.f32 %v24950_v32, %v31197_v25  ;;  %v12239_v41 = vpop.f32.mrb[63].mxu1 }
 0x8f6   : > { %34819 = vst [vmem:[#allocation76_spill] sm:$0xff] %v31495_v21  ;;  %v31500_v49 = vld [vmem:[#allocation2 + $0x139] sm:$0xff]  ;;  %12541 = vst.msk [vmem:[#allocation4 + $0xe8] sm:$0xff] %vm12479_vm6, %v31491_v42  ;;  %v12317_v1 = vadd.f32 %v31197_v25, %v12239_v41 }
 0x8f7   : > { %12700 = vst.msk [vmem:[#allocation2 + $0x169] sm:$0xff] %vm4892_vm5, %v31495_v21  ;;  %24992 = vmatprep.mubr.msk.f32.mxu0 %vm634_vm1, %v31500_v49  ;;  %v31513_v53 = vmax.f32 %v12318_v61, 0.0  ;;  %v12704_v41 = vld [vmem:[#allocation2] sm:$0xff]  ;;  %v31547_v42 = vld [vmem:[%s33876_s9 + $0x18] sm:$0xff] }
 0x8f8   : > { %12540 = vst.msk [vmem:[#allocation4 + $0xe0] sm:$0xff] %vm12479_vm6, %v31495_v21  ;;  %24993 = vmatmul.mubr.msk.f32.gmra.mrb[122].mxu0 %vm634_vm1, %v31509_v40  ;;  %v31517_v50 = vmax.f32 %v12317_v1, 0.0  ;;  %v31529_v25 = vld [vmem:[#allocation2 + $0x159] sm:$0xff]  ;;  %v31580_v21 = vld [vmem:[#allocation2 + $0x68] sm:$0xff] }
 0x8f9   : > { %34820 = vst [vmem:[#allocation70_spill] sm:$0xff] %v31513_v53  ;;  %12703 = vst.msk [vmem:[#allocation2 + $0x189] sm:$0xff] %vm4892_vm5, %v31513_v53  ;;  %v31648_v35 = vld [vmem:[#allocation2 + $0x138] sm:$0xff]  ;;  %v31652_v52 = vld [vmem:[#allocation2 + $0x140] sm:$0xff] }
 0x8fa   : > { %34821 = vst [vmem:[#allocation84_spill] sm:$0xff] %v31517_v50  ;;  %v31521_v32 = vld [vmem:[#allocation2 + $0x151] sm:$0xff]  ;;  %12543 = vst.msk [vmem:[#allocation4 + $0xf8] sm:$0xff] %vm12479_vm6, %v31513_v53  ;;  %v12705_v53 = vld [vmem:[#allocation2 + $0x8] sm:$0xff] }
 0x8fb   : > { %12702 = vst.msk [vmem:[#allocation2 + $0x181] sm:$0xff] %vm4892_vm5, %v31517_v50  ;;  %24995 = vmatprep.mubr.msk.f32.mxu0 %vm634_vm1, %v31521_v32  ;;  %v31656_v36 = vld [vmem:[#allocation2 + $0x150] sm:$0xff]  ;;  %v31660_v17 = vld [vmem:[#allocation2 + $0x158] sm:$0xff] }
 0x8fc   : > { %12542 = vst.msk [vmem:[#allocation4 + $0xf0] sm:$0xff] %vm12479_vm6, %v31517_v50  ;;  %24996 = vmatmul.mubr.msk.f32.gmra.mrb[124].mxu0 %vm634_vm1, %v31529_v25  ;;  %v31539_v1 = vld [vmem:[#allocation2 + $0x171] sm:$0xff]  ;;  %v31576_v50 = vld [vmem:[#allocation2 + $0x60] sm:$0xff] }
 0x8fd   : > { %34823 = vst [vmem:[#allocation32_spill] sm:$0xff] %v31539_v1 }
 0x8fe   : > { %v31535_v61 = vld [vmem:[#allocation2 + $0x169] sm:$0xff] }
 0x8ff   : > { %34822 = vst [vmem:[#allocation82_spill] sm:$0xff] %v31535_v61  ;;  %24998 = vmatprep.mubr.msk.f32.mxu0 %vm634_vm1, %v31535_v61  ;;  %v31664_v4 = vld [vmem:[#allocation2 + $0x168] sm:$0xff]  ;;  %v31668_v60 = vld [vmem:[#allocation2 + $0x170] sm:$0xff] }
 0x900   : > { %24999 = vmatmul.mubr.msk.f32.gmra.mrb[126].mxu0 %vm634_vm1, %v31539_v1  ;;  %v31679_v1 = vld [vmem:[#allocation2 + $0x1a] sm:$0xff]  ;;  %v31685_v61 = vld [vmem:[#allocation2 + $0x22] sm:$0xff] }
 0x901   : > { %25003 = vmatprep.mubr.msk.f32.mxu0 %vm634_vm1, %v12704_v41  ;;  %v31560_v41 = vld [vmem:[#allocation2 + $0x30] sm:$0xff]  ;;  %34824 = vst [vmem:[#allocation30_spill] sm:$0xff] %v31679_v1  ;;  %34825 = vst [vmem:[#allocation81_spill] sm:$0xff] %v31685_v61 }
 0x904   : > { %25004 = vmatmul.mubr.msk.f32.vlgmr.msra.gmra.mrb[96].mxu0 %vm634_vm1, %v12705_v53  ;;  %v31564_v53 = vld [vmem:[#allocation2 + $0x38] sm:$0xff] }
 0x905   : > { %25052 = vmatpush3.msra.mxu0 %v31191_v23  ;;  %25006 = vmatprep.mubr.msk.f32.mxu0 %vm634_vm1, %v31550_v12  ;;  %v31568_v23 = vld [vmem:[#allocation2 + $0x48] sm:$0xff] }
 0x906   : > { %25101 = vmatprep.subr.mxu0 %v31547_v42 }
 0x908   : > { %25007 = vmatmul.mubr.msk.f32.gmra.mrb[98].mxu0 %vm634_vm1, %v31556_v46 }
 0x909   : > { %25009 = vmatprep.mubr.msk.f32.mxu0 %vm634_vm1, %v31560_v41 }
 0x90c   : > { %25010 = vmatmul.mubr.msk.f32.gmra.mrb[100].mxu0 %vm634_vm1, %v31564_v53 }
 0x90d   : > { %25012 = vmatprep.mubr.msk.f32.mxu0 %vm634_vm1, %v31568_v23 }
 0x910   : > { %25013 = vmatmul.mubr.msk.f32.gmra.mrb[102].mxu0 %vm634_vm1, %v31572_v27 }
 0x911   : > { %25015 = vmatprep.mubr.msk.f32.mxu0 %vm634_vm1, %v31576_v50 }
 0x914   : > { %25016 = vmatmul.mubr.msk.f32.gmra.mrb[104].mxu0 %vm634_vm1, %v31580_v21 }
 0x915   : > { %25018 = vmatprep.mubr.msk.f32.mxu0 %vm634_vm1, %v31584_v37 }
 0x918   : > { %25019 = vmatmul.mubr.msk.f32.gmra.mrb[106].mxu0 %vm634_vm1, %v31588_v48 }
 0x919   : > { %25021 = vmatprep.mubr.msk.f32.mxu0 %vm634_vm1, %v31592_v28 }
 0x91c   : > { %25022 = vmatmul.mubr.msk.f32.gmra.mrb[108].mxu0 %vm634_vm1, %v31596_v57 }
 0x91d   : > { %25024 = vmatprep.mubr.msk.f32.mxu0 %vm634_vm1, %v31600_v3 }
 0x920   : > { %25025 = vmatmul.mubr.msk.f32.gmra.mrb[110].mxu0 %vm634_vm1, %v31604_v20 }
 0x921   : > { %25027 = vmatprep.mubr.msk.f32.mxu0 %vm634_vm1, %v31608_v43 }
 0x924   : > { %25028 = vmatmul.mubr.msk.f32.gmra.mrb[112].mxu0 %vm634_vm1, %v31612_v39 }
 0x925   : > { %25030 = vmatprep.mubr.msk.f32.mxu0 %vm634_vm1, %v31616_v62 }
 0x928   : > { %25031 = vmatmul.mubr.msk.f32.gmra.mrb[114].mxu0 %vm634_vm1, %v31620_v31 }
 0x929   : > { %25033 = vmatprep.mubr.msk.f32.mxu0 %vm634_vm1, %v31624_v9 }
 0x92c   : > { %25034 = vmatmul.mubr.msk.f32.gmra.mrb[116].mxu0 %vm634_vm1, %v31628_v44 }
 0x92d   : > { %25036 = vmatprep.mubr.msk.f32.mxu0 %vm634_vm1, %v31632_v54 }
 0x930   : > { %25037 = vmatmul.mubr.msk.f32.gmra.mrb[118].mxu0 %vm634_vm1, %v31636_v24 }
 0x931   : > { %25039 = vmatprep.mubr.msk.f32.mxu0 %vm634_vm1, %v31640_v7 }
 0x934   : > { %25040 = vmatmul.mubr.msk.f32.gmra.mrb[120].mxu0 %vm634_vm1, %v31644_v56 }
 0x935   : > { %25042 = vmatprep.mubr.msk.f32.mxu0 %vm634_vm1, %v31648_v35 }
 0x938   : > { %25043 = vmatmul.mubr.msk.f32.gmra.mrb[122].mxu0 %vm634_vm1, %v31652_v52 }
 0x939   : > { %25045 = vmatprep.mubr.msk.f32.mxu0 %vm634_vm1, %v31656_v36 }
 0x93c   : > { %25046 = vmatmul.mubr.msk.f32.gmra.mrb[124].mxu0 %vm634_vm1, %v31660_v17 }
 0x93d   : > { %25048 = vmatprep.mubr.msk.f32.mxu0 %vm634_vm1, %v31664_v4 }
 0x940   : > { %25049 = vmatmul.mubr.msk.f32.gmra.mrb[126].mxu0 %vm634_vm1, %v31668_v60 }
 0x941   : > { %25053 = vmatprep.mubr.msk.f32.mxu0 %vm634_vm1, %v13413_v26  ;;  %v31689_v26 = vld [vmem:[#allocation2 + $0x32] sm:$0xff] }
 0x942   : > { %34826 = vst [vmem:[#allocation66_spill] sm:$0xff] %v31689_v26 }
 0x944   : > { %25054 = vmatmul.mubr.msk.f32.vlgmr.msra.gmra.mrb[96].mxu0 %vm634_vm1, %v13414_v29  ;;  %v31693_v29 = vld [vmem:[#allocation2 + $0x3a] sm:$0xff] }
 0x945   : > { %25102 = vmatpush3.msra.mxu0 %v31547_v42  ;;  %25056 = vmatprep.mubr.msk.f32.mxu0 %vm634_vm1, %v31679_v1  ;;  %34827 = vst [vmem:[#allocation5_spill] sm:$0xff] %v31693_v29  ;;  %v31697_v42 = vld [vmem:[#allocation2 + $0x4a] sm:$0xff]  ;;  %v31701_v1 = vld [vmem:[#allocation2 + $0x52] sm:$0xff] }
 0x946   : > { %25151 = vmatprep.subr.mxu0 %v31676_v14  ;;  %34828 = vst [vmem:[#allocation98_spill] sm:$0xff] %v31697_v42  ;;  %34829 = vst [vmem:[#allocation106_spill] sm:$0xff] %v31701_v1 }
 0x948   : > { %25057 = vmatmul.mubr.msk.f32.gmra.mrb[98].mxu0 %vm634_vm1, %v31685_v61  ;;  %v31705_v61 = vld [vmem:[#allocation2 + $0x62] sm:$0xff] }
 0x949   : > { %25059 = vmatprep.mubr.msk.f32.mxu0 %vm634_vm1, %v31689_v26  ;;  %34830 = vst [vmem:[#allocation46_spill] sm:$0xff] %v31705_v61  ;;  %v31709_v26 = vld [vmem:[#allocation2 + $0x6a] sm:$0xff] }
 0x94a   : > { %34831 = vst [vmem:[#allocation110_spill] sm:$0xff] %v31709_v26 }
 0x94c   : > { %25060 = vmatmul.mubr.msk.f32.gmra.mrb[100].mxu0 %vm634_vm1, %v31693_v29  ;;  %v31713_v29 = vld [vmem:[#allocation2 + $0x7a] sm:$0xff] }
 0x94d   : > { %25062 = vmatprep.mubr.msk.f32.mxu0 %vm634_vm1, %v31697_v42  ;;  %34832 = vst [vmem:[#allocation105_spill] sm:$0xff] %v31713_v29  ;;  %v31717_v42 = vld [vmem:[#allocation2 + $0x82] sm:$0xff] }
 0x94e   : > { %34833 = vst [vmem:[#allocation40_spill] sm:$0xff] %v31717_v42 }
 0x950   : > { %25063 = vmatmul.mubr.msk.f32.gmra.mrb[102].mxu0 %vm634_vm1, %v31701_v1  ;;  %v31721_v1 = vld [vmem:[#allocation2 + $0x92] sm:$0xff] }
 0x951   : > { %25065 = vmatprep.mubr.msk.f32.mxu0 %vm634_vm1, %v31705_v61  ;;  %34834 = vst [vmem:[#allocation102_spill] sm:$0xff] %v31721_v1  ;;  %v31725_v61 = vld [vmem:[#allocation2 + $0x9a] sm:$0xff] }
 0x952   : > { %34835 = vst [vmem:[#allocation101_spill] sm:$0xff] %v31725_v61 }
 0x954   : > { %25066 = vmatmul.mubr.msk.f32.gmra.mrb[104].mxu0 %vm634_vm1, %v31709_v26  ;;  %v31729_v26 = vld [vmem:[#allocation2 + $0xaa] sm:$0xff] }
 0x955   : > { %25068 = vmatprep.mubr.msk.f32.mxu0 %vm634_vm1, %v31713_v29  ;;  %34836 = vst [vmem:[#allocation108_spill] sm:$0xff] %v31729_v26  ;;  %v31733_v29 = vld [vmem:[#allocation2 + $0xb2] sm:$0xff] }
 0x956   : > { %34837 = vst [vmem:[#allocation107_spill] sm:$0xff] %v31733_v29 }
 0x958   : > { %25069 = vmatmul.mubr.msk.f32.gmra.mrb[106].mxu0 %vm634_vm1, %v31717_v42  ;;  %v31737_v42 = vld [vmem:[#allocation2 + $0xc2] sm:$0xff] }
 0x959   : > { %25071 = vmatprep.mubr.msk.f32.mxu0 %vm634_vm1, %v31721_v1  ;;  %34838 = vst [vmem:[#allocation22_spill] sm:$0xff] %v31737_v42  ;;  %v31741_v1 = vld [vmem:[#allocation2 + $0xca] sm:$0xff] }
 0x95a   : > { %34839 = vst [vmem:[#allocation16_spill] sm:$0xff] %v31741_v1 }
 0x95c   : > { %25072 = vmatmul.mubr.msk.f32.gmra.mrb[108].mxu0 %vm634_vm1, %v31725_v61  ;;  %v31745_v61 = vld [vmem:[#allocation2 + $0xda] sm:$0xff] }
 0x95d   : > { %25074 = vmatprep.mubr.msk.f32.mxu0 %vm634_vm1, %v31729_v26  ;;  %34840 = vst [vmem:[#allocation26_spill] sm:$0xff] %v31745_v61  ;;  %v31749_v26 = vld [vmem:[#allocation2 + $0xe2] sm:$0xff] }
 0x95e   : > { %34841 = vst [vmem:[#allocation62_spill] sm:$0xff] %v31749_v26 }
 0x960   : > { %25075 = vmatmul.mubr.msk.f32.gmra.mrb[110].mxu0 %vm634_vm1, %v31733_v29  ;;  %v31753_v29 = vld [vmem:[#allocation2 + $0xf2] sm:$0xff] }
 0x961   : > { %25077 = vmatprep.mubr.msk.f32.mxu0 %vm634_vm1, %v31737_v42  ;;  %34842 = vst [vmem:[#allocation55_spill] sm:$0xff] %v31753_v29  ;;  %v31757_v42 = vld [vmem:[#allocation2 + $0xfa] sm:$0xff] }
 0x962   : > { %34843 = vst [vmem:[#allocation37_spill] sm:$0xff] %v31757_v42 }
 0x964   : > { %25078 = vmatmul.mubr.msk.f32.gmra.mrb[112].mxu0 %vm634_vm1, %v31741_v1  ;;  %v31761_v1 = vld [vmem:[#allocation2 + $0x10a] sm:$0xff] }
 0x965   : > { %25080 = vmatprep.mubr.msk.f32.mxu0 %vm634_vm1, %v31745_v61  ;;  %34844 = vst [vmem:[#allocation79_spill] sm:$0xff] %v31761_v1  ;;  %v31765_v61 = vld [vmem:[#allocation2 + $0x112] sm:$0xff] }
 0x966   : > { %34845 = vst [vmem:[#allocation74_spill] sm:$0xff] %v31765_v61 }
 0x968   : > { %25081 = vmatmul.mubr.msk.f32.gmra.mrb[114].mxu0 %vm634_vm1, %v31749_v26  ;;  %v31769_v26 = vld [vmem:[#allocation2 + $0x122] sm:$0xff] }
 0x969   : > { %25083 = vmatprep.mubr.msk.f32.mxu0 %vm634_vm1, %v31753_v29  ;;  %34846 = vst [vmem:[#allocation90_spill] sm:$0xff] %v31769_v26  ;;  %v31773_v29 = vld [vmem:[#allocation2 + $0x12a] sm:$0xff] }
 0x96a   : > { %34847 = vst [vmem:[#allocation85_spill] sm:$0xff] %v31773_v29 }
 0x96c   : > { %25084 = vmatmul.mubr.msk.f32.gmra.mrb[116].mxu0 %vm634_vm1, %v31757_v42  ;;  %v31777_v42 = vld [vmem:[#allocation2 + $0x13a] sm:$0xff] }
 0x96d   : > { %25086 = vmatprep.mubr.msk.f32.mxu0 %vm634_vm1, %v31761_v1  ;;  %34848 = vst [vmem:[#allocation99_spill] sm:$0xff] %v31777_v42  ;;  %v31781_v1 = vld [vmem:[#allocation2 + $0x142] sm:$0xff] }
 0x970   : > { %25087 = vmatmul.mubr.msk.f32.gmra.mrb[118].mxu0 %vm634_vm1, %v31765_v61  ;;  %v31785_v61 = vld [vmem:[#allocation2 + $0x152] sm:$0xff] }
 0x971   : > { %25089 = vmatprep.mubr.msk.f32.mxu0 %vm634_vm1, %v31769_v26  ;;  %34849 = vst [vmem:[#allocation59_spill] sm:$0xff] %v31785_v61  ;;  %v31789_v26 = vld [vmem:[#allocation2 + $0x15a] sm:$0xff] }
 0x974   : > { %25090 = vmatmul.mubr.msk.f32.gmra.mrb[120].mxu0 %vm634_vm1, %v31773_v29  ;;  %v31793_v29 = vld [vmem:[#allocation2 + $0x16a] sm:$0xff] }
 0x975   : > { %25092 = vmatprep.mubr.msk.f32.mxu0 %vm634_vm1, %v31777_v42  ;;  %34850 = vst [vmem:[#allocation17_spill] sm:$0xff] %v31793_v29  ;;  %v31797_v42 = vld [vmem:[#allocation2 + $0x172] sm:$0xff] }
 0x978   : > { %25093 = vmatmul.mubr.msk.f32.gmra.mrb[122].mxu0 %vm634_vm1, %v31781_v1 }
 0x979   : > { %25095 = vmatprep.mubr.msk.f32.mxu0 %vm634_vm1, %v31785_v61  ;;  %v21574_v61 = vld [vmem:[%s33876_s9 + $0x28] sm:$0xff] }
 0x97c   : > { %25096 = vmatmul.mubr.msk.f32.gmra.mrb[124].mxu0 %vm634_vm1, %v31789_v26 }
 0x97d   : > { %25098 = vmatprep.mubr.msk.f32.mxu0 %vm634_vm1, %v31793_v29 }
 0x980   : > { %25099 = vmatmul.mubr.msk.f32.gmra.mrb[126].mxu0 %vm634_vm1, %v31797_v42 }
 0x981   : > { %25103 = vmatprep.mubr.msk.f32.mxu0 %vm634_vm1, %v31550_v12  ;;  %v21607_v12 = vld [vmem:[%s33876_s9 + $0x30] sm:$0xff] }
 0x984   : > { %25104 = vmatmul.mubr.msk.f32.vlgmr.msra.gmra.mrb[96].mxu0 %vm634_vm1, %v31556_v46  ;;  %v31869_v46 = vld [vmem:[#allocation2 + $0x188] sm:$0xff] }
 0x985   : > { %25152 = vmatpush3.msra.mxu0 %v31676_v14  ;;  %25106 = vmatprep.mubr.msk.f32.mxu0 %vm634_vm1, %v31560_v41  ;;  %v31865_v14 = vld [vmem:[#allocation2 + $0x180] sm:$0xff] }
 0x986   : > { %25201 = vmatprep.subr.mxu0 %v21574_v61 }
 0x988   : > { %25107 = vmatmul.mubr.msk.f32.gmra.mrb[98].mxu0 %vm634_vm1, %v31564_v53 }
 0x989   : > { %25109 = vmatprep.mubr.msk.f32.mxu0 %vm634_vm1, %v31568_v23 }
 0x98c   : > { %25110 = vmatmul.mubr.msk.f32.gmra.mrb[100].mxu0 %vm634_vm1, %v31572_v27 }
 0x98d   : > { %25112 = vmatprep.mubr.msk.f32.mxu0 %vm634_vm1, %v31576_v50 }
 0x990   : > { %25113 = vmatmul.mubr.msk.f32.gmra.mrb[102].mxu0 %vm634_vm1, %v31580_v21 }
 0x991   : > { %25115 = vmatprep.mubr.msk.f32.mxu0 %vm634_vm1, %v31584_v37 }
 0x994   : > { %25116 = vmatmul.mubr.msk.f32.gmra.mrb[104].mxu0 %vm634_vm1, %v31588_v48 }
 0x995   : > { %25118 = vmatprep.mubr.msk.f32.mxu0 %vm634_vm1, %v31592_v28 }
 0x998   : > { %25119 = vmatmul.mubr.msk.f32.gmra.mrb[106].mxu0 %vm634_vm1, %v31596_v57 }
 0x999   : > { %25121 = vmatprep.mubr.msk.f32.mxu0 %vm634_vm1, %v31600_v3 }
 0x99c   : > { %25122 = vmatmul.mubr.msk.f32.gmra.mrb[108].mxu0 %vm634_vm1, %v31604_v20 }
 0x99d   : > { %25124 = vmatprep.mubr.msk.f32.mxu0 %vm634_vm1, %v31608_v43 }
 0x9a0   : > { %25125 = vmatmul.mubr.msk.f32.gmra.mrb[110].mxu0 %vm634_vm1, %v31612_v39 }
 0x9a1   : > { %25127 = vmatprep.mubr.msk.f32.mxu0 %vm634_vm1, %v31616_v62 }
 0x9a4   : > { %25128 = vmatmul.mubr.msk.f32.gmra.mrb[112].mxu0 %vm634_vm1, %v31620_v31 }
 0x9a5   : > { %25130 = vmatprep.mubr.msk.f32.mxu0 %vm634_vm1, %v31624_v9 }
 0x9a8   : > { %25131 = vmatmul.mubr.msk.f32.gmra.mrb[114].mxu0 %vm634_vm1, %v31628_v44 }
 0x9a9   : > { %25133 = vmatprep.mubr.msk.f32.mxu0 %vm634_vm1, %v31632_v54 }
 0x9ac   : > { %25134 = vmatmul.mubr.msk.f32.gmra.mrb[116].mxu0 %vm634_vm1, %v31636_v24 }
 0x9ad   : > { %25136 = vmatprep.mubr.msk.f32.mxu0 %vm634_vm1, %v31640_v7 }
 0x9b0   : > { %25137 = vmatmul.mubr.msk.f32.gmra.mrb[118].mxu0 %vm634_vm1, %v31644_v56 }
 0x9b1   : > { %25139 = vmatprep.mubr.msk.f32.mxu0 %vm634_vm1, %v31648_v35 }
 0x9b4   : > { %25140 = vmatmul.mubr.msk.f32.gmra.mrb[120].mxu0 %vm634_vm1, %v31652_v52 }
 0x9b5   : > { %25142 = vmatprep.mubr.msk.f32.mxu0 %vm634_vm1, %v31656_v36 }
 0x9b8   : > { %25143 = vmatmul.mubr.msk.f32.gmra.mrb[122].mxu0 %vm634_vm1, %v31660_v17 }
 0x9b9   : > { %25145 = vmatprep.mubr.msk.f32.mxu0 %vm634_vm1, %v31664_v4 }
 0x9bc   : > { %25146 = vmatmul.mubr.msk.f32.gmra.mrb[124].mxu0 %vm634_vm1, %v31668_v60 }
 0x9bd   : > { %25148 = vmatprep.mubr.msk.f32.mxu0 %vm634_vm1, %v31865_v14 }
 0x9c0   : > { %25149 = vmatmul.mubr.msk.f32.gmra.mrb[126].mxu0 %vm634_vm1, %v31869_v46 }
 0x9c1   : > { %25153 = vmatprep.mubr.msk.f32.mxu0 %vm634_vm1, %v31236_v34  ;;  %v34851_v34 = vld [vmem:[#allocation82_spill] sm:$0xff] }
 0x9c4   : > { %25154 = vmatmul.mubr.msk.f32.vlgmr.msra.gmra.mrb[96].mxu0 %vm634_vm1, %v31245_v47  ;;  %v34852_v47 = vld [vmem:[#allocation32_spill] sm:$0xff] }
 0x9c5   : > { %25202 = vmatpush3.msra.mxu0 %v21574_v61  ;;  %25156 = vmatprep.mubr.msk.f32.mxu0 %vm634_vm1, %v31258_v22  ;;  %v31936_v22 = vld [vmem:[#allocation2 + $0x181] sm:$0xff]  ;;  %v34860_v61 = vld [vmem:[#allocation110_spill] sm:$0xff] }
 0x9c6   : > { %25251 = vmatprep.subr.mxu0 %v21607_v12 }
 0x9c8   : > { %25157 = vmatmul.mubr.msk.f32.gmra.mrb[98].mxu0 %vm634_vm1, %v31267_v2  ;;  %v31940_v2 = vld [vmem:[#allocation2 + $0x189] sm:$0xff] }
 0x9c9   : > { %25159 = vmatprep.mubr.msk.f32.mxu0 %vm634_vm1, %v31280_v45  ;;  %v34853_v45 = vld [vmem:[#allocation30_spill] sm:$0xff] }
 0x9cc   : > { %25160 = vmatmul.mubr.msk.f32.gmra.mrb[100].mxu0 %vm634_vm1, %v31289_v16  ;;  %v21640_v16 = vld [vmem:[%s33876_s9 + $0x38] sm:$0xff] }
 0x9cd   : > { %25162 = vmatprep.mubr.msk.f32.mxu0 %vm634_vm1, %v31302_v8  ;;  %v34854_v8 = vld [vmem:[#allocation81_spill] sm:$0xff] }
 0x9d0   : > { %25163 = vmatmul.mubr.msk.f32.gmra.mrb[102].mxu0 %vm634_vm1, %v31311_v51  ;;  %v34855_v51 = vld [vmem:[#allocation66_spill] sm:$0xff] }
 0x9d1   : > { %25165 = vmatprep.mubr.msk.f32.mxu0 %vm634_vm1, %v31324_v11  ;;  %v34856_v11 = vld [vmem:[#allocation5_spill] sm:$0xff] }
 0x9d4   : > { %25166 = vmatmul.mubr.msk.f32.gmra.mrb[104].mxu0 %vm634_vm1, %v31333_v55  ;;  %v34857_v55 = vld [vmem:[#allocation98_spill] sm:$0xff] }
 0x9d5   : > { %25168 = vmatprep.mubr.msk.f32.mxu0 %vm634_vm1, %v31346_v18  ;;  %v34858_v18 = vld [vmem:[#allocation106_spill] sm:$0xff] }
 0x9d8   : > { %25169 = vmatmul.mubr.msk.f32.gmra.mrb[106].mxu0 %vm634_vm1, %v31355_v13  ;;  %v34859_v13 = vld [vmem:[#allocation46_spill] sm:$0xff] }
 0x9d9   : > { %25171 = vmatprep.mubr.msk.f32.mxu0 %vm634_vm1, %v31368_v19 }
 0x9dc   : > { %25172 = vmatmul.mubr.msk.f32.gmra.mrb[108].mxu0 %vm634_vm1, %v31377_v59 }
 0x9dd   : > { %25174 = vmatprep.mubr.msk.f32.mxu0 %vm634_vm1, %v31390_v63 }
 0x9e0   : > { %25175 = vmatmul.mubr.msk.f32.gmra.mrb[110].mxu0 %vm634_vm1, %v31399_v5 }
 0x9e1   : > { %25177 = vmatprep.mubr.msk.f32.mxu0 %vm634_vm1, %v31412_v38 }
 0x9e4   : > { %25178 = vmatmul.mubr.msk.f32.gmra.mrb[112].mxu0 %vm634_vm1, %v31421_v15 }
 0x9e5   : > { %25180 = vmatprep.mubr.msk.f32.mxu0 %vm634_vm1, %v31434_v10 }
 0x9e8   : > { %25181 = vmatmul.mubr.msk.f32.gmra.mrb[114].mxu0 %vm634_vm1, %v31443_v30 }
 0x9e9   : > { %25183 = vmatprep.mubr.msk.f32.mxu0 %vm634_vm1, %v31456_v0 }
 0x9ec   : > { %25184 = vmatmul.mubr.msk.f32.gmra.mrb[116].mxu0 %vm634_vm1, %v31465_v6 }
 0x9ed   : > { %25186 = vmatprep.mubr.msk.f32.mxu0 %vm634_vm1, %v31478_v58 }
 0x9f0   : > { %25187 = vmatmul.mubr.msk.f32.gmra.mrb[118].mxu0 %vm634_vm1, %v31487_v33 }
 0x9f1   : > { %25189 = vmatprep.mubr.msk.f32.mxu0 %vm634_vm1, %v31500_v49 }
 0x9f4   : > { %25190 = vmatmul.mubr.msk.f32.gmra.mrb[120].mxu0 %vm634_vm1, %v31509_v40 }
 0x9f5   : > { %25192 = vmatprep.mubr.msk.f32.mxu0 %vm634_vm1, %v31521_v32 }
 0x9f8   : > { %25193 = vmatmul.mubr.msk.f32.gmra.mrb[122].mxu0 %vm634_vm1, %v31529_v25 }
 0x9f9   : > { %25195 = vmatprep.mubr.msk.f32.mxu0 %vm634_vm1, %v34851_v34 }
 0x9fc   : > { %25196 = vmatmul.mubr.msk.f32.gmra.mrb[124].mxu0 %vm634_vm1, %v34852_v47 }
 0x9fd   : > { %25198 = vmatprep.mubr.msk.f32.mxu0 %vm634_vm1, %v31936_v22 }
 0xa00   : > { %25199 = vmatmul.mubr.msk.f32.gmra.mrb[126].mxu0 %vm634_vm1, %v31940_v2 }
 0xa01   : > { %25203 = vmatprep.mubr.msk.f32.mxu0 %vm634_vm1, %v34853_v45  ;;  %v34862_v45 = vld [vmem:[#allocation40_spill] sm:$0xff] }
 0xa04   : > { %25204 = vmatmul.mubr.msk.f32.vlgmr.msra.gmra.mrb[96].mxu0 %vm634_vm1, %v34854_v8  ;;  %v34863_v8 = vld [vmem:[#allocation102_spill] sm:$0xff] }
 0xa05   : > { %25252 = vmatpush3.msra.mxu0 %v21607_v12  ;;  %25206 = vmatprep.mubr.msk.f32.mxu0 %vm634_vm1, %v34855_v51  ;;  %v34861_v12 = vld [vmem:[#allocation105_spill] sm:$0xff] }
 0xa06   : > { %25301 = vmatprep.subr.mxu0 %v21640_v16 }
 0xa08   : > { %25207 = vmatmul.mubr.msk.f32.gmra.mrb[98].mxu0 %vm634_vm1, %v34856_v11  ;;  %v34864_v11 = vld [vmem:[#allocation101_spill] sm:$0xff] }
 0xa09   : > { %25209 = vmatprep.mubr.msk.f32.mxu0 %vm634_vm1, %v34857_v55  ;;  %v34865_v55 = vld [vmem:[#allocation108_spill] sm:$0xff] }
 0xa0c   : > { %25210 = vmatmul.mubr.msk.f32.gmra.mrb[100].mxu0 %vm634_vm1, %v34858_v18  ;;  %v34866_v18 = vld [vmem:[#allocation107_spill] sm:$0xff] }
 0xa0d   : > { %25212 = vmatprep.mubr.msk.f32.mxu0 %vm634_vm1, %v34859_v13  ;;  %v34867_v13 = vld [vmem:[#allocation22_spill] sm:$0xff] }
 0xa10   : > { %25213 = vmatmul.mubr.msk.f32.gmra.mrb[102].mxu0 %vm634_vm1, %v34860_v61  ;;  %v34868_v61 = vld [vmem:[#allocation16_spill] sm:$0xff] }
 0xa11   : > { %25215 = vmatprep.mubr.msk.f32.mxu0 %vm634_vm1, %v34861_v12  ;;  %v34869_v12 = vld [vmem:[#allocation26_spill] sm:$0xff] }
 0xa14   : > { %25216 = vmatmul.mubr.msk.f32.gmra.mrb[104].mxu0 %vm634_vm1, %v34862_v45  ;;  %v34870_v45 = vld [vmem:[#allocation62_spill] sm:$0xff] }
 0xa15   : > { %25218 = vmatprep.mubr.msk.f32.mxu0 %vm634_vm1, %v34863_v8  ;;  %v34871_v8 = vld [vmem:[#allocation55_spill] sm:$0xff] }
 0xa18   : > { %25219 = vmatmul.mubr.msk.f32.gmra.mrb[106].mxu0 %vm634_vm1, %v34864_v11  ;;  %v34872_v11 = vld [vmem:[#allocation37_spill] sm:$0xff] }
 0xa19   : > { %25221 = vmatprep.mubr.msk.f32.mxu0 %vm634_vm1, %v34865_v55  ;;  %v34873_v55 = vld [vmem:[#allocation79_spill] sm:$0xff] }
 0xa1c   : > { %25222 = vmatmul.mubr.msk.f32.gmra.mrb[108].mxu0 %vm634_vm1, %v34866_v18  ;;  %v34874_v18 = vld [vmem:[#allocation74_spill] sm:$0xff] }
 0xa1d   : > { %25224 = vmatprep.mubr.msk.f32.mxu0 %vm634_vm1, %v34867_v13  ;;  %v34875_v13 = vld [vmem:[#allocation90_spill] sm:$0xff] }
 0xa20   : > { %25225 = vmatmul.mubr.msk.f32.gmra.mrb[110].mxu0 %vm634_vm1, %v34868_v61  ;;  %v34876_v61 = vld [vmem:[#allocation85_spill] sm:$0xff] }
 0xa21   : > { %25227 = vmatprep.mubr.msk.f32.mxu0 %vm634_vm1, %v34869_v12  ;;  %v34877_v12 = vld [vmem:[#allocation99_spill] sm:$0xff] }
 0xa24   : > { %25228 = vmatmul.mubr.msk.f32.gmra.mrb[112].mxu0 %vm634_vm1, %v34870_v45 }
 0xa25   : > { %25230 = vmatprep.mubr.msk.f32.mxu0 %vm634_vm1, %v34871_v8  ;;  %v34878_v8 = vld [vmem:[#allocation59_spill] sm:$0xff] }
 0xa28   : > { %25231 = vmatmul.mubr.msk.f32.gmra.mrb[114].mxu0 %vm634_vm1, %v34872_v11 }
 0xa29   : > { %25233 = vmatprep.mubr.msk.f32.mxu0 %vm634_vm1, %v34873_v55 }
 0xa2c   : > { %25234 = vmatmul.mubr.msk.f32.gmra.mrb[116].mxu0 %vm634_vm1, %v34874_v18 }
 0xa2d   : > { %25236 = vmatprep.mubr.msk.f32.mxu0 %vm634_vm1, %v34875_v13  ;;  %v32007_v13 = vld [vmem:[#allocation2 + $0x182] sm:$0xff] }
 0xa30   : > { %25237 = vmatmul.mubr.msk.f32.gmra.mrb[118].mxu0 %vm634_vm1, %v34876_v61 }
 0xa31   : > { %25239 = vmatprep.mubr.msk.f32.mxu0 %vm634_vm1, %v34877_v12  ;;  %v32011_v12 = vld [vmem:[#allocation2 + $0x18a] sm:$0xff] }
 0xa34   : > { %25240 = vmatmul.mubr.msk.f32.gmra.mrb[120].mxu0 %vm634_vm1, %v31781_v1 }
 0xa35   : > { %25242 = vmatprep.mubr.msk.f32.mxu0 %vm634_vm1, %v34878_v8 }
 0xa38   : > { %25243 = vmatmul.mubr.msk.f32.gmra.mrb[122].mxu0 %vm634_vm1, %v31789_v26 }
 0xa39   : > { %25245 = vmatprep.mubr.msk.f32.mxu0 %vm634_vm1, %v31793_v29  ;;  %v21673_v29 = vld [vmem:[%s33876_s9 + $0x40] sm:$0xff] }
 0xa3c   : > { %25246 = vmatmul.mubr.msk.f32.gmra.mrb[124].mxu0 %vm634_vm1, %v31797_v42 }
 0xa3d   : > { %25248 = vmatprep.mubr.msk.f32.mxu0 %vm634_vm1, %v32007_v13 }
 0xa40   : > { %25249 = vmatmul.mubr.msk.f32.gmra.mrb[126].mxu0 %vm634_vm1, %v32011_v12 }
 0xa41   : > { %25253 = vmatprep.mubr.msk.f32.mxu0 %vm634_vm1, %v31560_v41 }
 0xa44   : > { %25254 = vmatmul.mubr.msk.f32.vlgmr.msra.gmra.mrb[96].mxu0 %vm634_vm1, %v31564_v53 }
 0xa45   : > { %25302 = vmatpush3.msra.mxu0 %v21640_v16  ;;  %25256 = vmatprep.mubr.msk.f32.mxu0 %vm634_vm1, %v31568_v23 }
 0xa46   : > { %25351 = vmatprep.subr.mxu0 %v21673_v29 }
 0xa48   : > { %25257 = vmatmul.mubr.msk.f32.gmra.mrb[98].mxu0 %vm634_vm1, %v31572_v27  ;;  %v34890_v27 = vld [vmem:[#allocation22_spill] sm:$0xff] }
 0xa49   : > { %25259 = vmatprep.mubr.msk.f32.mxu0 %vm634_vm1, %v31576_v50 }
 0xa4c   : > { %25260 = vmatmul.mubr.msk.f32.gmra.mrb[100].mxu0 %vm634_vm1, %v31580_v21 }
 0xa4d   : > { %25262 = vmatprep.mubr.msk.f32.mxu0 %vm634_vm1, %v31584_v37  ;;  %v15765_v37 = vld [vmem:[#allocation2 + $0x19a] sm:$0xff] }
 0xa50   : > { %25263 = vmatmul.mubr.msk.f32.gmra.mrb[102].mxu0 %vm634_vm1, %v31588_v48  ;;  %v34894_v48 = vld [vmem:[#allocation90_spill] sm:$0xff] }
 0xa51   : > { %25265 = vmatprep.mubr.msk.f32.mxu0 %vm634_vm1, %v31592_v28  ;;  %v34891_v28 = vld [vmem:[#allocation16_spill] sm:$0xff] }
 0xa54   : > { %25266 = vmatmul.mubr.msk.f32.gmra.mrb[104].mxu0 %vm634_vm1, %v31596_v57  ;;  %v34887_v57 = vld [vmem:[#allocation101_spill] sm:$0xff] }
 0xa55   : > { %25268 = vmatprep.mubr.msk.f32.mxu0 %vm634_vm1, %v31600_v3  ;;  %v34883_v3 = vld [vmem:[#allocation110_spill] sm:$0xff] }
 0xa58   : > { %25269 = vmatmul.mubr.msk.f32.gmra.mrb[106].mxu0 %vm634_vm1, %v31604_v20  ;;  %v34879_v20 = vld [vmem:[#allocation5_spill] sm:$0xff] }
 0xa59   : > { %25271 = vmatprep.mubr.msk.f32.mxu0 %vm634_vm1, %v31608_v43  ;;  %v15378_v43 = vld [vmem:[#allocation2 + $0x199] sm:$0xff] }
 0xa5c   : > { %25272 = vmatmul.mubr.msk.f32.gmra.mrb[108].mxu0 %vm634_vm1, %v31612_v39  ;;  %v15356_v39 = vld [vmem:[#allocation2 + $0x91] sm:$0xff] }
 0xa5d   : > { %25274 = vmatprep.mubr.msk.f32.mxu0 %vm634_vm1, %v31616_v62  ;;  %v15354_v62 = vld [vmem:[#allocation2 + $0x79] sm:$0xff] }
 0xa60   : > { %25275 = vmatmul.mubr.msk.f32.gmra.mrb[110].mxu0 %vm634_vm1, %v31620_v31  ;;  %v15352_v31 = vld [vmem:[#allocation2 + $0x61] sm:$0xff] }
 0xa61   : > { %25277 = vmatprep.mubr.msk.f32.mxu0 %vm634_vm1, %v31624_v9  ;;  %v14991_v9 = vld [vmem:[#allocation2 + $0x198] sm:$0xff] }
 0xa64   : > { %25278 = vmatmul.mubr.msk.f32.gmra.mrb[112].mxu0 %vm634_vm1, %v31628_v44  ;;  %v34886_v44 = vld [vmem:[#allocation102_spill] sm:$0xff] }
 0xa65   : > { %25280 = vmatprep.mubr.msk.f32.mxu0 %vm634_vm1, %v31632_v54  ;;  %v34882_v54 = vld [vmem:[#allocation46_spill] sm:$0xff] }
 0xa68   : > { %25281 = vmatmul.mubr.msk.f32.gmra.mrb[114].mxu0 %vm634_vm1, %v31636_v24  ;;  %v15379_v24 = vld [vmem:[#allocation2 + $0x1a1] sm:$0xff] }
 0xa69   : > { %25283 = vmatprep.mubr.msk.f32.mxu0 %vm634_vm1, %v31640_v7  ;;  %v15357_v7 = vld [vmem:[#allocation2 + $0x99] sm:$0xff] }
 0xa6c   : > { %25284 = vmatmul.mubr.msk.f32.gmra.mrb[116].mxu0 %vm634_vm1, %v31644_v56  ;;  %v15355_v56 = vld [vmem:[#allocation2 + $0x81] sm:$0xff] }
 0xa6d   : > { %25286 = vmatprep.mubr.msk.f32.mxu0 %vm634_vm1, %v31648_v35  ;;  %v15353_v35 = vld [vmem:[#allocation2 + $0x69] sm:$0xff] }
 0xa70   : > { %25287 = vmatmul.mubr.msk.f32.gmra.mrb[118].mxu0 %vm634_vm1, %v31652_v52  ;;  %v14992_v52 = vld [vmem:[#allocation2 + $0x1a0] sm:$0xff] }
 0xa71   : > { %25289 = vmatprep.mubr.msk.f32.mxu0 %vm634_vm1, %v31656_v36  ;;  %v15348_v36 = vld [vmem:[#allocation2 + $0x31] sm:$0xff] }
 0xa74   : > { %25290 = vmatmul.mubr.msk.f32.gmra.mrb[120].mxu0 %vm634_vm1, %v31660_v17  ;;  %v15349_v17 = vld [vmem:[#allocation2 + $0x39] sm:$0xff] }
 0xa75   : > { %25292 = vmatprep.mubr.msk.f32.mxu0 %vm634_vm1, %v31664_v4  ;;  %v15350_v4 = vld [vmem:[#allocation2 + $0x49] sm:$0xff] }
 0xa78   : > { %25293 = vmatmul.mubr.msk.f32.gmra.mrb[122].mxu0 %vm634_vm1, %v31668_v60  ;;  %v15351_v60 = vld [vmem:[#allocation2 + $0x51] sm:$0xff] }
 0xa79   : > { %25295 = vmatprep.mubr.msk.f32.mxu0 %vm634_vm1, %v31865_v14 }
 0xa7c   : > { %25296 = vmatmul.mubr.msk.f32.gmra.mrb[124].mxu0 %vm634_vm1, %v31869_v46 }
 0xa7d   : > { %25298 = vmatprep.mubr.msk.f32.mxu0 %vm634_vm1, %v14991_v9 }
 0xa80   : > { %25299 = vmatmul.mubr.msk.f32.gmra.mrb[126].mxu0 %vm634_vm1, %v14992_v52 }
 0xa81   : > { %25303 = vmatprep.mubr.msk.f32.mxu0 %vm634_vm1, %v15348_v36 }
 0xa84   : > { %25304 = vmatmul.mubr.msk.f32.vlgmr.msra.gmra.mrb[96].mxu0 %vm634_vm1, %v15349_v17 }
 0xa85   : > { %25352 = vmatpush3.msra.mxu0 %v21673_v29  ;;  %25306 = vmatprep.mubr.msk.f32.mxu0 %vm634_vm1, %v15350_v4 }
 0xa88   : > { %25307 = vmatmul.mubr.msk.f32.gmra.mrb[98].mxu0 %vm634_vm1, %v15351_v60 }
 0xa89   : > { %25309 = vmatprep.mubr.msk.f32.mxu0 %vm634_vm1, %v15352_v31  ;;  %v27269_v31 = vmov 0.0|0.0  }
 0xa8a   : > { %25881 = vmatprep.subr.bf16.mxu1 %v27269_v31 }
 0xa8c   : > { %25310 = vmatmul.mubr.msk.f32.gmra.mrb[100].mxu0 %vm634_vm1, %v15353_v35 }
 0xa8d   : > { %25312 = vmatprep.mubr.msk.f32.mxu0 %vm634_vm1, %v15354_v62 }
 0xa90   : > { %25313 = vmatmul.mubr.msk.f32.gmra.mrb[102].mxu0 %vm634_vm1, %v15355_v56  ;;  %v16585_v56 = vld [vmem:[%s33878_s11] sm:$0xff] }
 0xa91   : > { %25315 = vmatprep.mubr.msk.f32.mxu0 %vm634_vm1, %v15356_v39  ;;  %v16586_v39 = vld [vmem:[%s33878_s11 + $0x8] sm:$0xff] }
 0xa94   : > { %25316 = vmatmul.mubr.msk.f32.gmra.mrb[104].mxu0 %vm634_vm1, %v15357_v7 }
 0xa95   : > { %25318 = vmatprep.mubr.msk.f32.mxu0 %vm634_vm1, %v31368_v19  ;;  %v34880_v19 = vld [vmem:[#allocation98_spill] sm:$0xff] }
 0xa98   : > { %25319 = vmatmul.mubr.msk.f32.gmra.mrb[106].mxu0 %vm634_vm1, %v31377_v59  ;;  %v34881_v59 = vld [vmem:[#allocation106_spill] sm:$0xff] }
 0xa99   : > { %25321 = vmatprep.mubr.msk.f32.mxu0 %vm634_vm1, %v31390_v63  ;;  %v34884_v63 = vld [vmem:[#allocation105_spill] sm:$0xff] }
 0xa9c   : > { %25322 = vmatmul.mubr.msk.f32.gmra.mrb[108].mxu0 %vm634_vm1, %v31399_v5  ;;  %v34885_v5 = vld [vmem:[#allocation40_spill] sm:$0xff] }
 0xa9d   : > { %25324 = vmatprep.mubr.msk.f32.mxu0 %vm634_vm1, %v31412_v38  ;;  %v34888_v38 = vld [vmem:[#allocation108_spill] sm:$0xff] }
 0xaa0   : > { %25325 = vmatmul.mubr.msk.f32.gmra.mrb[110].mxu0 %vm634_vm1, %v31421_v15  ;;  %v34889_v15 = vld [vmem:[#allocation107_spill] sm:$0xff] }
 0xaa1   : > { %25327 = vmatprep.mubr.msk.f32.mxu0 %vm634_vm1, %v31434_v10  ;;  %v34892_v10 = vld [vmem:[#allocation26_spill] sm:$0xff] }
 0xaa4   : > { %25328 = vmatmul.mubr.msk.f32.gmra.mrb[112].mxu0 %vm634_vm1, %v31443_v30  ;;  %v34893_v30 = vld [vmem:[#allocation55_spill] sm:$0xff] }
 0xaa5   : > { %25330 = vmatprep.mubr.msk.f32.mxu0 %vm634_vm1, %v31456_v0  ;;  %v34895_v0 = vld [vmem:[#allocation99_spill] sm:$0xff] }
 0xaa8   : > { %25331 = vmatmul.mubr.msk.f32.gmra.mrb[114].mxu0 %vm634_vm1, %v31465_v6  ;;  %v34896_v6 = vld [vmem:[#allocation17_spill] sm:$0xff] }
 0xaa9   : > { %25333 = vmatprep.mubr.msk.f32.mxu0 %vm634_vm1, %v31478_v58  ;;  %v15766_v58 = vld [vmem:[#allocation2 + $0x1a2] sm:$0xff] }
 0xaac   : > { %25334 = vmatmul.mubr.msk.f32.gmra.mrb[116].mxu0 %vm634_vm1, %v31487_v33  ;;  %v32197_v33 = vld [vmem:[%s33877_s10] ss:$0 sm:$0xff] }
 0xaad   : > { %25336 = vmatprep.mubr.msk.f32.mxu0 %vm634_vm1, %v31500_v49 }
 0xab0   : > { %25337 = vmatmul.mubr.msk.f32.gmra.mrb[118].mxu0 %vm634_vm1, %v31509_v40 }
 0xab1   : > { %25339 = vmatprep.mubr.msk.f32.mxu0 %vm634_vm1, %v31521_v32 }
 0xab4   : > { %25340 = vmatmul.mubr.msk.f32.gmra.mrb[120].mxu0 %vm634_vm1, %v31529_v25 }
 0xab5   : > { %25342 = vmatprep.mubr.msk.f32.mxu0 %vm634_vm1, %v34851_v34 }
 0xab8   : > { %25343 = vmatmul.mubr.msk.f32.gmra.mrb[122].mxu0 %vm634_vm1, %v34852_v47 }
 0xab9   : > { %25345 = vmatprep.mubr.msk.f32.mxu0 %vm634_vm1, %v31936_v22 }
 0xabc   : > { %25346 = vmatmul.mubr.msk.f32.gmra.mrb[124].mxu0 %vm634_vm1, %v31940_v2 }
 0xabd   : > { %25348 = vmatprep.mubr.msk.f32.mxu0 %vm634_vm1, %v15378_v43 }
 0xac0   : > { %25349 = vmatmul.mubr.msk.f32.gmra.mrb[126].mxu0 %vm634_vm1, %v15379_v24  ;;  %v25882_v24 = vpack.c.bf16 %v16586_v39, %v16585_v56 }
 0xac1   : > { %25353 = vmatprep.mubr.msk.f32.mxu0 %vm634_vm1, %v34855_v51 }
 0xac2   : > { %25883 = vmatpush3.bf16.msra.mxu1 %v25882_v24 }
 0xac4   : > { %25354 = vmatmul.mubr.msk.f32.vlgmr.msra.gmra.mrb[96].mxu0 %vm634_vm1, %v34879_v20 }
 0xac5   : > { %25356 = vmatprep.mubr.msk.f32.mxu0 %vm634_vm1, %v34880_v19 }
 0xac8   : > { %25357 = vmatmul.mubr.msk.f32.gmra.mrb[98].mxu0 %vm634_vm1, %v34881_v59 }
 0xac9   : > { %25359 = vmatprep.mubr.msk.f32.mxu0 %vm634_vm1, %v34882_v54 }
 0xacc   : > { %25360 = vmatmul.mubr.msk.f32.gmra.mrb[100].mxu0 %vm634_vm1, %v34883_v3  ;;  %v34897_v3 = vmov 0.0  }
 0xacd   : > { %25362 = vmatprep.mubr.msk.f32.mxu0 %vm634_vm1, %v34884_v63  ;;  %25408 = vmatprep.subr.mxu1 %v34897_v3 }
 0xace   : > { %25405 = vmatprep.mubr.msk.f32.mxu1 %vm27272_vm7, %v34897_v3 }
 0xad0   : > { %25363 = vmatmul.mubr.msk.f32.gmra.mrb[102].mxu0 %vm634_vm1, %v34885_v5 }
 0xad1   : > { %25365 = vmatprep.mubr.msk.f32.mxu0 %vm634_vm1, %v34886_v44 }
 0xad4   : > { %25366 = vmatmul.mubr.msk.f32.gmra.mrb[104].mxu0 %vm634_vm1, %v34887_v57 }
 0xad5   : > { %25368 = vmatprep.mubr.msk.f32.mxu0 %vm634_vm1, %v34888_v38 }
 0xad8   : > { %25369 = vmatmul.mubr.msk.f32.gmra.mrb[106].mxu0 %vm634_vm1, %v34889_v15 }
 0xad9   : > { %25371 = vmatprep.mubr.msk.f32.mxu0 %vm634_vm1, %v34890_v27 }
 0xadc   : > { %25372 = vmatmul.mubr.msk.f32.gmra.mrb[108].mxu0 %vm634_vm1, %v34891_v28 }
 0xadd   : > { %25374 = vmatprep.mubr.msk.f32.mxu0 %vm634_vm1, %v34892_v10 }
 0xae0   : > { %25375 = vmatmul.mubr.msk.f32.gmra.mrb[110].mxu0 %vm634_vm1, %v34870_v45 }
 0xae1   : > { %25377 = vmatprep.mubr.msk.f32.mxu0 %vm634_vm1, %v34893_v30 }
 0xae4   : > { %25378 = vmatmul.mubr.msk.f32.gmra.mrb[112].mxu0 %vm634_vm1, %v34872_v11 }
 0xae5   : > { %25380 = vmatprep.mubr.msk.f32.mxu0 %vm634_vm1, %v34873_v55 }
 0xae8   : > { %25381 = vmatmul.mubr.msk.f32.gmra.mrb[114].mxu0 %vm634_vm1, %v34874_v18 }
 0xae9   : > { %25383 = vmatprep.mubr.msk.f32.mxu0 %vm634_vm1, %v34894_v48 }
 0xaec   : > { %25384 = vmatmul.mubr.msk.f32.gmra.mrb[116].mxu0 %vm634_vm1, %v34876_v61 }
 0xaed   : > { %25386 = vmatprep.mubr.msk.f32.mxu0 %vm634_vm1, %v34895_v0 }
 0xaf0   : > { %25387 = vmatmul.mubr.msk.f32.gmra.mrb[118].mxu0 %vm634_vm1, %v31781_v1 }
 0xaf1   : > { %25389 = vmatprep.mubr.msk.f32.mxu0 %vm634_vm1, %v34878_v8 }
 0xaf4   : > { %25390 = vmatmul.mubr.msk.f32.gmra.mrb[120].mxu0 %vm634_vm1, %v31789_v26 }
 0xaf5   : > { %25392 = vmatprep.mubr.msk.f32.mxu0 %vm634_vm1, %v34896_v6 }
 0xaf8   : > { %25393 = vmatmul.mubr.msk.f32.gmra.mrb[122].mxu0 %vm634_vm1, %v31797_v42 }
 0xaf9   : > { %25395 = vmatprep.mubr.msk.f32.mxu0 %vm634_vm1, %v32007_v13 }
 0xafc   : > { %25396 = vmatmul.mubr.msk.f32.gmra.mrb[124].mxu0 %vm634_vm1, %v32011_v12 }
 0xafd   : > { %25398 = vmatprep.mubr.msk.f32.mxu0 %vm634_vm1, %v15765_v37 }
 0xb00   : > { %25399 = vmatmul.mubr.msk.f32.gmra.mrb[126].mxu0 %vm634_vm1, %v15766_v58 }
 0xb97   : > { %v25355_v21 = vpop.f32.mrb[96].mxu0 }
 0xb98   : > { %v32200_v49 = vadd.f32 %v25355_v21, %v32197_v33  ;;  %v15931_v40 = vpop.f32.mrb[97].mxu0 }
 0xb99   : > { %v32203_v50 = vadd.f32 %v32197_v33, %v15931_v40 }
 0xb9a   : > { %v16162_v32 = vmax.f32 %v32200_v49, 0.0  ;;  %v34905_v49 = vld [vmem:[#allocation10_spill] sm:$0xff] }
 0xb9b   : > { %v16161_v25 = vmax.f32 %v32203_v50, 0.0  ;;  %v25358_v1 = vpop.f32.mrb[98].mxu0  ;;  %v34906_v50 = vld [vmem:[#allocation69_spill] sm:$0xff] }
 0xb9c   : > { %v32208_v41 = vadd.f32 %v25358_v1, %v32197_v33  ;;  %16356 = vrot.lane.b32.xlu1 %v16162_v32, %s27268_s23  ;;  %v15941_v53 = vpop.f32.mrb[99].mxu0 }
 0xb9d   : > { %v32214_v23 = vadd.f32 %v32197_v33, %v15941_v53  ;;  %16354 = vrot.lane.b32.xlu0 %v16161_v25, %s27268_s23 }
 0xb9e   : > { %v16164_v26 = vmax.f32 %v32208_v41, 0.0  ;;  %v34910_v41 = vld [vmem:[#allocation7_spill] sm:$0xff] }
 0xb9f   : > { %v16163_v29 = vmax.f32 %v32214_v23, 0.0  ;;  %v25361_v42 = vpop.f32.mrb[100].mxu0  ;;  %v34911_v23 = vld [vmem:[#allocation12_spill] sm:$0xff] }
 0xba0   : > { %v32222_v14 = vadd.f32 %v25361_v42, %v32197_v33  ;;  %16360 = vrot.lane.b32.xlu1 %v16164_v26, %s27268_s23  ;;  %v15951_v46 = vpop.f32.mrb[101].mxu0 }
 0xba1   : > { %v32228_v34 = vadd.f32 %v32197_v33, %v15951_v46  ;;  %16358 = vrot.lane.b32.xlu0 %v16163_v29, %s27268_s23 }
 0xba2   : > { %v16166_v47 = vmax.f32 %v32222_v14, 0.0 }
 0xba3   : > { %v16165_v22 = vmax.f32 %v32228_v34, 0.0  ;;  %v25364_v2 = vpop.f32.mrb[102].mxu0 }
 0xba4   : > { %v32236_v16 = vadd.f32 %v25364_v2, %v32197_v33  ;;  %16364 = vrot.lane.b32.xlu1 %v16166_v47, %s27268_s23  ;;  %v15961_v51 = vpop.f32.mrb[103].mxu0 }
 0xba5   : > { %v32242_v11 = vadd.f32 %v32197_v33, %v15961_v51  ;;  %16362 = vrot.lane.b32.xlu0 %v16165_v22, %s27268_s23 }
 0xba6   : > { %v16168_v55 = vmax.f32 %v32236_v16, 0.0 }
 0xba7   : > { %v16167_v18 = vmax.f32 %v32242_v11, 0.0  ;;  %v25367_v13 = vpop.f32.mrb[104].mxu0  ;;  %v34932_v11 = vld [vmem:[#allocation67_spill] sm:$0xff] }
 0xba8   : > { %v32250_v61 = vadd.f32 %v25367_v13, %v32197_v33  ;;  %16368 = vrot.lane.b32.xlu1 %v16168_v55, %s27268_s23  ;;  %v15971_v12 = vpop.f32.mrb[105].mxu0 }
 0xba9   : > { %v32256_v45 = vadd.f32 %v32197_v33, %v15971_v12  ;;  %16366 = vrot.lane.b32.xlu0 %v16167_v18, %s27268_s23 }
 0xbaa   : > { %v16170_v8 = vmax.f32 %v32250_v61, 0.0 }
 0xbab   : > { %v16169_v9 = vmax.f32 %v32256_v45, 0.0  ;;  %v25370_v52 = vpop.f32.mrb[106].mxu0  ;;  %v34934_v45 = vld [vmem:[#allocation11_spill] sm:$0xff] }
 0xbac   : > { %v32264_v36 = vadd.f32 %v25370_v52, %v32197_v33  ;;  %16372 = vrot.lane.b32.xlu1 %v16170_v8, %s27268_s23  ;;  %v15981_v17 = vpop.f32.mrb[107].mxu0 }
 0xbad   : > { %v32270_v4 = vadd.f32 %v32197_v33, %v15981_v17  ;;  %16370 = vrot.lane.b32.xlu0 %v16169_v9, %s27268_s23 }
 0xbae   : > { %v16172_v60 = vmax.f32 %v32264_v36, 0.0 }
 0xbaf   : > { %v16171_v35 = vmax.f32 %v32270_v4, 0.0  ;;  %v25373_v62 = vpop.f32.mrb[108].mxu0  ;;  %v34936_v4 = vld [vmem:[#allocation38_spill] sm:$0xff] }
 0xbb0   : > { %v32284_v7 = vadd.f32 %v25373_v62, %v32197_v33  ;;  %16376 = vrot.lane.b32.xlu1 %v16172_v60, %s27268_s23  ;;  %v15991_v43 = vpop.f32.mrb[109].mxu0 }
 0xbb1   : > { %v32290_v20 = vadd.f32 %v32197_v33, %v15991_v43  ;;  %16374 = vrot.lane.b32.xlu0 %v16171_v35, %s27268_s23 }
 0xbb2   : > { %v16174_v19 = vmax.f32 %v32284_v7, 0.0 }
 0xbb3   : > { %v16173_v59 = vmax.f32 %v32290_v20, 0.0  ;;  %v25376_v54 = vpop.f32.mrb[110].mxu0  ;;  %v34938_v20 = vld [vmem:[#allocation91_spill] sm:$0xff] }
 0xbb4   : > { %v32299_v63 = vadd.f32 %v25376_v54, %v32197_v33  ;;  %16380 = vrot.lane.b32.xlu1 %v16174_v19, %s27268_s23  ;;  %v16001_v5 = vpop.f32.mrb[111].mxu0 }
 0xbb5   : > { %v32305_v44 = vadd.f32 %v32197_v33, %v16001_v5  ;;  %16378 = vrot.lane.b32.xlu0 %v16173_v59, %s27268_s23 }
 0xbb6   : > { %v16176_v57 = vmax.f32 %v32299_v63, 0.0 }
 0xbb7   : > { %v16175_v38 = vmax.f32 %v32305_v44, 0.0  ;;  %v25379_v15 = vpop.f32.mrb[112].mxu0  ;;  %v34940_v44 = vld [vmem:[#allocation18_spill] sm:$0xff] }
 0xbb8   : > { %v32313_v27 = vadd.f32 %v25379_v15, %v32197_v33  ;;  %16384 = vrot.lane.b32.xlu1 %v16176_v57, %s27268_s23  ;;  %v16011_v28 = vpop.f32.mrb[113].mxu0 }
 0xbb9   : > { %v32319_v10 = vadd.f32 %v32197_v33, %v16011_v28  ;;  %16382 = vrot.lane.b32.xlu0 %v16175_v38, %s27268_s23 }
 0xbba   : > { %v16178_v30 = vmax.f32 %v32313_v27, 0.0 }
 0xbbb   : > { %v16177_v48 = vmax.f32 %v32319_v10, 0.0  ;;  %v25382_v0 = vpop.f32.mrb[114].mxu0  ;;  %v34942_v10 = vld [vmem:[#allocation25_spill] sm:$0xff] }
 0xbbc   : > { %v32327_v6 = vadd.f32 %v25382_v0, %v32197_v33  ;;  %16388 = vrot.lane.b32.xlu1 %v16178_v30, %s27268_s23  ;;  %v16021_v37 = vpop.f32.mrb[115].mxu0 }
 0xbbd   : > { %v32333_v58 = vadd.f32 %v32197_v33, %v16021_v37  ;;  %16386 = vrot.lane.b32.xlu0 %v16177_v48, %s27268_s23 }
 0xbbe   : > { %v16180_v21 = vmax.f32 %v32327_v6, 0.0 }
 0xbbf   : > { %v16179_v40 = vmax.f32 %v32333_v58, 0.0  ;;  %v25385_v1 = vpop.f32.mrb[116].mxu0  ;;  %v34944_v58 = vld [vmem:[#allocation51_spill] sm:$0xff] }
 0xbc0   : > { %v32341_v53 = vadd.f32 %v25385_v1, %v32197_v33  ;;  %16392 = vrot.lane.b32.xlu1 %v16180_v21, %s27268_s23  ;;  %v16031_v42 = vpop.f32.mrb[117].mxu0 }
 0xbc1   : > { %v32347_v46 = vadd.f32 %v32197_v33, %v16031_v42  ;;  %16390 = vrot.lane.b32.xlu0 %v16179_v40, %s27268_s23 }
 0xbc2   : > { %v16182_v2 = vmax.f32 %v32341_v53, 0.0 }
 0xbc3   : > { %v16181_v51 = vmax.f32 %v32347_v46, 0.0  ;;  %v25388_v13 = vpop.f32.mrb[118].mxu0  ;;  %v34946_v46 = vld [vmem:[#allocation78_spill] sm:$0xff] }
 0xbc4   : > { %v32355_v12 = vadd.f32 %v25388_v13, %v32197_v33  ;;  %16396 = vrot.lane.b32.xlu1 %v16182_v2, %s27268_s23  ;;  %v16041_v52 = vpop.f32.mrb[119].mxu0 }
 0xbc5   : > { %v32361_v17 = vadd.f32 %v32197_v33, %v16041_v52  ;;  %16394 = vrot.lane.b32.xlu0 %v16181_v51, %s27268_s23 }
 0xbc6   : > { %v34175_v31 = vmax.f32 %v32355_v12, 0.0 }
 0xbc7   : > { %v16183_v62 = vmax.f32 %v32361_v17, 0.0  ;;  %v25391_v56 = vpop.f32.mrb[120].mxu0 }
 0xbc8   : > { %v32369_v39 = vadd.f32 %v25391_v56, %v32197_v33  ;;  %16400 = vrot.lane.b32.xlu1 %v34175_v31, %s27268_s23  ;;  %v16051_v43 = vpop.f32.mrb[121].mxu0 }
 0xbc9   : > { %v32375_v24 = vadd.f32 %v32197_v33, %v16051_v43  ;;  %16398 = vrot.lane.b32.xlu0 %v16183_v62, %s27268_s23 }
 0xbca   : > { %v34173_v54 = vmax.f32 %v32369_v39, 0.0 }
 0xbcb   : > { %v16185_v5 = vmax.f32 %v32375_v24, 0.0  ;;  %v25394_v15 = vpop.f32.mrb[122].mxu0  ;;  %v34949_v24 = vld [vmem:[#allocation50_spill] sm:$0xff] }
 0xbcc   : > { %v32383_v28 = vadd.f32 %v25394_v15, %v32197_v33  ;;  %16404 = vrot.lane.b32.xlu1 %v34173_v54, %s27268_s23  ;;  %v16061_v0 = vpop.f32.mrb[123].mxu0 }
 0xbcd   : > { %v32389_v37 = vadd.f32 %v32197_v33, %v16061_v0  ;;  %16402 = vrot.lane.b32.xlu0 %v16185_v5, %s27268_s23 }
 0xbce   : > { %v34174_v1 = vmax.f32 %v32383_v28, 0.0 }
 0xbcf   : > { %v34176_v42 = vmax.f32 %v32389_v37, 0.0  ;;  %v25397_v13 = vpop.f32.mrb[124].mxu0 }
 0xbd0   : > { %v32397_v52 = vadd.f32 %v25397_v13, %v32197_v33  ;;  %16408 = vrot.lane.b32.xlu1 %v34174_v1, %s27268_s23  ;;  %v16071_v56 = vpop.f32.mrb[125].mxu0 }
 0xbd1   : > { %v32403_v43 = vadd.f32 %v32197_v33, %v16071_v56  ;;  %16406 = vrot.lane.b32.xlu0 %v34176_v42, %s27268_s23 }
 0xbd2   : > { %v34177_v15 = vmax.f32 %v32397_v52, 0.0 }
 0xbd3   : > { %v16189_v0 = vmax.f32 %v32403_v43, 0.0  ;;  %v25400_v54 = vpop.f32.mrb[126].mxu0 }
 0xbd4   : > { %v32411_v13 = vadd.f32 %v25400_v54, %v32197_v33  ;;  %16412 = vrot.lane.b32.xlu1 %v34177_v15, %s27268_s23  ;;  %v16081_v1 = vpop.f32.mrb[127].mxu0  ;;  %v34899_v54 = vld [vmem:[#allocation14_spill] sm:$0xff]  ;;  %v34901_v15 = vld [vmem:[#allocation112_spill] sm:$0xff] }
 0xbd5   : > { %v32417_v56 = vadd.f32 %v32197_v33, %v16081_v1  ;;  %16410 = vrot.lane.b32.xlu0 %v16189_v0, %s27268_s23  ;;  %v34898_v33 = vld [vmem:[#allocation43_spill] sm:$0xff]  ;;  %v34900_v1 = vld [vmem:[#allocation109_spill] sm:$0xff] }
 0xbd6   : > { %v16192_v31 = vmax.f32 %v32411_v13, 0.0  ;;  %v21777_v13 = vld [vmem:[%s33882_s15 + $0x28] sm:$0xff] }
 0xbd7   : > { %v16191_v42 = vmax.f32 %v32417_v56, 0.0  ;;  %v34956_v56 = vld [vmem:[#allocation60_spill] sm:$0xff] }
 0xbd8   : > { %16416 = vrot.lane.b32.xlu1 %v16192_v31, %s27268_s23 }
 0xbd9   : > { %16414 = vrot.lane.b32.xlu0 %v16191_v42, %s27268_s23 }
 0xbdc   : > { %8448 = vrot.lane.b32.xlu1 %v34898_v33, %s27270_s29  ;;  %v34902_v33 = vld [vmem:[#allocation56_spill] sm:$0xff] }
 0xbdd   : > { %8446 = vrot.lane.b32.xlu0 %v34899_v54, %s27270_s29  ;;  %v34903_v54 = vld [vmem:[#allocation58_spill] sm:$0xff] }
 0xbe0   : > { %12385 = vrot.lane.b32.xlu1 %v34900_v1, %s27268_s23  ;;  %v34909_v1 = vld [vmem:[#allocation88_spill] sm:$0xff] }
 0xbe1   : > { %12383 = vrot.lane.b32.xlu0 %v34901_v15, %s27268_s23  ;;  %v34904_v15 = vld [vmem:[#allocation111_spill] sm:$0xff] }
 0xbe4   : > { %16227 = vrot.lane.b32.xlu1 %v16162_v32, %s27271_s0  ;;  %v34907_v32 = vld [vmem:[#allocation64_spill] sm:$0xff] }
 0xbe5   : > { %16225 = vrot.lane.b32.xlu0 %v16161_v25, %s27271_s0  ;;  %v34908_v25 = vld [vmem:[#allocation23_spill] sm:$0xff] }
 0xbe8   : > { %8452 = vrot.lane.b32.xlu1 %v34902_v33, %s27270_s29 }
 0xbe9   : > { %8450 = vrot.lane.b32.xlu0 %v34903_v54, %s27270_s29 }
 0xbec   : > { %12389 = vrot.lane.b32.xlu1 %v34904_v15, %s27268_s23 }
 0xbed   : > { %12387 = vrot.lane.b32.xlu0 %v34905_v49, %s27268_s23 }
 0xbf0   : > { %16231 = vrot.lane.b32.xlu1 %v16164_v26, %s27271_s0  ;;  %v34912_v26 = vld [vmem:[#allocation9_spill] sm:$0xff] }
 0xbf1   : > { %16229 = vrot.lane.b32.xlu0 %v16163_v29, %s27271_s0  ;;  %v34913_v29 = vld [vmem:[#allocation53_spill] sm:$0xff] }
 0xbf4   : > { %8456 = vrot.lane.b32.xlu1 %v34906_v50, %s27270_s29 }
 0xbf5   : > { %8454 = vrot.lane.b32.xlu0 %v34907_v32, %s27270_s29  ;;  %v34915_v32 = vld [vmem:[#allocation24_spill] sm:$0xff] }
 0xbf8   : > { %12393 = vrot.lane.b32.xlu1 %v34908_v25, %s27268_s23 }
 0xbf9   : > { %12391 = vrot.lane.b32.xlu0 %v34909_v1, %s27268_s23 }
 0xbfc   : > { %16235 = vrot.lane.b32.xlu1 %v16166_v47, %s27271_s0  ;;  %v34914_v47 = vld [vmem:[#allocation95_spill] sm:$0xff] }
 0xbfd   : > { %16233 = vrot.lane.b32.xlu0 %v16165_v22, %s27271_s0 }
 0xc00   : > { %8460 = vrot.lane.b32.xlu1 %v34910_v41, %s27270_s29 }
 0xc01   : > { %8458 = vrot.lane.b32.xlu0 %v34911_v23, %s27270_s29 }
 0xc04   : > { %12397 = vrot.lane.b32.xlu1 %v34912_v26, %s27268_s23  ;;  %v34916_v26 = vld [vmem:[#allocation75_spill] sm:$0xff] }
 0xc08   : > { %16239 = vrot.lane.b32.xlu1 %v16168_v55, %s27271_s0 }
 0xc0c   : > { %8464 = vrot.lane.b32.xlu1 %v34913_v29, %s27270_s29 }
 0xc0e   : > { %v16357_v14 = vpop.permute.xlu1 %16356 }
 0xc0f   : > { %16451 = vst.msk [vmem:[#allocation4 + $0x8] sm:$0xff] %vm16321_vm8, %v16357_v14  ;;  %v16355_v34 = vpop.permute.xlu0 %16354 }
 0xc10   : > { %16450 = vst.msk [vmem:[#allocation4] sm:$0xff] %vm16321_vm8, %v16355_v34  ;;  %12401 = vrot.lane.b32.xlu1 %v34914_v47, %s27268_s23 }
 0xc12   : > { %v16361_v22 = vpop.permute.xlu1 %16360 }
 0xc13   : > { %16453 = vst.msk [vmem:[#allocation4 + $0x18] sm:$0xff] %vm16321_vm8, %v16361_v22  ;;  %v16359_v33 = vpop.permute.xlu0 %16358 }
 0xc14   : > { %16452 = vst.msk [vmem:[#allocation4 + $0x10] sm:$0xff] %vm16321_vm8, %v16359_v33  ;;  %16243 = vrot.lane.b32.xlu1 %v16170_v8, %s27271_s0 }
 0xc16   : > { %v16483_v16 = vld [vmem:[#allocation4 + $0x8] sm:$0xff]  ;;  %v16365_v55 = vpop.permute.xlu1 %16364 }
 0xc17   : > { %v16482_v54 = vld [vmem:[#allocation4] sm:$0xff]  ;;  %16455 = vst.msk [vmem:[#allocation4 + $0x28] sm:$0xff] %vm16321_vm8, %v16365_v55  ;;  %v16363_v15 = vpop.permute.xlu0 %16362  ;;  %v16515_v49 = vsel %vm549_vm2, %v16483_v16, 0.0 }
 0xc18   : > { %v16514_v50 = vsel %vm549_vm2, %v16482_v54, 0.0  ;;  %16454 = vst.msk [vmem:[#allocation4 + $0x20] sm:$0xff] %vm16321_vm8, %v16363_v15  ;;  %8468 = vrot.lane.b32.xlu1 %v34915_v32, %s27270_s29 }
 0xc19   : > { %v16516_v1 = vadd.f32 %v16515_v49, %v16514_v50 }
 0xc1a   : > { %v16369_v25 = vpop.permute.xlu1 %16368  ;;  %v16485_v41 = vld [vmem:[#allocation4 + $0x18] sm:$0xff] }
 0xc1b   : > { %v16484_v61 = vld [vmem:[#allocation4 + $0x10] sm:$0xff]  ;;  %16457 = vst.msk [vmem:[#allocation4 + $0x38] sm:$0xff] %vm16321_vm8, %v16369_v25  ;;  %v16367_v8 = vpop.permute.xlu0 %16366  ;;  %v16519_v14 = vsel %vm549_vm2, %v16485_v41, 0.0 }
 0xc1c   : > { %v16517_v23 = vsel %vm549_vm2, %v16484_v61, 0.0  ;;  %16456 = vst.msk [vmem:[#allocation4 + $0x30] sm:$0xff] %vm16321_vm8, %v16367_v8  ;;  %12405 = vrot.lane.b32.xlu1 %v34916_v26, %s27268_s23  ;;  %v34917_v61 = vld [vmem:[#allocation45_spill] sm:$0xff] }
 0xc1d   : > { %v16518_v29 = vadd.f32 %v16517_v23, %v16516_v1 }
 0xc1e   : > { %v16373_v34 = vpop.permute.xlu1 %16372  ;;  %v16487_v47 = vld [vmem:[#allocation4 + $0x28] sm:$0xff] }
 0xc1f   : > { %v16520_v22 = vadd.f32 %v16519_v14, %v16518_v29  ;;  %v16486_v33 = vld [vmem:[#allocation4 + $0x20] sm:$0xff]  ;;  %16459 = vst.msk [vmem:[#allocation4 + $0x48] sm:$0xff] %vm16321_vm8, %v16373_v34  ;;  %v16371_v16 = vpop.permute.xlu0 %16370  ;;  %v16523_v15 = vsel %vm549_vm2, %v16487_v47, 0.0 }
 0xc20   : > { %v16521_v55 = vsel %vm549_vm2, %v16486_v33, 0.0  ;;  %16458 = vst.msk [vmem:[#allocation4 + $0x40] sm:$0xff] %vm16321_vm8, %v16371_v16  ;;  %16247 = vrot.lane.b32.xlu1 %v16172_v60, %s27271_s0  ;;  %v34918_v47 = vld [vmem:[#allocation13_spill] sm:$0xff] }
 0xc21   : > { %v16522_v54 = vadd.f32 %v16521_v55, %v16520_v22 }
 0xc22   : > { %v16377_v49 = vpop.permute.xlu1 %16376  ;;  %v16489_v50 = vld [vmem:[#allocation4 + $0x38] sm:$0xff] }
 0xc23   : > { %v16524_v32 = vadd.f32 %v16523_v15, %v16522_v54  ;;  %v16488_v25 = vld [vmem:[#allocation4 + $0x30] sm:$0xff]  ;;  %16461 = vst.msk [vmem:[#allocation4 + $0x58] sm:$0xff] %vm16321_vm8, %v16377_v49  ;;  %v16375_v1 = vpop.permute.xlu0 %16374  ;;  %v16527_v36 = vsel %vm549_vm2, %v16489_v50, 0.0 }
 0xc24   : > { %v16525_v41 = vsel %vm549_vm2, %v16488_v25, 0.0  ;;  %16460 = vst.msk [vmem:[#allocation4 + $0x50] sm:$0xff] %vm16321_vm8, %v16375_v1  ;;  %8472 = vrot.lane.b32.xlu1 %v34917_v61, %s27270_s29 }
 0xc25   : > { %v16526_v8 = vadd.f32 %v16525_v41, %v16524_v32 }
 0xc26   : > { %v16381_v60 = vpop.permute.xlu1 %16380  ;;  %v16491_v23 = vld [vmem:[#allocation4 + $0x48] sm:$0xff] }
 0xc27   : > { %v16528_v26 = vadd.f32 %v16527_v36, %v16526_v8  ;;  %v16490_v29 = vld [vmem:[#allocation4 + $0x40] sm:$0xff]  ;;  %16463 = vst.msk [vmem:[#allocation4 + $0x68] sm:$0xff] %vm16321_vm8, %v16381_v60  ;;  %v16379_v14 = vpop.permute.xlu0 %16378  ;;  %v16531_v33 = vsel %vm549_vm2, %v16491_v23, 0.0  ;;  %v34919_v23 = vld [vmem:[#allocation6_spill] sm:$0xff] }
 0xc28   : > { %v16529_v34 = vsel %vm549_vm2, %v16490_v29, 0.0  ;;  %16462 = vst.msk [vmem:[#allocation4 + $0x60] sm:$0xff] %vm16321_vm8, %v16379_v14  ;;  %12409 = vrot.lane.b32.xlu1 %v34918_v47, %s27268_s23 }
 0xc29   : > { %v16530_v22 = vadd.f32 %v16529_v34, %v16528_v26 }
 0xc2a   : > { %v16385_v16 = vpop.permute.xlu1 %16384  ;;  %v16493_v55 = vld [vmem:[#allocation4 + $0x58] sm:$0xff] }
 0xc2b   : > { %v16532_v54 = vadd.f32 %v16531_v33, %v16530_v22  ;;  %v16492_v15 = vld [vmem:[#allocation4 + $0x50] sm:$0xff]  ;;  %16465 = vst.msk [vmem:[#allocation4 + $0x78] sm:$0xff] %vm16321_vm8, %v16385_v16  ;;  %v16383_v49 = vpop.permute.xlu0 %16382  ;;  %v16535_v25 = vsel %vm549_vm2, %v16493_v55, 0.0  ;;  %v34920_v33 = vld [vmem:[#allocation20_spill] sm:$0xff] }
 0xc2c   : > { %v16533_v50 = vsel %vm549_vm2, %v16492_v15, 0.0  ;;  %16464 = vst.msk [vmem:[#allocation4 + $0x70] sm:$0xff] %vm16321_vm8, %v16383_v49  ;;  %16251 = vrot.lane.b32.xlu1 %v16174_v19, %s27271_s0 }
 0xc2d   : > { %v16534_v32 = vadd.f32 %v16533_v50, %v16532_v54 }
 0xc2e   : > { %v16389_v1 = vpop.permute.xlu1 %16388  ;;  %v16495_v41 = vld [vmem:[#allocation4 + $0x68] sm:$0xff] }
 0xc2f   : > { %v16536_v61 = vadd.f32 %v16535_v25, %v16534_v32  ;;  %v16494_v8 = vld [vmem:[#allocation4 + $0x60] sm:$0xff]  ;;  %16467 = vst.msk [vmem:[#allocation4 + $0x88] sm:$0xff] %vm16321_vm8, %v16389_v1  ;;  %v16387_v36 = vpop.permute.xlu0 %16386  ;;  %v16539_v7 = vsel %vm549_vm2, %v16495_v41, 0.0 }
 0xc30   : > { %v16537_v60 = vsel %vm549_vm2, %v16494_v8, 0.0  ;;  %16466 = vst.msk [vmem:[#allocation4 + $0x80] sm:$0xff] %vm16321_vm8, %v16387_v36  ;;  %8476 = vrot.lane.b32.xlu1 %v34919_v23, %s27270_s29 }
 0xc31   : > { %v16538_v26 = vadd.f32 %v16537_v60, %v16536_v61 }
 0xc32   : > { %v16393_v19 = vpop.permute.xlu1 %16392  ;;  %v16497_v29 = vld [vmem:[#allocation4 + $0x78] sm:$0xff] }
 0xc33   : > { %v16540_v14 = vadd.f32 %v16539_v7, %v16538_v26  ;;  %v16496_v34 = vld [vmem:[#allocation4 + $0x70] sm:$0xff]  ;;  %16469 = vst.msk [vmem:[#allocation4 + $0x98] sm:$0xff] %vm16321_vm8, %v16393_v19  ;;  %v16391_v47 = vpop.permute.xlu0 %16390  ;;  %v16543_v55 = vsel %vm549_vm2, %v16497_v29, 0.0  ;;  %v34921_v7 = vld [vmem:[#allocation93_spill] sm:$0xff] }
 0xc34   : > { %v16541_v22 = vsel %vm549_vm2, %v16496_v34, 0.0  ;;  %16468 = vst.msk [vmem:[#allocation4 + $0x90] sm:$0xff] %vm16321_vm8, %v16391_v47  ;;  %12413 = vrot.lane.b32.xlu1 %v34920_v33, %s27268_s23  ;;  %v34922_v33 = vld [vmem:[#allocation28_spill] sm:$0xff] }
 0xc35   : > { %v16542_v16 = vadd.f32 %v16541_v22, %v16540_v14 }
 0xc36   : > { %v16397_v54 = vpop.permute.xlu1 %16396  ;;  %v16499_v15 = vld [vmem:[#allocation4 + $0x88] sm:$0xff] }
 0xc37   : > { %v16544_v49 = vadd.f32 %v16543_v55, %v16542_v16  ;;  %v16498_v50 = vld [vmem:[#allocation4 + $0x80] sm:$0xff]  ;;  %16471 = vst.msk [vmem:[#allocation4 + $0xa8] sm:$0xff] %vm16321_vm8, %v16397_v54  ;;  %v16395_v32 = vpop.permute.xlu0 %16394  ;;  %v16547_v41 = vsel %vm549_vm2, %v16499_v15, 0.0 }
 0xc38   : > { %v16545_v25 = vsel %vm549_vm2, %v16498_v50, 0.0  ;;  %16470 = vst.msk [vmem:[#allocation4 + $0xa0] sm:$0xff] %vm16321_vm8, %v16395_v32  ;;  %16255 = vrot.lane.b32.xlu1 %v16176_v57, %s27271_s0 }
 0xc39   : > { %v16546_v1 = vadd.f32 %v16545_v25, %v16544_v49 }
 0xc3a   : > { %v16401_v61 = vpop.permute.xlu1 %16400  ;;  %v16501_v8 = vld [vmem:[#allocation4 + $0x98] sm:$0xff] }
 0xc3b   : > { %v16548_v36 = vadd.f32 %v16547_v41, %v16546_v1  ;;  %v16500_v60 = vld [vmem:[#allocation4 + $0x90] sm:$0xff]  ;;  %16473 = vst.msk [vmem:[#allocation4 + $0xb8] sm:$0xff] %vm16321_vm8, %v16401_v61  ;;  %v16399_v23 = vpop.permute.xlu0 %16398  ;;  %v16551_v63 = vsel %vm549_vm2, %v16501_v8, 0.0 }
 0xc3c   : > { %v16549_v26 = vsel %vm549_vm2, %v16500_v60, 0.0  ;;  %16472 = vst.msk [vmem:[#allocation4 + $0xb0] sm:$0xff] %vm16321_vm8, %v16399_v23  ;;  %8480 = vrot.lane.b32.xlu1 %v34921_v7, %s27270_s29  ;;  %v34923_v7 = vld [vmem:[#allocation94_spill] sm:$0xff] }
 0xc3d   : > { %v16550_v19 = vadd.f32 %v16549_v26, %v16548_v36 }
 0xc3e   : > { %v16405_v57 = vpop.permute.xlu1 %16404  ;;  %v16503_v29 = vld [vmem:[#allocation4 + $0xa8] sm:$0xff] }
 0xc3f   : > { %v16552_v14 = vadd.f32 %v16551_v63, %v16550_v19  ;;  %v16502_v34 = vld [vmem:[#allocation4 + $0xa0] sm:$0xff]  ;;  %16475 = vst.msk [vmem:[#allocation4 + $0xc8] sm:$0xff] %vm16321_vm8, %v16405_v57  ;;  %v16403_v47 = vpop.permute.xlu0 %16402  ;;  %v16555_v55 = vsel %vm549_vm2, %v16503_v29, 0.0 }
 0xc40   : > { %v16553_v22 = vsel %vm549_vm2, %v16502_v34, 0.0  ;;  %16474 = vst.msk [vmem:[#allocation4 + $0xc0] sm:$0xff] %vm16321_vm8, %v16403_v47  ;;  %12417 = vrot.lane.b32.xlu1 %v34922_v33, %s27268_s23  ;;  %v34924_v47 = vld [vmem:[#allocation63_spill] sm:$0xff] }
 0xc41   : > { %v16554_v16 = vadd.f32 %v16553_v22, %v16552_v14 }
 0xc42   : > { %v16409_v54 = vpop.permute.xlu1 %16408  ;;  %v16505_v15 = vld [vmem:[#allocation4 + $0xb8] sm:$0xff] }
 0xc43   : > { %v16556_v49 = vadd.f32 %v16555_v55, %v16554_v16  ;;  %v16504_v50 = vld [vmem:[#allocation4 + $0xb0] sm:$0xff]  ;;  %16477 = vst.msk [vmem:[#allocation4 + $0xd8] sm:$0xff] %vm16321_vm8, %v16409_v54  ;;  %v16407_v32 = vpop.permute.xlu0 %16406  ;;  %v16559_v41 = vsel %vm549_vm2, %v16505_v15, 0.0 }
 0xc44   : > { %v16557_v25 = vsel %vm549_vm2, %v16504_v50, 0.0  ;;  %16476 = vst.msk [vmem:[#allocation4 + $0xd0] sm:$0xff] %vm16321_vm8, %v16407_v32  ;;  %16259 = vrot.lane.b32.xlu1 %v16178_v30, %s27271_s0 }
 0xc45   : > { %v16558_v1 = vadd.f32 %v16557_v25, %v16556_v49 }
 0xc46   : > { %v16413_v61 = vpop.permute.xlu1 %16412  ;;  %v16507_v8 = vld [vmem:[#allocation4 + $0xc8] sm:$0xff] }
 0xc47   : > { %v16560_v36 = vadd.f32 %v16559_v41, %v16558_v1  ;;  %v16506_v60 = vld [vmem:[#allocation4 + $0xc0] sm:$0xff]  ;;  %16479 = vst.msk [vmem:[#allocation4 + $0xe8] sm:$0xff] %vm16321_vm8, %v16413_v61  ;;  %v16411_v23 = vpop.permute.xlu0 %16410  ;;  %v16563_v27 = vsel %vm549_vm2, %v16507_v8, 0.0 }
 0xc48   : > { %v16561_v26 = vsel %vm549_vm2, %v16506_v60, 0.0  ;;  %16478 = vst.msk [vmem:[#allocation4 + $0xe0] sm:$0xff] %vm16321_vm8, %v16411_v23  ;;  %8484 = vrot.lane.b32.xlu1 %v34923_v7, %s27270_s29  ;;  %v34925_v60 = vld [vmem:[#allocation54_spill] sm:$0xff] }
 0xc49   : > { %v16562_v19 = vadd.f32 %v16561_v26, %v16560_v36 }
 0xc4a   : > { %v16417_v30 = vpop.permute.xlu1 %16416  ;;  %v16509_v63 = vld [vmem:[#allocation4 + $0xd8] sm:$0xff] }
 0xc4b   : > { %v16508_v57 = vld [vmem:[#allocation4 + $0xd0] sm:$0xff]  ;;  %16481 = vst.msk [vmem:[#allocation4 + $0xf8] sm:$0xff] %vm16321_vm8, %v16417_v30  ;;  %v16415_v29 = vpop.permute.xlu0 %16414  ;;  %v16564_v14 = vadd.f32 %v16563_v27, %v16562_v19  ;;  %v16567_v16 = vsel %vm549_vm2, %v16509_v63, 0.0  ;;  %v34926_v27 = vld [vmem:[#allocation8_spill] sm:$0xff] }
 0xc4c   : > { %v16565_v34 = vsel %vm549_vm2, %v16508_v57, 0.0  ;;  %16480 = vst.msk [vmem:[#allocation4 + $0xf0] sm:$0xff] %vm16321_vm8, %v16415_v29  ;;  %12421 = vrot.lane.b32.xlu1 %v34924_v47, %s27268_s23 }
 0xc4d   : > { %v16566_v22 = vadd.f32 %v16565_v34, %v16564_v14 }
 0xc4e   : > { %v8449_v33 = vpop.permute.xlu1 %8448  ;;  %v16511_v15 = vld [vmem:[#allocation4 + $0xe8] sm:$0xff] }
 0xc4f   : > { %8543 = vst.msk [vmem:[#allocation3 + $0x8] sm:$0xff] %vm4892_vm5, %v8449_v33  ;;  %v8447_v55 = vpop.permute.xlu0 %8446  ;;  %v16510_v54 = vld [vmem:[#allocation4 + $0xe0] sm:$0xff]  ;;  %v16568_v49 = vadd.f32 %v16567_v16, %v16566_v22  ;;  %v16571_v1 = vsel %vm549_vm2, %v16511_v15, 0.0 }
 0xc50   : > { %8542 = vst.msk [vmem:[#allocation3] sm:$0xff] %vm4892_vm5, %v8447_v55  ;;  %16263 = vrot.lane.b32.xlu1 %v16180_v21, %s27271_s0  ;;  %v16569_v50 = vsel %vm549_vm2, %v16510_v54, 0.0 }
 0xc51   : > { %v16570_v32 = vadd.f32 %v16569_v50, %v16568_v49 }
 0xc52   : > { %v12386_v25 = vpop.permute.xlu1 %12385  ;;  %v16513_v8 = vld [vmem:[#allocation4 + $0xf8] sm:$0xff] }
 0xc53   : > { %12481 = vst.msk [vmem:[#allocation3 + $0x8] sm:$0xff] %vm12479_vm6, %v12386_v25  ;;  %v12384_v41 = vpop.permute.xlu0 %12383  ;;  %v16512_v61 = vld [vmem:[#allocation4 + $0xf0] sm:$0xff]  ;;  %v16572_v36 = vadd.f32 %v16571_v1, %v16570_v32  ;;  %v16575_v26 = vsel %vm549_vm2, %v16513_v8, 0.0 }
 0xc54   : > { %12480 = vst.msk [vmem:[#allocation3] sm:$0xff] %vm12479_vm6, %v12384_v41  ;;  %8488 = vrot.lane.b32.xlu1 %v34925_v60, %s27270_s29  ;;  %v16573_v6 = vsel %vm549_vm2, %v16512_v61, 0.0 }
 0xc55   : > { %v16574_v21 = vadd.f32 %v16573_v6, %v16572_v36 }
 0xc56   : > { %v16228_v23 = vpop.permute.xlu1 %16227 }
 0xc57   : > { %16323 = vst.msk [vmem:[#allocation3 + $0x8] sm:$0xff] %vm16321_vm8, %v16228_v23  ;;  %v16226_v7 = vpop.permute.xlu0 %16225  ;;  %v16576_v19 = vadd.f32 %v16575_v26, %v16574_v21 }
 0xc58   : > { %16322 = vst.msk [vmem:[#allocation3] sm:$0xff] %vm16321_vm8, %v16226_v7  ;;  %12425 = vrot.lane.b32.xlu1 %v34926_v27, %s27268_s23 }
 0xc59   : > { %v16577_v30 = vrot.slane %v16576_v19, 4 }
 0xc5a   : > { %v8453_v63 = vpop.permute.xlu1 %8452 }
 0xc5b   : > { %8545 = vst.msk [vmem:[#allocation3 + $0x18] sm:$0xff] %vm4892_vm5, %v8453_v63  ;;  %v8451_v57 = vpop.permute.xlu0 %8450  ;;  %v16578_v29 = vadd.f32 %v16577_v30, %v16576_v19 }
 0xc5c   : > { %8544 = vst.msk [vmem:[#allocation3 + $0x10] sm:$0xff] %vm4892_vm5, %v8451_v57  ;;  %16267 = vrot.lane.b32.xlu1 %v16182_v2, %s27271_s0 }
 0xc5d   : > { %v16579_v14 = vrot.slane %v16578_v29, 2 }
 0xc5e   : > { %v12390_v34 = vpop.permute.xlu1 %12389 }
 0xc5f   : > { %12483 = vst.msk [vmem:[#allocation3 + $0x18] sm:$0xff] %vm12479_vm6, %v12390_v34  ;;  %v12388_v47 = vpop.permute.xlu0 %12387  ;;  %v16580_v22 = vadd.f32 %v16579_v14, %v16578_v29 }
 0xc60   : > { %12482 = vst.msk [vmem:[#allocation3 + $0x10] sm:$0xff] %vm12479_vm6, %v12388_v47  ;;  %v16662_v47 = vld [vmem:[%s33880_s13] sm:$0xf] }
 0xc61   : > { %v16581_v33 = vrot.slane %v16580_v22, 1 }
 0xc62   : > { %v16232_v16 = vpop.permute.xlu1 %16231 }
 0xc63   : > { %16325 = vst.msk [vmem:[#allocation3 + $0x18] sm:$0xff] %vm16321_vm8, %v16232_v16  ;;  %v16230_v55 = vpop.permute.xlu0 %16229  ;;  %v16582_v54 = vadd.f32 %v16581_v33, %v16580_v22 }
 0xc64   : > { %16324 = vst.msk [vmem:[#allocation3 + $0x10] sm:$0xff] %vm16321_vm8, %v16230_v55 }
 0xc65   : > { %v16584_v15 = vmul.f32 0.00390625, %v16582_v54 }
 0xc66   : > { %v8457_v49 = vpop.permute.xlu1 %8456 }
 0xc67   : > { %8547 = vst.msk [vmem:[#allocation3 + $0x28] sm:$0xff] %vm4892_vm5, %v8457_v49  ;;  %v8455_v53 = vpop.permute.xlu0 %8454  ;;  %25406 = vmatmul.mubr.msk.f32.vlgmr.msra.gmra.mrb[64].mxu1 %vm549_vm2, %v16584_v15  ;;  %v16587_v15 = vld [vmem:[%s33879_s12] sm:$0x1] }
 0xc68   : > { %8546 = vst.msk [vmem:[#allocation3 + $0x20] sm:$0xff] %vm4892_vm5, %v8455_v53  ;;  %25410 = vmatprep.mubr.msk.f32.mxu1 %vm27272_vm7, %v34897_v3  ;;  %25409 = vmatpush3.msk.msra.mxu1 %vm1185_vm0, %v16662_v47 }
 0xc6a   : > { %v12394_v2 = vpop.permute.xlu1 %12393 }
 0xc6b   : > { %12485 = vst.msk [vmem:[#allocation3 + $0x28] sm:$0xff] %vm12479_vm6, %v12394_v2  ;;  %v12392_v50 = vpop.permute.xlu0 %12391 }
 0xc6c   : > { %12484 = vst.msk [vmem:[#allocation3 + $0x20] sm:$0xff] %vm12479_vm6, %v12392_v50 }
 0xc6e   : > { %v16236_v32 = vpop.permute.xlu1 %16235 }
 0xc6f   : > { %16327 = vst.msk [vmem:[#allocation3 + $0x28] sm:$0xff] %vm16321_vm8, %v16236_v32  ;;  %v16234_v25 = vpop.permute.xlu0 %16233  ;;  %v16663_v32 = vld [vmem:[%s33881_s14] sm:$0x1] }
 0xc70   : > { %16326 = vst.msk [vmem:[#allocation3 + $0x20] sm:$0xff] %vm16321_vm8, %v16234_v25 }
 0xc72   : > { %v8461_v1 = vpop.permute.xlu1 %8460 }
 0xc73   : > { %8549 = vst.msk [vmem:[#allocation3 + $0x38] sm:$0xff] %vm4892_vm5, %v8461_v1  ;;  %v8459_v41 = vpop.permute.xlu0 %8458 }
 0xc74   : > { %8548 = vst.msk [vmem:[#allocation3 + $0x30] sm:$0xff] %vm4892_vm5, %v8459_v41 }
 0xc76   : > { %v12398_v61 = vpop.permute.xlu1 %12397 }
 0xc77   : > { %12487 = vst.msk [vmem:[#allocation3 + $0x38] sm:$0xff] %vm12479_vm6, %v12398_v61 }
 0xc7a   : > { %v16240_v3 = vpop.permute.xlu1 %16239 }
 0xc7b   : > { %16329 = vst.msk [vmem:[#allocation3 + $0x38] sm:$0xff] %vm16321_vm8, %v16240_v3  ;;  %v34927_v3 = vld [vmem:[#allocation104_spill] sm:$0xff] }
 0xc7e   : > { %v8465_v8 = vpop.permute.xlu1 %8464 }
 0xc7f   : > { %8551 = vst.msk [vmem:[#allocation3 + $0x48] sm:$0xff] %vm4892_vm5, %v8465_v8  ;;  %v34928_v8 = vld [vmem:[#allocation48_spill] sm:$0xff] }
 0xc82   : > { %v12402_v36 = vpop.permute.xlu1 %12401 }
 0xc83   : > { %12489 = vst.msk [vmem:[#allocation3 + $0x48] sm:$0xff] %vm12479_vm6, %v12402_v36  ;;  %v34929_v36 = vld [vmem:[#allocation72_spill] sm:$0xff] }
 0xc86   : > { %v16244_v60 = vpop.permute.xlu1 %16243 }
 0xc87   : > { %16331 = vst.msk [vmem:[#allocation3 + $0x48] sm:$0xff] %vm16321_vm8, %v16244_v60  ;;  %v34930_v60 = vld [vmem:[#allocation31_spill] sm:$0xff] }
 0xc8a   : > { %v8469_v6 = vpop.permute.xlu1 %8468 }
 0xc8b   : > { %8553 = vst.msk [vmem:[#allocation3 + $0x58] sm:$0xff] %vm4892_vm5, %v8469_v6  ;;  %v34931_v6 = vld [vmem:[#allocation15_spill] sm:$0xff] }
 0xc8e   : > { %v12406_v21 = vpop.permute.xlu1 %12405 }
 0xc8f   : > { %12491 = vst.msk [vmem:[#allocation3 + $0x58] sm:$0xff] %vm12479_vm6, %v12406_v21 }
 0xc92   : > { %v16248_v23 = vpop.permute.xlu1 %16247 }
 0xc93   : > { %16333 = vst.msk [vmem:[#allocation3 + $0x58] sm:$0xff] %vm16321_vm8, %v16248_v23  ;;  %v34947_v23 = vld [vmem:[#allocation39_spill] sm:$0xff] }
 0xc96   : > { %v8473_v26 = vpop.permute.xlu1 %8472 }
 0xc97   : > { %8555 = vst.msk [vmem:[#allocation3 + $0x68] sm:$0xff] %vm4892_vm5, %v8473_v26  ;;  %v34948_v26 = vmax.f32 %v32389_v37, 0.0 }
 0xc9a   : > { %v12410_v7 = vpop.permute.xlu1 %12409 }
 0xc9b   : > { %12493 = vst.msk [vmem:[#allocation3 + $0x68] sm:$0xff] %vm12479_vm6, %v12410_v7 }
 0xc9e   : > { %v16252_v19 = vpop.permute.xlu1 %16251 }
 0xc9f   : > { %16335 = vst.msk [vmem:[#allocation3 + $0x68] sm:$0xff] %vm16321_vm8, %v16252_v19  ;;  %v34950_v19 = vld [vmem:[#allocation76_spill] sm:$0xff] }
 0xca2   : > { %v8477_v27 = vpop.permute.xlu1 %8476 }
 0xca3   : > { %8557 = vst.msk [vmem:[#allocation3 + $0x78] sm:$0xff] %vm4892_vm5, %v8477_v27 }
 0xca6   : > { %v12414_v30 = vpop.permute.xlu1 %12413 }
 0xca7   : > { %12495 = vst.msk [vmem:[#allocation3 + $0x78] sm:$0xff] %vm12479_vm6, %v12414_v30 }
 0xcaa   : > { %v16256_v63 = vpop.permute.xlu1 %16255 }
 0xcab   : > { %16337 = vst.msk [vmem:[#allocation3 + $0x78] sm:$0xff] %vm16321_vm8, %v16256_v63 }
 0xcae   : > { %v8481_v57 = vpop.permute.xlu1 %8480 }
 0xcaf   : > { %8559 = vst.msk [vmem:[#allocation3 + $0x88] sm:$0xff] %vm4892_vm5, %v8481_v57  ;;  %v34951_v57 = vld [vmem:[#allocation68_spill] sm:$0xff] }
 0xcb2   : > { %v12418_v29 = vpop.permute.xlu1 %12417 }
 0xcb3   : > { %12497 = vst.msk [vmem:[#allocation3 + $0x88] sm:$0xff] %vm12479_vm6, %v12418_v29 }
 0xcb6   : > { %v16260_v14 = vpop.permute.xlu1 %16259 }
 0xcb7   : > { %16339 = vst.msk [vmem:[#allocation3 + $0x88] sm:$0xff] %vm16321_vm8, %v16260_v14  ;;  %v34952_v14 = vld [vmem:[#allocation84_spill] sm:$0xff] }
 0xcba   : > { %v8485_v34 = vpop.permute.xlu1 %8484 }
 0xcbb   : > { %8561 = vst.msk [vmem:[#allocation3 + $0x98] sm:$0xff] %vm4892_vm5, %v8485_v34 }
 0xcbe   : > { %v12422_v22 = vpop.permute.xlu1 %12421 }
 0xcbf   : > { %12499 = vst.msk [vmem:[#allocation3 + $0x98] sm:$0xff] %vm12479_vm6, %v12422_v22  ;;  %v34954_v22 = vld [vmem:[#allocation35_spill] sm:$0xff] }
 0xcc2   : > { %v16264_v33 = vpop.permute.xlu1 %16263 }
 0xcc3   : > { %16341 = vst.msk [vmem:[#allocation3 + $0x98] sm:$0xff] %vm16321_vm8, %v16264_v33 }
 0xcc6   : > { %v8489_v16 = vpop.permute.xlu1 %8488 }
 0xcc7   : > { %8563 = vst.msk [vmem:[#allocation3 + $0xa8] sm:$0xff] %vm4892_vm5, %v8489_v16  ;;  %v34955_v16 = vmax.f32 %v32355_v12, 0.0  ;;  %v21711_v12 = vld [vmem:[%s33882_s15 + $0x18] sm:$0xff] }
 0xcca   : > { %v12426_v55 = vpop.permute.xlu1 %12425 }
 0xccb   : > { %12501 = vst.msk [vmem:[#allocation3 + $0xa8] sm:$0xff] %vm12479_vm6, %v12426_v55 }
 0xcce   : > { %v16268_v54 = vpop.permute.xlu1 %16267 }
 0xccf   : > { %16343 = vst.msk [vmem:[#allocation3 + $0xa8] sm:$0xff] %vm16321_vm8, %v16268_v54  ;;  %v34957_v54 = vld [vmem:[#allocation96_spill] sm:$0xff] }
 0xd3a   : > { %v16657_v49 = vpop.f32.mrb[64].mxu1 }
 0xd3b   : > { %v16658_v53 = vadd.f32 %v16657_v49, %v16587_v15  ;;  %v25407_v2 = vpop.f32.mrb[65].mxu1  ;;  %v21710_v49 = vld [vmem:[%s33882_s15 + $0x10] sm:$0xff] }
 0xd3c   : > { %v34958_v2 = vmax.f32 %v32369_v39, 0.0  ;;  %v34959_v39 = vld [vmem:[#allocation80_spill] sm:$0xff] }
 0xd3d   : > { %v16661_v50 = vmax.f32 %v16658_v53, 0.0  ;;  %v25884_v53 = vpack.c.bf16 %v21711_v12, %v21710_v49  ;;  %v16762_v49 = vld [vmem:[#allocation3 + $0x58] sm:$0xff]  ;;  %v16764_v12 = vld [vmem:[#allocation3 + $0x68] sm:$0xff] }
 0xd3f   : > { %25411 = vmatmul.mubr.msk.f32.vlgmr.msra.gmra.mrb[66].mxu1 %vm989_vm4, %v16661_v50  ;;  %v16885_v50 = vld [vmem:[#allocation2 + $0x1] sm:$0xff]  ;;  %25885 = vmatprep.subr.bf16.mxu1 %v25884_v53 }
 0xd40   : > { %25417 = vmatprep.mubr.msk.f32.mxu1 %vm549_vm2, %v16885_v50  ;;  %25887 = vmatpush3.bf16.msra.mxu1 %v25884_v53  ;;  %v16766_v53 = vld [vmem:[#allocation3 + $0x78] sm:$0xff] }
 0xe12   : > { %v16736_v25 = vpop.f32.mrb[66].mxu1 }
 0xe13   : > { %v16737_v1 = vadd.f32 %v16736_v25, %v16663_v32  ;;  %v25412_v41 = vpop.f32.mrb[67].mxu1  ;;  %v16883_v32 = vld [vmem:[%s33882_s15] sm:$0xff]  ;;  %v16884_v25 = vld [vmem:[%s33882_s15 + $0x8] sm:$0xff] }
 0xe15   : > { %v16740_v61 = vsel %vm557_vm3, %v16737_v1, -inf }
 0xe16   : > { %16741 = vmax.xlane.f32.xlu0 %v16740_v61  ;;  %v16886_v61 = vld [vmem:[#allocation2 + $0x9] sm:$0xff] }
 0xe17   : > { %25418 = vmatmul.mubr.msk.f32.vlgmr.msra.gmra.mrb[68].mxu1 %vm549_vm2, %v16886_v61  ;;  %v16770_v61 = vld [vmem:[#allocation3 + $0x98] sm:$0xff] }
 0xe2c   : > { %12395 = vrot.lane.b32.xlu0 %v34927_v3, %s27268_s23 }
 0xe30   : > { %16237 = vrot.lane.b32.xlu0 %v16167_v18, %s27271_s0  ;;  %v34933_v18 = vld [vmem:[#allocation57_spill] sm:$0xff] }
 0xe34   : > { %8462 = vrot.lane.b32.xlu0 %v34928_v8, %s27270_s29  ;;  %v34960_v8 = vld [vmem:[#allocation52_spill] sm:$0xff] }
 0xe38   : > { %12399 = vrot.lane.b32.xlu0 %v34929_v36, %s27268_s23 }
 0xe3c   : > { %16241 = vrot.lane.b32.xlu0 %v16169_v9, %s27271_s0  ;;  %v34935_v9 = vld [vmem:[#allocation34_spill] sm:$0xff] }
 0xe40   : > { %8466 = vrot.lane.b32.xlu0 %v34930_v60, %s27270_s29  ;;  %v34961_v60 = vmax.f32 %v32383_v28, 0.0 }
 0xe44   : > { %12403 = vrot.lane.b32.xlu0 %v34931_v6, %s27268_s23 }
 0xe48   : > { %16245 = vrot.lane.b32.xlu0 %v16171_v35, %s27271_s0  ;;  %v34937_v35 = vld [vmem:[#allocation71_spill] sm:$0xff] }
 0xe4c   : > { %8470 = vrot.lane.b32.xlu0 %v34932_v11, %s27270_s29  ;;  %v34962_v11 = vld [vmem:[#allocation89_spill] sm:$0xff] }
 0xe50   : > { %12407 = vrot.lane.b32.xlu0 %v34933_v18, %s27268_s23 }
 0xe54   : > { %16249 = vrot.lane.b32.xlu0 %v16173_v59, %s27271_s0  ;;  %v34939_v59 = vld [vmem:[#allocation83_spill] sm:$0xff] }
 0xe58   : > { %8474 = vrot.lane.b32.xlu0 %v34934_v45, %s27270_s29  ;;  %v34963_v45 = vld [vmem:[#allocation33_spill] sm:$0xff] }
 0xe5c   : > { %12411 = vrot.lane.b32.xlu0 %v34935_v9, %s27268_s23 }
 0xe60   : > { %16253 = vrot.lane.b32.xlu0 %v16175_v38, %s27271_s0  ;;  %v34941_v38 = vld [vmem:[#allocation47_spill] sm:$0xff] }
 0xe64   : > { %8478 = vrot.lane.b32.xlu0 %v34936_v4, %s27270_s29  ;;  %v34964_v4 = vmax.f32 %v32397_v52, 0.0 }
 0xe68   : > { %12415 = vrot.lane.b32.xlu0 %v34937_v35, %s27268_s23  ;;  %v34965_v35 = vld [vmem:[#allocation41_spill] sm:$0xff] }
 0xe6c   : > { %16257 = vrot.lane.b32.xlu0 %v16177_v48, %s27271_s0  ;;  %v34943_v48 = vld [vmem:[#allocation49_spill] sm:$0xff] }
 0xe70   : > { %8482 = vrot.lane.b32.xlu0 %v34938_v20, %s27270_s29 }
 0xe74   : > { %12419 = vrot.lane.b32.xlu0 %v34939_v59, %s27268_s23  ;;  %v34966_v59 = vld [vmem:[#allocation70_spill] sm:$0xff] }
 0xe78   : > { %16261 = vrot.lane.b32.xlu0 %v16179_v40, %s27271_s0  ;;  %v34945_v40 = vld [vmem:[#allocation19_spill] sm:$0xff] }
 0xe7c   : > { %8486 = vrot.lane.b32.xlu0 %v34940_v44, %s27270_s29 }
 0xe80   : > { %12423 = vrot.lane.b32.xlu0 %v34941_v38, %s27268_s23 }
 0xe84   : > { %16265 = vrot.lane.b32.xlu0 %v16181_v51, %s27271_s0 }
 0xe88   : > { %8490 = vrot.lane.b32.xlu0 %v34942_v10, %s27270_s29 }
 0xe8c   : > { %12427 = vrot.lane.b32.xlu0 %v34943_v48, %s27268_s23 }
 0xe90   : > { %16269 = vrot.lane.b32.xlu0 %v16183_v62, %s27271_s0 }
 0xe94   : > { %8494 = vrot.lane.b32.xlu0 %v34944_v58, %s27270_s29 }
 0xe98   : > { %12431 = vrot.lane.b32.xlu0 %v34945_v40, %s27268_s23 }
 0xe9c   : > { %16273 = vrot.lane.b32.xlu0 %v16185_v5, %s27271_s0 }
 0xea0   : > { %8498 = vrot.lane.b32.xlu0 %v34946_v46, %s27270_s29 }
 0xea3   : > { %v16742_v51 = vpop.xlane.xlu0 %16741 }
 0xea4   : > { %v16743_v21 = vsub.f32 %v16737_v1, %v16742_v51  ;;  %12435 = vrot.lane.b32.xlu0 %v34947_v23, %s27268_s23  ;;  %v25888_v1 = vpack.c.bf16 %v16884_v25, %v16883_v32 }
 0xea6   : > { %v16744_v17 = vmul.f32 1.442695, %v16743_v21  ;;  %25889 = vmatprep.subr.bf16.mxu1 %v25888_v1 }
 0xea7   : > { %v12396_v62 = vpop.permute.xlu0 %12395  ;;  %25891 = vmatpush3.bf16.msra.mxu1 %v25888_v1 }
 0xea8   : > { %27219 = vpow2.f32 %v16744_v17  ;;  %12486 = vst.msk [vmem:[#allocation3 + $0x30] sm:$0xff] %vm12479_vm6, %v12396_v62  ;;  %16277 = vrot.lane.b32.xlu0 %v34948_v26, %s27271_s0 }
 0xeab   : > { %v16238_v7 = vpop.permute.xlu0 %16237 }
 0xeac   : > { %16328 = vst.msk [vmem:[#allocation3 + $0x30] sm:$0xff] %vm16321_vm8, %v16238_v7  ;;  %8502 = vrot.lane.b32.xlu0 %v34949_v24, %s27270_s29 }
 0xeaf   : > { %v8463_v5 = vpop.permute.xlu0 %8462 }
 0xeb0   : > { %8550 = vst.msk [vmem:[#allocation3 + $0x40] sm:$0xff] %vm4892_vm5, %v8463_v5  ;;  %12439 = vrot.lane.b32.xlu0 %v34950_v19, %s27268_s23 }
 0xeb2   : > { %v32736_v27 = vpop.eup %27219 }
 0xeb3   : > { %v12400_v30 = vpop.permute.xlu0 %12399  ;;  %v16746_v63 = vsel %vm557_vm3, %v32736_v27, 0.0 }
 0xeb4   : > { %12488 = vst.msk [vmem:[#allocation3 + $0x40] sm:$0xff] %vm12479_vm6, %v12400_v30  ;;  %16281 = vrot.lane.b32.xlu0 %v16189_v0, %s27271_s0  ;;  %16747 = vadd.xlane.f32.xlu1 %v16746_v63  ;;  %v34953_v0 = vld [vmem:[#allocation27_spill] sm:$0xff]  ;;  %v16783_v63 = vlaneseq }
 0xeb7   : > { %v16242_v37 = vpop.permute.xlu0 %16241 }
 0xeb8   : > { %16330 = vst.msk [vmem:[#allocation3 + $0x40] sm:$0xff] %vm16321_vm8, %v16242_v37  ;;  %8506 = vrot.lane.b32.xlu0 %v34951_v57, %s27270_s29  ;;  %v16784_v57 = vshrl.u32 %v16783_v63, 7 }
 0xebb   : > { %v8467_v29 = vpop.permute.xlu0 %8466 }
 0xebc   : > { %8552 = vst.msk [vmem:[#allocation3 + $0x50] sm:$0xff] %vm4892_vm5, %v8467_v29  ;;  %12443 = vrot.lane.b32.xlu0 %v34952_v14, %s27268_s23  ;;  %v16785_v14 = vsub.s32 0, %v16784_v57 }
 0xebf   : > { %v12404_v34 = vpop.permute.xlu0 %12403 }
 0xec0   : > { %12490 = vst.msk [vmem:[#allocation3 + $0x50] sm:$0xff] %vm12479_vm6, %v12404_v34  ;;  %16285 = vrot.lane.b32.xlu0 %v16191_v42, %s27271_s0 }
 0xec3   : > { %v16246_v43 = vpop.permute.xlu0 %16245 }
 0xec4   : > { %16332 = vst.msk [vmem:[#allocation3 + $0x50] sm:$0xff] %vm16321_vm8, %v16246_v43 }
 0xec5   : > { %8492 = vrot.lane.b32.xlu1 %v34953_v0, %s27270_s29 }
 0xec7   : > { %v8471_v47 = vpop.permute.xlu0 %8470 }
 0xec8   : > { %8554 = vst.msk [vmem:[#allocation3 + $0x60] sm:$0xff] %vm4892_vm5, %v8471_v47  ;;  %v16752_v47 = vld [vmem:[#allocation3 + $0x8] sm:$0xff] }
 0xec9   : > { %12429 = vrot.lane.b32.xlu1 %v34954_v22, %s27268_s23  ;;  %v16751_v22 = vld [vmem:[#allocation3] sm:$0xff] }
 0xecb   : > { %v12408_v33 = vpop.permute.xlu0 %12407 }
 0xecc   : > { %12492 = vst.msk [vmem:[#allocation3 + $0x60] sm:$0xff] %vm12479_vm6, %v12408_v33  ;;  %v16754_v33 = vld [vmem:[#allocation3 + $0x18] sm:$0xff] }
 0xecd   : > { %16271 = vrot.lane.b32.xlu1 %v34955_v16, %s27271_s0  ;;  %v16753_v16 = vld [vmem:[#allocation3 + $0x10] sm:$0xff] }
 0xecf   : > { %v16250_v42 = vpop.permute.xlu0 %16249 }
 0xed0   : > { %16334 = vst.msk [vmem:[#allocation3 + $0x60] sm:$0xff] %vm16321_vm8, %v16250_v42  ;;  %v16756_v42 = vld [vmem:[#allocation3 + $0x28] sm:$0xff] }
 0xed1   : > { %8496 = vrot.lane.b32.xlu1 %v34956_v56, %s27270_s29  ;;  %v16755_v56 = vld [vmem:[#allocation3 + $0x20] sm:$0xff] }
 0xed3   : > { %v8475_v55 = vpop.permute.xlu0 %8474 }
 0xed4   : > { %8556 = vst.msk [vmem:[#allocation3 + $0x70] sm:$0xff] %vm4892_vm5, %v8475_v55 }
 0xed5   : > { %12433 = vrot.lane.b32.xlu1 %v34957_v54, %s27268_s23  ;;  %v16758_v54 = vld [vmem:[#allocation3 + $0x38] sm:$0xff] }
 0xed7   : > { %v12412_v15 = vpop.permute.xlu0 %12411 }
 0xed8   : > { %12494 = vst.msk [vmem:[#allocation3 + $0x70] sm:$0xff] %vm12479_vm6, %v12412_v15  ;;  %v16760_v15 = vld [vmem:[#allocation3 + $0x48] sm:$0xff] }
 0xed9   : > { %16275 = vrot.lane.b32.xlu1 %v34958_v2, %s27271_s0  ;;  %v16757_v2 = vld [vmem:[#allocation3 + $0x30] sm:$0xff] }
 0xedb   : > { %v16254_v41 = vpop.permute.xlu0 %16253 }
 0xedc   : > { %16336 = vst.msk [vmem:[#allocation3 + $0x70] sm:$0xff] %vm16321_vm8, %v16254_v41  ;;  %v16768_v41 = vld [vmem:[#allocation3 + $0x88] sm:$0xff] }
 0xedd   : > { %8500 = vrot.lane.b32.xlu1 %v34959_v39, %s27270_s29  ;;  %v16759_v39 = vld [vmem:[#allocation3 + $0x40] sm:$0xff] }
 0xedf   : > { %v8479_v3 = vpop.permute.xlu0 %8478 }
 0xee0   : > { %8558 = vst.msk [vmem:[#allocation3 + $0x80] sm:$0xff] %vm4892_vm5, %v8479_v3  ;;  %v16761_v3 = vld [vmem:[#allocation3 + $0x50] sm:$0xff] }
 0xee1   : > { %12437 = vrot.lane.b32.xlu1 %v34960_v8, %s27268_s23 }
 0xee3   : > { %v12416_v36 = vpop.permute.xlu0 %12415 }
 0xee4   : > { %12496 = vst.msk [vmem:[#allocation3 + $0x80] sm:$0xff] %vm12479_vm6, %v12416_v36 }
 0xee5   : > { %16279 = vrot.lane.b32.xlu1 %v34961_v60, %s27271_s0 }
 0xee7   : > { %v16258_v6 = vpop.permute.xlu0 %16257 }
 0xee8   : > { %16338 = vst.msk [vmem:[#allocation3 + $0x80] sm:$0xff] %vm16321_vm8, %v16258_v6 }
 0xee9   : > { %8504 = vrot.lane.b32.xlu1 %v34962_v11, %s27270_s29  ;;  %v16772_v11 = vld [vmem:[#allocation3 + $0xa8] sm:$0xff] }
 0xeeb   : > { %v8483_v18 = vpop.permute.xlu0 %8482 }
 0xeec   : > { %8560 = vst.msk [vmem:[#allocation3 + $0x90] sm:$0xff] %vm4892_vm5, %v8483_v18  ;;  %v16763_v18 = vld [vmem:[#allocation3 + $0x60] sm:$0xff] }
 0xeed   : > { %12441 = vrot.lane.b32.xlu1 %v34963_v45, %s27268_s23  ;;  %v16765_v45 = vld [vmem:[#allocation3 + $0x70] sm:$0xff] }
 0xeef   : > { %v12420_v9 = vpop.permute.xlu0 %12419 }
 0xef0   : > { %12498 = vst.msk [vmem:[#allocation3 + $0x90] sm:$0xff] %vm12479_vm6, %v12420_v9 }
 0xef1   : > { %16283 = vrot.lane.b32.xlu1 %v34964_v4, %s27271_s0 }
 0xef3   : > { %v16262_v28 = vpop.permute.xlu0 %16261 }
 0xef4   : > { %16340 = vst.msk [vmem:[#allocation3 + $0x90] sm:$0xff] %vm16321_vm8, %v16262_v28 }
 0xef5   : > { %8508 = vrot.lane.b32.xlu1 %v34965_v35, %s27270_s29 }
 0xef7   : > { %v8487_v20 = vpop.permute.xlu0 %8486 }
 0xef8   : > { %8562 = vst.msk [vmem:[#allocation3 + $0xa0] sm:$0xff] %vm4892_vm5, %v8487_v20  ;;  %v16767_v20 = vld [vmem:[#allocation3 + $0x80] sm:$0xff] }
 0xef9   : > { %12445 = vrot.lane.b32.xlu1 %v34966_v59, %s27268_s23 }
 0xefb   : > { %v12424_v44 = vpop.permute.xlu0 %12423  ;;  %v16769_v59 = vld [vmem:[#allocation3 + $0x90] sm:$0xff] }
 0xefc   : > { %12500 = vst.msk [vmem:[#allocation3 + $0xa0] sm:$0xff] %vm12479_vm6, %v12424_v44 }
 0xefd   : > { %16287 = vrot.lane.b32.xlu1 %v16192_v31, %s27271_s0  ;;  %v21776_v31 = vld [vmem:[%s33882_s15 + $0x20] sm:$0xff] }
 0xefe   : > { %v32830_v46 = vpack.c.bf16 %v21777_v13, %v21776_v31 }
 0xeff   : > { %v16266_v52 = vpop.permute.xlu0 %16265 }
 0xf00   : > { %16342 = vst.msk [vmem:[#allocation3 + $0xa0] sm:$0xff] %vm16321_vm8, %v16266_v52  ;;  %25893 = vmatprep.subr.bf16.mxu1 %v32830_v46 }
 0xf03   : > { %v8491_v38 = vpop.permute.xlu0 %8490 }
 0xf04   : > { %8564 = vst.msk [vmem:[#allocation3 + $0xb0] sm:$0xff] %vm4892_vm5, %v8491_v38 }
 0xf07   : > { %v12428_v10 = vpop.permute.xlu0 %12427  ;;  %v16771_v44 = vld [vmem:[#allocation3 + $0xa0] sm:$0xff] }
 0xf08   : > { %12502 = vst.msk [vmem:[#allocation3 + $0xb0] sm:$0xff] %vm12479_vm6, %v12428_v10 }
 0xf0b   : > { %v16270_v48 = vpop.permute.xlu0 %16269 }
 0xf0c   : > { %16344 = vst.msk [vmem:[#allocation3 + $0xb0] sm:$0xff] %vm16321_vm8, %v16270_v48 }
 0xf0f   : > { %v8495_v58 = vpop.permute.xlu0 %8494 }
 0xf10   : > { %8566 = vst.msk [vmem:[#allocation3 + $0xc0] sm:$0xff] %vm4892_vm5, %v8495_v58 }
 0xf13   : > { %v12432_v40 = vpop.permute.xlu0 %12431  ;;  %v16773_v58 = vld [vmem:[#allocation3 + $0xb0] sm:$0xff] }
 0xf14   : > { %12504 = vst.msk [vmem:[#allocation3 + $0xc0] sm:$0xff] %vm12479_vm6, %v12432_v40 }
 0xf17   : > { %v16274_v51 = vpop.permute.xlu0 %16273 }
 0xf18   : > { %16346 = vst.msk [vmem:[#allocation3 + $0xc0] sm:$0xff] %vm16321_vm8, %v16274_v51 }
 0xf1b   : > { %v8499_v21 = vpop.permute.xlu0 %8498 }
 0xf1c   : > { %8568 = vst.msk [vmem:[#allocation3 + $0xd0] sm:$0xff] %vm4892_vm5, %v8499_v21 }
 0xf1f   : > { %v12436_v23 = vpop.permute.xlu0 %12435  ;;  %v16775_v40 = vld [vmem:[#allocation3 + $0xc0] sm:$0xff] }
 0xf20   : > { %12506 = vst.msk [vmem:[#allocation3 + $0xd0] sm:$0xff] %vm12479_vm6, %v12436_v23 }
 0xf23   : > { %v16278_v17 = vpop.permute.xlu0 %16277 }
 0xf24   : > { %16348 = vst.msk [vmem:[#allocation3 + $0xd0] sm:$0xff] %vm16321_vm8, %v16278_v17 }
 0xf27   : > { %v8503_v62 = vpop.permute.xlu0 %8502 }
 0xf28   : > { %8570 = vst.msk [vmem:[#allocation3 + $0xe0] sm:$0xff] %vm4892_vm5, %v8503_v62 }
 0xf2b   : > { %v12440_v26 = vpop.permute.xlu0 %12439  ;;  %v16777_v62 = vld [vmem:[#allocation3 + $0xd0] sm:$0xff] }
 0xf2c   : > { %12508 = vst.msk [vmem:[#allocation3 + $0xe0] sm:$0xff] %vm12479_vm6, %v12440_v26 }
 0xf2f   : > { %v16282_v7 = vpop.permute.xlu0 %16281 }
 0xf30   : > { %16350 = vst.msk [vmem:[#allocation3 + $0xe0] sm:$0xff] %vm16321_vm8, %v16282_v7 }
 0xf33   : > { %v8507_v24 = vpop.permute.xlu0 %8506 }
 0xf34   : > { %8572 = vst.msk [vmem:[#allocation3 + $0xf0] sm:$0xff] %vm4892_vm5, %v8507_v24 }
 0xf37   : > { %v12444_v5 = vpop.permute.xlu0 %12443  ;;  %v16779_v26 = vld [vmem:[#allocation3 + $0xe0] sm:$0xff] }
 0xf38   : > { %12510 = vst.msk [vmem:[#allocation3 + $0xf0] sm:$0xff] %vm12479_vm6, %v12444_v5 }
 0xf3b   : > { %v16286_v19 = vpop.permute.xlu0 %16285 }
 0xf3c   : > { %16352 = vst.msk [vmem:[#allocation3 + $0xf0] sm:$0xff] %vm16321_vm8, %v16286_v19 }
 0xf41   : > { %v16748_v30 = vpop.xlane.xlu1 %16747 }
 0xf42   : > { %27221 = vrcp.f32 %v16748_v30 }
 0xf43   : > { %v16781_v7 = vld [vmem:[#allocation3 + $0xf0] sm:$0xff] }
 0xf45   : > { %v8493_v37 = vpop.permute.xlu1 %8492 }
 0xf46   : > { %8565 = vst.msk [vmem:[#allocation3 + $0xb8] sm:$0xff] %vm4892_vm5, %v8493_v37 }
 0xf49   : > { %v12430_v29 = vpop.permute.xlu1 %12429 }
 0xf4a   : > { %12503 = vst.msk [vmem:[#allocation3 + $0xb8] sm:$0xff] %vm12479_vm6, %v12430_v29 }
 0xf4c   : > { %v27222_v34 = vpop.eup %27221 }
 0xf4d   : > { %v16750_v43 = vmul.f32 %v27222_v34, %v32736_v27  ;;  %v16272_v0 = vpop.permute.xlu1 %16271 }
 0xf4e   : > { %16345 = vst.msk [vmem:[#allocation3 + $0xb8] sm:$0xff] %vm16321_vm8, %v16272_v0 }
 0xf4f   : > { %v32847_v55 = vrot.slane %v16750_v43, %v16785_v14 }
 0xf51   : > { %v16787_v50 = vmul.f32 %v32847_v55, %v16751_v22  ;;  %v16788_v27 = vmul.f32 %v32847_v55, %v16752_v47  ;;  %v16789_v32 = vmul.f32 %v32847_v55, %v16753_v16  ;;  %v16790_v25 = vmul.f32 %v32847_v55, %v16754_v33  ;;  %v8497_v1 = vpop.permute.xlu1 %8496 }
 0xf52   : > { %v16791_v8 = vmul.f32 %v32847_v55, %v16755_v56  ;;  %v16792_v36 = vmul.f32 %v32847_v55, %v16756_v42  ;;  %v16793_v60 = vmul.f32 %v32847_v55, %v16757_v2  ;;  %v16794_v6 = vmul.f32 %v32847_v55, %v16758_v54  ;;  %8567 = vst.msk [vmem:[#allocation3 + $0xc8] sm:$0xff] %vm4892_vm5, %v8497_v1 }
 0xf53   : > { %v16795_v9 = vmul.f32 %v32847_v55, %v16759_v39  ;;  %v16796_v4 = vmul.f32 %v32847_v55, %v16760_v15  ;;  %v16797_v28 = vmul.f32 %v32847_v55, %v16761_v3  ;;  %v16798_v35 = vmul.f32 %v32847_v55, %v16762_v49  ;;  %16819 = vst.msk [vmem:[#allocation2 + $0x19] sm:$0xff] %vm549_vm2, %v16787_v50 }
 0xf54   : > { %16820 = vst.msk [vmem:[#allocation2 + $0x21] sm:$0xff] %vm549_vm2, %v16788_v27  ;;  %16821 = vst.msk [vmem:[#allocation2 + $0x31] sm:$0xff] %vm549_vm2, %v16789_v32  ;;  %v16799_v52 = vmul.f32 %v32847_v55, %v16763_v18  ;;  %v16800_v38 = vmul.f32 %v32847_v55, %v16764_v12  ;;  %v16801_v10 = vmul.f32 %v32847_v55, %v16765_v45 }
 0xf55   : > { %16822 = vst.msk [vmem:[#allocation2 + $0x39] sm:$0xff] %vm549_vm2, %v16790_v25  ;;  %v16802_v48 = vmul.f32 %v32847_v55, %v16766_v53  ;;  %16823 = vst.msk [vmem:[#allocation2 + $0x49] sm:$0xff] %vm549_vm2, %v16791_v8  ;;  %v16803_v31 = vmul.f32 %v32847_v55, %v16767_v20  ;;  %v16804_v13 = vmul.f32 %v32847_v55, %v16768_v41  ;;  %v16774_v23 = vld [vmem:[#allocation3 + $0xb8] sm:$0xff]  ;;  %v12434_v17 = vpop.permute.xlu1 %12433 }
 0xf56   : > { %16824 = vst.msk [vmem:[#allocation2 + $0x51] sm:$0xff] %vm549_vm2, %v16792_v36  ;;  %16825 = vst.msk [vmem:[#allocation2 + $0x61] sm:$0xff] %vm549_vm2, %v16793_v60  ;;  %v16805_v51 = vmul.f32 %v32847_v55, %v16769_v59  ;;  %v16806_v21 = vmul.f32 %v32847_v55, %v16770_v61  ;;  %v16807_v24 = vmul.f32 %v32847_v55, %v16771_v44 }
 0xf57   : > { %16826 = vst.msk [vmem:[#allocation2 + $0x69] sm:$0xff] %vm549_vm2, %v16794_v6  ;;  %16827 = vst.msk [vmem:[#allocation2 + $0x79] sm:$0xff] %vm549_vm2, %v16795_v9  ;;  %v16808_v5 = vmul.f32 %v32847_v55, %v16772_v11  ;;  %v16809_v19 = vmul.f32 %v32847_v55, %v16773_v58  ;;  %v16811_v30 = vmul.f32 %v32847_v55, %v16775_v40 }
 0xf58   : > { %16828 = vst.msk [vmem:[#allocation2 + $0x81] sm:$0xff] %vm549_vm2, %v16796_v4  ;;  %16829 = vst.msk [vmem:[#allocation2 + $0x91] sm:$0xff] %vm549_vm2, %v16797_v28  ;;  %v16813_v63 = vmul.f32 %v32847_v55, %v16777_v62  ;;  %v16815_v37 = vmul.f32 %v32847_v55, %v16779_v26  ;;  %v16817_v57 = vmul.f32 %v32847_v55, %v16781_v7 }
 0xf59   : > { %16830 = vst.msk [vmem:[#allocation2 + $0x99] sm:$0xff] %vm549_vm2, %v16798_v35  ;;  %16831 = vst.msk [vmem:[#allocation2 + $0xa9] sm:$0xff] %vm549_vm2, %v16799_v52  ;;  %v16810_v29 = vmul.f32 %v32847_v55, %v16774_v23  ;;  %v16276_v14 = vpop.permute.xlu1 %16275  ;;  %v21811_v23 = vld [vmem:[%s33882_s15 + $0x38] sm:$0xff] }
 0xf5a   : > { %16832 = vst.msk [vmem:[#allocation2 + $0xb1] sm:$0xff] %vm549_vm2, %v16800_v38  ;;  %16833 = vst.msk [vmem:[#allocation2 + $0xc1] sm:$0xff] %vm549_vm2, %v16801_v10  ;;  %v32908_v34 = vld [vmem:[#allocation2 + $0x19] sm:$0xff] }
 0xf5b   : > { %16834 = vst.msk [vmem:[#allocation2 + $0xc9] sm:$0xff] %vm549_vm2, %v16802_v48  ;;  %16835 = vst.msk [vmem:[#allocation2 + $0xd9] sm:$0xff] %vm549_vm2, %v16803_v31  ;;  %v32910_v43 = vld [vmem:[#allocation2 + $0x21] sm:$0xff]  ;;  %25420 = vmatprep.mubr.msk.f32.mxu1 %vm549_vm2, %v32908_v34  ;;  %v32916_v0 = vld [vmem:[#allocation2 + $0x31] sm:$0xff] }
 0xf5c   : > { %12505 = vst.msk [vmem:[#allocation3 + $0xc8] sm:$0xff] %vm12479_vm6, %v12434_v17  ;;  %25421 = vmatmul.mubr.msk.f32.gmra.mrb[70].mxu1 %vm549_vm2, %v32910_v43  ;;  %v32921_v22 = vld [vmem:[#allocation2 + $0x39] sm:$0xff]  ;;  %v32925_v33 = vld [vmem:[#allocation2 + $0x49] sm:$0xff] }
 0xf5d   : > { %16836 = vst.msk [vmem:[#allocation2 + $0xe1] sm:$0xff] %vm549_vm2, %v16804_v13  ;;  %16837 = vst.msk [vmem:[#allocation2 + $0xf1] sm:$0xff] %vm549_vm2, %v16805_v51  ;;  %v8501_v47 = vpop.permute.xlu1 %8500  ;;  %25423 = vmatprep.mubr.msk.f32.mxu1 %vm549_vm2, %v32916_v0  ;;  %v32931_v54 = vld [vmem:[#allocation2 + $0x51] sm:$0xff]  ;;  %v32936_v15 = vld [vmem:[#allocation2 + $0x61] sm:$0xff] }
 0xf5e   : > { %16838 = vst.msk [vmem:[#allocation2 + $0xf9] sm:$0xff] %vm549_vm2, %v16806_v21  ;;  %16839 = vst.msk [vmem:[#allocation2 + $0x109] sm:$0xff] %vm549_vm2, %v16807_v24  ;;  %v32941_v12 = vld [vmem:[#allocation2 + $0x69] sm:$0xff]  ;;  %v32945_v53 = vld [vmem:[#allocation2 + $0x79] sm:$0xff] }
 0xf5f   : > { %16840 = vst.msk [vmem:[#allocation2 + $0x111] sm:$0xff] %vm549_vm2, %v16808_v5  ;;  %16841 = vst.msk [vmem:[#allocation2 + $0x121] sm:$0xff] %vm549_vm2, %v16809_v19  ;;  %v32950_v50 = vld [vmem:[#allocation2 + $0x81] sm:$0xff]  ;;  %v32954_v27 = vld [vmem:[#allocation2 + $0x91] sm:$0xff] }
 0xf60   : > { %16843 = vst.msk [vmem:[#allocation2 + $0x139] sm:$0xff] %vm549_vm2, %v16811_v30  ;;  %16845 = vst.msk [vmem:[#allocation2 + $0x151] sm:$0xff] %vm549_vm2, %v16813_v63  ;;  %25424 = vmatmul.mubr.msk.f32.gmra.mrb[72].mxu1 %vm549_vm2, %v32921_v22  ;;  %v32960_v41 = vld [vmem:[#allocation2 + $0x99] sm:$0xff]  ;;  %v32965_v61 = vld [vmem:[#allocation2 + $0xa9] sm:$0xff] }
 0xf61   : > { %16847 = vst.msk [vmem:[#allocation2 + $0x169] sm:$0xff] %vm549_vm2, %v16815_v37  ;;  %16849 = vst.msk [vmem:[#allocation2 + $0x181] sm:$0xff] %vm549_vm2, %v16817_v57  ;;  %v12438_v42 = vpop.permute.xlu1 %12437  ;;  %25426 = vmatprep.mubr.msk.f32.mxu1 %vm549_vm2, %v32925_v33  ;;  %v32970_v3 = vld [vmem:[#allocation2 + $0xb1] sm:$0xff]  ;;  %v32974_v8 = vld [vmem:[#allocation2 + $0xc1] sm:$0xff] }
 0xf62   : > { %16842 = vst.msk [vmem:[#allocation2 + $0x129] sm:$0xff] %vm549_vm2, %v16810_v29  ;;  %v32979_v60 = vld [vmem:[#allocation2 + $0xc9] sm:$0xff]  ;;  %v32983_v6 = vld [vmem:[#allocation2 + $0xd9] sm:$0xff] }
 0xf63   : > { %16347 = vst.msk [vmem:[#allocation3 + $0xc8] sm:$0xff] %vm16321_vm8, %v16276_v14  ;;  %v16851_v13 = vld [vmem:[#allocation2] sm:$0xff]  ;;  %v21810_v21 = vld [vmem:[%s33882_s15 + $0x30] sm:$0xff]  ;;  %v16852_v17 = vld [vmem:[#allocation2 + $0x8] sm:$0xff] }
 0xf64   : > { %8569 = vst.msk [vmem:[#allocation3 + $0xd8] sm:$0xff] %vm4892_vm5, %v8501_v47  ;;  %25427 = vmatmul.mubr.msk.f32.gmra.mrb[74].mxu1 %vm549_vm2, %v32931_v54  ;;  %v32989_v9 = vld [vmem:[#allocation2 + $0xe1] sm:$0xff]  ;;  %v32994_v4 = vld [vmem:[#allocation2 + $0xf1] sm:$0xff]  ;;  %v33052_v62 = vpack.c.bf16 %v21811_v23, %v21810_v21 }
 0xf65   : > { %12507 = vst.msk [vmem:[#allocation3 + $0xd8] sm:$0xff] %vm12479_vm6, %v12438_v42  ;;  %v16280_v49 = vpop.permute.xlu1 %16279  ;;  %25429 = vmatprep.mubr.msk.f32.mxu1 %vm549_vm2, %v32936_v15  ;;  %v32999_v35 = vld [vmem:[#allocation2 + $0xf9] sm:$0xff]  ;;  %v33003_v20 = vld [vmem:[#allocation2 + $0x109] sm:$0xff] }
 0xf66   : > { %16349 = vst.msk [vmem:[#allocation3 + $0xd8] sm:$0xff] %vm16321_vm8, %v16280_v49  ;;  %v33007_v59 = vld [vmem:[#allocation2 + $0x111] sm:$0xff]  ;;  %v33011_v44 = vld [vmem:[#allocation2 + $0x121] sm:$0xff] }
 0xf67   : > { %v33021_v48 = vld [vmem:[#allocation2 + $0x139] sm:$0xff]  ;;  %v33029_v40 = vld [vmem:[#allocation2 + $0x151] sm:$0xff]  ;;  %v33085_v63 = vld [vmem:[#allocation2 + $0x68] sm:$0xff] }
 0xf68   : > { %25430 = vmatmul.mubr.msk.f32.gmra.mrb[76].mxu1 %vm549_vm2, %v32941_v12  ;;  %34968 = vst [vmem:[#allocation61_spill] sm:$0xff] %v33021_v48  ;;  %34970 = vst [vmem:[#allocation36_spill] sm:$0xff] %v33029_v40  ;;  %v33037_v31 = vld [vmem:[#allocation2 + $0x169] sm:$0xff]  ;;  %v33055_v26 = vld [vmem:[#allocation2 + $0x18] sm:$0xff] }
 0xf69   : > { %v8505_v2 = vpop.permute.xlu1 %8504  ;;  %25432 = vmatprep.mubr.msk.f32.mxu1 %vm549_vm2, %v32945_v53  ;;  %v33016_v10 = vld [vmem:[#allocation2 + $0x129] sm:$0xff]  ;;  %34972 = vst [vmem:[#allocation73_spill] sm:$0xff] %v33037_v31  ;;  %v33061_v7 = vld [vmem:[#allocation2 + $0x20] sm:$0xff]  ;;  %v33069_v5 = vld [vmem:[#allocation2 + $0x38] sm:$0xff] }
 0xf6a   : > { %v16776_v16 = vld [vmem:[#allocation3 + $0xc8] sm:$0xff]  ;;  %8571 = vst.msk [vmem:[#allocation3 + $0xe8] sm:$0xff] %vm4892_vm5, %v8505_v2  ;;  %34967 = vst [vmem:[#allocation97_spill] sm:$0xff] %v33016_v10  ;;  %v33065_v24 = vld [vmem:[#allocation2 + $0x30] sm:$0xff] }
 0xf6b   : > { %v16812_v56 = vmul.f32 %v32847_v55, %v16776_v16  ;;  %v33077_v19 = vld [vmem:[#allocation2 + $0x50] sm:$0xff]  ;;  %v33081_v30 = vld [vmem:[#allocation2 + $0x60] sm:$0xff]  ;;  %v33089_v37 = vld [vmem:[#allocation2 + $0x78] sm:$0xff] }
 0xf6c   : > { %25433 = vmatmul.mubr.msk.f32.gmra.mrb[78].mxu1 %vm549_vm2, %v32950_v50  ;;  %v33093_v57 = vld [vmem:[#allocation2 + $0x80] sm:$0xff]  ;;  %v33097_v29 = vld [vmem:[#allocation2 + $0x90] sm:$0xff]  ;;  %v33101_v14 = vld [vmem:[#allocation2 + $0x98] sm:$0xff] }
 0xf6d   : > { %16844 = vst.msk [vmem:[#allocation2 + $0x141] sm:$0xff] %vm549_vm2, %v16812_v56  ;;  %v16778_v32 = vld [vmem:[#allocation3 + $0xd8] sm:$0xff]  ;;  %v12442_v25 = vpop.permute.xlu1 %12441  ;;  %25435 = vmatprep.mubr.msk.f32.mxu1 %vm549_vm2, %v32954_v27  ;;  %v33109_v16 = vld [vmem:[#allocation2 + $0xb0] sm:$0xff]  ;;  %v33113_v42 = vld [vmem:[#allocation2 + $0xc0] sm:$0xff] }
 0xf6e   : > { %v16814_v1 = vmul.f32 %v32847_v55, %v16778_v32  ;;  %12509 = vst.msk [vmem:[#allocation3 + $0xe8] sm:$0xff] %vm12479_vm6, %v12442_v25  ;;  %v33105_v47 = vld [vmem:[#allocation2 + $0xa8] sm:$0xff]  ;;  %v33121_v49 = vld [vmem:[#allocation2 + $0xd8] sm:$0xff]  ;;  %v33125_v2 = vld [vmem:[#allocation2 + $0xe0] sm:$0xff] }
 0xf6f   : > { %v33117_v56 = vld [vmem:[#allocation2 + $0xc8] sm:$0xff]  ;;  %v33129_v32 = vld [vmem:[#allocation2 + $0xf0] sm:$0xff]  ;;  %v33133_v25 = vld [vmem:[#allocation2 + $0xf8] sm:$0xff] }
 0xf70   : > { %16846 = vst.msk [vmem:[#allocation2 + $0x159] sm:$0xff] %vm549_vm2, %v16814_v1  ;;  %25436 = vmatmul.mubr.msk.f32.gmra.mrb[80].mxu1 %vm549_vm2, %v32960_v41  ;;  %v33137_v1 = vld [vmem:[#allocation2 + $0x108] sm:$0xff]  ;;  %v21844_v23 = vld [vmem:[%s33882_s15 + $0x40] sm:$0xff] }
 0xf71   : > { %v16284_v39 = vpop.permute.xlu1 %16283  ;;  %25438 = vmatprep.mubr.msk.f32.mxu1 %vm549_vm2, %v32965_v61 }
 0xf72   : > { %16351 = vst.msk [vmem:[#allocation3 + $0xe8] sm:$0xff] %vm16321_vm8, %v16284_v39  ;;  %v33141_v39 = vld [vmem:[#allocation2 + $0x110] sm:$0xff] }
 0xf74   : > { %25439 = vmatmul.mubr.msk.f32.gmra.mrb[82].mxu1 %vm549_vm2, %v32970_v3  ;;  %v33025_v58 = vld [vmem:[#allocation2 + $0x141] sm:$0xff] }
 0xf75   : > { %v8509_v36 = vpop.permute.xlu1 %8508  ;;  %25441 = vmatprep.mubr.msk.f32.mxu1 %vm549_vm2, %v32974_v8  ;;  %34969 = vst [vmem:[#allocation29_spill] sm:$0xff] %v33025_v58 }
 0xf76   : > { %8573 = vst.msk [vmem:[#allocation3 + $0xf8] sm:$0xff] %vm4892_vm5, %v8509_v36  ;;  %v33145_v36 = vld [vmem:[#allocation2 + $0x120] sm:$0xff] }
 0xf78   : > { %25442 = vmatmul.mubr.msk.f32.gmra.mrb[84].mxu1 %vm549_vm2, %v32979_v60 }
 0xf79   : > { %v16780_v11 = vld [vmem:[#allocation3 + $0xe8] sm:$0xff]  ;;  %v12446_v18 = vpop.permute.xlu1 %12445  ;;  %25444 = vmatprep.mubr.msk.f32.mxu1 %vm549_vm2, %v32983_v6 }
 0xf7a   : > { %v16816_v45 = vmul.f32 %v32847_v55, %v16780_v11  ;;  %12511 = vst.msk [vmem:[#allocation3 + $0xf8] sm:$0xff] %vm12479_vm6, %v12446_v18  ;;  %v33149_v11 = vld [vmem:[#allocation2 + $0x128] sm:$0xff]  ;;  %v33153_v18 = vld [vmem:[#allocation2 + $0x138] sm:$0xff] }
 0xf7c   : > { %16848 = vst.msk [vmem:[#allocation2 + $0x171] sm:$0xff] %vm549_vm2, %v16816_v45  ;;  %25445 = vmatmul.mubr.msk.f32.gmra.mrb[86].mxu1 %vm549_vm2, %v32989_v9  ;;  %v33157_v45 = vld [vmem:[#allocation2 + $0x140] sm:$0xff] }
 0xf7d   : > { %v16288_v28 = vpop.permute.xlu1 %16287  ;;  %25447 = vmatprep.mubr.msk.f32.mxu1 %vm549_vm2, %v32994_v4 }
 0xf7e   : > { %16353 = vst.msk [vmem:[#allocation3 + $0xf8] sm:$0xff] %vm16321_vm8, %v16288_v28  ;;  %v33161_v28 = vld [vmem:[#allocation2 + $0x150] sm:$0xff] }
 0xf80   : > { %25448 = vmatmul.mubr.msk.f32.gmra.mrb[88].mxu1 %vm549_vm2, %v32999_v35 }
 0xf81   : > { %25450 = vmatprep.mubr.msk.f32.mxu1 %vm549_vm2, %v33003_v20 }
 0xf83   : > { %v33041_v51 = vld [vmem:[#allocation2 + $0x171] sm:$0xff] }
 0xf84   : > { %25451 = vmatmul.mubr.msk.f32.gmra.mrb[90].mxu1 %vm549_vm2, %v33007_v59  ;;  %34973 = vst [vmem:[#allocation65_spill] sm:$0xff] %v33041_v51  ;;  %v33173_v21 = vld [vmem:[#allocation2 + $0x170] sm:$0xff] }
 0xf85   : > { %v16782_v52 = vld [vmem:[#allocation3 + $0xf8] sm:$0xff]  ;;  %25453 = vmatprep.mubr.msk.f32.mxu1 %vm549_vm2, %v33011_v44 }
 0xf86   : > { %v16818_v38 = vmul.f32 %v32847_v55, %v16782_v52  ;;  %v33033_v55 = vld [vmem:[#allocation2 + $0x159] sm:$0xff] }
 0xf87   : > { %34971 = vst [vmem:[#allocation44_spill] sm:$0xff] %v33033_v55  ;;  %v33165_v52 = vld [vmem:[#allocation2 + $0x158] sm:$0xff] }
 0xf88   : > { %16850 = vst.msk [vmem:[#allocation2 + $0x189] sm:$0xff] %vm549_vm2, %v16818_v38  ;;  %25454 = vmatmul.mubr.msk.f32.gmra.mrb[92].mxu1 %vm549_vm2, %v33016_v10  ;;  %v33169_v38 = vld [vmem:[#allocation2 + $0x168] sm:$0xff] }
 0xf89   : > { %25456 = vmatprep.mubr.msk.f32.mxu1 %vm549_vm2, %v33021_v48 }
 0xf8c   : > { %25457 = vmatmul.mubr.msk.f32.gmra.mrb[94].mxu1 %vm549_vm2, %v33025_v58 }
 0xf8d   : > { %25459 = vmatprep.mubr.msk.f32.mxu1 %vm549_vm2, %v33029_v40  ;;  %v33193_v40 = vld [vmem:[#allocation2 + $0x22] sm:$0xff] }
 0xf90   : > { %25460 = vmatmul.mubr.msk.f32.gmra.mrb[96].mxu1 %vm549_vm2, %v33033_v55  ;;  %v33187_v55 = vld [vmem:[#allocation2 + $0x1a] sm:$0xff] }
 0xf91   : > { %25462 = vmatprep.mubr.msk.f32.mxu1 %vm549_vm2, %v33037_v31 }
 0xf94   : > { %25463 = vmatmul.mubr.msk.f32.gmra.mrb[98].mxu1 %vm549_vm2, %v33041_v51  ;;  %v17563_v51 = vld [vmem:[#allocation2 + $0xa] sm:$0xff] }
 0xf95   : > { %25469 = vmatprep.mubr.msk.f32.mxu1 %vm549_vm2, %v16851_v13  ;;  %v17562_v13 = vld [vmem:[#allocation2 + $0x2] sm:$0xff] }
 0xf98   : > { %25470 = vmatmul.mubr.msk.f32.vlgmr.msra.gmra.mrb[68].mxu1 %vm549_vm2, %v16852_v17  ;;  %v21845_v17 = vld [vmem:[%s33882_s15 + $0x48] sm:$0xff] }
 0xf99   : > { %25895 = vmatpush3.bf16.msra.mxu1 %v32830_v46  ;;  %25472 = vmatprep.mubr.msk.f32.mxu1 %vm549_vm2, %v33055_v26  ;;  %v33073_v46 = vld [vmem:[#allocation2 + $0x48] sm:$0xff]  ;;  %v33184_v31 = vpack.c.bf16 %v21845_v17, %v21844_v23  ;;  %v33209_v23 = vld [vmem:[#allocation2 + $0x52] sm:$0xff] }
 0xf9a   : > { %25897 = vmatprep.subr.bf16.mxu1 %v33052_v62  ;;  %34977 = vst [vmem:[#allocation21_spill] sm:$0xff] %v33209_v23  ;;  %v33213_v17 = vld [vmem:[#allocation2 + $0x62] sm:$0xff] }
 0xf9b   : > { %34978 = vst [vmem:[#allocation87_spill] sm:$0xff] %v33213_v17 }
 0xf9c   : > { %25473 = vmatmul.mubr.msk.f32.gmra.mrb[70].mxu1 %vm549_vm2, %v33061_v7 }
 0xf9d   : > { %25475 = vmatprep.mubr.msk.f32.mxu1 %vm549_vm2, %v33065_v24 }
 0xfa0   : > { %25476 = vmatmul.mubr.msk.f32.gmra.mrb[72].mxu1 %vm549_vm2, %v33069_v5 }
 0xfa1   : > { %25478 = vmatprep.mubr.msk.f32.mxu1 %vm549_vm2, %v33073_v46 }
 0xfa4   : > { %25479 = vmatmul.mubr.msk.f32.gmra.mrb[74].mxu1 %vm549_vm2, %v33077_v19 }
 0xfa5   : > { %25481 = vmatprep.mubr.msk.f32.mxu1 %vm549_vm2, %v33081_v30 }
 0xfa8   : > { %25482 = vmatmul.mubr.msk.f32.gmra.mrb[76].mxu1 %vm549_vm2, %v33085_v63 }
 0xfa9   : > { %25484 = vmatprep.mubr.msk.f32.mxu1 %vm549_vm2, %v33089_v37 }
 0xfac   : > { %25485 = vmatmul.mubr.msk.f32.gmra.mrb[78].mxu1 %vm549_vm2, %v33093_v57 }
 0xfad   : > { %25487 = vmatprep.mubr.msk.f32.mxu1 %vm549_vm2, %v33097_v29 }
 0xfb0   : > { %25488 = vmatmul.mubr.msk.f32.gmra.mrb[80].mxu1 %vm549_vm2, %v33101_v14 }
 0xfb1   : > { %25490 = vmatprep.mubr.msk.f32.mxu1 %vm549_vm2, %v33105_v47 }
 0xfb4   : > { %25491 = vmatmul.mubr.msk.f32.gmra.mrb[82].mxu1 %vm549_vm2, %v33109_v16 }
 0xfb5   : > { %25493 = vmatprep.mubr.msk.f32.mxu1 %vm549_vm2, %v33113_v42 }
 0xfb8   : > { %25494 = vmatmul.mubr.msk.f32.gmra.mrb[84].mxu1 %vm549_vm2, %v33117_v56 }
 0xfb9   : > { %25496 = vmatprep.mubr.msk.f32.mxu1 %vm549_vm2, %v33121_v49 }
 0xfbc   : > { %25497 = vmatmul.mubr.msk.f32.gmra.mrb[86].mxu1 %vm549_vm2, %v33125_v2 }
 0xfbd   : > { %25499 = vmatprep.mubr.msk.f32.mxu1 %vm549_vm2, %v33129_v32 }
 0xfc0   : > { %25500 = vmatmul.mubr.msk.f32.gmra.mrb[88].mxu1 %vm549_vm2, %v33133_v25 }
 0xfc1   : > { %25502 = vmatprep.mubr.msk.f32.mxu1 %vm549_vm2, %v33137_v1 }
 0xfc4   : > { %25503 = vmatmul.mubr.msk.f32.gmra.mrb[90].mxu1 %vm549_vm2, %v33141_v39 }
 0xfc5   : > { %25505 = vmatprep.mubr.msk.f32.mxu1 %vm549_vm2, %v33145_v36 }
 0xfc8   : > { %25506 = vmatmul.mubr.msk.f32.gmra.mrb[92].mxu1 %vm549_vm2, %v33149_v11 }
 0xfc9   : > { %25508 = vmatprep.mubr.msk.f32.mxu1 %vm549_vm2, %v33153_v18 }
 0xfcc   : > { %25509 = vmatmul.mubr.msk.f32.gmra.mrb[94].mxu1 %vm549_vm2, %v33157_v45 }
 0xfcd   : > { %25511 = vmatprep.mubr.msk.f32.mxu1 %vm549_vm2, %v33161_v28 }
 0xfd0   : > { %25512 = vmatmul.mubr.msk.f32.gmra.mrb[96].mxu1 %vm549_vm2, %v33165_v52 }
 0xfd1   : > { %25514 = vmatprep.mubr.msk.f32.mxu1 %vm549_vm2, %v33169_v38 }
 0xfd4   : > { %25515 = vmatmul.mubr.msk.f32.gmra.mrb[98].mxu1 %vm549_vm2, %v33173_v21 }
 0xfd5   : > { %25521 = vmatprep.mubr.msk.f32.mxu1 %vm549_vm2, %v17562_v13  ;;  %v33197_v13 = vld [vmem:[#allocation2 + $0x32] sm:$0xff] }
 0xfd6   : > { %34974 = vst [vmem:[#allocation92_spill] sm:$0xff] %v33197_v13 }
 0xfd8   : > { %25522 = vmatmul.mubr.msk.f32.vlgmr.msra.gmra.mrb[68].mxu1 %vm549_vm2, %v17563_v51  ;;  %v33201_v51 = vld [vmem:[#allocation2 + $0x3a] sm:$0xff] }
 0xfd9   : > { %25899 = vmatpush3.bf16.msra.mxu1 %v33052_v62  ;;  %25524 = vmatprep.mubr.msk.f32.mxu1 %vm549_vm2, %v33187_v55  ;;  %34975 = vst [vmem:[#allocation86_spill] sm:$0xff] %v33201_v51  ;;  %v33205_v62 = vld [vmem:[#allocation2 + $0x4a] sm:$0xff] }
 0xfda   : > { %25901 = vmatprep.subr.bf16.mxu1 %v33184_v31  ;;  %34976 = vst [vmem:[#allocation42_spill] sm:$0xff] %v33205_v62 }
 0xfdc   : > { %25525 = vmatmul.mubr.msk.f32.gmra.mrb[70].mxu1 %vm549_vm2, %v33193_v40 }
 0xfdd   : > { %25527 = vmatprep.mubr.msk.f32.mxu1 %vm549_vm2, %v33197_v13  ;;  %v33217_v13 = vld [vmem:[#allocation2 + $0x6a] sm:$0xff] }
 0xfde   : > { %34979 = vst [vmem:[#allocation77_spill] sm:$0xff] %v33217_v13 }
 0xfe0   : > { %25528 = vmatmul.mubr.msk.f32.gmra.mrb[72].mxu1 %vm549_vm2, %v33201_v51  ;;  %v33221_v51 = vld [vmem:[#allocation2 + $0x7a] sm:$0xff] }
 0xfe1   : > { %25530 = vmatprep.mubr.msk.f32.mxu1 %vm549_vm2, %v33205_v62  ;;  %34980 = vst [vmem:[#allocation103_spill] sm:$0xff] %v33221_v51  ;;  %v33225_v62 = vld [vmem:[#allocation2 + $0x82] sm:$0xff] }
 0xfe2   : > { %34981 = vst [vmem:[#allocation100_spill] sm:$0xff] %v33225_v62 }
 0xfe4   : > { %25531 = vmatmul.mubr.msk.f32.gmra.mrb[74].mxu1 %vm549_vm2, %v33209_v23  ;;  %v33229_v23 = vld [vmem:[#allocation2 + $0x92] sm:$0xff] }
 0xfe5   : > { %25533 = vmatprep.mubr.msk.f32.mxu1 %vm549_vm2, %v33213_v17  ;;  %34982 = vst [vmem:[#allocation82_spill] sm:$0xff] %v33229_v23  ;;  %v33233_v17 = vld [vmem:[#allocation2 + $0x9a] sm:$0xff] }
 0xfe6   : > { %34983 = vst [vmem:[#allocation32_spill] sm:$0xff] %v33233_v17 }
 0xfe8   : > { %25534 = vmatmul.mubr.msk.f32.gmra.mrb[76].mxu1 %vm549_vm2, %v33217_v13  ;;  %v33237_v13 = vld [vmem:[#allocation2 + $0xaa] sm:$0xff] }
 0xfe9   : > { %25536 = vmatprep.mubr.msk.f32.mxu1 %vm549_vm2, %v33221_v51  ;;  %34984 = vst [vmem:[#allocation30_spill] sm:$0xff] %v33237_v13  ;;  %v33241_v51 = vld [vmem:[#allocation2 + $0xb2] sm:$0xff] }
 0xfea   : > { %34985 = vst [vmem:[#allocation81_spill] sm:$0xff] %v33241_v51 }
 0xfec   : > { %25537 = vmatmul.mubr.msk.f32.gmra.mrb[78].mxu1 %vm549_vm2, %v33225_v62  ;;  %v33245_v62 = vld [vmem:[#allocation2 + $0xc2] sm:$0xff] }
 0xfed   : > { %25539 = vmatprep.mubr.msk.f32.mxu1 %vm549_vm2, %v33229_v23  ;;  %34986 = vst [vmem:[#allocation66_spill] sm:$0xff] %v33245_v62  ;;  %v33249_v23 = vld [vmem:[#allocation2 + $0xca] sm:$0xff] }
 0xfee   : > { %34987 = vst [vmem:[#allocation62_spill] sm:$0xff] %v33249_v23 }
 0xff0   : > { %25540 = vmatmul.mubr.msk.f32.gmra.mrb[80].mxu1 %vm549_vm2, %v33233_v17  ;;  %v33253_v17 = vld [vmem:[#allocation2 + $0xda] sm:$0xff] }
 0xff1   : > { %25542 = vmatprep.mubr.msk.f32.mxu1 %vm549_vm2, %v33237_v13  ;;  %34988 = vst [vmem:[#allocation37_spill] sm:$0xff] %v33253_v17  ;;  %v33257_v13 = vld [vmem:[#allocation2 + $0xe2] sm:$0xff] }
 0xff2   : > { %34989 = vst [vmem:[#allocation79_spill] sm:$0xff] %v33257_v13 }
 0xff4   : > { %25543 = vmatmul.mubr.msk.f32.gmra.mrb[82].mxu1 %vm549_vm2, %v33241_v51  ;;  %v33261_v51 = vld [vmem:[#allocation2 + $0xf2] sm:$0xff] }
 0xff5   : > { %25545 = vmatprep.mubr.msk.f32.mxu1 %vm549_vm2, %v33245_v62  ;;  %34990 = vst [vmem:[#allocation74_spill] sm:$0xff] %v33261_v51  ;;  %v33265_v62 = vld [vmem:[#allocation2 + $0xfa] sm:$0xff] }
 0xff6   : > { %34991 = vst [vmem:[#allocation85_spill] sm:$0xff] %v33265_v62 }
 0xff8   : > { %25546 = vmatmul.mubr.msk.f32.gmra.mrb[84].mxu1 %vm549_vm2, %v33249_v23  ;;  %v33269_v23 = vld [vmem:[#allocation2 + $0x10a] sm:$0xff] }
 0xff9   : > { %25548 = vmatprep.mubr.msk.f32.mxu1 %vm549_vm2, %v33253_v17  ;;  %34992 = vst [vmem:[#allocation59_spill] sm:$0xff] %v33269_v23  ;;  %v33273_v17 = vld [vmem:[#allocation2 + $0x112] sm:$0xff] }
 0xffa   : > { %34993 = vst [vmem:[#allocation5_spill] sm:$0xff] %v33273_v17 }
 0xffc   : > { %25549 = vmatmul.mubr.msk.f32.gmra.mrb[86].mxu1 %vm549_vm2, %v33257_v13  ;;  %v33277_v13 = vld [vmem:[#allocation2 + $0x122] sm:$0xff] }
 0xffd   : > { %25551 = vmatprep.mubr.msk.f32.mxu1 %vm549_vm2, %v33261_v51  ;;  %34994 = vst [vmem:[#allocation98_spill] sm:$0xff] %v33277_v13  ;;  %v33281_v51 = vld [vmem:[#allocation2 + $0x12a] sm:$0xff] }
 0xffe   : > { %34995 = vst [vmem:[#allocation106_spill] sm:$0xff] %v33281_v51 }
0x1000   : > { %25552 = vmatmul.mubr.msk.f32.gmra.mrb[88].mxu1 %vm549_vm2, %v33265_v62  ;;  %v33285_v62 = vld [vmem:[#allocation2 + $0x13a] sm:$0xff] }
0x1001   : > { %25554 = vmatprep.mubr.msk.f32.mxu1 %vm549_vm2, %v33269_v23  ;;  %34996 = vst [vmem:[#allocation46_spill] sm:$0xff] %v33285_v62  ;;  %v33289_v23 = vld [vmem:[#allocation2 + $0x142] sm:$0xff] }
0x1002   : > { %34997 = vst [vmem:[#allocation110_spill] sm:$0xff] %v33289_v23 }
0x1004   : > { %25555 = vmatmul.mubr.msk.f32.gmra.mrb[90].mxu1 %vm549_vm2, %v33273_v17  ;;  %v33293_v17 = vld [vmem:[#allocation2 + $0x152] sm:$0xff] }
0x1005   : > { %25557 = vmatprep.mubr.msk.f32.mxu1 %vm549_vm2, %v33277_v13  ;;  %34998 = vst [vmem:[#allocation105_spill] sm:$0xff] %v33293_v17  ;;  %v33297_v13 = vld [vmem:[#allocation2 + $0x15a] sm:$0xff] }
0x1006   : > { %34999 = vst [vmem:[#allocation40_spill] sm:$0xff] %v33297_v13 }
0x1008   : > { %25558 = vmatmul.mubr.msk.f32.gmra.mrb[92].mxu1 %vm549_vm2, %v33281_v51  ;;  %v33301_v51 = vld [vmem:[#allocation2 + $0x16a] sm:$0xff] }
0x1009   : > { %25560 = vmatprep.mubr.msk.f32.mxu1 %vm549_vm2, %v33285_v62  ;;  %v33305_v62 = vld [vmem:[#allocation2 + $0x172] sm:$0xff] }
0x100a   : > { %35000 = vst [vmem:[#allocation102_spill] sm:$0xff] %v33305_v62 }
0x100c   : > { %25561 = vmatmul.mubr.msk.f32.gmra.mrb[94].mxu1 %vm549_vm2, %v33289_v23  ;;  %v21878_v23 = vld [vmem:[%s33882_s15 + $0x50] sm:$0xff] }
0x100d   : > { %25563 = vmatprep.mubr.msk.f32.mxu1 %vm549_vm2, %v33293_v17  ;;  %v21879_v17 = vld [vmem:[%s33882_s15 + $0x58] sm:$0xff] }
0x1010   : > { %25564 = vmatmul.mubr.msk.f32.gmra.mrb[96].mxu1 %vm549_vm2, %v33297_v13  ;;  %v25904_v13 = vpack.c.bf16 %v21879_v17, %v21878_v23  ;;  %v21913_v23 = vld [vmem:[%s33882_s15 + $0x68] sm:$0xff] }
0x1011   : > { %25566 = vmatprep.mubr.msk.f32.mxu1 %vm549_vm2, %v33301_v51 }
0x1014   : > { %25567 = vmatmul.mubr.msk.f32.gmra.mrb[98].mxu1 %vm549_vm2, %v33305_v62 }
0x1015   : > { %25573 = vmatprep.mubr.msk.f32.mxu1 %vm549_vm2, %v33055_v26  ;;  %v33380_v26 = vld [vmem:[#allocation2 + $0x188] sm:$0xff] }
0x1018   : > { %25574 = vmatmul.mubr.msk.f32.vlgmr.msra.gmra.mrb[68].mxu1 %vm549_vm2, %v33061_v7  ;;  %v21912_v7 = vld [vmem:[%s33882_s15 + $0x60] sm:$0xff] }
0x1019   : > { %25903 = vmatpush3.bf16.msra.mxu1 %v33184_v31  ;;  %25576 = vmatprep.mubr.msk.f32.mxu1 %vm549_vm2, %v33065_v24  ;;  %v33376_v31 = vld [vmem:[#allocation2 + $0x180] sm:$0xff]  ;;  %v25908_v17 = vpack.c.bf16 %v21913_v23, %v21912_v7  ;;  %v35004_v7 = vld [vmem:[#allocation65_spill] sm:$0xff] }
0x101a   : > { %25905 = vmatprep.subr.bf16.mxu1 %v25904_v13  ;;  %v33450_v23 = vld [vmem:[#allocation2 + $0x181] sm:$0xff] }
0x101b   : > { %35005 = vst [vmem:[#allocation101_spill] sm:$0xff] %v33450_v23 }
0x101c   : > { %25577 = vmatmul.mubr.msk.f32.gmra.mrb[70].mxu1 %vm549_vm2, %v33069_v5 }
0x101d   : > { %25579 = vmatprep.mubr.msk.f32.mxu1 %vm549_vm2, %v33073_v46 }
0x1020   : > { %25580 = vmatmul.mubr.msk.f32.gmra.mrb[72].mxu1 %vm549_vm2, %v33077_v19 }
0x1021   : > { %25582 = vmatprep.mubr.msk.f32.mxu1 %vm549_vm2, %v33081_v30 }
0x1024   : > { %25583 = vmatmul.mubr.msk.f32.gmra.mrb[74].mxu1 %vm549_vm2, %v33085_v63 }
0x1025   : > { %25585 = vmatprep.mubr.msk.f32.mxu1 %vm549_vm2, %v33089_v37 }
0x1028   : > { %25586 = vmatmul.mubr.msk.f32.gmra.mrb[76].mxu1 %vm549_vm2, %v33093_v57 }
0x1029   : > { %25588 = vmatprep.mubr.msk.f32.mxu1 %vm549_vm2, %v33097_v29 }
0x102c   : > { %25589 = vmatmul.mubr.msk.f32.gmra.mrb[78].mxu1 %vm549_vm2, %v33101_v14 }
0x102d   : > { %25591 = vmatprep.mubr.msk.f32.mxu1 %vm549_vm2, %v33105_v47 }
0x1030   : > { %25592 = vmatmul.mubr.msk.f32.gmra.mrb[80].mxu1 %vm549_vm2, %v33109_v16 }
0x1031   : > { %25594 = vmatprep.mubr.msk.f32.mxu1 %vm549_vm2, %v33113_v42 }
0x1034   : > { %25595 = vmatmul.mubr.msk.f32.gmra.mrb[82].mxu1 %vm549_vm2, %v33117_v56 }
0x1035   : > { %25597 = vmatprep.mubr.msk.f32.mxu1 %vm549_vm2, %v33121_v49 }
0x1038   : > { %25598 = vmatmul.mubr.msk.f32.gmra.mrb[84].mxu1 %vm549_vm2, %v33125_v2 }
0x1039   : > { %25600 = vmatprep.mubr.msk.f32.mxu1 %vm549_vm2, %v33129_v32 }
0x103c   : > { %25601 = vmatmul.mubr.msk.f32.gmra.mrb[86].mxu1 %vm549_vm2, %v33133_v25 }
0x103d   : > { %25603 = vmatprep.mubr.msk.f32.mxu1 %vm549_vm2, %v33137_v1 }
0x1040   : > { %25604 = vmatmul.mubr.msk.f32.gmra.mrb[88].mxu1 %vm549_vm2, %v33141_v39 }
0x1041   : > { %25606 = vmatprep.mubr.msk.f32.mxu1 %vm549_vm2, %v33145_v36 }
0x1044   : > { %25607 = vmatmul.mubr.msk.f32.gmra.mrb[90].mxu1 %vm549_vm2, %v33149_v11 }
0x1045   : > { %25609 = vmatprep.mubr.msk.f32.mxu1 %vm549_vm2, %v33153_v18 }
0x1048   : > { %25610 = vmatmul.mubr.msk.f32.gmra.mrb[92].mxu1 %vm549_vm2, %v33157_v45 }
0x1049   : > { %25612 = vmatprep.mubr.msk.f32.mxu1 %vm549_vm2, %v33161_v28 }
0x104c   : > { %25613 = vmatmul.mubr.msk.f32.gmra.mrb[94].mxu1 %vm549_vm2, %v33165_v52 }
0x104d   : > { %25615 = vmatprep.mubr.msk.f32.mxu1 %vm549_vm2, %v33169_v38 }
0x1050   : > { %25616 = vmatmul.mubr.msk.f32.gmra.mrb[96].mxu1 %vm549_vm2, %v33173_v21 }
0x1051   : > { %25618 = vmatprep.mubr.msk.f32.mxu1 %vm549_vm2, %v33376_v31 }
0x1054   : > { %25619 = vmatmul.mubr.msk.f32.gmra.mrb[98].mxu1 %vm549_vm2, %v33380_v26 }
0x1055   : > { %25625 = vmatprep.mubr.msk.f32.mxu1 %vm549_vm2, %v32908_v34  ;;  %v35001_v34 = vld [vmem:[#allocation36_spill] sm:$0xff] }
0x1058   : > { %25626 = vmatmul.mubr.msk.f32.vlgmr.msra.gmra.mrb[68].mxu1 %vm549_vm2, %v32910_v43  ;;  %v35002_v43 = vld [vmem:[#allocation44_spill] sm:$0xff] }
0x1059   : > { %25907 = vmatpush3.bf16.msra.mxu1 %v25904_v13  ;;  %25628 = vmatprep.mubr.msk.f32.mxu1 %vm549_vm2, %v32916_v0  ;;  %v35003_v13 = vld [vmem:[#allocation73_spill] sm:$0xff] }
0x105a   : > { %25909 = vmatprep.subr.bf16.mxu1 %v25908_v17 }
0x105c   : > { %25629 = vmatmul.mubr.msk.f32.gmra.mrb[70].mxu1 %vm549_vm2, %v32921_v22 }
0x105d   : > { %25631 = vmatprep.mubr.msk.f32.mxu1 %vm549_vm2, %v32925_v33 }
0x1060   : > { %25632 = vmatmul.mubr.msk.f32.gmra.mrb[72].mxu1 %vm549_vm2, %v32931_v54 }
0x1061   : > { %25634 = vmatprep.mubr.msk.f32.mxu1 %vm549_vm2, %v32936_v15 }
0x1064   : > { %25635 = vmatmul.mubr.msk.f32.gmra.mrb[74].mxu1 %vm549_vm2, %v32941_v12 }
0x1065   : > { %25637 = vmatprep.mubr.msk.f32.mxu1 %vm549_vm2, %v32945_v53 }
0x1068   : > { %25638 = vmatmul.mubr.msk.f32.gmra.mrb[76].mxu1 %vm549_vm2, %v32950_v50 }
0x1069   : > { %25640 = vmatprep.mubr.msk.f32.mxu1 %vm549_vm2, %v32954_v27 }
0x106c   : > { %25641 = vmatmul.mubr.msk.f32.gmra.mrb[78].mxu1 %vm549_vm2, %v32960_v41 }
0x106d   : > { %25643 = vmatprep.mubr.msk.f32.mxu1 %vm549_vm2, %v32965_v61 }
0x1070   : > { %25644 = vmatmul.mubr.msk.f32.gmra.mrb[80].mxu1 %vm549_vm2, %v32970_v3 }
0x1071   : > { %25646 = vmatprep.mubr.msk.f32.mxu1 %vm549_vm2, %v32974_v8 }
0x1074   : > { %25647 = vmatmul.mubr.msk.f32.gmra.mrb[82].mxu1 %vm549_vm2, %v32979_v60 }
0x1075   : > { %25649 = vmatprep.mubr.msk.f32.mxu1 %vm549_vm2, %v32983_v6 }
0x1078   : > { %25650 = vmatmul.mubr.msk.f32.gmra.mrb[84].mxu1 %vm549_vm2, %v32989_v9 }
0x1079   : > { %25652 = vmatprep.mubr.msk.f32.mxu1 %vm549_vm2, %v32994_v4 }
0x107c   : > { %25653 = vmatmul.mubr.msk.f32.gmra.mrb[86].mxu1 %vm549_vm2, %v32999_v35 }
0x107d   : > { %25655 = vmatprep.mubr.msk.f32.mxu1 %vm549_vm2, %v33003_v20 }
0x1080   : > { %25656 = vmatmul.mubr.msk.f32.gmra.mrb[88].mxu1 %vm549_vm2, %v33007_v59 }
0x1081   : > { %25658 = vmatprep.mubr.msk.f32.mxu1 %vm549_vm2, %v33011_v44 }
0x1084   : > { %25659 = vmatmul.mubr.msk.f32.gmra.mrb[90].mxu1 %vm549_vm2, %v33016_v10  ;;  %v35010_v10 = vld [vmem:[#allocation21_spill] sm:$0xff] }
0x1085   : > { %25661 = vmatprep.mubr.msk.f32.mxu1 %vm549_vm2, %v33021_v48  ;;  %v33454_v48 = vld [vmem:[#allocation2 + $0x189] sm:$0xff] }
0x1086   : > { %35006 = vst [vmem:[#allocation108_spill] sm:$0xff] %v33454_v48 }
0x1088   : > { %25662 = vmatmul.mubr.msk.f32.gmra.mrb[92].mxu1 %vm549_vm2, %v33025_v58  ;;  %v35009_v58 = vld [vmem:[#allocation42_spill] sm:$0xff] }
0x1089   : > { %25664 = vmatprep.mubr.msk.f32.mxu1 %vm549_vm2, %v35001_v34  ;;  %v21946_v34 = vld [vmem:[%s33882_s15 + $0x70] sm:$0xff] }
0x108c   : > { %25665 = vmatmul.mubr.msk.f32.gmra.mrb[94].mxu1 %vm549_vm2, %v35002_v43  ;;  %v21947_v43 = vld [vmem:[%s33882_s15 + $0x78] sm:$0xff] }
0x108d   : > { %25667 = vmatprep.mubr.msk.f32.mxu1 %vm549_vm2, %v35003_v13  ;;  %v35008_v13 = vld [vmem:[#allocation86_spill] sm:$0xff] }
0x1090   : > { %25668 = vmatmul.mubr.msk.f32.gmra.mrb[96].mxu1 %vm549_vm2, %v35004_v7  ;;  %v25912_v7 = vpack.c.bf16 %v21947_v43, %v21946_v34  ;;  %v35015_v34 = vld [vmem:[#allocation82_spill] sm:$0xff]  ;;  %v35016_v43 = vld [vmem:[#allocation32_spill] sm:$0xff] }
0x1091   : > { %25670 = vmatprep.mubr.msk.f32.mxu1 %vm549_vm2, %v33450_v23  ;;  %v35007_v23 = vld [vmem:[#allocation92_spill] sm:$0xff] }
0x1094   : > { %25671 = vmatmul.mubr.msk.f32.gmra.mrb[98].mxu1 %vm549_vm2, %v33454_v48  ;;  %v35011_v48 = vld [vmem:[#allocation87_spill] sm:$0xff] }
0x1095   : > { %25677 = vmatprep.mubr.msk.f32.mxu1 %vm549_vm2, %v33187_v55  ;;  %v35012_v55 = vld [vmem:[#allocation77_spill] sm:$0xff] }
0x1098   : > { %25678 = vmatmul.mubr.msk.f32.vlgmr.msra.gmra.mrb[68].mxu1 %vm549_vm2, %v33193_v40  ;;  %v35013_v40 = vld [vmem:[#allocation103_spill] sm:$0xff] }
0x1099   : > { %25911 = vmatpush3.bf16.msra.mxu1 %v25908_v17  ;;  %25680 = vmatprep.mubr.msk.f32.mxu1 %vm549_vm2, %v35007_v23  ;;  %v35014_v17 = vld [vmem:[#allocation100_spill] sm:$0xff] }
0x109a   : > { %25913 = vmatprep.subr.bf16.mxu1 %v25912_v7 }
0x109c   : > { %25681 = vmatmul.mubr.msk.f32.gmra.mrb[70].mxu1 %vm549_vm2, %v35008_v13 }
0x109d   : > { %25683 = vmatprep.mubr.msk.f32.mxu1 %vm549_vm2, %v35009_v58  ;;  %v35017_v58 = vld [vmem:[#allocation30_spill] sm:$0xff] }
0x10a0   : > { %25684 = vmatmul.mubr.msk.f32.gmra.mrb[72].mxu1 %vm549_vm2, %v35010_v10  ;;  %v35018_v10 = vld [vmem:[#allocation81_spill] sm:$0xff] }
0x10a1   : > { %25686 = vmatprep.mubr.msk.f32.mxu1 %vm549_vm2, %v35011_v48  ;;  %v35019_v48 = vld [vmem:[#allocation66_spill] sm:$0xff] }
0x10a4   : > { %25687 = vmatmul.mubr.msk.f32.gmra.mrb[74].mxu1 %vm549_vm2, %v35012_v55  ;;  %v35020_v55 = vld [vmem:[#allocation62_spill] sm:$0xff] }
0x10a5   : > { %25689 = vmatprep.mubr.msk.f32.mxu1 %vm549_vm2, %v35013_v40  ;;  %v35021_v40 = vld [vmem:[#allocation37_spill] sm:$0xff] }
0x10a8   : > { %25690 = vmatmul.mubr.msk.f32.gmra.mrb[76].mxu1 %vm549_vm2, %v35014_v17  ;;  %v35022_v17 = vld [vmem:[#allocation79_spill] sm:$0xff] }
0x10a9   : > { %25692 = vmatprep.mubr.msk.f32.mxu1 %vm549_vm2, %v35015_v34  ;;  %v35023_v34 = vld [vmem:[#allocation74_spill] sm:$0xff] }
0x10ac   : > { %25693 = vmatmul.mubr.msk.f32.gmra.mrb[78].mxu1 %vm549_vm2, %v35016_v43  ;;  %v35024_v43 = vld [vmem:[#allocation85_spill] sm:$0xff] }
0x10ad   : > { %25695 = vmatprep.mubr.msk.f32.mxu1 %vm549_vm2, %v35017_v58  ;;  %v35025_v58 = vld [vmem:[#allocation59_spill] sm:$0xff] }
0x10b0   : > { %25696 = vmatmul.mubr.msk.f32.gmra.mrb[80].mxu1 %vm549_vm2, %v35018_v10  ;;  %v35026_v10 = vld [vmem:[#allocation5_spill] sm:$0xff] }
0x10b1   : > { %25698 = vmatprep.mubr.msk.f32.mxu1 %vm549_vm2, %v35019_v48  ;;  %v35027_v48 = vld [vmem:[#allocation98_spill] sm:$0xff] }
0x10b4   : > { %25699 = vmatmul.mubr.msk.f32.gmra.mrb[82].mxu1 %vm549_vm2, %v35020_v55  ;;  %v35028_v55 = vld [vmem:[#allocation106_spill] sm:$0xff] }
0x10b5   : > { %25701 = vmatprep.mubr.msk.f32.mxu1 %vm549_vm2, %v35021_v40  ;;  %v35029_v40 = vld [vmem:[#allocation46_spill] sm:$0xff] }
0x10b8   : > { %25702 = vmatmul.mubr.msk.f32.gmra.mrb[84].mxu1 %vm549_vm2, %v35022_v17  ;;  %v35030_v17 = vld [vmem:[#allocation110_spill] sm:$0xff] }
0x10b9   : > { %25704 = vmatprep.mubr.msk.f32.mxu1 %vm549_vm2, %v35023_v34  ;;  %v35031_v34 = vld [vmem:[#allocation105_spill] sm:$0xff] }
0x10bc   : > { %25705 = vmatmul.mubr.msk.f32.gmra.mrb[86].mxu1 %vm549_vm2, %v35024_v43  ;;  %v35032_v43 = vld [vmem:[#allocation40_spill] sm:$0xff] }
0x10bd   : > { %25707 = vmatprep.mubr.msk.f32.mxu1 %vm549_vm2, %v35025_v58 }
0x10c0   : > { %25708 = vmatmul.mubr.msk.f32.gmra.mrb[88].mxu1 %vm549_vm2, %v35026_v10 }
0x10c1   : > { %25710 = vmatprep.mubr.msk.f32.mxu1 %vm549_vm2, %v35027_v48  ;;  %v33524_v48 = vld [vmem:[#allocation2 + $0x182] sm:$0xff] }
0x10c4   : > { %25711 = vmatmul.mubr.msk.f32.gmra.mrb[90].mxu1 %vm549_vm2, %v35028_v55 }
0x10c5   : > { %25713 = vmatprep.mubr.msk.f32.mxu1 %vm549_vm2, %v35029_v40  ;;  %v33528_v40 = vld [vmem:[#allocation2 + $0x18a] sm:$0xff] }
0x10c8   : > { %25714 = vmatmul.mubr.msk.f32.gmra.mrb[92].mxu1 %vm549_vm2, %v35030_v17 }
0x10c9   : > { %25716 = vmatprep.mubr.msk.f32.mxu1 %vm549_vm2, %v35031_v34  ;;  %v21980_v34 = vld [vmem:[%s33882_s15 + $0x80] sm:$0xff] }
0x10cc   : > { %25717 = vmatmul.mubr.msk.f32.gmra.mrb[94].mxu1 %vm549_vm2, %v35032_v43  ;;  %v21981_v43 = vld [vmem:[%s33882_s15 + $0x88] sm:$0xff] }
0x10cd   : > { %25719 = vmatprep.mubr.msk.f32.mxu1 %vm549_vm2, %v33301_v51 }
0x10d0   : > { %25720 = vmatmul.mubr.msk.f32.gmra.mrb[96].mxu1 %vm549_vm2, %v33305_v62  ;;  %v25916_v62 = vpack.c.bf16 %v21981_v43, %v21980_v34  ;;  %v27229_v43 = vld [vmem:[%s27386_s20 + $0x20] sm:$0xff] }
0x10d1   : > { %25722 = vmatprep.mubr.msk.f32.mxu1 %vm549_vm2, %v33524_v48 }
0x10d4   : > { %25723 = vmatmul.mubr.msk.f32.gmra.mrb[98].mxu1 %vm549_vm2, %v33528_v40 }
0x10d5   : > { %25729 = vmatprep.mubr.msk.f32.mxu1 %vm549_vm2, %v33065_v24  ;;  %v19144_v24 = vld [vmem:[#allocation2 + $0x198] sm:$0xff] }
0x10d8   : > { %25730 = vmatmul.mubr.msk.f32.vlgmr.msra.gmra.mrb[68].mxu1 %vm549_vm2, %v33069_v5  ;;  %v19145_v5 = vld [vmem:[#allocation2 + $0x1a0] sm:$0xff] }
0x10d9   : > { %25915 = vmatpush3.bf16.msra.mxu1 %v25912_v7  ;;  %25732 = vmatprep.mubr.msk.f32.mxu1 %vm549_vm2, %v33073_v46  ;;  %v35052_v46 = vld [vmem:[#allocation66_spill] sm:$0xff] }
0x10da   : > { %25917 = vmatprep.subr.bf16.mxu1 %v25916_v62 }
0x10dc   : > { %25733 = vmatmul.mubr.msk.f32.gmra.mrb[70].mxu1 %vm549_vm2, %v33077_v19  ;;  %v35053_v19 = vld [vmem:[#allocation62_spill] sm:$0xff] }
0x10dd   : > { %25735 = vmatprep.mubr.msk.f32.mxu1 %vm549_vm2, %v33081_v30  ;;  %v35054_v30 = vld [vmem:[#allocation37_spill] sm:$0xff] }
0x10e0   : > { %25736 = vmatmul.mubr.msk.f32.gmra.mrb[72].mxu1 %vm549_vm2, %v33085_v63  ;;  %v35055_v63 = vld [vmem:[#allocation79_spill] sm:$0xff] }
0x10e1   : > { %25738 = vmatprep.mubr.msk.f32.mxu1 %vm549_vm2, %v33089_v37  ;;  %v35056_v37 = vld [vmem:[#allocation74_spill] sm:$0xff] }
0x10e4   : > { %25739 = vmatmul.mubr.msk.f32.gmra.mrb[74].mxu1 %vm549_vm2, %v33093_v57  ;;  %v35057_v57 = vld [vmem:[#allocation85_spill] sm:$0xff] }
0x10e5   : > { %25741 = vmatprep.mubr.msk.f32.mxu1 %vm549_vm2, %v33097_v29  ;;  %v35058_v29 = vld [vmem:[#allocation98_spill] sm:$0xff] }
0x10e8   : > { %25742 = vmatmul.mubr.msk.f32.gmra.mrb[76].mxu1 %vm549_vm2, %v33101_v14  ;;  %v35059_v14 = vld [vmem:[#allocation46_spill] sm:$0xff] }
0x10e9   : > { %25744 = vmatprep.mubr.msk.f32.mxu1 %vm549_vm2, %v33105_v47  ;;  %v35060_v47 = vld [vmem:[#allocation105_spill] sm:$0xff] }
0x10ec   : > { %25745 = vmatmul.mubr.msk.f32.gmra.mrb[78].mxu1 %vm549_vm2, %v33109_v16  ;;  %v19920_v16 = vld [vmem:[#allocation2 + $0x19a] sm:$0xff] }
0x10ed   : > { %25747 = vmatprep.mubr.msk.f32.mxu1 %vm549_vm2, %v33113_v42  ;;  %v19921_v42 = vld [vmem:[#allocation2 + $0x1a2] sm:$0xff] }
0x10f0   : > { %25748 = vmatmul.mubr.msk.f32.gmra.mrb[80].mxu1 %vm549_vm2, %v33117_v56  ;;  %v33727_v56 = vld [vmem:[%s33883_s16] ss:$0 sm:$0xff] }
0x10f1   : > { %25750 = vmatprep.mubr.msk.f32.mxu1 %vm549_vm2, %v33121_v49 }
0x10f4   : > { %25751 = vmatmul.mubr.msk.f32.gmra.mrb[82].mxu1 %vm549_vm2, %v33125_v2 }
0x10f5   : > { %25753 = vmatprep.mubr.msk.f32.mxu1 %vm549_vm2, %v33129_v32 }
0x10f8   : > { %25754 = vmatmul.mubr.msk.f32.gmra.mrb[84].mxu1 %vm549_vm2, %v33133_v25  ;;  %v27224_v25 = vld [vmem:[%s27386_s20 + $0x8] sm:$0xff] }
0x10f9   : > { %25756 = vmatprep.mubr.msk.f32.mxu1 %vm549_vm2, %v33137_v1 }
0x10fc   : > { %25757 = vmatmul.mubr.msk.f32.gmra.mrb[86].mxu1 %vm549_vm2, %v33141_v39  ;;  %v27225_v39 = vld [vmem:[%s27386_s20] sm:$0xff] }
0x10fd   : > { %25759 = vmatprep.mubr.msk.f32.mxu1 %vm549_vm2, %v33145_v36 }
0x1100   : > { %25760 = vmatmul.mubr.msk.f32.gmra.mrb[88].mxu1 %vm549_vm2, %v33149_v11 }
0x1101   : > { %25762 = vmatprep.mubr.msk.f32.mxu1 %vm549_vm2, %v33153_v18 }
0x1104   : > { %25763 = vmatmul.mubr.msk.f32.gmra.mrb[90].mxu1 %vm549_vm2, %v33157_v45 }
0x1105   : > { %25765 = vmatprep.mubr.msk.f32.mxu1 %vm549_vm2, %v33161_v28 }
0x1108   : > { %25766 = vmatmul.mubr.msk.f32.gmra.mrb[92].mxu1 %vm549_vm2, %v33165_v52 }
0x1109   : > { %25768 = vmatprep.mubr.msk.f32.mxu1 %vm549_vm2, %v33169_v38 }
0x110c   : > { %25769 = vmatmul.mubr.msk.f32.gmra.mrb[94].mxu1 %vm549_vm2, %v33173_v21  ;;  %v27226_v21 = vld [vmem:[%s27386_s20 + $0x18] sm:$0xff] }
0x110d   : > { %25771 = vmatprep.mubr.msk.f32.mxu1 %vm549_vm2, %v33376_v31 }
0x1110   : > { %25772 = vmatmul.mubr.msk.f32.gmra.mrb[96].mxu1 %vm549_vm2, %v33380_v26 }
0x1111   : > { %25774 = vmatprep.mubr.msk.f32.mxu1 %vm549_vm2, %v19144_v24 }
0x1114   : > { %25775 = vmatmul.mubr.msk.f32.gmra.mrb[98].mxu1 %vm549_vm2, %v19145_v5 }
0x1115   : > { %25781 = vmatprep.mubr.msk.f32.mxu1 %vm549_vm2, %v32916_v0  ;;  %v35033_v0 = vld [vmem:[#allocation97_spill] sm:$0xff] }
0x1118   : > { %25782 = vmatmul.mubr.msk.f32.vlgmr.msra.gmra.mrb[68].mxu1 %vm549_vm2, %v32921_v22  ;;  %v35034_v22 = vld [vmem:[#allocation61_spill] sm:$0xff] }
0x1119   : > { %25919 = vmatpush3.bf16.msra.mxu1 %v25916_v62  ;;  %25784 = vmatprep.mubr.msk.f32.mxu1 %vm549_vm2, %v32925_v33  ;;  %v35035_v33 = vld [vmem:[#allocation29_spill] sm:$0xff] }
0x111a   : > { %v27227_v62 = vld [vmem:[%s27386_s20 + $0x10] sm:$0xff] }
0x111c   : > { %25785 = vmatmul.mubr.msk.f32.gmra.mrb[70].mxu1 %vm549_vm2, %v32931_v54  ;;  %v35036_v54 = vld [vmem:[#allocation36_spill] sm:$0xff] }
0x111d   : > { %25787 = vmatprep.mubr.msk.f32.mxu1 %vm549_vm2, %v32936_v15  ;;  %v35037_v15 = vld [vmem:[#allocation44_spill] sm:$0xff] }
0x1120   : > { %25788 = vmatmul.mubr.msk.f32.gmra.mrb[72].mxu1 %vm549_vm2, %v32941_v12  ;;  %v35038_v12 = vld [vmem:[#allocation73_spill] sm:$0xff] }
0x1121   : > { %25790 = vmatprep.mubr.msk.f32.mxu1 %vm549_vm2, %v32945_v53  ;;  %v35039_v53 = vld [vmem:[#allocation65_spill] sm:$0xff] }
0x1124   : > { %25791 = vmatmul.mubr.msk.f32.gmra.mrb[74].mxu1 %vm549_vm2, %v32950_v50  ;;  %v35040_v50 = vld [vmem:[#allocation101_spill] sm:$0xff] }
0x1125   : > { %25793 = vmatprep.mubr.msk.f32.mxu1 %vm549_vm2, %v32954_v27  ;;  %v19532_v27 = vld [vmem:[#allocation2 + $0x199] sm:$0xff] }
0x1128   : > { %25794 = vmatmul.mubr.msk.f32.gmra.mrb[76].mxu1 %vm549_vm2, %v32960_v41  ;;  %v35041_v41 = vld [vmem:[#allocation108_spill] sm:$0xff] }
0x1129   : > { %25796 = vmatprep.mubr.msk.f32.mxu1 %vm549_vm2, %v32965_v61  ;;  %v19533_v61 = vld [vmem:[#allocation2 + $0x1a1] sm:$0xff] }
0x112c   : > { %25797 = vmatmul.mubr.msk.f32.gmra.mrb[78].mxu1 %vm549_vm2, %v32970_v3  ;;  %v35042_v3 = vld [vmem:[#allocation42_spill] sm:$0xff] }
0x112d   : > { %25799 = vmatprep.mubr.msk.f32.mxu1 %vm549_vm2, %v32974_v8  ;;  %v35043_v8 = vld [vmem:[#allocation21_spill] sm:$0xff] }
0x1130   : > { %25800 = vmatmul.mubr.msk.f32.gmra.mrb[80].mxu1 %vm549_vm2, %v32979_v60  ;;  %v35044_v60 = vld [vmem:[#allocation87_spill] sm:$0xff] }
0x1131   : > { %25802 = vmatprep.mubr.msk.f32.mxu1 %vm549_vm2, %v32983_v6  ;;  %v35045_v6 = vld [vmem:[#allocation77_spill] sm:$0xff] }
0x1134   : > { %25803 = vmatmul.mubr.msk.f32.gmra.mrb[82].mxu1 %vm549_vm2, %v32989_v9  ;;  %v35046_v9 = vld [vmem:[#allocation103_spill] sm:$0xff] }
0x1135   : > { %25805 = vmatprep.mubr.msk.f32.mxu1 %vm549_vm2, %v32994_v4  ;;  %v35047_v4 = vld [vmem:[#allocation100_spill] sm:$0xff] }
0x1138   : > { %25806 = vmatmul.mubr.msk.f32.gmra.mrb[84].mxu1 %vm549_vm2, %v32999_v35  ;;  %v35048_v35 = vld [vmem:[#allocation82_spill] sm:$0xff] }
0x1139   : > { %25808 = vmatprep.mubr.msk.f32.mxu1 %vm549_vm2, %v33003_v20  ;;  %v35049_v20 = vld [vmem:[#allocation32_spill] sm:$0xff] }
0x113c   : > { %25809 = vmatmul.mubr.msk.f32.gmra.mrb[86].mxu1 %vm549_vm2, %v33007_v59  ;;  %v35050_v59 = vld [vmem:[#allocation30_spill] sm:$0xff] }
0x113d   : > { %25811 = vmatprep.mubr.msk.f32.mxu1 %vm549_vm2, %v33011_v44  ;;  %v35051_v44 = vld [vmem:[#allocation81_spill] sm:$0xff] }
0x1140   : > { %25812 = vmatmul.mubr.msk.f32.gmra.mrb[88].mxu1 %vm549_vm2, %v35033_v0 }
0x1141   : > { %25814 = vmatprep.mubr.msk.f32.mxu1 %vm549_vm2, %v35034_v22 }
0x1144   : > { %25815 = vmatmul.mubr.msk.f32.gmra.mrb[90].mxu1 %vm549_vm2, %v35035_v33 }
0x1145   : > { %25817 = vmatprep.mubr.msk.f32.mxu1 %vm549_vm2, %v35036_v54 }
0x1148   : > { %25818 = vmatmul.mubr.msk.f32.gmra.mrb[92].mxu1 %vm549_vm2, %v35037_v15 }
0x1149   : > { %25820 = vmatprep.mubr.msk.f32.mxu1 %vm549_vm2, %v35038_v12  ;;  %v27230_v12 = vld [vmem:[%s27386_s20 + $0x38] sm:$0xff] }
0x114c   : > { %25821 = vmatmul.mubr.msk.f32.gmra.mrb[94].mxu1 %vm549_vm2, %v35039_v53 }
0x114d   : > { %25823 = vmatprep.mubr.msk.f32.mxu1 %vm549_vm2, %v35040_v50  ;;  %v27231_v50 = vld [vmem:[%s27386_s20 + $0x30] sm:$0xff] }
0x1150   : > { %25824 = vmatmul.mubr.msk.f32.gmra.mrb[96].mxu1 %vm549_vm2, %v35041_v41 }
0x1151   : > { %25826 = vmatprep.mubr.msk.f32.mxu1 %vm549_vm2, %v19532_v27 }
0x1154   : > { %25827 = vmatmul.mubr.msk.f32.gmra.mrb[98].mxu1 %vm549_vm2, %v19533_v61 }
0x1155   : > { %25833 = vmatprep.mubr.msk.f32.mxu1 %vm549_vm2, %v35007_v23 }
0x1158   : > { %25834 = vmatmul.mubr.msk.f32.vlgmr.msra.gmra.mrb[68].mxu1 %vm549_vm2, %v35008_v13 }
0x1159   : > { %25836 = vmatprep.mubr.msk.f32.mxu1 %vm549_vm2, %v35042_v3 }
0x115c   : > { %25837 = vmatmul.mubr.msk.f32.gmra.mrb[70].mxu1 %vm549_vm2, %v35043_v8 }
0x115d   : > { %25839 = vmatprep.mubr.msk.f32.mxu1 %vm549_vm2, %v35044_v60 }
0x1160   : > { %25840 = vmatmul.mubr.msk.f32.gmra.mrb[72].mxu1 %vm549_vm2, %v35045_v6 }
0x1161   : > { %25842 = vmatprep.mubr.msk.f32.mxu1 %vm549_vm2, %v35046_v9  ;;  %v27232_v9 = vld [vmem:[%s27386_s20 + $0x48] sm:$0xff] }
0x1164   : > { %25843 = vmatmul.mubr.msk.f32.gmra.mrb[74].mxu1 %vm549_vm2, %v35047_v4 }
0x1165   : > { %25845 = vmatprep.mubr.msk.f32.mxu1 %vm549_vm2, %v35048_v35  ;;  %v27233_v35 = vld [vmem:[%s27386_s20 + $0x40] sm:$0xff] }
0x1168   : > { %25846 = vmatmul.mubr.msk.f32.gmra.mrb[76].mxu1 %vm549_vm2, %v35049_v20 }
0x1169   : > { %25848 = vmatprep.mubr.msk.f32.mxu1 %vm549_vm2, %v35050_v59 }
0x116c   : > { %25849 = vmatmul.mubr.msk.f32.gmra.mrb[78].mxu1 %vm549_vm2, %v35051_v44 }
0x116d   : > { %25851 = vmatprep.mubr.msk.f32.mxu1 %vm549_vm2, %v35052_v46 }
0x1170   : > { %25852 = vmatmul.mubr.msk.f32.gmra.mrb[80].mxu1 %vm549_vm2, %v35053_v19 }
0x1171   : > { %25854 = vmatprep.mubr.msk.f32.mxu1 %vm549_vm2, %v35054_v30 }
0x1174   : > { %25855 = vmatmul.mubr.msk.f32.gmra.mrb[82].mxu1 %vm549_vm2, %v35055_v63 }
0x1175   : > { %25857 = vmatprep.mubr.msk.f32.mxu1 %vm549_vm2, %v35056_v37  ;;  %v27234_v37 = vld [vmem:[%s27386_s20 + $0x58] sm:$0xff] }
0x1178   : > { %25858 = vmatmul.mubr.msk.f32.gmra.mrb[84].mxu1 %vm549_vm2, %v35057_v57 }
0x1179   : > { %25860 = vmatprep.mubr.msk.f32.mxu1 %vm549_vm2, %v35025_v58  ;;  %v35061_v58 = vld [vmem:[#allocation40_spill] sm:$0xff] }
0x117c   : > { %25861 = vmatmul.mubr.msk.f32.gmra.mrb[86].mxu1 %vm549_vm2, %v35026_v10  ;;  %v35062_v10 = vld [vmem:[#allocation102_spill] sm:$0xff] }
0x117d   : > { %25863 = vmatprep.mubr.msk.f32.mxu1 %vm549_vm2, %v35058_v29  ;;  %v27235_v29 = vld [vmem:[%s27386_s20 + $0x50] sm:$0xff] }
0x1180   : > { %25864 = vmatmul.mubr.msk.f32.gmra.mrb[88].mxu1 %vm549_vm2, %v35028_v55 }
0x1181   : > { %25866 = vmatprep.mubr.msk.f32.mxu1 %vm549_vm2, %v35059_v14 }
0x1184   : > { %25867 = vmatmul.mubr.msk.f32.gmra.mrb[90].mxu1 %vm549_vm2, %v35030_v17  ;;  %v27228_v17 = vld [vmem:[%s27386_s20 + $0x28] sm:$0xff] }
0x1185   : > { %25869 = vmatprep.mubr.msk.f32.mxu1 %vm549_vm2, %v35060_v47 }
0x1188   : > { %25870 = vmatmul.mubr.msk.f32.gmra.mrb[92].mxu1 %vm549_vm2, %v35061_v58 }
0x1189   : > { %25872 = vmatprep.mubr.msk.f32.mxu1 %vm549_vm2, %v33301_v51 }
0x118c   : > { %25873 = vmatmul.mubr.msk.f32.gmra.mrb[94].mxu1 %vm549_vm2, %v35062_v10 }
0x118d   : > { %25875 = vmatprep.mubr.msk.f32.mxu1 %vm549_vm2, %v33524_v48 }
0x1190   : > { %25876 = vmatmul.mubr.msk.f32.gmra.mrb[96].mxu1 %vm549_vm2, %v33528_v40 }
0x1191   : > { %25878 = vmatprep.mubr.msk.f32.mxu1 %vm549_vm2, %v19920_v16 }
0x1194   : > { %25879 = vmatmul.mubr.msk.f32.gmra.mrb[98].mxu1 %vm549_vm2, %v19921_v42 }
0x122b   : > { %v25835_v49 = vpop.f32.mrb[68].mxu1 }
0x122c   : > { %v20286_v2 = vadd.f32 %v25835_v49, %v33727_v56  ;;  %v20087_v32 = vpop.f32.mrb[69].mxu1 }
0x122d   : > { %v20285_v48 = vadd.f32 %v33727_v56, %v20087_v32 }
0x122e   : > { %v20318_v1 = vadd.f32 %v27224_v25, %v20286_v2  ;;  %v27236_v2 = vld [vmem:[%s27386_s20 + $0x68] sm:$0xff] }
0x122f   : > { %v20317_v36 = vadd.f32 %v27225_v39, %v20285_v48  ;;  %v25838_v11 = vpop.f32.mrb[70].mxu1  ;;  %v27237_v48 = vld [vmem:[%s27386_s20 + $0x60] sm:$0xff] }
0x1230   : > { %v20350_v18 = vmax.f32 %v20318_v1, 0.0  ;;  %v20288_v45 = vadd.f32 %v25838_v11, %v33727_v56  ;;  %v20097_v28 = vpop.f32.mrb[71].mxu1 }
0x1231   : > { %v20349_v52 = vmax.f32 %v20317_v36, 0.0  ;;  %v20287_v38 = vadd.f32 %v33727_v56, %v20097_v28  ;;  %v27238_v28 = vld [vmem:[%s27386_s20 + $0x78] sm:$0xff] }
0x1232   : > { %20382 = vst.msk [vmem:[%s33737_s26 + $0x8] sm:$0xff] %vm634_vm1, %v20350_v18  ;;  %v20320_v51 = vadd.f32 %v27226_v21, %v20288_v45 }
0x1233   : > { %20381 = vst.msk [vmem:[%s33737_s26] sm:$0xff] %vm634_vm1, %v20349_v52  ;;  %v20319_v31 = vadd.f32 %v27227_v62, %v20287_v38  ;;  %v25841_v26 = vpop.f32.mrb[72].mxu1  ;;  %v27239_v38 = vld [vmem:[%s27386_s20 + $0x70] sm:$0xff] }
0x1234   : > { %v20352_v13 = vmax.f32 %v20320_v51, 0.0  ;;  %v20290_v7 = vadd.f32 %v25841_v26, %v33727_v56  ;;  %v20107_v23 = vpop.f32.mrb[73].mxu1 }
0x1235   : > { %v20351_v55 = vmax.f32 %v20319_v31, 0.0  ;;  %v20289_v40 = vadd.f32 %v33727_v56, %v20107_v23  ;;  %v27240_v23 = vld [vmem:[%s27386_s20 + $0x88] sm:$0xff] }
0x1236   : > { %20384 = vst.msk [vmem:[%s33737_s26 + $0x18] sm:$0xff] %vm634_vm1, %v20352_v13  ;;  %v20322_v34 = vadd.f32 %v27228_v17, %v20290_v7 }
0x1237   : > { %20383 = vst.msk [vmem:[%s33737_s26 + $0x10] sm:$0xff] %vm634_vm1, %v20351_v55  ;;  %v20321_v24 = vadd.f32 %v27229_v43, %v20289_v40  ;;  %v25844_v5 = vpop.f32.mrb[74].mxu1  ;;  %v27241_v40 = vld [vmem:[%s27386_s20 + $0x80] sm:$0xff] }
0x1238   : > { %v20354_v0 = vmax.f32 %v20322_v34, 0.0  ;;  %v20292_v22 = vadd.f32 %v25844_v5, %v33727_v56  ;;  %v20117_v33 = vpop.f32.mrb[75].mxu1 }
0x1239   : > { %v20353_v54 = vmax.f32 %v20321_v24, 0.0  ;;  %v20291_v15 = vadd.f32 %v33727_v56, %v20117_v33  ;;  %v27242_v33 = vld [vmem:[%s27386_s20 + $0x98] sm:$0xff] }
0x123a   : > { %20386 = vst.msk [vmem:[%s33737_s26 + $0x28] sm:$0xff] %vm634_vm1, %v20354_v0  ;;  %v20324_v53 = vadd.f32 %v27230_v12, %v20292_v22 }
0x123b   : > { %20385 = vst.msk [vmem:[%s33737_s26 + $0x20] sm:$0xff] %vm634_vm1, %v20353_v54  ;;  %v20323_v27 = vadd.f32 %v27231_v50, %v20291_v15  ;;  %v25847_v41 = vpop.f32.mrb[76].mxu1  ;;  %v27243_v15 = vld [vmem:[%s27386_s20 + $0x90] sm:$0xff] }
0x123c   : > { %v20356_v61 = vmax.f32 %v20324_v53, 0.0  ;;  %v20294_v3 = vadd.f32 %v25847_v41, %v33727_v56  ;;  %v20127_v8 = vpop.f32.mrb[77].mxu1 }
0x123d   : > { %v20355_v60 = vmax.f32 %v20323_v27, 0.0  ;;  %v20293_v6 = vadd.f32 %v33727_v56, %v20127_v8  ;;  %v27244_v8 = vld [vmem:[%s27386_s20 + $0xa8] sm:$0xff] }
0x123e   : > { %20388 = vst.msk [vmem:[%s33737_s26 + $0x38] sm:$0xff] %vm634_vm1, %v20356_v61  ;;  %v20326_v4 = vadd.f32 %v27232_v9, %v20294_v3 }
0x123f   : > { %20387 = vst.msk [vmem:[%s33737_s26 + $0x30] sm:$0xff] %vm634_vm1, %v20355_v60  ;;  %v20325_v20 = vadd.f32 %v27233_v35, %v20293_v6  ;;  %v25850_v59 = vpop.f32.mrb[78].mxu1  ;;  %v27245_v6 = vld [vmem:[%s27386_s20 + $0xa0] sm:$0xff] }
0x1240   : > { %v20358_v44 = vmax.f32 %v20326_v4, 0.0  ;;  %v20296_v46 = vadd.f32 %v25850_v59, %v33727_v56  ;;  %v20137_v19 = vpop.f32.mrb[79].mxu1 }
0x1241   : > { %v20357_v30 = vmax.f32 %v20325_v20, 0.0  ;;  %v20295_v63 = vadd.f32 %v33727_v56, %v20137_v19  ;;  %v27246_v19 = vld [vmem:[%s27386_s20 + $0xb8] sm:$0xff] }
0x1242   : > { %20390 = vst.msk [vmem:[%s33737_s26 + $0x48] sm:$0xff] %vm634_vm1, %v20358_v44  ;;  %v20328_v57 = vadd.f32 %v27234_v37, %v20296_v46 }
0x1243   : > { %20389 = vst.msk [vmem:[%s33737_s26 + $0x40] sm:$0xff] %vm634_vm1, %v20357_v30  ;;  %v20327_v14 = vadd.f32 %v27235_v29, %v20295_v63  ;;  %v25853_v47 = vpop.f32.mrb[80].mxu1  ;;  %v27247_v63 = vld [vmem:[%s27386_s20 + $0xb0] sm:$0xff] }
0x1244   : > { %v20360_v58 = vmax.f32 %v20328_v57, 0.0  ;;  %v20298_v10 = vadd.f32 %v25853_v47, %v33727_v56  ;;  %v20147_v16 = vpop.f32.mrb[81].mxu1 }
0x1245   : > { %v20359_v42 = vmax.f32 %v20327_v14, 0.0  ;;  %v20297_v49 = vadd.f32 %v33727_v56, %v20147_v16  ;;  %v27248_v16 = vld [vmem:[%s27386_s20 + $0xc8] sm:$0xff] }
0x1246   : > { %20392 = vst.msk [vmem:[%s33737_s26 + $0x58] sm:$0xff] %vm634_vm1, %v20360_v58  ;;  %v20330_v32 = vadd.f32 %v27236_v2, %v20298_v10 }
0x1247   : > { %20391 = vst.msk [vmem:[%s33737_s26 + $0x50] sm:$0xff] %vm634_vm1, %v20359_v42  ;;  %v20329_v25 = vadd.f32 %v27237_v48, %v20297_v49  ;;  %v25856_v1 = vpop.f32.mrb[82].mxu1  ;;  %v27249_v49 = vld [vmem:[%s27386_s20 + $0xc0] sm:$0xff] }
0x1248   : > { %v20362_v39 = vmax.f32 %v20330_v32, 0.0  ;;  %v20300_v36 = vadd.f32 %v25856_v1, %v33727_v56  ;;  %v20157_v11 = vpop.f32.mrb[83].mxu1 }
0x1249   : > { %v20361_v18 = vmax.f32 %v20329_v25, 0.0  ;;  %v20299_v45 = vadd.f32 %v33727_v56, %v20157_v11  ;;  %v27250_v11 = vld [vmem:[%s27386_s20 + $0xd8] sm:$0xff] }
0x124a   : > { %20394 = vst.msk [vmem:[%s33737_s26 + $0x68] sm:$0xff] %vm634_vm1, %v20362_v39  ;;  %v20332_v52 = vadd.f32 %v27238_v28, %v20300_v36 }
0x124b   : > { %20393 = vst.msk [vmem:[%s33737_s26 + $0x60] sm:$0xff] %vm634_vm1, %v20361_v18  ;;  %v20331_v21 = vadd.f32 %v27239_v38, %v20299_v45  ;;  %v25859_v51 = vpop.f32.mrb[84].mxu1  ;;  %v27251_v45 = vld [vmem:[%s27386_s20 + $0xd0] sm:$0xff] }
0x124c   : > { %v20364_v62 = vmax.f32 %v20332_v52, 0.0  ;;  %v20302_v31 = vadd.f32 %v25859_v51, %v33727_v56  ;;  %v20167_v26 = vpop.f32.mrb[85].mxu1 }
0x124d   : > { %v20363_v13 = vmax.f32 %v20331_v21, 0.0  ;;  %v20301_v7 = vadd.f32 %v33727_v56, %v20167_v26  ;;  %v27252_v26 = vld [vmem:[%s27386_s20 + $0xe8] sm:$0xff] }
0x124e   : > { %20396 = vst.msk [vmem:[%s33737_s26 + $0x78] sm:$0xff] %vm634_vm1, %v20364_v62  ;;  %v20334_v55 = vadd.f32 %v27240_v23, %v20302_v31 }
0x124f   : > { %20395 = vst.msk [vmem:[%s33737_s26 + $0x70] sm:$0xff] %vm634_vm1, %v20363_v13  ;;  %v20333_v17 = vadd.f32 %v27241_v40, %v20301_v7  ;;  %v25862_v34 = vpop.f32.mrb[86].mxu1  ;;  %v27253_v7 = vld [vmem:[%s27386_s20 + $0xe0] sm:$0xff] }
0x1250   : > { %v20366_v43 = vmax.f32 %v20334_v55, 0.0  ;;  %v20304_v24 = vadd.f32 %v25862_v34, %v33727_v56  ;;  %v20177_v5 = vpop.f32.mrb[87].mxu1 }
0x1251   : > { %v20365_v0 = vmax.f32 %v20333_v17, 0.0  ;;  %v20303_v22 = vadd.f32 %v33727_v56, %v20177_v5  ;;  %v27254_v5 = vld [vmem:[%s27386_s20 + $0xf8] sm:$0xff] }
0x1252   : > { %20398 = vst.msk [vmem:[%s33737_s26 + $0x88] sm:$0xff] %vm634_vm1, %v20366_v43  ;;  %v20336_v54 = vadd.f32 %v27242_v33, %v20304_v24 }
0x1253   : > { %20397 = vst.msk [vmem:[%s33737_s26 + $0x80] sm:$0xff] %vm634_vm1, %v20365_v0  ;;  %v20335_v12 = vadd.f32 %v27243_v15, %v20303_v22  ;;  %v25865_v53 = vpop.f32.mrb[88].mxu1  ;;  %v27255_v22 = vld [vmem:[%s27386_s20 + $0xf0] sm:$0xff] }
0x1254   : > { %v20368_v50 = vmax.f32 %v20336_v54, 0.0  ;;  %v20306_v27 = vadd.f32 %v25865_v53, %v33727_v56  ;;  %v20187_v41 = vpop.f32.mrb[89].mxu1 }
0x1255   : > { %v20367_v61 = vmax.f32 %v20335_v12, 0.0  ;;  %v20305_v3 = vadd.f32 %v33727_v56, %v20187_v41 }
0x1256   : > { %20400 = vst.msk [vmem:[%s33737_s26 + $0x98] sm:$0xff] %vm634_vm1, %v20368_v50  ;;  %v20338_v60 = vadd.f32 %v27244_v8, %v20306_v27 }
0x1257   : > { %20399 = vst.msk [vmem:[%s33737_s26 + $0x90] sm:$0xff] %vm634_vm1, %v20367_v61  ;;  %v20337_v9 = vadd.f32 %v27245_v6, %v20305_v3  ;;  %v25868_v4 = vpop.f32.mrb[90].mxu1 }
0x1258   : > { %v20370_v35 = vmax.f32 %v20338_v60, 0.0  ;;  %v20308_v20 = vadd.f32 %v25868_v4, %v33727_v56  ;;  %v20197_v59 = vpop.f32.mrb[91].mxu1 }
0x1259   : > { %v20369_v44 = vmax.f32 %v20337_v9, 0.0  ;;  %v20307_v46 = vadd.f32 %v33727_v56, %v20197_v59 }
0x125a   : > { %20402 = vst.msk [vmem:[%s33737_s26 + $0xa8] sm:$0xff] %vm634_vm1, %v20370_v35  ;;  %v20340_v30 = vadd.f32 %v27246_v19, %v20308_v20 }
0x125b   : > { %20401 = vst.msk [vmem:[%s33737_s26 + $0xa0] sm:$0xff] %vm634_vm1, %v20369_v44  ;;  %v20339_v37 = vadd.f32 %v27247_v63, %v20307_v46  ;;  %v25871_v57 = vpop.f32.mrb[92].mxu1 }
0x125c   : > { %v20372_v29 = vmax.f32 %v20340_v30, 0.0  ;;  %v20310_v14 = vadd.f32 %v25871_v57, %v33727_v56  ;;  %v20207_v47 = vpop.f32.mrb[93].mxu1 }
0x125d   : > { %v20371_v58 = vmax.f32 %v20339_v37, 0.0  ;;  %v20309_v10 = vadd.f32 %v33727_v56, %v20207_v47 }
0x125e   : > { %20404 = vst.msk [vmem:[%s33737_s26 + $0xb8] sm:$0xff] %vm634_vm1, %v20372_v29  ;;  %v20342_v42 = vadd.f32 %v27248_v16, %v20310_v14 }
0x125f   : > { %20403 = vst.msk [vmem:[%s33737_s26 + $0xb0] sm:$0xff] %vm634_vm1, %v20371_v58  ;;  %v20341_v2 = vadd.f32 %v27249_v49, %v20309_v10  ;;  %v25874_v32 = vpop.f32.mrb[94].mxu1 }
0x1260   : > { %v20374_v48 = vmax.f32 %v20342_v42, 0.0  ;;  %v20312_v25 = vadd.f32 %v25874_v32, %v33727_v56  ;;  %v20217_v1 = vpop.f32.mrb[95].mxu1 }
0x1261   : > { %v20373_v39 = vmax.f32 %v20341_v2, 0.0  ;;  %v20311_v36 = vadd.f32 %v33727_v56, %v20217_v1 }
0x1262   : > { %20406 = vst.msk [vmem:[%s33737_s26 + $0xc8] sm:$0xff] %vm634_vm1, %v20374_v48  ;;  %v20344_v18 = vadd.f32 %v27250_v11, %v20312_v25 }
0x1263   : > { %20405 = vst.msk [vmem:[%s33737_s26 + $0xc0] sm:$0xff] %vm634_vm1, %v20373_v39  ;;  %v20343_v28 = vadd.f32 %v27251_v45, %v20311_v36  ;;  %v25877_v52 = vpop.f32.mrb[96].mxu1 }
0x1264   : > { %v20376_v38 = vmax.f32 %v20344_v18, 0.0  ;;  %v20314_v21 = vadd.f32 %v25877_v52, %v33727_v56  ;;  %v20227_v51 = vpop.f32.mrb[97].mxu1 }
0x1265   : > { %v20375_v62 = vmax.f32 %v20343_v28, 0.0  ;;  %v20313_v31 = vadd.f32 %v33727_v56, %v20227_v51 }
0x1266   : > { %20408 = vst.msk [vmem:[%s33737_s26 + $0xd8] sm:$0xff] %vm634_vm1, %v20376_v38  ;;  %v20346_v13 = vadd.f32 %v27252_v26, %v20314_v21 }
0x1267   : > { %20407 = vst.msk [vmem:[%s33737_s26 + $0xd0] sm:$0xff] %vm634_vm1, %v20375_v62  ;;  %v20345_v23 = vadd.f32 %v27253_v7, %v20313_v31  ;;  %v25880_v55 = vpop.f32.mrb[98].mxu1 }
0x1268   : > { %v20378_v40 = vmax.f32 %v20346_v13, 0.0  ;;  %v20316_v17 = vadd.f32 %v25880_v55, %v33727_v56  ;;  %v20237_v34 = vpop.f32.mrb[99].mxu1 }
0x1269   : > { %v20377_v43 = vmax.f32 %v20345_v23, 0.0  ;;  %v20315_v24 = vadd.f32 %v33727_v56, %v20237_v34 }
0x126a   : > { %20410 = vst.msk [vmem:[%s33737_s26 + $0xe8] sm:$0xff] %vm634_vm1, %v20378_v40  ;;  %v20348_v0 = vadd.f32 %v27254_v5, %v20316_v17 }
0x126b   : > { %20409 = vst.msk [vmem:[%s33737_s26 + $0xe0] sm:$0xff] %vm634_vm1, %v20377_v43  ;;  %v20347_v33 = vadd.f32 %v27255_v22, %v20315_v24 }
0x126c   : > { %v20380_v54 = vmax.f32 %v20348_v0, 0.0 }
0x126d   : > { %v20379_v15 = vmax.f32 %v20347_v33, 0.0 }
0x126e   : > { %20412 = vst.msk [vmem:[%s33737_s26 + $0xf8] sm:$0xff] %vm634_vm1, %v20380_v54 }
0x126f   : > { %20411 = vst.msk [vmem:[%s33737_s26 + $0xf0] sm:$0xff] %vm634_vm1, %v20379_v15 }
0x1270 PF: > { %s27_s24 = sadd.s32 1, %s27262_s24  }
0x1271   : > { %p24_p4 = scmp.ge.s32.totalorder %s27_s24, 4  }
0x1273   :  { %26 = sbr.rel (!%p24_p4) target bundleno = 3 (0x3), region = 161 }

</bundles_post_ra>
